<compile_context>
chip_gen: v7x
topology: tpu7x:2x2x1
jax: 0.10.0
libtpu: 0.0.40
codegen_flags: <defaults>
</compile_context>

<pallas_src>
import functools

import jax
import jax.numpy as jnp
from jax import lax
from jax.experimental import pallas as pl
from jax.experimental.pallas import tpu as pltpu


def _round_up(x, m):
    return (x + m - 1) // m * m


# ----------------------------------------------------------------------------
# Fused kernel: all LSTM layers + final Linear, per (batch_block, time_chunk)
# ----------------------------------------------------------------------------
def _fused_lstm_linear_kernel(x_ref, *refs, num_layers, hidden_pad, t_chunk,
                              batch_block, unroll):
    """refs = [wih_0, whh_0, b_0, ..., wih_{L-1}, whh_{L-1}, b_{L-1},
               w_lin, b_lin, y_out, h_scratch, c_scratch, act_scratch,
               gates_scratch]

    x_ref : (Tt*Bb, Din)    bf16, time-major rows of the current chunk
    wih_l : (Din_l, 4*Hp)   bf16, gate columns packed (i, f, o, g), lane-aligned
    whh_l : (Hp,   4*Hp)    bf16
    b_l   : (1,    4*Hp)    f32 combined bias (b_ih + b_hh), zero on pad lanes
    w_lin : (Hp, Op) bf16 ; b_lin : (1, Op) f32   (Op = 128-lane padded)
    y_out : (Tt*Bb, Op) f32
    h/c   : (L, Bb, Hp) f32 persistent recurrent state
    act   : (Tt*Bb, Hp)  f32 inter-layer activation buffer
    gates : (Tt*Bb, 4Hp) f32 hoisted x@W_ih projection for the chunk
    """
    n_w = 3 * num_layers
    layer_refs = refs[:n_w]
    w_lin_ref = refs[n_w]
    b_lin_ref = refs[n_w + 1]
    y_ref = refs[n_w + 2]
    h_ref, c_ref, act_ref, gates_ref = refs[n_w + 3:]

    Hp = hidden_pad
    Bb = batch_block
    Tt = t_chunk

    # New batch block (time index restarts) -> reset recurrent state.
    @pl.when(pl.program_id(1) == 0)
    def _init():
        h_ref[...] = jnp.zeros_like(h_ref)
        c_ref[...] = jnp.zeros_like(c_ref)

    aligned = (Bb % 8 == 0)

    for layer in range(num_layers):
        wih = layer_refs[3 * layer][...]        # bf16 (Din_l, 4Hp)
        whh = layer_refs[3 * layer + 1][...]    # bf16 (Hp, 4Hp)
        bias = layer_refs[3 * layer + 2][...]   # f32  (1, 4Hp)

        cur = x_ref[...] if layer == 0 else act_ref[...].astype(jnp.bfloat16)

        # Hoisted input projection: one big MXU matmul for the whole chunk,
        # spilled to VMEM scratch so the recurrence keeps its vregs for gate
        # math instead of a live (rows, 4Hp) f32 value.
        gates_ref[...] = (jnp.dot(cur, wih, preferred_element_type=jnp.float32)
                          + bias)

        # NOTE: h is cast to bf16 for the h@Whh matmul (MXU-native); rounding
        # compounds mildly over very long sequences but h/c stay f32.
        # TODO(synk): optionally keep Whh stationary in the MXU staging regs
        # (pltpu.matmul_push_rhs / matmul_acc_lhs) for small-Bb recurrences.
        def step(r0, h, c):
            g = gates_ref[pl.ds(r0, Bb), :] + jnp.dot(
                h.astype(jnp.bfloat16), whh,
                preferred_element_type=jnp.float32)           # (Bb, 4Hp)
            # Gate columns packed (i, f, o, g): one contiguous sigmoid stream
            # over 3*Hp lanes + one tanh stream (2 EUP launches, not 4).
            sg = jax.nn.sigmoid(g[:, :3 * Hp])
            i_g = sg[:, 0 * Hp:1 * Hp]
            f_g = sg[:, 1 * Hp:2 * Hp]
            o_g = sg[:, 2 * Hp:3 * Hp]
            g_g = jnp.tanh(g[:, 3 * Hp:4 * Hp])
            c = f_g * c + i_g * g_g
            h = o_g * jnp.tanh(c)
            act_ref[pl.ds(r0, Bb), :] = h
            return h, c

        h = h_ref[layer]
        c = c_ref[layer]
        if aligned:
            # Bounded-unroll recurrence with 8-aligned dynamic row offsets.
            def body(t, carry):
                r0 = pl.multiple_of(t * Bb, 8)
                return step(r0, *carry)
            h, c = lax.fori_loop(0, Tt, body, (h, c), unroll=unroll)
        else:
            # Tiny batch (Bb < 8): static unroll with static offsets.
            for t in range(Tt):
                h, c = step(t * Bb, h, c)
        h_ref[layer] = h
        c_ref[layer] = c

    # Fused, lane-dense (Op multiple of 128) output projection: full-width
    # MXU matmul and unmasked stores; avoids an extra HBM round trip.
    y = (jnp.dot(act_ref[...].astype(jnp.bfloat16), w_lin_ref[...],
                 preferred_element_type=jnp.float32) + b_lin_ref[...])
    y_ref[...] = y.astype(y_ref.dtype)


# ----------------------------------------------------------------------------
# Parameter preparation (padding + bf16 cast), plain JAX
# ----------------------------------------------------------------------------
def init_params(key, input_dim, hidden_dim, layer_dim, output_dim):
    """Deterministic init mirroring nn.LSTM / nn.Linear parameter shapes."""
    params = {"lstm": []}
    k = 1.0 / jnp.sqrt(hidden_dim)
    for layer in range(layer_dim):
        din = input_dim if layer == 0 else hidden_dim
        key, k1, k2, k3, k4 = jax.random.split(key, 5)
        w_ih = jax.random.uniform(k1, (4 * hidden_dim, din), jnp.float32, -k, k)
        w_hh = jax.random.uniform(k2, (4 * hidden_dim, hidden_dim), jnp.float32, -k, k)
        b_ih = jax.random.uniform(k3, (4 * hidden_dim,), jnp.float32, -k, k)
        b_hh = jax.random.uniform(k4, (4 * hidden_dim,), jnp.float32, -k, k)
        params["lstm"].append({
            "wih_t": jnp.transpose(w_ih),                    # (Din, 4H)  gates (i,f,g,o)
            "whh_t": jnp.transpose(w_hh),                    # (H, 4H)
            "b": (b_ih + b_hh).reshape(1, 4 * hidden_dim),   # (1, 4H)
        })
    key, k5, k6 = jax.random.split(key, 3)
    w_lin = jax.random.uniform(k5, (output_dim, hidden_dim), jnp.float32, -k, k)
    b_lin = jax.random.uniform(k6, (output_dim,), jnp.float32, -k, k)
    params["w_lin_t"] = jnp.transpose(w_lin)                 # (H, O)
    params["b_lin"] = b_lin.reshape(1, output_dim)           # (1, O)
    return params


def prepare_kernel_params(params, hidden_dim, output_dim):
    """Zero-pad H -> Hp and O -> Op (128-lane), re-pack gates as (i, f, o, g),
    cast matmul operands to bf16.

    Note: for small H (e.g. 32) the per-gate 128-lane padding makes gate math
    run on mostly-zero lanes; a packed-gates layout would cut that 4x if
    small-H configs dominate (alignment vs. lane-waste trade-off).
    """
    H = hidden_dim
    Hp = _round_up(H, 128)
    O = output_dim
    Op = _round_up(O, 128)
    gate_order = (0, 1, 3, 2)        # source gate blocks are (i, f, g, o)
    layers = []
    for idx, lp in enumerate(params["lstm"]):
        wih_t, whh_t, b = lp["wih_t"], lp["whh_t"], lp["b"]
        din = wih_t.shape[0]
        din_p = din if idx == 0 else Hp      # layers >=1 consume padded H
        wih_p = jnp.zeros((din_p, 4 * Hp), jnp.float32)
        whh_p = jnp.zeros((Hp, 4 * Hp), jnp.float32)
        b_p = jnp.zeros((1, 4 * Hp), jnp.float32)
        for dst, src in enumerate(gate_order):
            wih_p = wih_p.at[:din, dst * Hp:dst * Hp + H].set(wih_t[:, src * H:(src + 1) * H])
            whh_p = whh_p.at[:H, dst * Hp:dst * Hp + H].set(whh_t[:, src * H:(src + 1) * H])
            b_p = b_p.at[:, dst * Hp:dst * Hp + H].set(b[:, src * H:(src + 1) * H])
        layers.append((wih_p.astype(jnp.bfloat16),
                       whh_p.astype(jnp.bfloat16),
                       b_p))
    w_lin_p = jnp.zeros((Hp, Op), jnp.float32)
    w_lin_p = w_lin_p.at[:H, :O].set(params["w_lin_t"]).astype(jnp.bfloat16)
    b_lin_p = jnp.zeros((1, Op), jnp.float32)
    b_lin_p = b_lin_p.at[:, :O].set(params["b_lin"])
    return {"layers": layers, "w_lin": w_lin_p, "b_lin": b_lin_p,
            "hidden_pad": Hp, "out_pad": Op, "out_dim": O}


# ----------------------------------------------------------------------------
# Per-generation sizing helpers
# ----------------------------------------------------------------------------
def _vmem_capacity_bytes():
    try:
        return int(pltpu.get_tpu_info().vmem_capacity_bytes)
    except Exception:
        return 64 * 1024 * 1024        # conservative: v7x per-TensorCore VMEM


def _default_batch_block(B):
    """Split the batch across cores only on 2-TensorCore parts (v7x) and only
    when each half still gives the recurrent matmul a healthy M dim; on
    single-core v5e/v6e the batch grid axis is a purely serial loop."""
    try:
        kind = jax.devices()[0].device_kind.lower()
    except Exception:
        kind = ""
    if "v7" in kind and B % 2 == 0 and (B // 2) >= 64:
        return B // 2
    return B


def _pick_time_chunk(T, Bb, din, hidden_pad, out_pad, resident_bytes,
                     budget_bytes, max_rows=1024):
    """Largest legal time chunk whose (resident + streamed + temp) footprint
    fits the VMEM budget.  Row counts must be multiples of 16 (bf16 sublane
    tiling of the streamed input) unless the chunk spans the whole sequence."""
    candidates = []
    for tt in range(1, T + 1):
        if T % tt:
            continue
        rows = tt * Bb
        if tt != T and rows % 16 != 0:
            continue
        candidates.append(tt)
    best = candidates[0]
    for tt in candidates:
        rows = tt * Bb
        streamed = 2 * rows * 2 * din + 2 * rows * 4 * out_pad   # bf16 in / f32 out, 2x buffered
        temps = rows * hidden_pad * 4 + rows * 4 * hidden_pad * 4  # act f32 + gates f32
        if rows <= max_rows and resident_bytes + streamed + temps <= budget_bytes:
            best = tt
    return best


# ----------------------------------------------------------------------------
# Public forward
# ----------------------------------------------------------------------------
def lstm_model_forward(x, kparams, *, t_chunk=None, batch_block=None):
    """x: (B, T, input_dim) f32 -> (B, T, output_dim) f32."""
    B, T, Din = x.shape
    layers = kparams["layers"]
    Hp = kparams["hidden_pad"]
    Op = kparams["out_pad"]
    O = kparams["out_dim"]
    L = len(layers)

    Bb = batch_block if batch_block is not None else _default_batch_block(B)
    assert B % Bb == 0, (B, Bb)
    nb = B // Bb

    # (B, T, Din) -> (nb, T*Bb, Din) in bf16: rows time-major within each
    # batch block (plain 2-D kernel blocks, half the streamed HBM bytes).
    x_blk = (x.astype(jnp.bfloat16)
              .reshape(nb, Bb, T, Din)
              .transpose(0, 2, 1, 3)
              .reshape(nb, T * Bb, Din))

    weight_list = []
    for wih, whh, bias in layers:
        weight_list += [wih, whh, bias]
    weight_list += [kparams["w_lin"], kparams["b_lin"]]
    weight_bytes = sum(int(w.size) * w.dtype.itemsize for w in weight_list)
    state_bytes = 2 * L * Bb * Hp * 4          # persistent h/c scratch

    cap = _vmem_capacity_bytes()
    budget = min(max(cap - 16 * 1024 * 1024, 32 * 1024 * 1024),
                 112 * 1024 * 1024)

    def run(single_buffer_weights):
        w_mult = 1 if single_buffer_weights else 2
        resident = w_mult * weight_bytes + state_bytes
        Tt = (t_chunk if t_chunk is not None
              else _pick_time_chunk(T, Bb, Din, Hp, Op, resident, budget))
        assert T % Tt == 0, (T, Tt)
        rows = Tt * Bb
        assert rows % 16 == 0 or Tt == T, (Tt, Bb)
        nt = T // Tt
        unroll = max(1, min(8, Tt))

        w_kwargs = ({"pipeline_mode": pl.Buffered(1)}
                    if single_buffer_weights else {})

        in_specs = [pl.BlockSpec((None, rows, Din), lambda bi, ti: (bi, ti, 0))]
        inputs = [x_blk]
        for wih, whh, bias in layers:
            in_specs += [
                pl.BlockSpec(wih.shape, lambda bi, ti: (0, 0), **w_kwargs),
                pl.BlockSpec(whh.shape, lambda bi, ti: (0, 0), **w_kwargs),
                pl.BlockSpec(bias.shape, lambda bi, ti: (0, 0), **w_kwargs),
            ]
            inputs += [wih, whh, bias]
        in_specs += [
            pl.BlockSpec(kparams["w_lin"].shape, lambda bi, ti: (0, 0), **w_kwargs),
            pl.BlockSpec(kparams["b_lin"].shape, lambda bi, ti: (0, 0), **w_kwargs),
        ]
        inputs += [kparams["w_lin"], kparams["b_lin"]]

        kernel = functools.partial(
            _fused_lstm_linear_kernel,
            num_layers=L, hidden_pad=Hp, t_chunk=Tt, batch_block=Bb,
            unroll=unroll)

        return pl.pallas_call(
            kernel,
            out_shape=jax.ShapeDtypeStruct((nb, T * Bb, Op), jnp.float32),
            grid_spec=pltpu.PrefetchScalarGridSpec(
                num_scalar_prefetch=0,
                grid=(nb, nt),
                in_specs=in_specs,
                out_specs=pl.BlockSpec((None, rows, Op),
                                       lambda bi, ti: (bi, ti, 0)),
                scratch_shapes=[
                    pltpu.VMEM((L, Bb, Hp), jnp.float32),      # h (persists)
                    pltpu.VMEM((L, Bb, Hp), jnp.float32),      # c (persists)
                    pltpu.VMEM((rows, Hp), jnp.float32),       # inter-layer act
                    pltpu.VMEM((rows, 4 * Hp), jnp.float32),   # hoisted gates
                ]),
            compiler_params=pltpu.CompilerParams(
                dimension_semantics=("parallel", "arbitrary"),
                vmem_limit_bytes=budget),
        )(*inputs)

    try:
        y_blk = run(True)
    except Exception:
        # Fallback if this build rejects single-buffered (Buffered(1))
        # resident-weight BlockSpecs: rerun with default double buffering.
        y_blk = run(False)

    # (nb, T*Bb, Op) -> slice real output columns -> (B, T, O)
    y_blk = y_blk[..., :O]
    return (y_blk.reshape(nb, T, Bb, O)
                 .transpose(0, 2, 1, 3)
                 .reshape(B, T, O))


# ----------------------------------------------------------------------------
# Pure-JAX reference (f32, unpadded, original gate order) for correctness
# ----------------------------------------------------------------------------
def _reference_forward(x, params, hidden_dim):
    h_seq = jnp.transpose(x, (1, 0, 2))
    for lp in params["lstm"]:
        wih_t, whh_t, b = lp["wih_t"], lp["whh_t"], lp["b"]

        def step(carry, xt):
            h, c = carry
            gates = xt @ wih_t + h @ whh_t + b
            H = hidden_dim
            i = jax.nn.sigmoid(gates[:, 0 * H:1 * H])
            f = jax.nn.sigmoid(gates[:, 1 * H:2 * H])
            g = jnp.tanh(gates[:, 2 * H:3 * H])
            o = jax.nn.sigmoid(gates[:, 3 * H:4 * H])
            c = f * c + i * g
            h = o * jnp.tanh(c)
            return (h, c), h

        Bsz = h_seq.shape[1]
        init = (jnp.zeros((Bsz, hidden_dim), jnp.float32),
                jnp.zeros((Bsz, hidden_dim), jnp.float32))
        _, h_seq = lax.scan(step, init, h_seq)
    out = h_seq @ params["w_lin_t"] + params["b_lin"]
    return jnp.transpose(out, (1, 0, 2))


# ----------------------------------------------------------------------------
if __name__ == "__main__":
    input_dim, hidden_dim, layer_dim, output_dim = 16, 32, 2, 8

    key = jax.random.PRNGKey(0)
    key, kx1, kx2 = jax.random.split(key, 3)
    params = init_params(key, input_dim, hidden_dim, layer_dim, output_dim)
    kparams = prepare_kernel_params(params, hidden_dim, output_dim)

    # bf16 matmul operands (f32 accumulation / f32 h,c state) -> loose tol;
    # a structural bug (gate order / padding) would be O(1) off.
    TOL = 7e-2

    # Case 1: tiny batch (Bb=2 < 8 -> static-unroll recurrence path),
    # chunked time axis (grid = (1, 2)) exercising the h/c chunk carry.
    B1, T1 = 2, 16
    x1 = jax.random.normal(kx1, (B1, T1, input_dim), jnp.float32)
    out1 = jax.block_until_ready(lstm_model_forward(x1, kparams, t_chunk=8))
    assert out1.shape == (B1, T1, output_dim), out1.shape
    ref1 = _reference_forward(x1, params, hidden_dim)
    err1 = float(jnp.max(jnp.abs(out1 - ref1)))
    assert jnp.allclose(out1, ref1, atol=TOL, rtol=TOL), err1

    # Case 2: 8-aligned batch block -> fori_loop recurrence path with dynamic
    # (8-aligned) row offsets, also chunked in time (grid = (1, 2)).
    B2, T2 = 8, 16
    x2 = jax.random.normal(kx2, (B2, T2, input_dim), jnp.float32)
    out2 = jax.block_until_ready(lstm_model_forward(x2, kparams, t_chunk=8))
    assert out2.shape == (B2, T2, output_dim), out2.shape
    ref2 = _reference_forward(x2, params, hidden_dim)
    err2 = float(jnp.max(jnp.abs(out2 - ref2)))
    assert jnp.allclose(out2, ref2, atol=TOL, rtol=TOL), err2

    print("KERNEL_OK")
</pallas_src>

<mosaic_0001>
module attributes {stable_mosaic.version = 11 : i64} {
  func.func @_fused_lstm_linear_kernel(%arg0: i32, %arg1: i32, %arg2: memref<1x16x16xbf16, #tpu.memory_space<vmem>>, %arg3: memref<16x512xbf16, #tpu.memory_space<vmem>>, %arg4: memref<128x512xbf16, #tpu.memory_space<vmem>>, %arg5: memref<1x512xf32, #tpu.memory_space<vmem>>, %arg6: memref<128x512xbf16, #tpu.memory_space<vmem>>, %arg7: memref<128x512xbf16, #tpu.memory_space<vmem>>, %arg8: memref<1x512xf32, #tpu.memory_space<vmem>>, %arg9: memref<128x128xbf16, #tpu.memory_space<vmem>>, %arg10: memref<1x128xf32, #tpu.memory_space<vmem>>, %arg11: memref<1x16x128xf32, #tpu.memory_space<vmem>>, %arg12: memref<2x2x128xf32, #tpu.memory_space<vmem>>, %arg13: memref<2x2x128xf32, #tpu.memory_space<vmem>>, %arg14: memref<16x128xf32, #tpu.memory_space<vmem>>, %arg15: memref<16x512xf32, #tpu.memory_space<vmem>>) attributes {dimension_semantics = [#tpu.dimension_semantics<parallel>, #tpu.dimension_semantics<arbitrary>], iteration_bounds = array<i64: 1, 2>, scalar_prefetch = 0 : i64, scratch_operands = 4 : i64, tpu.core_type = #tpu.core_type<tc>, window_params = [{transform_indices = @transform_0, window_bounds = array<i64: 1, 16, 16>}, {pipeline_mode = #tpu.pipeline_mode<synchronous>, transform_indices = @transform_1, window_bounds = array<i64: 16, 512>}, {pipeline_mode = #tpu.pipeline_mode<synchronous>, transform_indices = @transform_2, window_bounds = array<i64: 128, 512>}, {pipeline_mode = #tpu.pipeline_mode<synchronous>, transform_indices = @transform_3, window_bounds = array<i64: 1, 512>}, {pipeline_mode = #tpu.pipeline_mode<synchronous>, transform_indices = @transform_4, window_bounds = array<i64: 128, 512>}, {pipeline_mode = #tpu.pipeline_mode<synchronous>, transform_indices = @transform_5, window_bounds = array<i64: 128, 512>}, {pipeline_mode = #tpu.pipeline_mode<synchronous>, transform_indices = @transform_6, window_bounds = array<i64: 1, 512>}, {pipeline_mode = #tpu.pipeline_mode<synchronous>, transform_indices = @transform_7, window_bounds = array<i64: 128, 128>}, {pipeline_mode = #tpu.pipeline_mode<synchronous>, transform_indices = @transform_8, window_bounds = array<i64: 1, 128>}, {transform_indices = @transform_9, window_bounds = array<i64: 1, 16, 128>}]} {
    %c0_i32 = arith.constant 0 : i32
    %0 = arith.cmpi eq, %arg1, %c0_i32 : i32
    %1 = arith.extui %0 : i1 to i32
    %c0_i32_0 = arith.constant 0 : i32
    %2 = arith.cmpi ne, %1, %c0_i32_0 : i32
    scf.if %2 {
      %cst_144 = arith.constant 0.000000e+00 : f32
      %387 = vector.broadcast %cst_144 : f32 to vector<2x2x128xf32>
      %c0_145 = arith.constant 0 : index
      %c0_146 = arith.constant 0 : index
      %c0_147 = arith.constant 0 : index
      %388 = vector.load %arg12[%c0_145, %c0_146, %c0_147] : memref<2x2x128xf32, #tpu.memory_space<vmem>>, vector<2x2x128xf32>
      tpu.vector_store %arg12[%c0_145, %c0_146, %c0_147], %387 {strides = array<i32>} : memref<2x2x128xf32, #tpu.memory_space<vmem>>, vector<2x2x128xf32>,
      %cst_148 = arith.constant 0.000000e+00 : f32
      %389 = vector.broadcast %cst_148 : f32 to vector<2x2x128xf32>
      %c0_149 = arith.constant 0 : index
      %c0_150 = arith.constant 0 : index
      %c0_151 = arith.constant 0 : index
      %390 = vector.load %arg13[%c0_149, %c0_150, %c0_151] : memref<2x2x128xf32, #tpu.memory_space<vmem>>, vector<2x2x128xf32>
      tpu.vector_store %arg13[%c0_149, %c0_150, %c0_151], %389 {strides = array<i32>} : memref<2x2x128xf32, #tpu.memory_space<vmem>>, vector<2x2x128xf32>,
    } else {
    }
    %c0 = arith.constant 0 : index
    %c0_1 = arith.constant 0 : index
    %3 = vector.load %arg3[%c0, %c0_1] : memref<16x512xbf16, #tpu.memory_space<vmem>>, vector<16x512xbf16>
    %c0_2 = arith.constant 0 : index
    %c0_3 = arith.constant 0 : index
    %4 = vector.load %arg4[%c0_2, %c0_3] : memref<128x512xbf16, #tpu.memory_space<vmem>>, vector<128x512xbf16>
    %c0_4 = arith.constant 0 : index
    %c0_5 = arith.constant 0 : index
    %5 = vector.load %arg5[%c0_4, %c0_5] : memref<1x512xf32, #tpu.memory_space<vmem>>, vector<1x512xf32>
    %c0_6 = arith.constant 0 : index
    %c0_7 = arith.constant 0 : index
    %c0_8 = arith.constant 0 : index
    %6 = vector.load %arg2[%c0_6, %c0_7, %c0_8] : memref<1x16x16xbf16, #tpu.memory_space<vmem>>, vector<1x16x16xbf16>
    %7 = vector.shape_cast %6 : vector<1x16x16xbf16> to vector<16x16xbf16>
    %cst = arith.constant dense<0.000000e+00> : vector<16x512xf32>
    %8 = tpu.matmul %7, %3, %cst {dimension_numbers = #tpu.dot_dimension_numbers<[1], [0], [0], [1], [0, 0, 1, 1], [], []>} : vector<16x16xbf16>, vector<16x512xbf16>, vector<16x512xf32> -> vector<16x512xf32>
    %9 = vector.broadcast %5 : vector<1x512xf32> to vector<16x512xf32>
    %10 = arith.addf %8, %9 : vector<16x512xf32>
    %c0_9 = arith.constant 0 : index
    %c0_10 = arith.constant 0 : index
    %11 = vector.load %arg15[%c0_9, %c0_10] : memref<16x512xf32, #tpu.memory_space<vmem>>, vector<16x512xf32>
    tpu.vector_store %arg15[%c0_9, %c0_10], %10 {strides = array<i32>} : memref<16x512xf32, #tpu.memory_space<vmem>>, vector<16x512xf32>,
    %c0_11 = arith.constant 0 : index
    %c0_12 = arith.constant 0 : index
    %c0_13 = arith.constant 0 : index
    %12 = vector.load %arg12[%c0_11, %c0_12, %c0_13] : memref<2x2x128xf32, #tpu.memory_space<vmem>>, vector<1x2x128xf32>
    %13 = vector.shape_cast %12 : vector<1x2x128xf32> to vector<2x128xf32>
    %c0_14 = arith.constant 0 : index
    %c0_15 = arith.constant 0 : index
    %c0_16 = arith.constant 0 : index
    %14 = vector.load %arg13[%c0_14, %c0_15, %c0_16] : memref<2x2x128xf32, #tpu.memory_space<vmem>>, vector<1x2x128xf32>
    %15 = vector.shape_cast %14 : vector<1x2x128xf32> to vector<2x128xf32>
    %c0_17 = arith.constant 0 : index
    %c0_18 = arith.constant 0 : index
    %16 = vector.load %arg15[%c0_17, %c0_18] : memref<16x512xf32, #tpu.memory_space<vmem>>, vector<2x512xf32>
    %17 = arith.truncf %13 : vector<2x128xf32> to vector<2x128xbf16>
    %cst_19 = arith.constant dense<0.000000e+00> : vector<2x512xf32>
    %18 = tpu.matmul %17, %4, %cst_19 {dimension_numbers = #tpu.dot_dimension_numbers<[1], [0], [0], [1], [0, 0, 1, 1], [], []>} : vector<2x128xbf16>, vector<128x512xbf16>, vector<2x512xf32> -> vector<2x512xf32>
    %19 = arith.addf %16, %18 : vector<2x512xf32>
    %20 = vector.extract_strided_slice %19 {offsets = [0, 0], sizes = [2, 384], strides = [1, 1]} : vector<2x512xf32> to vector<2x384xf32>
    %21 = arith.negf %20 : vector<2x384xf32>
    %22 = math.exp %21 : vector<2x384xf32>
    %cst_20 = arith.constant 1.000000e+00 : f32
    %23 = vector.broadcast %cst_20 : f32 to vector<2x384xf32>
    %24 = arith.addf %23, %22 : vector<2x384xf32>
    %25 = arith.divf %23, %24 : vector<2x384xf32>
    %26 = vector.extract_strided_slice %25 {offsets = [0, 0], sizes = [2, 128], strides = [1, 1]} : vector<2x384xf32> to vector<2x128xf32>
    %27 = vector.extract_strided_slice %25 {offsets = [0, 128], sizes = [2, 128], strides = [1, 1]} : vector<2x384xf32> to vector<2x128xf32>
    %28 = vector.extract_strided_slice %25 {offsets = [0, 256], sizes = [2, 128], strides = [1, 1]} : vector<2x384xf32> to vector<2x128xf32>
    %29 = vector.extract_strided_slice %19 {offsets = [0, 384], sizes = [2, 128], strides = [1, 1]} : vector<2x512xf32> to vector<2x128xf32>
    %30 = math.tanh %29 : vector<2x128xf32>
    %31 = arith.mulf %27, %15 : vector<2x128xf32>
    %32 = arith.mulf %26, %30 : vector<2x128xf32>
    %33 = arith.addf %31, %32 : vector<2x128xf32>
    %34 = math.tanh %33 : vector<2x128xf32>
    %35 = arith.mulf %28, %34 : vector<2x128xf32>
    %c0_21 = arith.constant 0 : index
    %c0_22 = arith.constant 0 : index
    %36 = vector.load %arg14[%c0_21, %c0_22] : memref<16x128xf32, #tpu.memory_space<vmem>>, vector<2x128xf32>
    tpu.vector_store %arg14[%c0_21, %c0_22], %35 {strides = array<i32>} : memref<16x128xf32, #tpu.memory_space<vmem>>, vector<2x128xf32>,
    %c2 = arith.constant 2 : index
    %c0_23 = arith.constant 0 : index
    %37 = vector.load %arg15[%c2, %c0_23] : memref<16x512xf32, #tpu.memory_space<vmem>>, vector<2x512xf32>
    %38 = arith.truncf %35 : vector<2x128xf32> to vector<2x128xbf16>
    %cst_24 = arith.constant dense<0.000000e+00> : vector<2x512xf32>
    %39 = tpu.matmul %38, %4, %cst_24 {dimension_numbers = #tpu.dot_dimension_numbers<[1], [0], [0], [1], [0, 0, 1, 1], [], []>} : vector<2x128xbf16>, vector<128x512xbf16>, vector<2x512xf32> -> vector<2x512xf32>
    %40 = arith.addf %37, %39 : vector<2x512xf32>
    %41 = vector.extract_strided_slice %40 {offsets = [0, 0], sizes = [2, 384], strides = [1, 1]} : vector<2x512xf32> to vector<2x384xf32>
    %42 = arith.negf %41 : vector<2x384xf32>
    %43 = math.exp %42 : vector<2x384xf32>
    %cst_25 = arith.constant 1.000000e+00 : f32
    %44 = vector.broadcast %cst_25 : f32 to vector<2x384xf32>
    %45 = arith.addf %44, %43 : vector<2x384xf32>
    %46 = arith.divf %44, %45 : vector<2x384xf32>
    %47 = vector.extract_strided_slice %46 {offsets = [0, 0], sizes = [2, 128], strides = [1, 1]} : vector<2x384xf32> to vector<2x128xf32>
    %48 = vector.extract_strided_slice %46 {offsets = [0, 128], sizes = [2, 128], strides = [1, 1]} : vector<2x384xf32> to vector<2x128xf32>
    %49 = vector.extract_strided_slice %46 {offsets = [0, 256], sizes = [2, 128], strides = [1, 1]} : vector<2x384xf32> to vector<2x128xf32>
    %50 = vector.extract_strided_slice %40 {offsets = [0, 384], sizes = [2, 128], strides = [1, 1]} : vector<2x512xf32> to vector<2x128xf32>
    %51 = math.tanh %50 : vector<2x128xf32>
    %52 = arith.mulf %48, %33 : vector<2x128xf32>
    %53 = arith.mulf %47, %51 : vector<2x128xf32>
    %54 = arith.addf %52, %53 : vector<2x128xf32>
    %55 = math.tanh %54 : vector<2x128xf32>
    %56 = arith.mulf %49, %55 : vector<2x128xf32>
    %c2_26 = arith.constant 2 : index
    %c0_27 = arith.constant 0 : index
    %57 = vector.load %arg14[%c2_26, %c0_27] : memref<16x128xf32, #tpu.memory_space<vmem>>, vector<2x128xf32>
    tpu.vector_store %arg14[%c2_26, %c0_27], %56 {strides = array<i32>} : memref<16x128xf32, #tpu.memory_space<vmem>>, vector<2x128xf32>,
    %c4 = arith.constant 4 : index
    %c0_28 = arith.constant 0 : index
    %58 = vector.load %arg15[%c4, %c0_28] : memref<16x512xf32, #tpu.memory_space<vmem>>, vector<2x512xf32>
    %59 = arith.truncf %56 : vector<2x128xf32> to vector<2x128xbf16>
    %cst_29 = arith.constant dense<0.000000e+00> : vector<2x512xf32>
    %60 = tpu.matmul %59, %4, %cst_29 {dimension_numbers = #tpu.dot_dimension_numbers<[1], [0], [0], [1], [0, 0, 1, 1], [], []>} : vector<2x128xbf16>, vector<128x512xbf16>, vector<2x512xf32> -> vector<2x512xf32>
    %61 = arith.addf %58, %60 : vector<2x512xf32>
    %62 = vector.extract_strided_slice %61 {offsets = [0, 0], sizes = [2, 384], strides = [1, 1]} : vector<2x512xf32> to vector<2x384xf32>
    %63 = arith.negf %62 : vector<2x384xf32>
    %64 = math.exp %63 : vector<2x384xf32>
    %cst_30 = arith.constant 1.000000e+00 : f32
    %65 = vector.broadcast %cst_30 : f32 to vector<2x384xf32>
    %66 = arith.addf %65, %64 : vector<2x384xf32>
    %67 = arith.divf %65, %66 : vector<2x384xf32>
    %68 = vector.extract_strided_slice %67 {offsets = [0, 0], sizes = [2, 128], strides = [1, 1]} : vector<2x384xf32> to vector<2x128xf32>
    %69 = vector.extract_strided_slice %67 {offsets = [0, 128], sizes = [2, 128], strides = [1, 1]} : vector<2x384xf32> to vector<2x128xf32>
    %70 = vector.extract_strided_slice %67 {offsets = [0, 256], sizes = [2, 128], strides = [1, 1]} : vector<2x384xf32> to vector<2x128xf32>
    %71 = vector.extract_strided_slice %61 {offsets = [0, 384], sizes = [2, 128], strides = [1, 1]} : vector<2x512xf32> to vector<2x128xf32>
    %72 = math.tanh %71 : vector<2x128xf32>
    %73 = arith.mulf %69, %54 : vector<2x128xf32>
    %74 = arith.mulf %68, %72 : vector<2x128xf32>
    %75 = arith.addf %73, %74 : vector<2x128xf32>
    %76 = math.tanh %75 : vector<2x128xf32>
    %77 = arith.mulf %70, %76 : vector<2x128xf32>
    %c4_31 = arith.constant 4 : index
    %c0_32 = arith.constant 0 : index
    %78 = vector.load %arg14[%c4_31, %c0_32] : memref<16x128xf32, #tpu.memory_space<vmem>>, vector<2x128xf32>
    tpu.vector_store %arg14[%c4_31, %c0_32], %77 {strides = array<i32>} : memref<16x128xf32, #tpu.memory_space<vmem>>, vector<2x128xf32>,
    %c6 = arith.constant 6 : index
    %c0_33 = arith.constant 0 : index
    %79 = vector.load %arg15[%c6, %c0_33] : memref<16x512xf32, #tpu.memory_space<vmem>>, vector<2x512xf32>
    %80 = arith.truncf %77 : vector<2x128xf32> to vector<2x128xbf16>
    %cst_34 = arith.constant dense<0.000000e+00> : vector<2x512xf32>
    %81 = tpu.matmul %80, %4, %cst_34 {dimension_numbers = #tpu.dot_dimension_numbers<[1], [0], [0], [1], [0, 0, 1, 1], [], []>} : vector<2x128xbf16>, vector<128x512xbf16>, vector<2x512xf32> -> vector<2x512xf32>
    %82 = arith.addf %79, %81 : vector<2x512xf32>
    %83 = vector.extract_strided_slice %82 {offsets = [0, 0], sizes = [2, 384], strides = [1, 1]} : vector<2x512xf32> to vector<2x384xf32>
    %84 = arith.negf %83 : vector<2x384xf32>
    %85 = math.exp %84 : vector<2x384xf32>
    %cst_35 = arith.constant 1.000000e+00 : f32
    %86 = vector.broadcast %cst_35 : f32 to vector<2x384xf32>
    %87 = arith.addf %86, %85 : vector<2x384xf32>
    %88 = arith.divf %86, %87 : vector<2x384xf32>
    %89 = vector.extract_strided_slice %88 {offsets = [0, 0], sizes = [2, 128], strides = [1, 1]} : vector<2x384xf32> to vector<2x128xf32>
    %90 = vector.extract_strided_slice %88 {offsets = [0, 128], sizes = [2, 128], strides = [1, 1]} : vector<2x384xf32> to vector<2x128xf32>
    %91 = vector.extract_strided_slice %88 {offsets = [0, 256], sizes = [2, 128], strides = [1, 1]} : vector<2x384xf32> to vector<2x128xf32>
    %92 = vector.extract_strided_slice %82 {offsets = [0, 384], sizes = [2, 128], strides = [1, 1]} : vector<2x512xf32> to vector<2x128xf32>
    %93 = math.tanh %92 : vector<2x128xf32>
    %94 = arith.mulf %90, %75 : vector<2x128xf32>
    %95 = arith.mulf %89, %93 : vector<2x128xf32>
    %96 = arith.addf %94, %95 : vector<2x128xf32>
    %97 = math.tanh %96 : vector<2x128xf32>
    %98 = arith.mulf %91, %97 : vector<2x128xf32>
    %c6_36 = arith.constant 6 : index
    %c0_37 = arith.constant 0 : index
    %99 = vector.load %arg14[%c6_36, %c0_37] : memref<16x128xf32, #tpu.memory_space<vmem>>, vector<2x128xf32>
    tpu.vector_store %arg14[%c6_36, %c0_37], %98 {strides = array<i32>} : memref<16x128xf32, #tpu.memory_space<vmem>>, vector<2x128xf32>,
    %c8 = arith.constant 8 : index
    %c0_38 = arith.constant 0 : index
    %100 = vector.load %arg15[%c8, %c0_38] : memref<16x512xf32, #tpu.memory_space<vmem>>, vector<2x512xf32>
    %101 = arith.truncf %98 : vector<2x128xf32> to vector<2x128xbf16>
    %cst_39 = arith.constant dense<0.000000e+00> : vector<2x512xf32>
    %102 = tpu.matmul %101, %4, %cst_39 {dimension_numbers = #tpu.dot_dimension_numbers<[1], [0], [0], [1], [0, 0, 1, 1], [], []>} : vector<2x128xbf16>, vector<128x512xbf16>, vector<2x512xf32> -> vector<2x512xf32>
    %103 = arith.addf %100, %102 : vector<2x512xf32>
    %104 = vector.extract_strided_slice %103 {offsets = [0, 0], sizes = [2, 384], strides = [1, 1]} : vector<2x512xf32> to vector<2x384xf32>
    %105 = arith.negf %104 : vector<2x384xf32>
    %106 = math.exp %105 : vector<2x384xf32>
    %cst_40 = arith.constant 1.000000e+00 : f32
    %107 = vector.broadcast %cst_40 : f32 to vector<2x384xf32>
    %108 = arith.addf %107, %106 : vector<2x384xf32>
    %109 = arith.divf %107, %108 : vector<2x384xf32>
    %110 = vector.extract_strided_slice %109 {offsets = [0, 0], sizes = [2, 128], strides = [1, 1]} : vector<2x384xf32> to vector<2x128xf32>
    %111 = vector.extract_strided_slice %109 {offsets = [0, 128], sizes = [2, 128], strides = [1, 1]} : vector<2x384xf32> to vector<2x128xf32>
    %112 = vector.extract_strided_slice %109 {offsets = [0, 256], sizes = [2, 128], strides = [1, 1]} : vector<2x384xf32> to vector<2x128xf32>
    %113 = vector.extract_strided_slice %103 {offsets = [0, 384], sizes = [2, 128], strides = [1, 1]} : vector<2x512xf32> to vector<2x128xf32>
    %114 = math.tanh %113 : vector<2x128xf32>
    %115 = arith.mulf %111, %96 : vector<2x128xf32>
    %116 = arith.mulf %110, %114 : vector<2x128xf32>
    %117 = arith.addf %115, %116 : vector<2x128xf32>
    %118 = math.tanh %117 : vector<2x128xf32>
    %119 = arith.mulf %112, %118 : vector<2x128xf32>
    %c8_41 = arith.constant 8 : index
    %c0_42 = arith.constant 0 : index
    %120 = vector.load %arg14[%c8_41, %c0_42] : memref<16x128xf32, #tpu.memory_space<vmem>>, vector<2x128xf32>
    tpu.vector_store %arg14[%c8_41, %c0_42], %119 {strides = array<i32>} : memref<16x128xf32, #tpu.memory_space<vmem>>, vector<2x128xf32>,
    %c10 = arith.constant 10 : index
    %c0_43 = arith.constant 0 : index
    %121 = vector.load %arg15[%c10, %c0_43] : memref<16x512xf32, #tpu.memory_space<vmem>>, vector<2x512xf32>
    %122 = arith.truncf %119 : vector<2x128xf32> to vector<2x128xbf16>
    %cst_44 = arith.constant dense<0.000000e+00> : vector<2x512xf32>
    %123 = tpu.matmul %122, %4, %cst_44 {dimension_numbers = #tpu.dot_dimension_numbers<[1], [0], [0], [1], [0, 0, 1, 1], [], []>} : vector<2x128xbf16>, vector<128x512xbf16>, vector<2x512xf32> -> vector<2x512xf32>
    %124 = arith.addf %121, %123 : vector<2x512xf32>
    %125 = vector.extract_strided_slice %124 {offsets = [0, 0], sizes = [2, 384], strides = [1, 1]} : vector<2x512xf32> to vector<2x384xf32>
    %126 = arith.negf %125 : vector<2x384xf32>
    %127 = math.exp %126 : vector<2x384xf32>
    %cst_45 = arith.constant 1.000000e+00 : f32
    %128 = vector.broadcast %cst_45 : f32 to vector<2x384xf32>
    %129 = arith.addf %128, %127 : vector<2x384xf32>
    %130 = arith.divf %128, %129 : vector<2x384xf32>
    %131 = vector.extract_strided_slice %130 {offsets = [0, 0], sizes = [2, 128], strides = [1, 1]} : vector<2x384xf32> to vector<2x128xf32>
    %132 = vector.extract_strided_slice %130 {offsets = [0, 128], sizes = [2, 128], strides = [1, 1]} : vector<2x384xf32> to vector<2x128xf32>
    %133 = vector.extract_strided_slice %130 {offsets = [0, 256], sizes = [2, 128], strides = [1, 1]} : vector<2x384xf32> to vector<2x128xf32>
    %134 = vector.extract_strided_slice %124 {offsets = [0, 384], sizes = [2, 128], strides = [1, 1]} : vector<2x512xf32> to vector<2x128xf32>
    %135 = math.tanh %134 : vector<2x128xf32>
    %136 = arith.mulf %132, %117 : vector<2x128xf32>
    %137 = arith.mulf %131, %135 : vector<2x128xf32>
    %138 = arith.addf %136, %137 : vector<2x128xf32>
    %139 = math.tanh %138 : vector<2x128xf32>
    %140 = arith.mulf %133, %139 : vector<2x128xf32>
    %c10_46 = arith.constant 10 : index
    %c0_47 = arith.constant 0 : index
    %141 = vector.load %arg14[%c10_46, %c0_47] : memref<16x128xf32, #tpu.memory_space<vmem>>, vector<2x128xf32>
    tpu.vector_store %arg14[%c10_46, %c0_47], %140 {strides = array<i32>} : memref<16x128xf32, #tpu.memory_space<vmem>>, vector<2x128xf32>,
    %c12 = arith.constant 12 : index
    %c0_48 = arith.constant 0 : index
    %142 = vector.load %arg15[%c12, %c0_48] : memref<16x512xf32, #tpu.memory_space<vmem>>, vector<2x512xf32>
    %143 = arith.truncf %140 : vector<2x128xf32> to vector<2x128xbf16>
    %cst_49 = arith.constant dense<0.000000e+00> : vector<2x512xf32>
    %144 = tpu.matmul %143, %4, %cst_49 {dimension_numbers = #tpu.dot_dimension_numbers<[1], [0], [0], [1], [0, 0, 1, 1], [], []>} : vector<2x128xbf16>, vector<128x512xbf16>, vector<2x512xf32> -> vector<2x512xf32>
    %145 = arith.addf %142, %144 : vector<2x512xf32>
    %146 = vector.extract_strided_slice %145 {offsets = [0, 0], sizes = [2, 384], strides = [1, 1]} : vector<2x512xf32> to vector<2x384xf32>
    %147 = arith.negf %146 : vector<2x384xf32>
    %148 = math.exp %147 : vector<2x384xf32>
    %cst_50 = arith.constant 1.000000e+00 : f32
    %149 = vector.broadcast %cst_50 : f32 to vector<2x384xf32>
    %150 = arith.addf %149, %148 : vector<2x384xf32>
    %151 = arith.divf %149, %150 : vector<2x384xf32>
    %152 = vector.extract_strided_slice %151 {offsets = [0, 0], sizes = [2, 128], strides = [1, 1]} : vector<2x384xf32> to vector<2x128xf32>
    %153 = vector.extract_strided_slice %151 {offsets = [0, 128], sizes = [2, 128], strides = [1, 1]} : vector<2x384xf32> to vector<2x128xf32>
    %154 = vector.extract_strided_slice %151 {offsets = [0, 256], sizes = [2, 128], strides = [1, 1]} : vector<2x384xf32> to vector<2x128xf32>
    %155 = vector.extract_strided_slice %145 {offsets = [0, 384], sizes = [2, 128], strides = [1, 1]} : vector<2x512xf32> to vector<2x128xf32>
    %156 = math.tanh %155 : vector<2x128xf32>
    %157 = arith.mulf %153, %138 : vector<2x128xf32>
    %158 = arith.mulf %152, %156 : vector<2x128xf32>
    %159 = arith.addf %157, %158 : vector<2x128xf32>
    %160 = math.tanh %159 : vector<2x128xf32>
    %161 = arith.mulf %154, %160 : vector<2x128xf32>
    %c12_51 = arith.constant 12 : index
    %c0_52 = arith.constant 0 : index
    %162 = vector.load %arg14[%c12_51, %c0_52] : memref<16x128xf32, #tpu.memory_space<vmem>>, vector<2x128xf32>
    tpu.vector_store %arg14[%c12_51, %c0_52], %161 {strides = array<i32>} : memref<16x128xf32, #tpu.memory_space<vmem>>, vector<2x128xf32>,
    %c14 = arith.constant 14 : index
    %c0_53 = arith.constant 0 : index
    %163 = vector.load %arg15[%c14, %c0_53] : memref<16x512xf32, #tpu.memory_space<vmem>>, vector<2x512xf32>
    %164 = arith.truncf %161 : vector<2x128xf32> to vector<2x128xbf16>
    %cst_54 = arith.constant dense<0.000000e+00> : vector<2x512xf32>
    %165 = tpu.matmul %164, %4, %cst_54 {dimension_numbers = #tpu.dot_dimension_numbers<[1], [0], [0], [1], [0, 0, 1, 1], [], []>} : vector<2x128xbf16>, vector<128x512xbf16>, vector<2x512xf32> -> vector<2x512xf32>
    %166 = arith.addf %163, %165 : vector<2x512xf32>
    %167 = vector.extract_strided_slice %166 {offsets = [0, 0], sizes = [2, 384], strides = [1, 1]} : vector<2x512xf32> to vector<2x384xf32>
    %168 = arith.negf %167 : vector<2x384xf32>
    %169 = math.exp %168 : vector<2x384xf32>
    %cst_55 = arith.constant 1.000000e+00 : f32
    %170 = vector.broadcast %cst_55 : f32 to vector<2x384xf32>
    %171 = arith.addf %170, %169 : vector<2x384xf32>
    %172 = arith.divf %170, %171 : vector<2x384xf32>
    %173 = vector.extract_strided_slice %172 {offsets = [0, 0], sizes = [2, 128], strides = [1, 1]} : vector<2x384xf32> to vector<2x128xf32>
    %174 = vector.extract_strided_slice %172 {offsets = [0, 128], sizes = [2, 128], strides = [1, 1]} : vector<2x384xf32> to vector<2x128xf32>
    %175 = vector.extract_strided_slice %172 {offsets = [0, 256], sizes = [2, 128], strides = [1, 1]} : vector<2x384xf32> to vector<2x128xf32>
    %176 = vector.extract_strided_slice %166 {offsets = [0, 384], sizes = [2, 128], strides = [1, 1]} : vector<2x512xf32> to vector<2x128xf32>
    %177 = math.tanh %176 : vector<2x128xf32>
    %178 = arith.mulf %174, %159 : vector<2x128xf32>
    %179 = arith.mulf %173, %177 : vector<2x128xf32>
    %180 = arith.addf %178, %179 : vector<2x128xf32>
    %181 = math.tanh %180 : vector<2x128xf32>
    %182 = arith.mulf %175, %181 : vector<2x128xf32>
    %c14_56 = arith.constant 14 : index
    %c0_57 = arith.constant 0 : index
    %183 = vector.load %arg14[%c14_56, %c0_57] : memref<16x128xf32, #tpu.memory_space<vmem>>, vector<2x128xf32>
    tpu.vector_store %arg14[%c14_56, %c0_57], %182 {strides = array<i32>} : memref<16x128xf32, #tpu.memory_space<vmem>>, vector<2x128xf32>,
    %c0_58 = arith.constant 0 : index
    %c0_59 = arith.constant 0 : index
    %c0_60 = arith.constant 0 : index
    %184 = vector.load %arg12[%c0_58, %c0_59, %c0_60] : memref<2x2x128xf32, #tpu.memory_space<vmem>>, vector<1x2x128xf32>
    %185 = vector.shape_cast %184 : vector<1x2x128xf32> to vector<2x128xf32>
    %186 = vector.shape_cast %182 : vector<2x128xf32> to vector<1x2x128xf32>
    tpu.vector_store %arg12[%c0_58, %c0_59, %c0_60], %186 {strides = array<i32>} : memref<2x2x128xf32, #tpu.memory_space<vmem>>, vector<1x2x128xf32>,
    %c0_61 = arith.constant 0 : index
    %c0_62 = arith.constant 0 : index
    %c0_63 = arith.constant 0 : index
    %187 = vector.load %arg13[%c0_61, %c0_62, %c0_63] : memref<2x2x128xf32, #tpu.memory_space<vmem>>, vector<1x2x128xf32>
    %188 = vector.shape_cast %187 : vector<1x2x128xf32> to vector<2x128xf32>
    %189 = vector.shape_cast %180 : vector<2x128xf32> to vector<1x2x128xf32>
    tpu.vector_store %arg13[%c0_61, %c0_62, %c0_63], %189 {strides = array<i32>} : memref<2x2x128xf32, #tpu.memory_space<vmem>>, vector<1x2x128xf32>,
    %c0_64 = arith.constant 0 : index
    %c0_65 = arith.constant 0 : index
    %190 = vector.load %arg6[%c0_64, %c0_65] : memref<128x512xbf16, #tpu.memory_space<vmem>>, vector<128x512xbf16>
    %c0_66 = arith.constant 0 : index
    %c0_67 = arith.constant 0 : index
    %191 = vector.load %arg7[%c0_66, %c0_67] : memref<128x512xbf16, #tpu.memory_space<vmem>>, vector<128x512xbf16>
    %c0_68 = arith.constant 0 : index
    %c0_69 = arith.constant 0 : index
    %192 = vector.load %arg8[%c0_68, %c0_69] : memref<1x512xf32, #tpu.memory_space<vmem>>, vector<1x512xf32>
    %c0_70 = arith.constant 0 : index
    %c0_71 = arith.constant 0 : index
    %193 = vector.load %arg14[%c0_70, %c0_71] : memref<16x128xf32, #tpu.memory_space<vmem>>, vector<16x128xf32>
    %194 = arith.truncf %193 : vector<16x128xf32> to vector<16x128xbf16>
    %cst_72 = arith.constant dense<0.000000e+00> : vector<16x512xf32>
    %195 = tpu.matmul %194, %190, %cst_72 {dimension_numbers = #tpu.dot_dimension_numbers<[1], [0], [0], [1], [0, 0, 1, 1], [], []>} : vector<16x128xbf16>, vector<128x512xbf16>, vector<16x512xf32> -> vector<16x512xf32>
    %196 = vector.broadcast %192 : vector<1x512xf32> to vector<16x512xf32>
    %197 = arith.addf %195, %196 : vector<16x512xf32>
    %c0_73 = arith.constant 0 : index
    %c0_74 = arith.constant 0 : index
    %198 = vector.load %arg15[%c0_73, %c0_74] : memref<16x512xf32, #tpu.memory_space<vmem>>, vector<16x512xf32>
    tpu.vector_store %arg15[%c0_73, %c0_74], %197 {strides = array<i32>} : memref<16x512xf32, #tpu.memory_space<vmem>>, vector<16x512xf32>,
    %c1 = arith.constant 1 : index
    %c0_75 = arith.constant 0 : index
    %c0_76 = arith.constant 0 : index
    %199 = vector.load %arg12[%c1, %c0_75, %c0_76] : memref<2x2x128xf32, #tpu.memory_space<vmem>>, vector<1x2x128xf32>
    %200 = vector.shape_cast %199 : vector<1x2x128xf32> to vector<2x128xf32>
    %c1_77 = arith.constant 1 : index
    %c0_78 = arith.constant 0 : index
    %c0_79 = arith.constant 0 : index
    %201 = vector.load %arg13[%c1_77, %c0_78, %c0_79] : memref<2x2x128xf32, #tpu.memory_space<vmem>>, vector<1x2x128xf32>
    %202 = vector.shape_cast %201 : vector<1x2x128xf32> to vector<2x128xf32>
    %c0_80 = arith.constant 0 : index
    %c0_81 = arith.constant 0 : index
    %203 = vector.load %arg15[%c0_80, %c0_81] : memref<16x512xf32, #tpu.memory_space<vmem>>, vector<2x512xf32>
    %204 = arith.truncf %200 : vector<2x128xf32> to vector<2x128xbf16>
    %cst_82 = arith.constant dense<0.000000e+00> : vector<2x512xf32>
    %205 = tpu.matmul %204, %191, %cst_82 {dimension_numbers = #tpu.dot_dimension_numbers<[1], [0], [0], [1], [0, 0, 1, 1], [], []>} : vector<2x128xbf16>, vector<128x512xbf16>, vector<2x512xf32> -> vector<2x512xf32>
    %206 = arith.addf %203, %205 : vector<2x512xf32>
    %207 = vector.extract_strided_slice %206 {offsets = [0, 0], sizes = [2, 384], strides = [1, 1]} : vector<2x512xf32> to vector<2x384xf32>
    %208 = arith.negf %207 : vector<2x384xf32>
    %209 = math.exp %208 : vector<2x384xf32>
    %cst_83 = arith.constant 1.000000e+00 : f32
    %210 = vector.broadcast %cst_83 : f32 to vector<2x384xf32>
    %211 = arith.addf %210, %209 : vector<2x384xf32>
    %212 = arith.divf %210, %211 : vector<2x384xf32>
    %213 = vector.extract_strided_slice %212 {offsets = [0, 0], sizes = [2, 128], strides = [1, 1]} : vector<2x384xf32> to vector<2x128xf32>
    %214 = vector.extract_strided_slice %212 {offsets = [0, 128], sizes = [2, 128], strides = [1, 1]} : vector<2x384xf32> to vector<2x128xf32>
    %215 = vector.extract_strided_slice %212 {offsets = [0, 256], sizes = [2, 128], strides = [1, 1]} : vector<2x384xf32> to vector<2x128xf32>
    %216 = vector.extract_strided_slice %206 {offsets = [0, 384], sizes = [2, 128], strides = [1, 1]} : vector<2x512xf32> to vector<2x128xf32>
    %217 = math.tanh %216 : vector<2x128xf32>
    %218 = arith.mulf %214, %202 : vector<2x128xf32>
    %219 = arith.mulf %213, %217 : vector<2x128xf32>
    %220 = arith.addf %218, %219 : vector<2x128xf32>
    %221 = math.tanh %220 : vector<2x128xf32>
    %222 = arith.mulf %215, %221 : vector<2x128xf32>
    %c0_84 = arith.constant 0 : index
    %c0_85 = arith.constant 0 : index
    %223 = vector.load %arg14[%c0_84, %c0_85] : memref<16x128xf32, #tpu.memory_space<vmem>>, vector<2x128xf32>
    tpu.vector_store %arg14[%c0_84, %c0_85], %222 {strides = array<i32>} : memref<16x128xf32, #tpu.memory_space<vmem>>, vector<2x128xf32>,
    %c2_86 = arith.constant 2 : index
    %c0_87 = arith.constant 0 : index
    %224 = vector.load %arg15[%c2_86, %c0_87] : memref<16x512xf32, #tpu.memory_space<vmem>>, vector<2x512xf32>
    %225 = arith.truncf %222 : vector<2x128xf32> to vector<2x128xbf16>
    %cst_88 = arith.constant dense<0.000000e+00> : vector<2x512xf32>
    %226 = tpu.matmul %225, %191, %cst_88 {dimension_numbers = #tpu.dot_dimension_numbers<[1], [0], [0], [1], [0, 0, 1, 1], [], []>} : vector<2x128xbf16>, vector<128x512xbf16>, vector<2x512xf32> -> vector<2x512xf32>
    %227 = arith.addf %224, %226 : vector<2x512xf32>
    %228 = vector.extract_strided_slice %227 {offsets = [0, 0], sizes = [2, 384], strides = [1, 1]} : vector<2x512xf32> to vector<2x384xf32>
    %229 = arith.negf %228 : vector<2x384xf32>
    %230 = math.exp %229 : vector<2x384xf32>
    %cst_89 = arith.constant 1.000000e+00 : f32
    %231 = vector.broadcast %cst_89 : f32 to vector<2x384xf32>
    %232 = arith.addf %231, %230 : vector<2x384xf32>
    %233 = arith.divf %231, %232 : vector<2x384xf32>
    %234 = vector.extract_strided_slice %233 {offsets = [0, 0], sizes = [2, 128], strides = [1, 1]} : vector<2x384xf32> to vector<2x128xf32>
    %235 = vector.extract_strided_slice %233 {offsets = [0, 128], sizes = [2, 128], strides = [1, 1]} : vector<2x384xf32> to vector<2x128xf32>
    %236 = vector.extract_strided_slice %233 {offsets = [0, 256], sizes = [2, 128], strides = [1, 1]} : vector<2x384xf32> to vector<2x128xf32>
    %237 = vector.extract_strided_slice %227 {offsets = [0, 384], sizes = [2, 128], strides = [1, 1]} : vector<2x512xf32> to vector<2x128xf32>
    %238 = math.tanh %237 : vector<2x128xf32>
    %239 = arith.mulf %235, %220 : vector<2x128xf32>
    %240 = arith.mulf %234, %238 : vector<2x128xf32>
    %241 = arith.addf %239, %240 : vector<2x128xf32>
    %242 = math.tanh %241 : vector<2x128xf32>
    %243 = arith.mulf %236, %242 : vector<2x128xf32>
    %c2_90 = arith.constant 2 : index
    %c0_91 = arith.constant 0 : index
    %244 = vector.load %arg14[%c2_90, %c0_91] : memref<16x128xf32, #tpu.memory_space<vmem>>, vector<2x128xf32>
    tpu.vector_store %arg14[%c2_90, %c0_91], %243 {strides = array<i32>} : memref<16x128xf32, #tpu.memory_space<vmem>>, vector<2x128xf32>,
    %c4_92 = arith.constant 4 : index
    %c0_93 = arith.constant 0 : index
    %245 = vector.load %arg15[%c4_92, %c0_93] : memref<16x512xf32, #tpu.memory_space<vmem>>, vector<2x512xf32>
    %246 = arith.truncf %243 : vector<2x128xf32> to vector<2x128xbf16>
    %cst_94 = arith.constant dense<0.000000e+00> : vector<2x512xf32>
    %247 = tpu.matmul %246, %191, %cst_94 {dimension_numbers = #tpu.dot_dimension_numbers<[1], [0], [0], [1], [0, 0, 1, 1], [], []>} : vector<2x128xbf16>, vector<128x512xbf16>, vector<2x512xf32> -> vector<2x512xf32>
    %248 = arith.addf %245, %247 : vector<2x512xf32>
    %249 = vector.extract_strided_slice %248 {offsets = [0, 0], sizes = [2, 384], strides = [1, 1]} : vector<2x512xf32> to vector<2x384xf32>
    %250 = arith.negf %249 : vector<2x384xf32>
    %251 = math.exp %250 : vector<2x384xf32>
    %cst_95 = arith.constant 1.000000e+00 : f32
    %252 = vector.broadcast %cst_95 : f32 to vector<2x384xf32>
    %253 = arith.addf %252, %251 : vector<2x384xf32>
    %254 = arith.divf %252, %253 : vector<2x384xf32>
    %255 = vector.extract_strided_slice %254 {offsets = [0, 0], sizes = [2, 128], strides = [1, 1]} : vector<2x384xf32> to vector<2x128xf32>
    %256 = vector.extract_strided_slice %254 {offsets = [0, 128], sizes = [2, 128], strides = [1, 1]} : vector<2x384xf32> to vector<2x128xf32>
    %257 = vector.extract_strided_slice %254 {offsets = [0, 256], sizes = [2, 128], strides = [1, 1]} : vector<2x384xf32> to vector<2x128xf32>
    %258 = vector.extract_strided_slice %248 {offsets = [0, 384], sizes = [2, 128], strides = [1, 1]} : vector<2x512xf32> to vector<2x128xf32>
    %259 = math.tanh %258 : vector<2x128xf32>
    %260 = arith.mulf %256, %241 : vector<2x128xf32>
    %261 = arith.mulf %255, %259 : vector<2x128xf32>
    %262 = arith.addf %260, %261 : vector<2x128xf32>
    %263 = math.tanh %262 : vector<2x128xf32>
    %264 = arith.mulf %257, %263 : vector<2x128xf32>
    %c4_96 = arith.constant 4 : index
    %c0_97 = arith.constant 0 : index
    %265 = vector.load %arg14[%c4_96, %c0_97] : memref<16x128xf32, #tpu.memory_space<vmem>>, vector<2x128xf32>
    tpu.vector_store %arg14[%c4_96, %c0_97], %264 {strides = array<i32>} : memref<16x128xf32, #tpu.memory_space<vmem>>, vector<2x128xf32>,
    %c6_98 = arith.constant 6 : index
    %c0_99 = arith.constant 0 : index
    %266 = vector.load %arg15[%c6_98, %c0_99] : memref<16x512xf32, #tpu.memory_space<vmem>>, vector<2x512xf32>
    %267 = arith.truncf %264 : vector<2x128xf32> to vector<2x128xbf16>
    %cst_100 = arith.constant dense<0.000000e+00> : vector<2x512xf32>
    %268 = tpu.matmul %267, %191, %cst_100 {dimension_numbers = #tpu.dot_dimension_numbers<[1], [0], [0], [1], [0, 0, 1, 1], [], []>} : vector<2x128xbf16>, vector<128x512xbf16>, vector<2x512xf32> -> vector<2x512xf32>
    %269 = arith.addf %266, %268 : vector<2x512xf32>
    %270 = vector.extract_strided_slice %269 {offsets = [0, 0], sizes = [2, 384], strides = [1, 1]} : vector<2x512xf32> to vector<2x384xf32>
    %271 = arith.negf %270 : vector<2x384xf32>
    %272 = math.exp %271 : vector<2x384xf32>
    %cst_101 = arith.constant 1.000000e+00 : f32
    %273 = vector.broadcast %cst_101 : f32 to vector<2x384xf32>
    %274 = arith.addf %273, %272 : vector<2x384xf32>
    %275 = arith.divf %273, %274 : vector<2x384xf32>
    %276 = vector.extract_strided_slice %275 {offsets = [0, 0], sizes = [2, 128], strides = [1, 1]} : vector<2x384xf32> to vector<2x128xf32>
    %277 = vector.extract_strided_slice %275 {offsets = [0, 128], sizes = [2, 128], strides = [1, 1]} : vector<2x384xf32> to vector<2x128xf32>
    %278 = vector.extract_strided_slice %275 {offsets = [0, 256], sizes = [2, 128], strides = [1, 1]} : vector<2x384xf32> to vector<2x128xf32>
    %279 = vector.extract_strided_slice %269 {offsets = [0, 384], sizes = [2, 128], strides = [1, 1]} : vector<2x512xf32> to vector<2x128xf32>
    %280 = math.tanh %279 : vector<2x128xf32>
    %281 = arith.mulf %277, %262 : vector<2x128xf32>
    %282 = arith.mulf %276, %280 : vector<2x128xf32>
    %283 = arith.addf %281, %282 : vector<2x128xf32>
    %284 = math.tanh %283 : vector<2x128xf32>
    %285 = arith.mulf %278, %284 : vector<2x128xf32>
    %c6_102 = arith.constant 6 : index
    %c0_103 = arith.constant 0 : index
    %286 = vector.load %arg14[%c6_102, %c0_103] : memref<16x128xf32, #tpu.memory_space<vmem>>, vector<2x128xf32>
    tpu.vector_store %arg14[%c6_102, %c0_103], %285 {strides = array<i32>} : memref<16x128xf32, #tpu.memory_space<vmem>>, vector<2x128xf32>,
    %c8_104 = arith.constant 8 : index
    %c0_105 = arith.constant 0 : index
    %287 = vector.load %arg15[%c8_104, %c0_105] : memref<16x512xf32, #tpu.memory_space<vmem>>, vector<2x512xf32>
    %288 = arith.truncf %285 : vector<2x128xf32> to vector<2x128xbf16>
    %cst_106 = arith.constant dense<0.000000e+00> : vector<2x512xf32>
    %289 = tpu.matmul %288, %191, %cst_106 {dimension_numbers = #tpu.dot_dimension_numbers<[1], [0], [0], [1], [0, 0, 1, 1], [], []>} : vector<2x128xbf16>, vector<128x512xbf16>, vector<2x512xf32> -> vector<2x512xf32>
    %290 = arith.addf %287, %289 : vector<2x512xf32>
    %291 = vector.extract_strided_slice %290 {offsets = [0, 0], sizes = [2, 384], strides = [1, 1]} : vector<2x512xf32> to vector<2x384xf32>
    %292 = arith.negf %291 : vector<2x384xf32>
    %293 = math.exp %292 : vector<2x384xf32>
    %cst_107 = arith.constant 1.000000e+00 : f32
    %294 = vector.broadcast %cst_107 : f32 to vector<2x384xf32>
    %295 = arith.addf %294, %293 : vector<2x384xf32>
    %296 = arith.divf %294, %295 : vector<2x384xf32>
    %297 = vector.extract_strided_slice %296 {offsets = [0, 0], sizes = [2, 128], strides = [1, 1]} : vector<2x384xf32> to vector<2x128xf32>
    %298 = vector.extract_strided_slice %296 {offsets = [0, 128], sizes = [2, 128], strides = [1, 1]} : vector<2x384xf32> to vector<2x128xf32>
    %299 = vector.extract_strided_slice %296 {offsets = [0, 256], sizes = [2, 128], strides = [1, 1]} : vector<2x384xf32> to vector<2x128xf32>
    %300 = vector.extract_strided_slice %290 {offsets = [0, 384], sizes = [2, 128], strides = [1, 1]} : vector<2x512xf32> to vector<2x128xf32>
    %301 = math.tanh %300 : vector<2x128xf32>
    %302 = arith.mulf %298, %283 : vector<2x128xf32>
    %303 = arith.mulf %297, %301 : vector<2x128xf32>
    %304 = arith.addf %302, %303 : vector<2x128xf32>
    %305 = math.tanh %304 : vector<2x128xf32>
    %306 = arith.mulf %299, %305 : vector<2x128xf32>
    %c8_108 = arith.constant 8 : index
    %c0_109 = arith.constant 0 : index
    %307 = vector.load %arg14[%c8_108, %c0_109] : memref<16x128xf32, #tpu.memory_space<vmem>>, vector<2x128xf32>
    tpu.vector_store %arg14[%c8_108, %c0_109], %306 {strides = array<i32>} : memref<16x128xf32, #tpu.memory_space<vmem>>, vector<2x128xf32>,
    %c10_110 = arith.constant 10 : index
    %c0_111 = arith.constant 0 : index
    %308 = vector.load %arg15[%c10_110, %c0_111] : memref<16x512xf32, #tpu.memory_space<vmem>>, vector<2x512xf32>
    %309 = arith.truncf %306 : vector<2x128xf32> to vector<2x128xbf16>
    %cst_112 = arith.constant dense<0.000000e+00> : vector<2x512xf32>
    %310 = tpu.matmul %309, %191, %cst_112 {dimension_numbers = #tpu.dot_dimension_numbers<[1], [0], [0], [1], [0, 0, 1, 1], [], []>} : vector<2x128xbf16>, vector<128x512xbf16>, vector<2x512xf32> -> vector<2x512xf32>
    %311 = arith.addf %308, %310 : vector<2x512xf32>
    %312 = vector.extract_strided_slice %311 {offsets = [0, 0], sizes = [2, 384], strides = [1, 1]} : vector<2x512xf32> to vector<2x384xf32>
    %313 = arith.negf %312 : vector<2x384xf32>
    %314 = math.exp %313 : vector<2x384xf32>
    %cst_113 = arith.constant 1.000000e+00 : f32
    %315 = vector.broadcast %cst_113 : f32 to vector<2x384xf32>
    %316 = arith.addf %315, %314 : vector<2x384xf32>
    %317 = arith.divf %315, %316 : vector<2x384xf32>
    %318 = vector.extract_strided_slice %317 {offsets = [0, 0], sizes = [2, 128], strides = [1, 1]} : vector<2x384xf32> to vector<2x128xf32>
    %319 = vector.extract_strided_slice %317 {offsets = [0, 128], sizes = [2, 128], strides = [1, 1]} : vector<2x384xf32> to vector<2x128xf32>
    %320 = vector.extract_strided_slice %317 {offsets = [0, 256], sizes = [2, 128], strides = [1, 1]} : vector<2x384xf32> to vector<2x128xf32>
    %321 = vector.extract_strided_slice %311 {offsets = [0, 384], sizes = [2, 128], strides = [1, 1]} : vector<2x512xf32> to vector<2x128xf32>
    %322 = math.tanh %321 : vector<2x128xf32>
    %323 = arith.mulf %319, %304 : vector<2x128xf32>
    %324 = arith.mulf %318, %322 : vector<2x128xf32>
    %325 = arith.addf %323, %324 : vector<2x128xf32>
    %326 = math.tanh %325 : vector<2x128xf32>
    %327 = arith.mulf %320, %326 : vector<2x128xf32>
    %c10_114 = arith.constant 10 : index
    %c0_115 = arith.constant 0 : index
    %328 = vector.load %arg14[%c10_114, %c0_115] : memref<16x128xf32, #tpu.memory_space<vmem>>, vector<2x128xf32>
    tpu.vector_store %arg14[%c10_114, %c0_115], %327 {strides = array<i32>} : memref<16x128xf32, #tpu.memory_space<vmem>>, vector<2x128xf32>,
    %c12_116 = arith.constant 12 : index
    %c0_117 = arith.constant 0 : index
    %329 = vector.load %arg15[%c12_116, %c0_117] : memref<16x512xf32, #tpu.memory_space<vmem>>, vector<2x512xf32>
    %330 = arith.truncf %327 : vector<2x128xf32> to vector<2x128xbf16>
    %cst_118 = arith.constant dense<0.000000e+00> : vector<2x512xf32>
    %331 = tpu.matmul %330, %191, %cst_118 {dimension_numbers = #tpu.dot_dimension_numbers<[1], [0], [0], [1], [0, 0, 1, 1], [], []>} : vector<2x128xbf16>, vector<128x512xbf16>, vector<2x512xf32> -> vector<2x512xf32>
    %332 = arith.addf %329, %331 : vector<2x512xf32>
    %333 = vector.extract_strided_slice %332 {offsets = [0, 0], sizes = [2, 384], strides = [1, 1]} : vector<2x512xf32> to vector<2x384xf32>
    %334 = arith.negf %333 : vector<2x384xf32>
    %335 = math.exp %334 : vector<2x384xf32>
    %cst_119 = arith.constant 1.000000e+00 : f32
    %336 = vector.broadcast %cst_119 : f32 to vector<2x384xf32>
    %337 = arith.addf %336, %335 : vector<2x384xf32>
    %338 = arith.divf %336, %337 : vector<2x384xf32>
    %339 = vector.extract_strided_slice %338 {offsets = [0, 0], sizes = [2, 128], strides = [1, 1]} : vector<2x384xf32> to vector<2x128xf32>
    %340 = vector.extract_strided_slice %338 {offsets = [0, 128], sizes = [2, 128], strides = [1, 1]} : vector<2x384xf32> to vector<2x128xf32>
    %341 = vector.extract_strided_slice %338 {offsets = [0, 256], sizes = [2, 128], strides = [1, 1]} : vector<2x384xf32> to vector<2x128xf32>
    %342 = vector.extract_strided_slice %332 {offsets = [0, 384], sizes = [2, 128], strides = [1, 1]} : vector<2x512xf32> to vector<2x128xf32>
    %343 = math.tanh %342 : vector<2x128xf32>
    %344 = arith.mulf %340, %325 : vector<2x128xf32>
    %345 = arith.mulf %339, %343 : vector<2x128xf32>
    %346 = arith.addf %344, %345 : vector<2x128xf32>
    %347 = math.tanh %346 : vector<2x128xf32>
    %348 = arith.mulf %341, %347 : vector<2x128xf32>
    %c12_120 = arith.constant 12 : index
    %c0_121 = arith.constant 0 : index
    %349 = vector.load %arg14[%c12_120, %c0_121] : memref<16x128xf32, #tpu.memory_space<vmem>>, vector<2x128xf32>
    tpu.vector_store %arg14[%c12_120, %c0_121], %348 {strides = array<i32>} : memref<16x128xf32, #tpu.memory_space<vmem>>, vector<2x128xf32>,
    %c14_122 = arith.constant 14 : index
    %c0_123 = arith.constant 0 : index
    %350 = vector.load %arg15[%c14_122, %c0_123] : memref<16x512xf32, #tpu.memory_space<vmem>>, vector<2x512xf32>
    %351 = arith.truncf %348 : vector<2x128xf32> to vector<2x128xbf16>
    %cst_124 = arith.constant dense<0.000000e+00> : vector<2x512xf32>
    %352 = tpu.matmul %351, %191, %cst_124 {dimension_numbers = #tpu.dot_dimension_numbers<[1], [0], [0], [1], [0, 0, 1, 1], [], []>} : vector<2x128xbf16>, vector<128x512xbf16>, vector<2x512xf32> -> vector<2x512xf32>
    %353 = arith.addf %350, %352 : vector<2x512xf32>
    %354 = vector.extract_strided_slice %353 {offsets = [0, 0], sizes = [2, 384], strides = [1, 1]} : vector<2x512xf32> to vector<2x384xf32>
    %355 = arith.negf %354 : vector<2x384xf32>
    %356 = math.exp %355 : vector<2x384xf32>
    %cst_125 = arith.constant 1.000000e+00 : f32
    %357 = vector.broadcast %cst_125 : f32 to vector<2x384xf32>
    %358 = arith.addf %357, %356 : vector<2x384xf32>
    %359 = arith.divf %357, %358 : vector<2x384xf32>
    %360 = vector.extract_strided_slice %359 {offsets = [0, 0], sizes = [2, 128], strides = [1, 1]} : vector<2x384xf32> to vector<2x128xf32>
    %361 = vector.extract_strided_slice %359 {offsets = [0, 128], sizes = [2, 128], strides = [1, 1]} : vector<2x384xf32> to vector<2x128xf32>
    %362 = vector.extract_strided_slice %359 {offsets = [0, 256], sizes = [2, 128], strides = [1, 1]} : vector<2x384xf32> to vector<2x128xf32>
    %363 = vector.extract_strided_slice %353 {offsets = [0, 384], sizes = [2, 128], strides = [1, 1]} : vector<2x512xf32> to vector<2x128xf32>
    %364 = math.tanh %363 : vector<2x128xf32>
    %365 = arith.mulf %361, %346 : vector<2x128xf32>
    %366 = arith.mulf %360, %364 : vector<2x128xf32>
    %367 = arith.addf %365, %366 : vector<2x128xf32>
    %368 = math.tanh %367 : vector<2x128xf32>
    %369 = arith.mulf %362, %368 : vector<2x128xf32>
    %c14_126 = arith.constant 14 : index
    %c0_127 = arith.constant 0 : index
    %370 = vector.load %arg14[%c14_126, %c0_127] : memref<16x128xf32, #tpu.memory_space<vmem>>, vector<2x128xf32>
    tpu.vector_store %arg14[%c14_126, %c0_127], %369 {strides = array<i32>} : memref<16x128xf32, #tpu.memory_space<vmem>>, vector<2x128xf32>,
    %c1_128 = arith.constant 1 : index
    %c0_129 = arith.constant 0 : index
    %c0_130 = arith.constant 0 : index
    %371 = vector.load %arg12[%c1_128, %c0_129, %c0_130] : memref<2x2x128xf32, #tpu.memory_space<vmem>>, vector<1x2x128xf32>
    %372 = vector.shape_cast %371 : vector<1x2x128xf32> to vector<2x128xf32>
    %373 = vector.shape_cast %369 : vector<2x128xf32> to vector<1x2x128xf32>
    tpu.vector_store %arg12[%c1_128, %c0_129, %c0_130], %373 {strides = array<i32>} : memref<2x2x128xf32, #tpu.memory_space<vmem>>, vector<1x2x128xf32>,
    %c1_131 = arith.constant 1 : index
    %c0_132 = arith.constant 0 : index
    %c0_133 = arith.constant 0 : index
    %374 = vector.load %arg13[%c1_131, %c0_132, %c0_133] : memref<2x2x128xf32, #tpu.memory_space<vmem>>, vector<1x2x128xf32>
    %375 = vector.shape_cast %374 : vector<1x2x128xf32> to vector<2x128xf32>
    %376 = vector.shape_cast %367 : vector<2x128xf32> to vector<1x2x128xf32>
    tpu.vector_store %arg13[%c1_131, %c0_132, %c0_133], %376 {strides = array<i32>} : memref<2x2x128xf32, #tpu.memory_space<vmem>>, vector<1x2x128xf32>,
    %c0_134 = arith.constant 0 : index
    %c0_135 = arith.constant 0 : index
    %377 = vector.load %arg14[%c0_134, %c0_135] : memref<16x128xf32, #tpu.memory_space<vmem>>, vector<16x128xf32>
    %378 = arith.truncf %377 : vector<16x128xf32> to vector<16x128xbf16>
    %c0_136 = arith.constant 0 : index
    %c0_137 = arith.constant 0 : index
    %379 = vector.load %arg9[%c0_136, %c0_137] : memref<128x128xbf16, #tpu.memory_space<vmem>>, vector<128x128xbf16>
    %cst_138 = arith.constant dense<0.000000e+00> : vector<16x128xf32>
    %380 = tpu.matmul %378, %379, %cst_138 {dimension_numbers = #tpu.dot_dimension_numbers<[1], [0], [0], [1], [0, 0, 1, 1], [], []>} : vector<16x128xbf16>, vector<128x128xbf16>, vector<16x128xf32> -> vector<16x128xf32>
    %c0_139 = arith.constant 0 : index
    %c0_140 = arith.constant 0 : index
    %381 = vector.load %arg10[%c0_139, %c0_140] : memref<1x128xf32, #tpu.memory_space<vmem>>, vector<1x128xf32>
    %382 = vector.broadcast %381 : vector<1x128xf32> to vector<16x128xf32>
    %383 = arith.addf %380, %382 : vector<16x128xf32>
    %c0_141 = arith.constant 0 : index
    %c0_142 = arith.constant 0 : index
    %c0_143 = arith.constant 0 : index
    %384 = vector.load %arg11[%c0_141, %c0_142, %c0_143] : memref<1x16x128xf32, #tpu.memory_space<vmem>>, vector<1x16x128xf32>
    %385 = vector.shape_cast %384 : vector<1x16x128xf32> to vector<16x128xf32>
    %386 = vector.shape_cast %383 : vector<16x128xf32> to vector<1x16x128xf32>
    tpu.vector_store %arg11[%c0_141, %c0_142, %c0_143], %386 {strides = array<i32>} : memref<1x16x128xf32, #tpu.memory_space<vmem>>, vector<1x16x128xf32>,
    return
  }
  func.func @transform_0(%arg0: i32, %arg1: i32) -> (i32, i32, i32) {
    %c0_i32 = arith.constant 0 : i32
    %c0_i32_0 = arith.constant 0 : i32
    return %arg0, %arg1, %c0_i32 : i32, i32, i32
  }
  func.func @transform_1(%arg0: i32, %arg1: i32) -> (i32, i32) {
    %c0_i32 = arith.constant 0 : i32
    %c0_i32_0 = arith.constant 0 : i32
    %c0_i32_1 = arith.constant 0 : i32
    return %c0_i32, %c0_i32_0 : i32, i32
  }
  func.func @transform_2(%arg0: i32, %arg1: i32) -> (i32, i32) {
    %c0_i32 = arith.constant 0 : i32
    %c0_i32_0 = arith.constant 0 : i32
    %c0_i32_1 = arith.constant 0 : i32
    return %c0_i32, %c0_i32_0 : i32, i32
  }
  func.func @transform_3(%arg0: i32, %arg1: i32) -> (i32, i32) {
    %c0_i32 = arith.constant 0 : i32
    %c0_i32_0 = arith.constant 0 : i32
    %c0_i32_1 = arith.constant 0 : i32
    return %c0_i32, %c0_i32_0 : i32, i32
  }
  func.func @transform_4(%arg0: i32, %arg1: i32) -> (i32, i32) {
    %c0_i32 = arith.constant 0 : i32
    %c0_i32_0 = arith.constant 0 : i32
    %c0_i32_1 = arith.constant 0 : i32
    return %c0_i32, %c0_i32_0 : i32, i32
  }
  func.func @transform_5(%arg0: i32, %arg1: i32) -> (i32, i32) {
    %c0_i32 = arith.constant 0 : i32
    %c0_i32_0 = arith.constant 0 : i32
    %c0_i32_1 = arith.constant 0 : i32
    return %c0_i32, %c0_i32_0 : i32, i32
  }
  func.func @transform_6(%arg0: i32, %arg1: i32) -> (i32, i32) {
    %c0_i32 = arith.constant 0 : i32
    %c0_i32_0 = arith.constant 0 : i32
    %c0_i32_1 = arith.constant 0 : i32
    return %c0_i32, %c0_i32_0 : i32, i32
  }
  func.func @transform_7(%arg0: i32, %arg1: i32) -> (i32, i32) {
    %c0_i32 = arith.constant 0 : i32
    %c0_i32_0 = arith.constant 0 : i32
    %c0_i32_1 = arith.constant 0 : i32
    return %c0_i32, %c0_i32_0 : i32, i32
  }
  func.func @transform_8(%arg0: i32, %arg1: i32) -> (i32, i32) {
    %c0_i32 = arith.constant 0 : i32
    %c0_i32_0 = arith.constant 0 : i32
    %c0_i32_1 = arith.constant 0 : i32
    return %c0_i32, %c0_i32_0 : i32, i32
  }
  func.func @transform_9(%arg0: i32, %arg1: i32) -> (i32, i32, i32) {
    %c0_i32 = arith.constant 0 : i32
    %c0_i32_0 = arith.constant 0 : i32
    return %arg0, %arg1, %c0_i32 : i32, i32, i32
  }
}

module attributes {stable_mosaic.version = 11 : i64} {
  func.func @_fused_lstm_linear_kernel(%arg0: i32, %arg1: i32, %arg2: memref<1x16x16xbf16, #tpu.memory_space<vmem>>, %arg3: memref<16x512xbf16, #tpu.memory_space<vmem>>, %arg4: memref<128x512xbf16, #tpu.memory_space<vmem>>, %arg5: memref<1x512xf32, #tpu.memory_space<vmem>>, %arg6: memref<128x512xbf16, #tpu.memory_space<vmem>>, %arg7: memref<128x512xbf16, #tpu.memory_space<vmem>>, %arg8: memref<1x512xf32, #tpu.memory_space<vmem>>, %arg9: memref<128x128xbf16, #tpu.memory_space<vmem>>, %arg10: memref<1x128xf32, #tpu.memory_space<vmem>>, %arg11: memref<1x16x128xf32, #tpu.memory_space<vmem>>, %arg12: memref<2x2x128xf32, #tpu.memory_space<vmem>>, %arg13: memref<2x2x128xf32, #tpu.memory_space<vmem>>, %arg14: memref<16x128xf32, #tpu.memory_space<vmem>>, %arg15: memref<16x512xf32, #tpu.memory_space<vmem>>) attributes {dimension_semantics = [#tpu.dimension_semantics<parallel>, #tpu.dimension_semantics<arbitrary>], iteration_bounds = array<i64: 1, 2>, scalar_prefetch = 0 : i64, scratch_operands = 4 : i64, tpu.core_type = #tpu.core_type<tc>, window_params = [{transform_indices = @transform_0, window_bounds = array<i64: 1, 16, 16>}, {pipeline_mode = #tpu.pipeline_mode<synchronous>, transform_indices = @transform_1, window_bounds = array<i64: 16, 512>}, {pipeline_mode = #tpu.pipeline_mode<synchronous>, transform_indices = @transform_2, window_bounds = array<i64: 128, 512>}, {pipeline_mode = #tpu.pipeline_mode<synchronous>, transform_indices = @transform_3, window_bounds = array<i64: 1, 512>}, {pipeline_mode = #tpu.pipeline_mode<synchronous>, transform_indices = @transform_4, window_bounds = array<i64: 128, 512>}, {pipeline_mode = #tpu.pipeline_mode<synchronous>, transform_indices = @transform_5, window_bounds = array<i64: 128, 512>}, {pipeline_mode = #tpu.pipeline_mode<synchronous>, transform_indices = @transform_6, window_bounds = array<i64: 1, 512>}, {pipeline_mode = #tpu.pipeline_mode<synchronous>, transform_indices = @transform_7, window_bounds = array<i64: 128, 128>}, {pipeline_mode = #tpu.pipeline_mode<synchronous>, transform_indices = @transform_8, window_bounds = array<i64: 1, 128>}, {transform_indices = @transform_9, window_bounds = array<i64: 1, 16, 128>}]} {
    %c0_i32 = arith.constant 0 : i32
    %0 = arith.cmpi eq, %arg1, %c0_i32 : i32
    %1 = arith.extui %0 : i1 to i32
    %c0_i32_0 = arith.constant 0 : i32
    %2 = arith.cmpi ne, %1, %c0_i32_0 : i32
    scf.if %2 {
      %cst_144 = arith.constant 0.000000e+00 : f32
      %387 = vector.broadcast %cst_144 : f32 to vector<2x2x128xf32>
      %c0_145 = arith.constant 0 : index
      %c0_146 = arith.constant 0 : index
      %c0_147 = arith.constant 0 : index
      %388 = vector.load %arg12[%c0_145, %c0_146, %c0_147] : memref<2x2x128xf32, #tpu.memory_space<vmem>>, vector<2x2x128xf32>
      tpu.vector_store %arg12[%c0_145, %c0_146, %c0_147], %387 {strides = array<i32>} : memref<2x2x128xf32, #tpu.memory_space<vmem>>, vector<2x2x128xf32>,
      %cst_148 = arith.constant 0.000000e+00 : f32
      %389 = vector.broadcast %cst_148 : f32 to vector<2x2x128xf32>
      %c0_149 = arith.constant 0 : index
      %c0_150 = arith.constant 0 : index
      %c0_151 = arith.constant 0 : index
      %390 = vector.load %arg13[%c0_149, %c0_150, %c0_151] : memref<2x2x128xf32, #tpu.memory_space<vmem>>, vector<2x2x128xf32>
      tpu.vector_store %arg13[%c0_149, %c0_150, %c0_151], %389 {strides = array<i32>} : memref<2x2x128xf32, #tpu.memory_space<vmem>>, vector<2x2x128xf32>,
    } else {
    }
    %c0 = arith.constant 0 : index
    %c0_1 = arith.constant 0 : index
    %3 = vector.load %arg3[%c0, %c0_1] : memref<16x512xbf16, #tpu.memory_space<vmem>>, vector<16x512xbf16>
    %c0_2 = arith.constant 0 : index
    %c0_3 = arith.constant 0 : index
    %4 = vector.load %arg4[%c0_2, %c0_3] : memref<128x512xbf16, #tpu.memory_space<vmem>>, vector<128x512xbf16>
    %c0_4 = arith.constant 0 : index
    %c0_5 = arith.constant 0 : index
    %5 = vector.load %arg5[%c0_4, %c0_5] : memref<1x512xf32, #tpu.memory_space<vmem>>, vector<1x512xf32>
    %c0_6 = arith.constant 0 : index
    %c0_7 = arith.constant 0 : index
    %c0_8 = arith.constant 0 : index
    %6 = vector.load %arg2[%c0_6, %c0_7, %c0_8] : memref<1x16x16xbf16, #tpu.memory_space<vmem>>, vector<1x16x16xbf16>
    %7 = vector.shape_cast %6 : vector<1x16x16xbf16> to vector<16x16xbf16>
    %cst = arith.constant dense<0.000000e+00> : vector<16x512xf32>
    %8 = tpu.matmul %7, %3, %cst {dimension_numbers = #tpu.dot_dimension_numbers<[1], [0], [0], [1], [0, 0, 1, 1], [], []>} : vector<16x16xbf16>, vector<16x512xbf16>, vector<16x512xf32> -> vector<16x512xf32>
    %9 = vector.broadcast %5 : vector<1x512xf32> to vector<16x512xf32>
    %10 = arith.addf %8, %9 : vector<16x512xf32>
    %c0_9 = arith.constant 0 : index
    %c0_10 = arith.constant 0 : index
    %11 = vector.load %arg15[%c0_9, %c0_10] : memref<16x512xf32, #tpu.memory_space<vmem>>, vector<16x512xf32>
    tpu.vector_store %arg15[%c0_9, %c0_10], %10 {strides = array<i32>} : memref<16x512xf32, #tpu.memory_space<vmem>>, vector<16x512xf32>,
    %c0_11 = arith.constant 0 : index
    %c0_12 = arith.constant 0 : index
    %c0_13 = arith.constant 0 : index
    %12 = vector.load %arg12[%c0_11, %c0_12, %c0_13] : memref<2x2x128xf32, #tpu.memory_space<vmem>>, vector<1x2x128xf32>
    %13 = vector.shape_cast %12 : vector<1x2x128xf32> to vector<2x128xf32>
    %c0_14 = arith.constant 0 : index
    %c0_15 = arith.constant 0 : index
    %c0_16 = arith.constant 0 : index
    %14 = vector.load %arg13[%c0_14, %c0_15, %c0_16] : memref<2x2x128xf32, #tpu.memory_space<vmem>>, vector<1x2x128xf32>
    %15 = vector.shape_cast %14 : vector<1x2x128xf32> to vector<2x128xf32>
    %c0_17 = arith.constant 0 : index
    %c0_18 = arith.constant 0 : index
    %16 = vector.load %arg15[%c0_17, %c0_18] : memref<16x512xf32, #tpu.memory_space<vmem>>, vector<2x512xf32>
    %17 = arith.truncf %13 : vector<2x128xf32> to vector<2x128xbf16>
    %cst_19 = arith.constant dense<0.000000e+00> : vector<2x512xf32>
    %18 = tpu.matmul %17, %4, %cst_19 {dimension_numbers = #tpu.dot_dimension_numbers<[1], [0], [0], [1], [0, 0, 1, 1], [], []>} : vector<2x128xbf16>, vector<128x512xbf16>, vector<2x512xf32> -> vector<2x512xf32>
    %19 = arith.addf %16, %18 : vector<2x512xf32>
    %20 = vector.extract_strided_slice %19 {offsets = [0, 0], sizes = [2, 384], strides = [1, 1]} : vector<2x512xf32> to vector<2x384xf32>
    %21 = arith.negf %20 : vector<2x384xf32>
    %22 = math.exp %21 : vector<2x384xf32>
    %cst_20 = arith.constant 1.000000e+00 : f32
    %23 = vector.broadcast %cst_20 : f32 to vector<2x384xf32>
    %24 = arith.addf %23, %22 : vector<2x384xf32>
    %25 = arith.divf %23, %24 : vector<2x384xf32>
    %26 = vector.extract_strided_slice %25 {offsets = [0, 0], sizes = [2, 128], strides = [1, 1]} : vector<2x384xf32> to vector<2x128xf32>
    %27 = vector.extract_strided_slice %25 {offsets = [0, 128], sizes = [2, 128], strides = [1, 1]} : vector<2x384xf32> to vector<2x128xf32>
    %28 = vector.extract_strided_slice %25 {offsets = [0, 256], sizes = [2, 128], strides = [1, 1]} : vector<2x384xf32> to vector<2x128xf32>
    %29 = vector.extract_strided_slice %19 {offsets = [0, 384], sizes = [2, 128], strides = [1, 1]} : vector<2x512xf32> to vector<2x128xf32>
    %30 = math.tanh %29 : vector<2x128xf32>
    %31 = arith.mulf %27, %15 : vector<2x128xf32>
    %32 = arith.mulf %26, %30 : vector<2x128xf32>
    %33 = arith.addf %31, %32 : vector<2x128xf32>
    %34 = math.tanh %33 : vector<2x128xf32>
    %35 = arith.mulf %28, %34 : vector<2x128xf32>
    %c0_21 = arith.constant 0 : index
    %c0_22 = arith.constant 0 : index
    %36 = vector.load %arg14[%c0_21, %c0_22] : memref<16x128xf32, #tpu.memory_space<vmem>>, vector<2x128xf32>
    tpu.vector_store %arg14[%c0_21, %c0_22], %35 {strides = array<i32>} : memref<16x128xf32, #tpu.memory_space<vmem>>, vector<2x128xf32>,
    %c2 = arith.constant 2 : index
    %c0_23 = arith.constant 0 : index
    %37 = vector.load %arg15[%c2, %c0_23] : memref<16x512xf32, #tpu.memory_space<vmem>>, vector<2x512xf32>
    %38 = arith.truncf %35 : vector<2x128xf32> to vector<2x128xbf16>
    %cst_24 = arith.constant dense<0.000000e+00> : vector<2x512xf32>
    %39 = tpu.matmul %38, %4, %cst_24 {dimension_numbers = #tpu.dot_dimension_numbers<[1], [0], [0], [1], [0, 0, 1, 1], [], []>} : vector<2x128xbf16>, vector<128x512xbf16>, vector<2x512xf32> -> vector<2x512xf32>
    %40 = arith.addf %37, %39 : vector<2x512xf32>
    %41 = vector.extract_strided_slice %40 {offsets = [0, 0], sizes = [2, 384], strides = [1, 1]} : vector<2x512xf32> to vector<2x384xf32>
    %42 = arith.negf %41 : vector<2x384xf32>
    %43 = math.exp %42 : vector<2x384xf32>
    %cst_25 = arith.constant 1.000000e+00 : f32
    %44 = vector.broadcast %cst_25 : f32 to vector<2x384xf32>
    %45 = arith.addf %44, %43 : vector<2x384xf32>
    %46 = arith.divf %44, %45 : vector<2x384xf32>
    %47 = vector.extract_strided_slice %46 {offsets = [0, 0], sizes = [2, 128], strides = [1, 1]} : vector<2x384xf32> to vector<2x128xf32>
    %48 = vector.extract_strided_slice %46 {offsets = [0, 128], sizes = [2, 128], strides = [1, 1]} : vector<2x384xf32> to vector<2x128xf32>
    %49 = vector.extract_strided_slice %46 {offsets = [0, 256], sizes = [2, 128], strides = [1, 1]} : vector<2x384xf32> to vector<2x128xf32>
    %50 = vector.extract_strided_slice %40 {offsets = [0, 384], sizes = [2, 128], strides = [1, 1]} : vector<2x512xf32> to vector<2x128xf32>
    %51 = math.tanh %50 : vector<2x128xf32>
    %52 = arith.mulf %48, %33 : vector<2x128xf32>
    %53 = arith.mulf %47, %51 : vector<2x128xf32>
    %54 = arith.addf %52, %53 : vector<2x128xf32>
    %55 = math.tanh %54 : vector<2x128xf32>
    %56 = arith.mulf %49, %55 : vector<2x128xf32>
    %c2_26 = arith.constant 2 : index
    %c0_27 = arith.constant 0 : index
    %57 = vector.load %arg14[%c2_26, %c0_27] : memref<16x128xf32, #tpu.memory_space<vmem>>, vector<2x128xf32>
    tpu.vector_store %arg14[%c2_26, %c0_27], %56 {strides = array<i32>} : memref<16x128xf32, #tpu.memory_space<vmem>>, vector<2x128xf32>,
    %c4 = arith.constant 4 : index
    %c0_28 = arith.constant 0 : index
    %58 = vector.load %arg15[%c4, %c0_28] : memref<16x512xf32, #tpu.memory_space<vmem>>, vector<2x512xf32>
    %59 = arith.truncf %56 : vector<2x128xf32> to vector<2x128xbf16>
    %cst_29 = arith.constant dense<0.000000e+00> : vector<2x512xf32>
    %60 = tpu.matmul %59, %4, %cst_29 {dimension_numbers = #tpu.dot_dimension_numbers<[1], [0], [0], [1], [0, 0, 1, 1], [], []>} : vector<2x128xbf16>, vector<128x512xbf16>, vector<2x512xf32> -> vector<2x512xf32>
    %61 = arith.addf %58, %60 : vector<2x512xf32>
    %62 = vector.extract_strided_slice %61 {offsets = [0, 0], sizes = [2, 384], strides = [1, 1]} : vector<2x512xf32> to vector<2x384xf32>
    %63 = arith.negf %62 : vector<2x384xf32>
    %64 = math.exp %63 : vector<2x384xf32>
    %cst_30 = arith.constant 1.000000e+00 : f32
    %65 = vector.broadcast %cst_30 : f32 to vector<2x384xf32>
    %66 = arith.addf %65, %64 : vector<2x384xf32>
    %67 = arith.divf %65, %66 : vector<2x384xf32>
    %68 = vector.extract_strided_slice %67 {offsets = [0, 0], sizes = [2, 128], strides = [1, 1]} : vector<2x384xf32> to vector<2x128xf32>
    %69 = vector.extract_strided_slice %67 {offsets = [0, 128], sizes = [2, 128], strides = [1, 1]} : vector<2x384xf32> to vector<2x128xf32>
    %70 = vector.extract_strided_slice %67 {offsets = [0, 256], sizes = [2, 128], strides = [1, 1]} : vector<2x384xf32> to vector<2x128xf32>
    %71 = vector.extract_strided_slice %61 {offsets = [0, 384], sizes = [2, 128], strides = [1, 1]} : vector<2x512xf32> to vector<2x128xf32>
    %72 = math.tanh %71 : vector<2x128xf32>
    %73 = arith.mulf %69, %54 : vector<2x128xf32>
    %74 = arith.mulf %68, %72 : vector<2x128xf32>
    %75 = arith.addf %73, %74 : vector<2x128xf32>
    %76 = math.tanh %75 : vector<2x128xf32>
    %77 = arith.mulf %70, %76 : vector<2x128xf32>
    %c4_31 = arith.constant 4 : index
    %c0_32 = arith.constant 0 : index
    %78 = vector.load %arg14[%c4_31, %c0_32] : memref<16x128xf32, #tpu.memory_space<vmem>>, vector<2x128xf32>
    tpu.vector_store %arg14[%c4_31, %c0_32], %77 {strides = array<i32>} : memref<16x128xf32, #tpu.memory_space<vmem>>, vector<2x128xf32>,
    %c6 = arith.constant 6 : index
    %c0_33 = arith.constant 0 : index
    %79 = vector.load %arg15[%c6, %c0_33] : memref<16x512xf32, #tpu.memory_space<vmem>>, vector<2x512xf32>
    %80 = arith.truncf %77 : vector<2x128xf32> to vector<2x128xbf16>
    %cst_34 = arith.constant dense<0.000000e+00> : vector<2x512xf32>
    %81 = tpu.matmul %80, %4, %cst_34 {dimension_numbers = #tpu.dot_dimension_numbers<[1], [0], [0], [1], [0, 0, 1, 1], [], []>} : vector<2x128xbf16>, vector<128x512xbf16>, vector<2x512xf32> -> vector<2x512xf32>
    %82 = arith.addf %79, %81 : vector<2x512xf32>
    %83 = vector.extract_strided_slice %82 {offsets = [0, 0], sizes = [2, 384], strides = [1, 1]} : vector<2x512xf32> to vector<2x384xf32>
    %84 = arith.negf %83 : vector<2x384xf32>
    %85 = math.exp %84 : vector<2x384xf32>
    %cst_35 = arith.constant 1.000000e+00 : f32
    %86 = vector.broadcast %cst_35 : f32 to vector<2x384xf32>
    %87 = arith.addf %86, %85 : vector<2x384xf32>
    %88 = arith.divf %86, %87 : vector<2x384xf32>
    %89 = vector.extract_strided_slice %88 {offsets = [0, 0], sizes = [2, 128], strides = [1, 1]} : vector<2x384xf32> to vector<2x128xf32>
    %90 = vector.extract_strided_slice %88 {offsets = [0, 128], sizes = [2, 128], strides = [1, 1]} : vector<2x384xf32> to vector<2x128xf32>
    %91 = vector.extract_strided_slice %88 {offsets = [0, 256], sizes = [2, 128], strides = [1, 1]} : vector<2x384xf32> to vector<2x128xf32>
    %92 = vector.extract_strided_slice %82 {offsets = [0, 384], sizes = [2, 128], strides = [1, 1]} : vector<2x512xf32> to vector<2x128xf32>
    %93 = math.tanh %92 : vector<2x128xf32>
    %94 = arith.mulf %90, %75 : vector<2x128xf32>
    %95 = arith.mulf %89, %93 : vector<2x128xf32>
    %96 = arith.addf %94, %95 : vector<2x128xf32>
    %97 = math.tanh %96 : vector<2x128xf32>
    %98 = arith.mulf %91, %97 : vector<2x128xf32>
    %c6_36 = arith.constant 6 : index
    %c0_37 = arith.constant 0 : index
    %99 = vector.load %arg14[%c6_36, %c0_37] : memref<16x128xf32, #tpu.memory_space<vmem>>, vector<2x128xf32>
    tpu.vector_store %arg14[%c6_36, %c0_37], %98 {strides = array<i32>} : memref<16x128xf32, #tpu.memory_space<vmem>>, vector<2x128xf32>,
    %c8 = arith.constant 8 : index
    %c0_38 = arith.constant 0 : index
    %100 = vector.load %arg15[%c8, %c0_38] : memref<16x512xf32, #tpu.memory_space<vmem>>, vector<2x512xf32>
    %101 = arith.truncf %98 : vector<2x128xf32> to vector<2x128xbf16>
    %cst_39 = arith.constant dense<0.000000e+00> : vector<2x512xf32>
    %102 = tpu.matmul %101, %4, %cst_39 {dimension_numbers = #tpu.dot_dimension_numbers<[1], [0], [0], [1], [0, 0, 1, 1], [], []>} : vector<2x128xbf16>, vector<128x512xbf16>, vector<2x512xf32> -> vector<2x512xf32>
    %103 = arith.addf %100, %102 : vector<2x512xf32>
    %104 = vector.extract_strided_slice %103 {offsets = [0, 0], sizes = [2, 384], strides = [1, 1]} : vector<2x512xf32> to vector<2x384xf32>
    %105 = arith.negf %104 : vector<2x384xf32>
    %106 = math.exp %105 : vector<2x384xf32>
    %cst_40 = arith.constant 1.000000e+00 : f32
    %107 = vector.broadcast %cst_40 : f32 to vector<2x384xf32>
    %108 = arith.addf %107, %106 : vector<2x384xf32>
    %109 = arith.divf %107, %108 : vector<2x384xf32>
    %110 = vector.extract_strided_slice %109 {offsets = [0, 0], sizes = [2, 128], strides = [1, 1]} : vector<2x384xf32> to vector<2x128xf32>
    %111 = vector.extract_strided_slice %109 {offsets = [0, 128], sizes = [2, 128], strides = [1, 1]} : vector<2x384xf32> to vector<2x128xf32>
    %112 = vector.extract_strided_slice %109 {offsets = [0, 256], sizes = [2, 128], strides = [1, 1]} : vector<2x384xf32> to vector<2x128xf32>
    %113 = vector.extract_strided_slice %103 {offsets = [0, 384], sizes = [2, 128], strides = [1, 1]} : vector<2x512xf32> to vector<2x128xf32>
    %114 = math.tanh %113 : vector<2x128xf32>
    %115 = arith.mulf %111, %96 : vector<2x128xf32>
    %116 = arith.mulf %110, %114 : vector<2x128xf32>
    %117 = arith.addf %115, %116 : vector<2x128xf32>
    %118 = math.tanh %117 : vector<2x128xf32>
    %119 = arith.mulf %112, %118 : vector<2x128xf32>
    %c8_41 = arith.constant 8 : index
    %c0_42 = arith.constant 0 : index
    %120 = vector.load %arg14[%c8_41, %c0_42] : memref<16x128xf32, #tpu.memory_space<vmem>>, vector<2x128xf32>
    tpu.vector_store %arg14[%c8_41, %c0_42], %119 {strides = array<i32>} : memref<16x128xf32, #tpu.memory_space<vmem>>, vector<2x128xf32>,
    %c10 = arith.constant 10 : index
    %c0_43 = arith.constant 0 : index
    %121 = vector.load %arg15[%c10, %c0_43] : memref<16x512xf32, #tpu.memory_space<vmem>>, vector<2x512xf32>
    %122 = arith.truncf %119 : vector<2x128xf32> to vector<2x128xbf16>
    %cst_44 = arith.constant dense<0.000000e+00> : vector<2x512xf32>
    %123 = tpu.matmul %122, %4, %cst_44 {dimension_numbers = #tpu.dot_dimension_numbers<[1], [0], [0], [1], [0, 0, 1, 1], [], []>} : vector<2x128xbf16>, vector<128x512xbf16>, vector<2x512xf32> -> vector<2x512xf32>
    %124 = arith.addf %121, %123 : vector<2x512xf32>
    %125 = vector.extract_strided_slice %124 {offsets = [0, 0], sizes = [2, 384], strides = [1, 1]} : vector<2x512xf32> to vector<2x384xf32>
    %126 = arith.negf %125 : vector<2x384xf32>
    %127 = math.exp %126 : vector<2x384xf32>
    %cst_45 = arith.constant 1.000000e+00 : f32
    %128 = vector.broadcast %cst_45 : f32 to vector<2x384xf32>
    %129 = arith.addf %128, %127 : vector<2x384xf32>
    %130 = arith.divf %128, %129 : vector<2x384xf32>
    %131 = vector.extract_strided_slice %130 {offsets = [0, 0], sizes = [2, 128], strides = [1, 1]} : vector<2x384xf32> to vector<2x128xf32>
    %132 = vector.extract_strided_slice %130 {offsets = [0, 128], sizes = [2, 128], strides = [1, 1]} : vector<2x384xf32> to vector<2x128xf32>
    %133 = vector.extract_strided_slice %130 {offsets = [0, 256], sizes = [2, 128], strides = [1, 1]} : vector<2x384xf32> to vector<2x128xf32>
    %134 = vector.extract_strided_slice %124 {offsets = [0, 384], sizes = [2, 128], strides = [1, 1]} : vector<2x512xf32> to vector<2x128xf32>
    %135 = math.tanh %134 : vector<2x128xf32>
    %136 = arith.mulf %132, %117 : vector<2x128xf32>
    %137 = arith.mulf %131, %135 : vector<2x128xf32>
    %138 = arith.addf %136, %137 : vector<2x128xf32>
    %139 = math.tanh %138 : vector<2x128xf32>
    %140 = arith.mulf %133, %139 : vector<2x128xf32>
    %c10_46 = arith.constant 10 : index
    %c0_47 = arith.constant 0 : index
    %141 = vector.load %arg14[%c10_46, %c0_47] : memref<16x128xf32, #tpu.memory_space<vmem>>, vector<2x128xf32>
    tpu.vector_store %arg14[%c10_46, %c0_47], %140 {strides = array<i32>} : memref<16x128xf32, #tpu.memory_space<vmem>>, vector<2x128xf32>,
    %c12 = arith.constant 12 : index
    %c0_48 = arith.constant 0 : index
    %142 = vector.load %arg15[%c12, %c0_48] : memref<16x512xf32, #tpu.memory_space<vmem>>, vector<2x512xf32>
    %143 = arith.truncf %140 : vector<2x128xf32> to vector<2x128xbf16>
    %cst_49 = arith.constant dense<0.000000e+00> : vector<2x512xf32>
    %144 = tpu.matmul %143, %4, %cst_49 {dimension_numbers = #tpu.dot_dimension_numbers<[1], [0], [0], [1], [0, 0, 1, 1], [], []>} : vector<2x128xbf16>, vector<128x512xbf16>, vector<2x512xf32> -> vector<2x512xf32>
    %145 = arith.addf %142, %144 : vector<2x512xf32>
    %146 = vector.extract_strided_slice %145 {offsets = [0, 0], sizes = [2, 384], strides = [1, 1]} : vector<2x512xf32> to vector<2x384xf32>
    %147 = arith.negf %146 : vector<2x384xf32>
    %148 = math.exp %147 : vector<2x384xf32>
    %cst_50 = arith.constant 1.000000e+00 : f32
    %149 = vector.broadcast %cst_50 : f32 to vector<2x384xf32>
    %150 = arith.addf %149, %148 : vector<2x384xf32>
    %151 = arith.divf %149, %150 : vector<2x384xf32>
    %152 = vector.extract_strided_slice %151 {offsets = [0, 0], sizes = [2, 128], strides = [1, 1]} : vector<2x384xf32> to vector<2x128xf32>
    %153 = vector.extract_strided_slice %151 {offsets = [0, 128], sizes = [2, 128], strides = [1, 1]} : vector<2x384xf32> to vector<2x128xf32>
    %154 = vector.extract_strided_slice %151 {offsets = [0, 256], sizes = [2, 128], strides = [1, 1]} : vector<2x384xf32> to vector<2x128xf32>
    %155 = vector.extract_strided_slice %145 {offsets = [0, 384], sizes = [2, 128], strides = [1, 1]} : vector<2x512xf32> to vector<2x128xf32>
    %156 = math.tanh %155 : vector<2x128xf32>
    %157 = arith.mulf %153, %138 : vector<2x128xf32>
    %158 = arith.mulf %152, %156 : vector<2x128xf32>
    %159 = arith.addf %157, %158 : vector<2x128xf32>
    %160 = math.tanh %159 : vector<2x128xf32>
    %161 = arith.mulf %154, %160 : vector<2x128xf32>
    %c12_51 = arith.constant 12 : index
    %c0_52 = arith.constant 0 : index
    %162 = vector.load %arg14[%c12_51, %c0_52] : memref<16x128xf32, #tpu.memory_space<vmem>>, vector<2x128xf32>
    tpu.vector_store %arg14[%c12_51, %c0_52], %161 {strides = array<i32>} : memref<16x128xf32, #tpu.memory_space<vmem>>, vector<2x128xf32>,
    %c14 = arith.constant 14 : index
    %c0_53 = arith.constant 0 : index
    %163 = vector.load %arg15[%c14, %c0_53] : memref<16x512xf32, #tpu.memory_space<vmem>>, vector<2x512xf32>
    %164 = arith.truncf %161 : vector<2x128xf32> to vector<2x128xbf16>
    %cst_54 = arith.constant dense<0.000000e+00> : vector<2x512xf32>
    %165 = tpu.matmul %164, %4, %cst_54 {dimension_numbers = #tpu.dot_dimension_numbers<[1], [0], [0], [1], [0, 0, 1, 1], [], []>} : vector<2x128xbf16>, vector<128x512xbf16>, vector<2x512xf32> -> vector<2x512xf32>
    %166 = arith.addf %163, %165 : vector<2x512xf32>
    %167 = vector.extract_strided_slice %166 {offsets = [0, 0], sizes = [2, 384], strides = [1, 1]} : vector<2x512xf32> to vector<2x384xf32>
    %168 = arith.negf %167 : vector<2x384xf32>
    %169 = math.exp %168 : vector<2x384xf32>
    %cst_55 = arith.constant 1.000000e+00 : f32
    %170 = vector.broadcast %cst_55 : f32 to vector<2x384xf32>
    %171 = arith.addf %170, %169 : vector<2x384xf32>
    %172 = arith.divf %170, %171 : vector<2x384xf32>
    %173 = vector.extract_strided_slice %172 {offsets = [0, 0], sizes = [2, 128], strides = [1, 1]} : vector<2x384xf32> to vector<2x128xf32>
    %174 = vector.extract_strided_slice %172 {offsets = [0, 128], sizes = [2, 128], strides = [1, 1]} : vector<2x384xf32> to vector<2x128xf32>
    %175 = vector.extract_strided_slice %172 {offsets = [0, 256], sizes = [2, 128], strides = [1, 1]} : vector<2x384xf32> to vector<2x128xf32>
    %176 = vector.extract_strided_slice %166 {offsets = [0, 384], sizes = [2, 128], strides = [1, 1]} : vector<2x512xf32> to vector<2x128xf32>
    %177 = math.tanh %176 : vector<2x128xf32>
    %178 = arith.mulf %174, %159 : vector<2x128xf32>
    %179 = arith.mulf %173, %177 : vector<2x128xf32>
    %180 = arith.addf %178, %179 : vector<2x128xf32>
    %181 = math.tanh %180 : vector<2x128xf32>
    %182 = arith.mulf %175, %181 : vector<2x128xf32>
    %c14_56 = arith.constant 14 : index
    %c0_57 = arith.constant 0 : index
    %183 = vector.load %arg14[%c14_56, %c0_57] : memref<16x128xf32, #tpu.memory_space<vmem>>, vector<2x128xf32>
    tpu.vector_store %arg14[%c14_56, %c0_57], %182 {strides = array<i32>} : memref<16x128xf32, #tpu.memory_space<vmem>>, vector<2x128xf32>,
    %c0_58 = arith.constant 0 : index
    %c0_59 = arith.constant 0 : index
    %c0_60 = arith.constant 0 : index
    %184 = vector.load %arg12[%c0_58, %c0_59, %c0_60] : memref<2x2x128xf32, #tpu.memory_space<vmem>>, vector<1x2x128xf32>
    %185 = vector.shape_cast %184 : vector<1x2x128xf32> to vector<2x128xf32>
    %186 = vector.shape_cast %182 : vector<2x128xf32> to vector<1x2x128xf32>
    tpu.vector_store %arg12[%c0_58, %c0_59, %c0_60], %186 {strides = array<i32>} : memref<2x2x128xf32, #tpu.memory_space<vmem>>, vector<1x2x128xf32>,
    %c0_61 = arith.constant 0 : index
    %c0_62 = arith.constant 0 : index
    %c0_63 = arith.constant 0 : index
    %187 = vector.load %arg13[%c0_61, %c0_62, %c0_63] : memref<2x2x128xf32, #tpu.memory_space<vmem>>, vector<1x2x128xf32>
    %188 = vector.shape_cast %187 : vector<1x2x128xf32> to vector<2x128xf32>
    %189 = vector.shape_cast %180 : vector<2x128xf32> to vector<1x2x128xf32>
    tpu.vector_store %arg13[%c0_61, %c0_62, %c0_63], %189 {strides = array<i32>} : memref<2x2x128xf32, #tpu.memory_space<vmem>>, vector<1x2x128xf32>,
    %c0_64 = arith.constant 0 : index
    %c0_65 = arith.constant 0 : index
    %190 = vector.load %arg6[%c0_64, %c0_65] : memref<128x512xbf16, #tpu.memory_space<vmem>>, vector<128x512xbf16>
    %c0_66 = arith.constant 0 : index
    %c0_67 = arith.constant 0 : index
    %191 = vector.load %arg7[%c0_66, %c0_67] : memref<128x512xbf16, #tpu.memory_space<vmem>>, vector<128x512xbf16>
    %c0_68 = arith.constant 0 : index
    %c0_69 = arith.constant 0 : index
    %192 = vector.load %arg8[%c0_68, %c0_69] : memref<1x512xf32, #tpu.memory_space<vmem>>, vector<1x512xf32>
    %c0_70 = arith.constant 0 : index
    %c0_71 = arith.constant 0 : index
    %193 = vector.load %arg14[%c0_70, %c0_71] : memref<16x128xf32, #tpu.memory_space<vmem>>, vector<16x128xf32>
    %194 = arith.truncf %193 : vector<16x128xf32> to vector<16x128xbf16>
    %cst_72 = arith.constant dense<0.000000e+00> : vector<16x512xf32>
    %195 = tpu.matmul %194, %190, %cst_72 {dimension_numbers = #tpu.dot_dimension_numbers<[1], [0], [0], [1], [0, 0, 1, 1], [], []>} : vector<16x128xbf16>, vector<128x512xbf16>, vector<16x512xf32> -> vector<16x512xf32>
    %196 = vector.broadcast %192 : vector<1x512xf32> to vector<16x512xf32>
    %197 = arith.addf %195, %196 : vector<16x512xf32>
    %c0_73 = arith.constant 0 : index
    %c0_74 = arith.constant 0 : index
    %198 = vector.load %arg15[%c0_73, %c0_74] : memref<16x512xf32, #tpu.memory_space<vmem>>, vector<16x512xf32>
    tpu.vector_store %arg15[%c0_73, %c0_74], %197 {strides = array<i32>} : memref<16x512xf32, #tpu.memory_space<vmem>>, vector<16x512xf32>,
    %c1 = arith.constant 1 : index
    %c0_75 = arith.constant 0 : index
    %c0_76 = arith.constant 0 : index
    %199 = vector.load %arg12[%c1, %c0_75, %c0_76] : memref<2x2x128xf32, #tpu.memory_space<vmem>>, vector<1x2x128xf32>
    %200 = vector.shape_cast %199 : vector<1x2x128xf32> to vector<2x128xf32>
    %c1_77 = arith.constant 1 : index
    %c0_78 = arith.constant 0 : index
    %c0_79 = arith.constant 0 : index
    %201 = vector.load %arg13[%c1_77, %c0_78, %c0_79] : memref<2x2x128xf32, #tpu.memory_space<vmem>>, vector<1x2x128xf32>
    %202 = vector.shape_cast %201 : vector<1x2x128xf32> to vector<2x128xf32>
    %c0_80 = arith.constant 0 : index
    %c0_81 = arith.constant 0 : index
    %203 = vector.load %arg15[%c0_80, %c0_81] : memref<16x512xf32, #tpu.memory_space<vmem>>, vector<2x512xf32>
    %204 = arith.truncf %200 : vector<2x128xf32> to vector<2x128xbf16>
    %cst_82 = arith.constant dense<0.000000e+00> : vector<2x512xf32>
    %205 = tpu.matmul %204, %191, %cst_82 {dimension_numbers = #tpu.dot_dimension_numbers<[1], [0], [0], [1], [0, 0, 1, 1], [], []>} : vector<2x128xbf16>, vector<128x512xbf16>, vector<2x512xf32> -> vector<2x512xf32>
    %206 = arith.addf %203, %205 : vector<2x512xf32>
    %207 = vector.extract_strided_slice %206 {offsets = [0, 0], sizes = [2, 384], strides = [1, 1]} : vector<2x512xf32> to vector<2x384xf32>
    %208 = arith.negf %207 : vector<2x384xf32>
    %209 = math.exp %208 : vector<2x384xf32>
    %cst_83 = arith.constant 1.000000e+00 : f32
    %210 = vector.broadcast %cst_83 : f32 to vector<2x384xf32>
    %211 = arith.addf %210, %209 : vector<2x384xf32>
    %212 = arith.divf %210, %211 : vector<2x384xf32>
    %213 = vector.extract_strided_slice %212 {offsets = [0, 0], sizes = [2, 128], strides = [1, 1]} : vector<2x384xf32> to vector<2x128xf32>
    %214 = vector.extract_strided_slice %212 {offsets = [0, 128], sizes = [2, 128], strides = [1, 1]} : vector<2x384xf32> to vector<2x128xf32>
    %215 = vector.extract_strided_slice %212 {offsets = [0, 256], sizes = [2, 128], strides = [1, 1]} : vector<2x384xf32> to vector<2x128xf32>
    %216 = vector.extract_strided_slice %206 {offsets = [0, 384], sizes = [2, 128], strides = [1, 1]} : vector<2x512xf32> to vector<2x128xf32>
    %217 = math.tanh %216 : vector<2x128xf32>
    %218 = arith.mulf %214, %202 : vector<2x128xf32>
    %219 = arith.mulf %213, %217 : vector<2x128xf32>
    %220 = arith.addf %218, %219 : vector<2x128xf32>
    %221 = math.tanh %220 : vector<2x128xf32>
    %222 = arith.mulf %215, %221 : vector<2x128xf32>
    %c0_84 = arith.constant 0 : index
    %c0_85 = arith.constant 0 : index
    %223 = vector.load %arg14[%c0_84, %c0_85] : memref<16x128xf32, #tpu.memory_space<vmem>>, vector<2x128xf32>
    tpu.vector_store %arg14[%c0_84, %c0_85], %222 {strides = array<i32>} : memref<16x128xf32, #tpu.memory_space<vmem>>, vector<2x128xf32>,
    %c2_86 = arith.constant 2 : index
    %c0_87 = arith.constant 0 : index
    %224 = vector.load %arg15[%c2_86, %c0_87] : memref<16x512xf32, #tpu.memory_space<vmem>>, vector<2x512xf32>
    %225 = arith.truncf %222 : vector<2x128xf32> to vector<2x128xbf16>
    %cst_88 = arith.constant dense<0.000000e+00> : vector<2x512xf32>
    %226 = tpu.matmul %225, %191, %cst_88 {dimension_numbers = #tpu.dot_dimension_numbers<[1], [0], [0], [1], [0, 0, 1, 1], [], []>} : vector<2x128xbf16>, vector<128x512xbf16>, vector<2x512xf32> -> vector<2x512xf32>
    %227 = arith.addf %224, %226 : vector<2x512xf32>
    %228 = vector.extract_strided_slice %227 {offsets = [0, 0], sizes = [2, 384], strides = [1, 1]} : vector<2x512xf32> to vector<2x384xf32>
    %229 = arith.negf %228 : vector<2x384xf32>
    %230 = math.exp %229 : vector<2x384xf32>
    %cst_89 = arith.constant 1.000000e+00 : f32
    %231 = vector.broadcast %cst_89 : f32 to vector<2x384xf32>
    %232 = arith.addf %231, %230 : vector<2x384xf32>
    %233 = arith.divf %231, %232 : vector<2x384xf32>
    %234 = vector.extract_strided_slice %233 {offsets = [0, 0], sizes = [2, 128], strides = [1, 1]} : vector<2x384xf32> to vector<2x128xf32>
    %235 = vector.extract_strided_slice %233 {offsets = [0, 128], sizes = [2, 128], strides = [1, 1]} : vector<2x384xf32> to vector<2x128xf32>
    %236 = vector.extract_strided_slice %233 {offsets = [0, 256], sizes = [2, 128], strides = [1, 1]} : vector<2x384xf32> to vector<2x128xf32>
    %237 = vector.extract_strided_slice %227 {offsets = [0, 384], sizes = [2, 128], strides = [1, 1]} : vector<2x512xf32> to vector<2x128xf32>
    %238 = math.tanh %237 : vector<2x128xf32>
    %239 = arith.mulf %235, %220 : vector<2x128xf32>
    %240 = arith.mulf %234, %238 : vector<2x128xf32>
    %241 = arith.addf %239, %240 : vector<2x128xf32>
    %242 = math.tanh %241 : vector<2x128xf32>
    %243 = arith.mulf %236, %242 : vector<2x128xf32>
    %c2_90 = arith.constant 2 : index
    %c0_91 = arith.constant 0 : index
    %244 = vector.load %arg14[%c2_90, %c0_91] : memref<16x128xf32, #tpu.memory_space<vmem>>, vector<2x128xf32>
    tpu.vector_store %arg14[%c2_90, %c0_91], %243 {strides = array<i32>} : memref<16x128xf32, #tpu.memory_space<vmem>>, vector<2x128xf32>,
    %c4_92 = arith.constant 4 : index
    %c0_93 = arith.constant 0 : index
    %245 = vector.load %arg15[%c4_92, %c0_93] : memref<16x512xf32, #tpu.memory_space<vmem>>, vector<2x512xf32>
    %246 = arith.truncf %243 : vector<2x128xf32> to vector<2x128xbf16>
    %cst_94 = arith.constant dense<0.000000e+00> : vector<2x512xf32>
    %247 = tpu.matmul %246, %191, %cst_94 {dimension_numbers = #tpu.dot_dimension_numbers<[1], [0], [0], [1], [0, 0, 1, 1], [], []>} : vector<2x128xbf16>, vector<128x512xbf16>, vector<2x512xf32> -> vector<2x512xf32>
    %248 = arith.addf %245, %247 : vector<2x512xf32>
    %249 = vector.extract_strided_slice %248 {offsets = [0, 0], sizes = [2, 384], strides = [1, 1]} : vector<2x512xf32> to vector<2x384xf32>
    %250 = arith.negf %249 : vector<2x384xf32>
    %251 = math.exp %250 : vector<2x384xf32>
    %cst_95 = arith.constant 1.000000e+00 : f32
    %252 = vector.broadcast %cst_95 : f32 to vector<2x384xf32>
    %253 = arith.addf %252, %251 : vector<2x384xf32>
    %254 = arith.divf %252, %253 : vector<2x384xf32>
    %255 = vector.extract_strided_slice %254 {offsets = [0, 0], sizes = [2, 128], strides = [1, 1]} : vector<2x384xf32> to vector<2x128xf32>
    %256 = vector.extract_strided_slice %254 {offsets = [0, 128], sizes = [2, 128], strides = [1, 1]} : vector<2x384xf32> to vector<2x128xf32>
    %257 = vector.extract_strided_slice %254 {offsets = [0, 256], sizes = [2, 128], strides = [1, 1]} : vector<2x384xf32> to vector<2x128xf32>
    %258 = vector.extract_strided_slice %248 {offsets = [0, 384], sizes = [2, 128], strides = [1, 1]} : vector<2x512xf32> to vector<2x128xf32>
    %259 = math.tanh %258 : vector<2x128xf32>
    %260 = arith.mulf %256, %241 : vector<2x128xf32>
    %261 = arith.mulf %255, %259 : vector<2x128xf32>
    %262 = arith.addf %260, %261 : vector<2x128xf32>
    %263 = math.tanh %262 : vector<2x128xf32>
    %264 = arith.mulf %257, %263 : vector<2x128xf32>
    %c4_96 = arith.constant 4 : index
    %c0_97 = arith.constant 0 : index
    %265 = vector.load %arg14[%c4_96, %c0_97] : memref<16x128xf32, #tpu.memory_space<vmem>>, vector<2x128xf32>
    tpu.vector_store %arg14[%c4_96, %c0_97], %264 {strides = array<i32>} : memref<16x128xf32, #tpu.memory_space<vmem>>, vector<2x128xf32>,
    %c6_98 = arith.constant 6 : index
    %c0_99 = arith.constant 0 : index
    %266 = vector.load %arg15[%c6_98, %c0_99] : memref<16x512xf32, #tpu.memory_space<vmem>>, vector<2x512xf32>
    %267 = arith.truncf %264 : vector<2x128xf32> to vector<2x128xbf16>
    %cst_100 = arith.constant dense<0.000000e+00> : vector<2x512xf32>
    %268 = tpu.matmul %267, %191, %cst_100 {dimension_numbers = #tpu.dot_dimension_numbers<[1], [0], [0], [1], [0, 0, 1, 1], [], []>} : vector<2x128xbf16>, vector<128x512xbf16>, vector<2x512xf32> -> vector<2x512xf32>
    %269 = arith.addf %266, %268 : vector<2x512xf32>
    %270 = vector.extract_strided_slice %269 {offsets = [0, 0], sizes = [2, 384], strides = [1, 1]} : vector<2x512xf32> to vector<2x384xf32>
    %271 = arith.negf %270 : vector<2x384xf32>
    %272 = math.exp %271 : vector<2x384xf32>
    %cst_101 = arith.constant 1.000000e+00 : f32
    %273 = vector.broadcast %cst_101 : f32 to vector<2x384xf32>
    %274 = arith.addf %273, %272 : vector<2x384xf32>
    %275 = arith.divf %273, %274 : vector<2x384xf32>
    %276 = vector.extract_strided_slice %275 {offsets = [0, 0], sizes = [2, 128], strides = [1, 1]} : vector<2x384xf32> to vector<2x128xf32>
    %277 = vector.extract_strided_slice %275 {offsets = [0, 128], sizes = [2, 128], strides = [1, 1]} : vector<2x384xf32> to vector<2x128xf32>
    %278 = vector.extract_strided_slice %275 {offsets = [0, 256], sizes = [2, 128], strides = [1, 1]} : vector<2x384xf32> to vector<2x128xf32>
    %279 = vector.extract_strided_slice %269 {offsets = [0, 384], sizes = [2, 128], strides = [1, 1]} : vector<2x512xf32> to vector<2x128xf32>
    %280 = math.tanh %279 : vector<2x128xf32>
    %281 = arith.mulf %277, %262 : vector<2x128xf32>
    %282 = arith.mulf %276, %280 : vector<2x128xf32>
    %283 = arith.addf %281, %282 : vector<2x128xf32>
    %284 = math.tanh %283 : vector<2x128xf32>
    %285 = arith.mulf %278, %284 : vector<2x128xf32>
    %c6_102 = arith.constant 6 : index
    %c0_103 = arith.constant 0 : index
    %286 = vector.load %arg14[%c6_102, %c0_103] : memref<16x128xf32, #tpu.memory_space<vmem>>, vector<2x128xf32>
    tpu.vector_store %arg14[%c6_102, %c0_103], %285 {strides = array<i32>} : memref<16x128xf32, #tpu.memory_space<vmem>>, vector<2x128xf32>,
    %c8_104 = arith.constant 8 : index
    %c0_105 = arith.constant 0 : index
    %287 = vector.load %arg15[%c8_104, %c0_105] : memref<16x512xf32, #tpu.memory_space<vmem>>, vector<2x512xf32>
    %288 = arith.truncf %285 : vector<2x128xf32> to vector<2x128xbf16>
    %cst_106 = arith.constant dense<0.000000e+00> : vector<2x512xf32>
    %289 = tpu.matmul %288, %191, %cst_106 {dimension_numbers = #tpu.dot_dimension_numbers<[1], [0], [0], [1], [0, 0, 1, 1], [], []>} : vector<2x128xbf16>, vector<128x512xbf16>, vector<2x512xf32> -> vector<2x512xf32>
    %290 = arith.addf %287, %289 : vector<2x512xf32>
    %291 = vector.extract_strided_slice %290 {offsets = [0, 0], sizes = [2, 384], strides = [1, 1]} : vector<2x512xf32> to vector<2x384xf32>
    %292 = arith.negf %291 : vector<2x384xf32>
    %293 = math.exp %292 : vector<2x384xf32>
    %cst_107 = arith.constant 1.000000e+00 : f32
    %294 = vector.broadcast %cst_107 : f32 to vector<2x384xf32>
    %295 = arith.addf %294, %293 : vector<2x384xf32>
    %296 = arith.divf %294, %295 : vector<2x384xf32>
    %297 = vector.extract_strided_slice %296 {offsets = [0, 0], sizes = [2, 128], strides = [1, 1]} : vector<2x384xf32> to vector<2x128xf32>
    %298 = vector.extract_strided_slice %296 {offsets = [0, 128], sizes = [2, 128], strides = [1, 1]} : vector<2x384xf32> to vector<2x128xf32>
    %299 = vector.extract_strided_slice %296 {offsets = [0, 256], sizes = [2, 128], strides = [1, 1]} : vector<2x384xf32> to vector<2x128xf32>
    %300 = vector.extract_strided_slice %290 {offsets = [0, 384], sizes = [2, 128], strides = [1, 1]} : vector<2x512xf32> to vector<2x128xf32>
    %301 = math.tanh %300 : vector<2x128xf32>
    %302 = arith.mulf %298, %283 : vector<2x128xf32>
    %303 = arith.mulf %297, %301 : vector<2x128xf32>
    %304 = arith.addf %302, %303 : vector<2x128xf32>
    %305 = math.tanh %304 : vector<2x128xf32>
    %306 = arith.mulf %299, %305 : vector<2x128xf32>
    %c8_108 = arith.constant 8 : index
    %c0_109 = arith.constant 0 : index
    %307 = vector.load %arg14[%c8_108, %c0_109] : memref<16x128xf32, #tpu.memory_space<vmem>>, vector<2x128xf32>
    tpu.vector_store %arg14[%c8_108, %c0_109], %306 {strides = array<i32>} : memref<16x128xf32, #tpu.memory_space<vmem>>, vector<2x128xf32>,
    %c10_110 = arith.constant 10 : index
    %c0_111 = arith.constant 0 : index
    %308 = vector.load %arg15[%c10_110, %c0_111] : memref<16x512xf32, #tpu.memory_space<vmem>>, vector<2x512xf32>
    %309 = arith.truncf %306 : vector<2x128xf32> to vector<2x128xbf16>
    %cst_112 = arith.constant dense<0.000000e+00> : vector<2x512xf32>
    %310 = tpu.matmul %309, %191, %cst_112 {dimension_numbers = #tpu.dot_dimension_numbers<[1], [0], [0], [1], [0, 0, 1, 1], [], []>} : vector<2x128xbf16>, vector<128x512xbf16>, vector<2x512xf32> -> vector<2x512xf32>
    %311 = arith.addf %308, %310 : vector<2x512xf32>
    %312 = vector.extract_strided_slice %311 {offsets = [0, 0], sizes = [2, 384], strides = [1, 1]} : vector<2x512xf32> to vector<2x384xf32>
    %313 = arith.negf %312 : vector<2x384xf32>
    %314 = math.exp %313 : vector<2x384xf32>
    %cst_113 = arith.constant 1.000000e+00 : f32
    %315 = vector.broadcast %cst_113 : f32 to vector<2x384xf32>
    %316 = arith.addf %315, %314 : vector<2x384xf32>
    %317 = arith.divf %315, %316 : vector<2x384xf32>
    %318 = vector.extract_strided_slice %317 {offsets = [0, 0], sizes = [2, 128], strides = [1, 1]} : vector<2x384xf32> to vector<2x128xf32>
    %319 = vector.extract_strided_slice %317 {offsets = [0, 128], sizes = [2, 128], strides = [1, 1]} : vector<2x384xf32> to vector<2x128xf32>
    %320 = vector.extract_strided_slice %317 {offsets = [0, 256], sizes = [2, 128], strides = [1, 1]} : vector<2x384xf32> to vector<2x128xf32>
    %321 = vector.extract_strided_slice %311 {offsets = [0, 384], sizes = [2, 128], strides = [1, 1]} : vector<2x512xf32> to vector<2x128xf32>
    %322 = math.tanh %321 : vector<2x128xf32>
    %323 = arith.mulf %319, %304 : vector<2x128xf32>
    %324 = arith.mulf %318, %322 : vector<2x128xf32>
    %325 = arith.addf %323, %324 : vector<2x128xf32>
    %326 = math.tanh %325 : vector<2x128xf32>
    %327 = arith.mulf %320, %326 : vector<2x128xf32>
    %c10_114 = arith.constant 10 : index
    %c0_115 = arith.constant 0 : index
    %328 = vector.load %arg14[%c10_114, %c0_115] : memref<16x128xf32, #tpu.memory_space<vmem>>, vector<2x128xf32>
    tpu.vector_store %arg14[%c10_114, %c0_115], %327 {strides = array<i32>} : memref<16x128xf32, #tpu.memory_space<vmem>>, vector<2x128xf32>,
    %c12_116 = arith.constant 12 : index
    %c0_117 = arith.constant 0 : index
    %329 = vector.load %arg15[%c12_116, %c0_117] : memref<16x512xf32, #tpu.memory_space<vmem>>, vector<2x512xf32>
    %330 = arith.truncf %327 : vector<2x128xf32> to vector<2x128xbf16>
    %cst_118 = arith.constant dense<0.000000e+00> : vector<2x512xf32>
    %331 = tpu.matmul %330, %191, %cst_118 {dimension_numbers = #tpu.dot_dimension_numbers<[1], [0], [0], [1], [0, 0, 1, 1], [], []>} : vector<2x128xbf16>, vector<128x512xbf16>, vector<2x512xf32> -> vector<2x512xf32>
    %332 = arith.addf %329, %331 : vector<2x512xf32>
    %333 = vector.extract_strided_slice %332 {offsets = [0, 0], sizes = [2, 384], strides = [1, 1]} : vector<2x512xf32> to vector<2x384xf32>
    %334 = arith.negf %333 : vector<2x384xf32>
    %335 = math.exp %334 : vector<2x384xf32>
    %cst_119 = arith.constant 1.000000e+00 : f32
    %336 = vector.broadcast %cst_119 : f32 to vector<2x384xf32>
    %337 = arith.addf %336, %335 : vector<2x384xf32>
    %338 = arith.divf %336, %337 : vector<2x384xf32>
    %339 = vector.extract_strided_slice %338 {offsets = [0, 0], sizes = [2, 128], strides = [1, 1]} : vector<2x384xf32> to vector<2x128xf32>
    %340 = vector.extract_strided_slice %338 {offsets = [0, 128], sizes = [2, 128], strides = [1, 1]} : vector<2x384xf32> to vector<2x128xf32>
    %341 = vector.extract_strided_slice %338 {offsets = [0, 256], sizes = [2, 128], strides = [1, 1]} : vector<2x384xf32> to vector<2x128xf32>
    %342 = vector.extract_strided_slice %332 {offsets = [0, 384], sizes = [2, 128], strides = [1, 1]} : vector<2x512xf32> to vector<2x128xf32>
    %343 = math.tanh %342 : vector<2x128xf32>
    %344 = arith.mulf %340, %325 : vector<2x128xf32>
    %345 = arith.mulf %339, %343 : vector<2x128xf32>
    %346 = arith.addf %344, %345 : vector<2x128xf32>
    %347 = math.tanh %346 : vector<2x128xf32>
    %348 = arith.mulf %341, %347 : vector<2x128xf32>
    %c12_120 = arith.constant 12 : index
    %c0_121 = arith.constant 0 : index
    %349 = vector.load %arg14[%c12_120, %c0_121] : memref<16x128xf32, #tpu.memory_space<vmem>>, vector<2x128xf32>
    tpu.vector_store %arg14[%c12_120, %c0_121], %348 {strides = array<i32>} : memref<16x128xf32, #tpu.memory_space<vmem>>, vector<2x128xf32>,
    %c14_122 = arith.constant 14 : index
    %c0_123 = arith.constant 0 : index
    %350 = vector.load %arg15[%c14_122, %c0_123] : memref<16x512xf32, #tpu.memory_space<vmem>>, vector<2x512xf32>
    %351 = arith.truncf %348 : vector<2x128xf32> to vector<2x128xbf16>
    %cst_124 = arith.constant dense<0.000000e+00> : vector<2x512xf32>
    %352 = tpu.matmul %351, %191, %cst_124 {dimension_numbers = #tpu.dot_dimension_numbers<[1], [0], [0], [1], [0, 0, 1, 1], [], []>} : vector<2x128xbf16>, vector<128x512xbf16>, vector<2x512xf32> -> vector<2x512xf32>
    %353 = arith.addf %350, %352 : vector<2x512xf32>
    %354 = vector.extract_strided_slice %353 {offsets = [0, 0], sizes = [2, 384], strides = [1, 1]} : vector<2x512xf32> to vector<2x384xf32>
    %355 = arith.negf %354 : vector<2x384xf32>
    %356 = math.exp %355 : vector<2x384xf32>
    %cst_125 = arith.constant 1.000000e+00 : f32
    %357 = vector.broadcast %cst_125 : f32 to vector<2x384xf32>
    %358 = arith.addf %357, %356 : vector<2x384xf32>
    %359 = arith.divf %357, %358 : vector<2x384xf32>
    %360 = vector.extract_strided_slice %359 {offsets = [0, 0], sizes = [2, 128], strides = [1, 1]} : vector<2x384xf32> to vector<2x128xf32>
    %361 = vector.extract_strided_slice %359 {offsets = [0, 128], sizes = [2, 128], strides = [1, 1]} : vector<2x384xf32> to vector<2x128xf32>
    %362 = vector.extract_strided_slice %359 {offsets = [0, 256], sizes = [2, 128], strides = [1, 1]} : vector<2x384xf32> to vector<2x128xf32>
    %363 = vector.extract_strided_slice %353 {offsets = [0, 384], sizes = [2, 128], strides = [1, 1]} : vector<2x512xf32> to vector<2x128xf32>
    %364 = math.tanh %363 : vector<2x128xf32>
    %365 = arith.mulf %361, %346 : vector<2x128xf32>
    %366 = arith.mulf %360, %364 : vector<2x128xf32>
    %367 = arith.addf %365, %366 : vector<2x128xf32>
    %368 = math.tanh %367 : vector<2x128xf32>
    %369 = arith.mulf %362, %368 : vector<2x128xf32>
    %c14_126 = arith.constant 14 : index
    %c0_127 = arith.constant 0 : index
    %370 = vector.load %arg14[%c14_126, %c0_127] : memref<16x128xf32, #tpu.memory_space<vmem>>, vector<2x128xf32>
    tpu.vector_store %arg14[%c14_126, %c0_127], %369 {strides = array<i32>} : memref<16x128xf32, #tpu.memory_space<vmem>>, vector<2x128xf32>,
    %c1_128 = arith.constant 1 : index
    %c0_129 = arith.constant 0 : index
    %c0_130 = arith.constant 0 : index
    %371 = vector.load %arg12[%c1_128, %c0_129, %c0_130] : memref<2x2x128xf32, #tpu.memory_space<vmem>>, vector<1x2x128xf32>
    %372 = vector.shape_cast %371 : vector<1x2x128xf32> to vector<2x128xf32>
    %373 = vector.shape_cast %369 : vector<2x128xf32> to vector<1x2x128xf32>
    tpu.vector_store %arg12[%c1_128, %c0_129, %c0_130], %373 {strides = array<i32>} : memref<2x2x128xf32, #tpu.memory_space<vmem>>, vector<1x2x128xf32>,
    %c1_131 = arith.constant 1 : index
    %c0_132 = arith.constant 0 : index
    %c0_133 = arith.constant 0 : index
    %374 = vector.load %arg13[%c1_131, %c0_132, %c0_133] : memref<2x2x128xf32, #tpu.memory_space<vmem>>, vector<1x2x128xf32>
    %375 = vector.shape_cast %374 : vector<1x2x128xf32> to vector<2x128xf32>
    %376 = vector.shape_cast %367 : vector<2x128xf32> to vector<1x2x128xf32>
    tpu.vector_store %arg13[%c1_131, %c0_132, %c0_133], %376 {strides = array<i32>} : memref<2x2x128xf32, #tpu.memory_space<vmem>>, vector<1x2x128xf32>,
    %c0_134 = arith.constant 0 : index
    %c0_135 = arith.constant 0 : index
    %377 = vector.load %arg14[%c0_134, %c0_135] : memref<16x128xf32, #tpu.memory_space<vmem>>, vector<16x128xf32>
    %378 = arith.truncf %377 : vector<16x128xf32> to vector<16x128xbf16>
    %c0_136 = arith.constant 0 : index
    %c0_137 = arith.constant 0 : index
    %379 = vector.load %arg9[%c0_136, %c0_137] : memref<128x128xbf16, #tpu.memory_space<vmem>>, vector<128x128xbf16>
    %cst_138 = arith.constant dense<0.000000e+00> : vector<16x128xf32>
    %380 = tpu.matmul %378, %379, %cst_138 {dimension_numbers = #tpu.dot_dimension_numbers<[1], [0], [0], [1], [0, 0, 1, 1], [], []>} : vector<16x128xbf16>, vector<128x128xbf16>, vector<16x128xf32> -> vector<16x128xf32>
    %c0_139 = arith.constant 0 : index
    %c0_140 = arith.constant 0 : index
    %381 = vector.load %arg10[%c0_139, %c0_140] : memref<1x128xf32, #tpu.memory_space<vmem>>, vector<1x128xf32>
    %382 = vector.broadcast %381 : vector<1x128xf32> to vector<16x128xf32>
    %383 = arith.addf %380, %382 : vector<16x128xf32>
    %c0_141 = arith.constant 0 : index
    %c0_142 = arith.constant 0 : index
    %c0_143 = arith.constant 0 : index
    %384 = vector.load %arg11[%c0_141, %c0_142, %c0_143] : memref<1x16x128xf32, #tpu.memory_space<vmem>>, vector<1x16x128xf32>
    %385 = vector.shape_cast %384 : vector<1x16x128xf32> to vector<16x128xf32>
    %386 = vector.shape_cast %383 : vector<16x128xf32> to vector<1x16x128xf32>
    tpu.vector_store %arg11[%c0_141, %c0_142, %c0_143], %386 {strides = array<i32>} : memref<1x16x128xf32, #tpu.memory_space<vmem>>, vector<1x16x128xf32>,
    return
  }
  func.func @transform_0(%arg0: i32, %arg1: i32) -> (i32, i32, i32) {
    %c0_i32 = arith.constant 0 : i32
    %c0_i32_0 = arith.constant 0 : i32
    return %arg0, %arg1, %c0_i32 : i32, i32, i32
  }
  func.func @transform_1(%arg0: i32, %arg1: i32) -> (i32, i32) {
    %c0_i32 = arith.constant 0 : i32
    %c0_i32_0 = arith.constant 0 : i32
    %c0_i32_1 = arith.constant 0 : i32
    return %c0_i32, %c0_i32_0 : i32, i32
  }
  func.func @transform_2(%arg0: i32, %arg1: i32) -> (i32, i32) {
    %c0_i32 = arith.constant 0 : i32
    %c0_i32_0 = arith.constant 0 : i32
    %c0_i32_1 = arith.constant 0 : i32
    return %c0_i32, %c0_i32_0 : i32, i32
  }
  func.func @transform_3(%arg0: i32, %arg1: i32) -> (i32, i32) {
    %c0_i32 = arith.constant 0 : i32
    %c0_i32_0 = arith.constant 0 : i32
    %c0_i32_1 = arith.constant 0 : i32
    return %c0_i32, %c0_i32_0 : i32, i32
  }
  func.func @transform_4(%arg0: i32, %arg1: i32) -> (i32, i32) {
    %c0_i32 = arith.constant 0 : i32
    %c0_i32_0 = arith.constant 0 : i32
    %c0_i32_1 = arith.constant 0 : i32
    return %c0_i32, %c0_i32_0 : i32, i32
  }
  func.func @transform_5(%arg0: i32, %arg1: i32) -> (i32, i32) {
    %c0_i32 = arith.constant 0 : i32
    %c0_i32_0 = arith.constant 0 : i32
    %c0_i32_1 = arith.constant 0 : i32
    return %c0_i32, %c0_i32_0 : i32, i32
  }
  func.func @transform_6(%arg0: i32, %arg1: i32) -> (i32, i32) {
    %c0_i32 = arith.constant 0 : i32
    %c0_i32_0 = arith.constant 0 : i32
    %c0_i32_1 = arith.constant 0 : i32
    return %c0_i32, %c0_i32_0 : i32, i32
  }
  func.func @transform_7(%arg0: i32, %arg1: i32) -> (i32, i32) {
    %c0_i32 = arith.constant 0 : i32
    %c0_i32_0 = arith.constant 0 : i32
    %c0_i32_1 = arith.constant 0 : i32
    return %c0_i32, %c0_i32_0 : i32, i32
  }
  func.func @transform_8(%arg0: i32, %arg1: i32) -> (i32, i32) {
    %c0_i32 = arith.constant 0 : i32
    %c0_i32_0 = arith.constant 0 : i32
    %c0_i32_1 = arith.constant 0 : i32
    return %c0_i32, %c0_i32_0 : i32, i32
  }
  func.func @transform_9(%arg0: i32, %arg1: i32) -> (i32, i32, i32) {
    %c0_i32 = arith.constant 0 : i32
    %c0_i32_0 = arith.constant 0 : i32
    return %arg0, %arg1, %c0_i32 : i32, i32, i32
  }
}

</mosaic_0001>

<bundles_post_ra>
// kernel: tpu_custom_call.1
= control target key start
LH: loop header
LB: loop body
LE: loop exit
PB: predicated region body
PF: predicated region fallthrough
CT: control target
= control target key end

     0   :  { %s5837_s0 = inlined_call_operand.vmem [shape: bf16[1,32,16], index: 0, kind: input, shape index: {}]   ;;  %s5838_s1 = inlined_call_operand.hbm [shape: bf16[16,512], index: 1, kind: input, shape index: {}]   ;;  %s5839_s2 = inlined_call_operand.hbm [shape: bf16[128,512], index: 2, kind: input, shape index: {}]   ;;  %s5840_s3 = inlined_call_operand.vmem [shape: f32[1,512], index: 3, kind: input, shape index: {}]   ;;  %s5841_s4 = inlined_call_operand.hbm [shape: bf16[128,512], index: 4, kind: input, shape index: {}]   ;;  %s5842_s5 = inlined_call_operand.hbm [shape: bf16[128,512], index: 5, kind: input, shape index: {}]   ;;  %s5843_s6 = inlined_call_operand.vmem [shape: f32[1,512], index: 6, kind: input, shape index: {}]   ;;  %s5844_s7 = inlined_call_operand.hbm [shape: bf16[128,128], index: 7, kind: input, shape index: {}]   ;;  %s5845_s8 = inlined_call_operand.vmem [shape: f32[1,128], index: 8, kind: input, shape index: {}]   ;;  %s5846_s9 = inlined_call_operand.hbm [shape: f32[1,32,128], index: 9, kind: output, shape index: {}]  }
   0x1   :  { %5858 = sst [smem:[#allocation27_spill]] %s5839_s2 }
   0x2   :  { %14 = vsyncpa [#allocation7], 0 }
   0x3   :  { %15 = vsyncpa [#allocation10], 0 }
   0x4   :  { %16 = vsyncpa [#allocation13], 0 }
   0x5   :  { %17 = vsyncpa [#allocation8], 0 }
   0x6   :  { %19 = vsyncpa [#allocation8 + $0x1], 0  ;;  %s4741_s30 = smov 0   ;;  %s4743_s10 = smov 0  }
   0x7   :  { %s4745_s11 = smov 0   ;;  %s4747_s12 = smov 0  }
   0x8   :  { %s4749_s13 = smov 0   ;;  %s4751_s14 = smov 0  }
   0x9 LB: > { %5859 = sst [smem:[#allocation20_spill]] %s4653_s30  ;;  %s3634_s15 = sadd.s32 4294967295, %s4673_s14   ;;  %s4673_s14 = sphi %s4751_s14, %s25_s14   ;;  %s4669_s13 = sphi %s4749_s13, %s5883_s13   ;;  %s4665_s12 = sphi %s4747_s12, %s5882_s12   ;;  %s4661_s11 = sphi %s4745_s11, %s5881_s11   ;;  %s4657_s10 = sphi %s4743_s10, %s5885_s10   ;;  %s4653_s30 = sphi %s4741_s30, %s5884_s30  }
   0xa   : > { %5860 = sst [smem:[#allocation21_spill]] %s4661_s11  ;;  %s3635_s16 = sadd.s32 4294967294, %s4673_s14  }
   0xb   : > { %5861 = sst [smem:[#allocation22_spill]] %s4669_s13  ;;  %s34_s17 = sadd.s32 1, %s4669_s13 }
   0xc   : > { %5862 = sst [smem:[#allocation23_spill]] %s4673_s14  ;;  %s242_s18 = sadd.s32 1, %s4661_s11 }
   0xd   : > { %p35_p0 = scmp.ge.s32.totalorder %s34_s17, 2  ;;  %p252_p1 = scmp.ne.s32.totalorder %s4661_s11, %s4657_s10 }
   0xe   : > { %p253_p2 = scmp.eq.s32.totalorder %s3634_s15, 1  ;;  %p258_p3 = scmp.ne.s32.totalorder %s4657_s10, %s4653_s30 }
   0xf   : > { %s5887_s17 = smov (%p35_p0, %s34_s17), 0  ;;  %p259_p5 = scmp.eq.s32.totalorder %s3635_s16, 1 }
  0x10   : > { %5863 = sst [smem:[#allocation24_spill]] %s5887_s17  ;;  %p4781_p4 = por %p253_p2, %p252_p1 }
  0x11   : > { %s238_s20 = ssub.s32 %s4669_s13, %s5887_s17  ;;  %p3636_p6 = scmp.ge.s32.totalorder %s4673_s14, 1 }
  0x12   : > { %s5864_s19 = scalar_select %p4781_p4, 1, 0 }
  0x13   : > { %p240_p7 = scmp.eq.s32.totalorder %s238_s20, 0  ;;  %p4788_p8 = por %p259_p5, %p258_p3 }
  0x14   : > { %p266_p9 = scmp.lt.s32.totalorder %s4673_s14, 3  ;;  %p4800_p11 = scmp.eq.s32.totalorder %s3634_s15, 0 }
  0x15   : > { %s5865_s21 = scalar_select %p4788_p8, 1, 0 }
  0x16   : > { %s4794_s22 = scalar_select %p240_p7, %s4661_s11, %s242_s18  }
  0x17   : > { %5866 = sst [smem:[#allocation25_spill]] %s5865_s21  ;;  %p4796_p10 = pnand %p3636_p6, %p266_p9 }
  0x18   : > { %5867 = sst [smem:[#allocation26_spill]] %s4794_s22  ;;  %s4675_s25 = smov [#allocation9]  }
  0x19   : > { %s5868_s23 = scalar_select %p4796_p10, 1, 0 }
  0x1a   : > { %s5869_s24 = scalar_select %p4800_p11, 1, 0 }
  0x1b   : > { %p3870_p12 = pneg %p4796_p10  ;;  %s291_s26 = sshll.u32 %s4675_s25, 4  ;;  %s292_s26 = int_to_ptr.vmem [resolvable:$true] %s291_s26 }
  0x1c   : > { %s4676_s28 = smov [#allocation12]   ;;  %s5871_s2 = sld [smem:[#allocation27_spill]] }
  0x1d   : > { %p4808_p13 = pnand %p4800_p11, %p3870_p12  ;;  %s320_s29 = sshll.u32 %s4676_s28, 4  ;;  %s4812_s29 = int_to_ptr.vmem [resolvable:$true] %s320_s29 }
  0x1f   : > { %p4822_p1 = pneg %p4808_p13 }
  0x22   : > { %s4443_s18 = scalar_lea.hbm %s5871_s2, 4096 }
  0x23   : > { %p4444_p0 = scmp.ne.s32.totalorder %s5871_s2, %s4443_s18  ;;  %p4450_p5 = scmp.lt.u32.totalorder %s4443_s18, %s5871_s2 }
  0x25   : > { %p4446_p2 = pnand %p4822_p1, %p4444_p0 }
  0x27   : > { %p4447_p3 = pneg %p4446_p2 }
  0x29   : > { %p4452_p6 = pnand %p4450_p5, %p4447_p3 }
  0x2b   : > { %4455 = shalt.err (!%p4452_p6)
}
  0x2c   : > { %s4456_s15 = scalar_lea.vmem %s292_s26, 4096  ;;  %p4464_p8 = scmp.lt.s32.totalorder %s292_s26, %s292_s26 }
  0x2d   : > { %p4457_p7 = scmp.ne.s32.totalorder %s292_s26, %s4456_s15  ;;  %p4465_p4 = scmp.lt.s32.totalorder %s4456_s15, %s4456_s15 }
  0x2f   : > { %p4459_p9 = pnand %p4457_p7, %p4822_p1  ;;  %p4466_p11 = por %p4465_p4, %p4464_p8 }
  0x31   : > { %p4460_p12 = pneg %p4459_p9 }
  0x33   : > { %p4467_p10 = pnand %p4466_p11, %p4460_p12 }
  0x35   : > { %4470 = shalt.err (!%p4467_p10)
}
  0x36   : > { %s4677_s17 = smov 256   ;;  %s4678_s16 = smov 16  }
  0x37   : > { %3876 = dma.hbm_to_vmem [thread:$0]  (!%p4808_p13), %s5871_s2, 4096, %s292_s26, [#allocation10], %s4677_s17, %s4677_s17, %s4678_s16  }
  0x38   : > { %s4471_s22 = scalar_lea.hbm %s5842_s5, 4096 }
  0x39   : > { %p4472_p4 = scmp.ne.s32.totalorder %s5842_s5, %s4471_s22  ;;  %p4478_p11 = scmp.lt.u32.totalorder %s4471_s22, %s5842_s5 }
  0x3b   : > { %p4474_p8 = pnand %p4472_p4, %p4822_p1 }
  0x3d   : > { %p4475_p10 = pneg %p4474_p8 }
  0x3f   : > { %p4480_p0 = pnand %p4478_p11, %p4475_p10 }
  0x41   : > { %4483 = shalt.err (!%p4480_p0)
}
  0x42   : > { %s4484_s26 = scalar_lea.vmem %s4812_s29, 4096  ;;  %p4492_p6 = scmp.lt.s32.totalorder %s4812_s29, %s4812_s29 }
  0x43   : > { %p4485_p2 = scmp.ne.s32.totalorder %s4812_s29, %s4484_s26  ;;  %p4493_p7 = scmp.lt.s32.totalorder %s4484_s26, %s4484_s26 }
  0x45   : > { %p4487_p3 = pnand %p4485_p2, %p4822_p1  ;;  %p4494_p9 = por %p4493_p7, %p4492_p6 }
  0x47   : > { %p4488_p5 = pneg %p4487_p3 }
  0x49   : > { %p4495_p12 = pnand %p4494_p9, %p4488_p5 }
  0x4b   : > { %4498 = shalt.err (!%p4495_p12)
}
  0x4c   : > { %3882 = dma.hbm_to_vmem [thread:$0]  (!%p4808_p13), %s5842_s5, 4096, %s4812_s29, [#allocation13], %s4677_s17, %s4677_s17, %s4678_s16  }
  0x4d   : > { %s4679_s21 = smov [#allocation6]   ;;  %s4680_s13 = smov [#allocation11]  }
  0x4e   : > { %s278_s22 = sshll.u32 %s4679_s21, 4  ;;  %s307_s18 = sshll.u32 %s4680_s13, 4  ;;  %s279_s22 = int_to_ptr.vmem [resolvable:$true] %s278_s22  ;;  %s308_s18 = int_to_ptr.vmem [resolvable:$true] %s307_s18 }
  0x4f   : > { %s4499_s15 = scalar_lea.hbm %s5838_s1, 512 }
  0x50   : > { %p4500_p4 = scmp.ne.s32.totalorder %s5838_s1, %s4499_s15  ;;  %p4506_p11 = scmp.lt.u32.totalorder %s4499_s15, %s5838_s1 }
  0x52   : > { %p4502_p8 = pnand %p4500_p4, %p4822_p1 }
  0x54   : > { %p4503_p10 = pneg %p4502_p8 }
  0x56   : > { %p4508_p0 = pnand %p4506_p11, %p4503_p10 }
  0x58   : > { %4511 = shalt.err (!%p4508_p0)
}
  0x59   : > { %s4512_s29 = scalar_lea.vmem %s279_s22, 512  ;;  %p4520_p6 = scmp.lt.s32.totalorder %s279_s22, %s279_s22 }
  0x5a   : > { %p4513_p2 = scmp.ne.s32.totalorder %s279_s22, %s4512_s29  ;;  %p4521_p7 = scmp.lt.s32.totalorder %s4512_s29, %s4512_s29 }
  0x5c   : > { %p4515_p3 = pnand %p4513_p2, %p4822_p1  ;;  %p4522_p9 = por %p4521_p7, %p4520_p6 }
  0x5e   : > { %p4516_p5 = pneg %p4515_p3 }
  0x60   : > { %p4523_p12 = pnand %p4522_p9, %p4516_p5 }
  0x62   : > { %4526 = shalt.err (!%p4523_p12)
}
  0x63   : > { %3873 = dma.hbm_to_vmem [thread:$0]  (!%p4808_p13), %s5838_s1, 512, %s279_s22, [#allocation7], %s4677_s17, %s4677_s17, %s4678_s16  }
  0x64   : > { %s4527_s13 = scalar_lea.hbm %s5841_s4, 4096 }
  0x65   : > { %p4528_p4 = scmp.ne.s32.totalorder %s5841_s4, %s4527_s13  ;;  %p4534_p11 = scmp.lt.u32.totalorder %s4527_s13, %s5841_s4 }
  0x67   : > { %p4530_p8 = pnand %p4528_p4, %p4822_p1 }
  0x69   : > { %p4531_p10 = pneg %p4530_p8 }
  0x6b   : > { %p4536_p0 = pnand %p4534_p11, %p4531_p10 }
  0x6d   : > { %4539 = shalt.err (!%p4536_p0)
}
  0x6e   : > { %s4540_s30 = scalar_lea.vmem %s308_s18, 4096  ;;  %p4548_p6 = scmp.lt.s32.totalorder %s308_s18, %s308_s18 }
  0x6f   : > { %p4541_p2 = scmp.ne.s32.totalorder %s308_s18, %s4540_s30  ;;  %p4549_p7 = scmp.lt.s32.totalorder %s4540_s30, %s4540_s30 }
  0x71   : > { %p4543_p3 = pnand %p4541_p2, %p4822_p1  ;;  %p4550_p9 = por %p4549_p7, %p4548_p6 }
  0x73   : > { %p4544_p5 = pneg %p4543_p3 }
  0x75   : > { %p4551_p12 = pnand %p4550_p9, %p4544_p5 }
  0x77   : > { %4554 = shalt.err (!%p4551_p12)
}
  0x78   : > { %3879 = dma.hbm_to_vmem [thread:$0]  (!%p4808_p13), %s5841_s4, 4096, %s308_s18, [#allocation10], %s4677_s17, %s4677_s17, %s4678_s16  }
  0x79   : > { %s4681_s2 = smov [#allocation14]   ;;  %s4555_s13 = scalar_lea.hbm %s5844_s7, 1024 }
  0x7a   : > { %s336_s14 = sshll.u32 %s4681_s2, 4  ;;  %p4556_p4 = scmp.ne.s32.totalorder %s5844_s7, %s4555_s13  ;;  %s337_s14 = int_to_ptr.vmem [resolvable:$true] %s336_s14 }
  0x7b   : > { %p4562_p11 = scmp.lt.u32.totalorder %s4555_s13, %s5844_s7 }
  0x7c   : > { %p4558_p8 = pnand %p4556_p4, %p4822_p1 }
  0x7e   : > { %p4559_p10 = pneg %p4558_p8 }
  0x80   : > { %p4564_p0 = pnand %p4562_p11, %p4559_p10 }
  0x82   : > { %4567 = shalt.err (!%p4564_p0)
}
  0x83   : > { %s4568_s17 = scalar_lea.vmem %s337_s14, 1024  ;;  %p4576_p6 = scmp.lt.s32.totalorder %s337_s14, %s337_s14 }
  0x84   : > { %p4569_p2 = scmp.ne.s32.totalorder %s337_s14, %s4568_s17  ;;  %p4577_p7 = scmp.lt.s32.totalorder %s4568_s17, %s4568_s17 }
  0x86   : > { %p4571_p3 = pnand %p4569_p2, %p4822_p1  ;;  %p4578_p9 = por %p4577_p7, %p4576_p6 }
  0x88   : > { %p4572_p5 = pneg %p4571_p3 }
  0x8a   : > { %p4579_p12 = pnand %p4578_p9, %p4572_p5 }
  0x8c   : > { %4582 = shalt.err (!%p4579_p12)
}
  0x8d   : > { %s4682_s16 = smov 64   ;;  %s4683_s18 = smov 4  }
  0x8e   : > { %3885 = dma.hbm_to_vmem [thread:$0]  (!%p4808_p13), %s5844_s7, 1024, %s337_s14, [#allocation13], %s4682_s16, %s4682_s16, %s4683_s18  }
  0x8f   : > { %p5873_p4 = scmp.ne.s32.totalorder %s5868_s23, 0 }
  0x90   : > { %p5874_p8 = scmp.ne.s32.totalorder (!%p5873_p4), %s5869_s24, 0 }
  0x91   : > { %368 = sbr.rel (%p5873_p4) target bundleno = 4685 (0x124d), region = 56 }
  0x98   : > { %4636 = dma.done.wait (%p5874_p8), [#allocation7], 512  }
  0x99   : > { %4638 = vsyncadd (%p5874_p8), [#allocation7], 4294966784 }
  0x9a   : > { %4640 = dma.done.wait (%p5874_p8), [#allocation10], 8192  }
  0x9b   : > { %4642 = vsyncadd (%p5874_p8), [#allocation10], 4294959104 }
  0x9c   : > { %4644 = dma.done.wait (%p5874_p8), [#allocation13], 5120  }
  0x9d   : > { %4646 = vsyncadd (%p5874_p8), [#allocation13], 4294962176  ;;  %s421_s23 = sand.u32 1, %s4657_s10   ;;  %s3650_s27 = sshll.u32 %s4665_s12, 1 }
  0x9e   : > { %s3649_s25 = sshll.u32 %s421_s23, 4  ;;  %p427_p13 = scmp.lt.s32.totalorder %s3650_s27, 3 }
  0x9f   : > { %s4948_s21 = scalar_lea.vmem [#allocation15], %s3649_s25  ;;  %p3652_p1 = scmp.ne.s32.totalorder %s4665_s12, 0 }
  0xa0   : > { %s5889_s27 = smov (!%p427_p13, %s3650_s27), 3  ;;  %v4684_v0 = vmov (!%p3652_p1), 0.0  }
  0xa1   : > { %s3651_s29 = sshll.u32 %s5889_s27, 2  ;;  %439 = sbr.rel (%p3652_p1) target bundleno = 168 (0xa8), region = 80  ;;  %440 = vst [vmem:[#allocation2] sm:$0x3] (!%p3652_p1), %v4684_v0  ;;  %441 = vst [vmem:[#allocation2 + $0x2] sm:$0x3] (!%p3652_p1), %v4684_v0 }
  0xa2   : > { %s432_s11 = scalar_lea.vmem %s5837_s0, %s3651_s29  ;;  %442 = vst [vmem:[#allocation3] sm:$0x3] (!%p3652_p1), %v4684_v0  ;;  %443 = vst [vmem:[#allocation3 + $0x2] sm:$0x3] (!%p3652_p1), %v4684_v0 }
  0xa8 PF: > { %v3964_v1 = vld [vmem:[#allocation6 + $0x4] ss:$16 sps:$4 sm:$0xff]   ;;  %v4685_v3 = vmov 0   ;;  %v3968_v4 = vld [vmem:[#allocation6] ss:$16 sps:$4 sm:$0xff]   ;;  %v3970_v6 = vld [vmem:[%s432_s11] sm:$0xff]   ;;  %v484_v41 = vlaneseq }
  0xa9   : > { %v4951_v2 = vld [vmem:[#allocation9 + $0x4] ss:$16 sps:$4 sm:$0xff]   ;;  %565 = vmatprep.mubr.bf16.mxu1 %v4685_v3  ;;  %826 = vmatprep.mubr.bf16.mxu0 %v4685_v3  ;;  %v4955_v5 = vld [vmem:[#allocation9] ss:$16 sps:$4 sm:$0xff]   ;;  %vm529_vm0 = vcmask 130048   ;;  %vm4687_vm1 = vmmov 0  }
  0xaa   : > { %533 = vmatprep.subr.bf16.mxu1 %v3964_v1  ;;  %794 = vmatprep.subr.bf16.mxu0 %v4951_v2  ;;  %v4959_v7 = vld [vmem:[#allocation9 + $0x24] ss:$16 sps:$4 sm:$0xff]   ;;  %v4961_v8 = vld [vmem:[#allocation9 + $0x20] ss:$16 sps:$4 sm:$0xff]   ;;  %v3974_v9 = vld [vmem:[#allocation6 + $0x8] ss:$16 sps:$4 sm:$0xff]  }
  0xab   : > { %534 = vmatpush1.bf16.msra.mxu1 %v3968_v4  ;;  %795 = vmatpush1.bf16.msra.mxu0 %v4955_v5  ;;  %v3976_v10 = vld [vmem:[#allocation6 + $0xc] ss:$16 sps:$4 sm:$0xff]   ;;  %v4965_v11 = vld [vmem:[#allocation9 + $0x44] ss:$16 sps:$4 sm:$0xff]   ;;  %v4967_v12 = vld [vmem:[#allocation9 + $0x40] ss:$16 sps:$4 sm:$0xff]  }
  0xac   : > { %796 = vmatprep.subr.bf16.mxu0 %v4959_v7  ;;  %576 = vmatprep.subr.bf16.mxu1 %v3976_v10  ;;  %v4970_v13 = vld [vmem:[#allocation9 + $0xc] ss:$16 sps:$4 sm:$0xff]   ;;  %v4973_v14 = vld [vmem:[#allocation9 + $0x64] ss:$16 sps:$4 sm:$0xff]   ;;  %v4978_v15 = vld [vmem:[#allocation9 + $0x8] ss:$16 sps:$4 sm:$0xff]  }
  0xad   : > { %v4980_v16 = vld [vmem:[#allocation9 + $0x60] ss:$16 sps:$4 sm:$0xff]   ;;  %v4982_v17 = vld [vmem:[#allocation9 + $0x2c] ss:$16 sps:$4 sm:$0xff]   ;;  %v4985_v18 = vld [vmem:[#allocation9 + $0x84] ss:$16 sps:$4 sm:$0xff]  }
  0xae   : > { %3658 = vmatmul.mubr.msk.bf16.vlgmr.msra.gmra.mrb[0].mxu1 %vm529_vm0, %v3970_v6  ;;  %v4988_v19 = vld [vmem:[#allocation9 + $0x28] ss:$16 sps:$4 sm:$0xff]   ;;  %v4992_v20 = vld [vmem:[#allocation9 + $0x80] ss:$16 sps:$4 sm:$0xff]   ;;  %v4996_v21 = vld [vmem:[#allocation9 + $0x4c] ss:$16 sps:$4 sm:$0xff]  }
  0xaf   : > { %797 = vmatpush1.bf16.msra.mxu0 %v4961_v8  ;;  %577 = vmatpush1.bf16.msra.mxu1 %v3974_v9  ;;  %v4998_v22 = vld [vmem:[#allocation9 + $0xa4] ss:$16 sps:$4 sm:$0xff]   ;;  %v5003_v23 = vld [vmem:[#allocation9 + $0x48] ss:$16 sps:$4 sm:$0xff]   ;;  %v5005_v24 = vld [vmem:[#allocation9 + $0xa0] ss:$16 sps:$4 sm:$0xff]  }
  0xb0   : > { %798 = vmatprep.subr.bf16.mxu0 %v4965_v11  ;;  %608 = vmatprep.mubr.bf16.mxu1 %v4685_v3  ;;  %v5007_v25 = vld [vmem:[#allocation9 + $0x6c] ss:$16 sps:$4 sm:$0xff]   ;;  %v5011_v26 = vld [vmem:[#allocation9 + $0xc4] ss:$16 sps:$4 sm:$0xff]   ;;  %v5013_v27 = vld [vmem:[#allocation9 + $0x68] ss:$16 sps:$4 sm:$0xff]  }
  0xb1   : > { %835 = vmatprep.subr.bf16.mxu1 %v4970_v13  ;;  %v5017_v28 = vld [vmem:[#allocation9 + $0xc0] ss:$16 sps:$4 sm:$0xff]   ;;  %v5021_v29 = vld [vmem:[#allocation9 + $0x8c] ss:$16 sps:$4 sm:$0xff]   ;;  %v5023_v30 = vld [vmem:[#allocation9 + $0xe4] ss:$16 sps:$4 sm:$0xff]  }
  0xb2   : > { %v5025_v31 = vld [vmem:[#allocation9 + $0x88] ss:$16 sps:$4 sm:$0xff]   ;;  %v5027_v32 = vld [vmem:[#allocation9 + $0xe0] ss:$16 sps:$4 sm:$0xff]   ;;  %v5029_v34 = vld [vmem:[#allocation9 + $0xac] ss:$16 sps:$4 sm:$0xff]  }
  0xb3   : > { %799 = vmatpush1.bf16.msra.mxu0 %v4967_v12  ;;  %v627_v33 = vld [vmem:[#allocation2] sm:$0x3]  ;;  %v5037_v37 = vld [vmem:[#allocation9 + $0xcc] ss:$16 sps:$4 sm:$0xff]   ;;  %v5089_v42 = vshrl.u32 %v484_v41, 7  ;;  %s3818_s17 = sshll.u32 %s4665_s12, 8 }
  0xb4   : > { %800 = vmatprep.subr.bf16.mxu0 %v4973_v14  ;;  %v5035_v35 = vld [vmem:[#allocation9 + $0xa8] ss:$16 sps:$4 sm:$0xff]   ;;  %v633_v36 = vpack.c.bf16 %v627_v33, %v627_v33  ;;  %v5045_v39 = vld [vmem:[#allocation9 + $0xec] ss:$16 sps:$4 sm:$0xff]   ;;  %s3505_s16 = sshll.u32 %s4948_s21, 4  ;;  %s5783_s22 = scalar_lea.hbm %s5846_s9, %s3818_s17  ;;  %s5785_s16 = int_to_ptr.vmem [resolvable:$true] %s3505_s16 }
  0xb5   : > { %v5043_v38 = vld [vmem:[#allocation9 + $0xc8] ss:$16 sps:$4 sm:$0xff]   ;;  %v486_v43 = vsub.s32 0, %v5089_v42  ;;  %v490_v45 = vsub.s32 1, %v5089_v42  ;;  %v494_v51 = vsub.s32 2, %v5089_v42  ;;  %v498_v54 = vsub.s32 3, %v5089_v42 }
  0xb6   : > { %3659 = vmatmul.mubr.msk.bf16.vlgmr.msra.gmra.mrb[4].mxu1 %vm529_vm0, %v3970_v6  ;;  %v5051_v40 = vld [vmem:[#allocation9 + $0xe8] ss:$16 sps:$4 sm:$0xff]   ;;  %s5791_s12 = scalar_lea.sflag [#allocation8], %s421_s23  ;;  %s4583_s27 = scalar_lea.vmem %s5785_s16, 256 }
  0xb7   : > { %836 = vmatpush1.bf16.msra.mxu1 %v4978_v15  ;;  %801 = vmatpush1.bf16.msra.mxu0 %v4980_v16  ;;  %v480_v44 = vld [vmem:[%s5840_s3] sm:$0xf]  ;;  %p4584_p10 = scmp.ne.s32.totalorder %s5785_s16, %s4583_s27  ;;  %p5875_p11 = scmp.ne.s32.totalorder %s5864_s19, 0 }
  0xb8   : > { %837 = vmatprep.subr.bf16.mxu1 %v4982_v17  ;;  %802 = vmatprep.subr.bf16.mxu0 %v4985_v18  ;;  %v487_v46 = vrot.slane %v480_v44, %v486_v43  ;;  %v491_v47 = vrot.slane %v480_v44, %v490_v45  ;;  %v495_v58 = vrot.slane %v480_v44, %v494_v51  ;;  %s4688_s25 = smov [#allocation15]  }
  0xb9   : > { %867 = vmatprep.mubr.bf16.mxu1 %v4685_v3  ;;  %v499_v59 = vrot.slane %v480_v44, %v498_v54  ;;  %p4585_p0 = pnand %p4584_p10, %p5875_p11  ;;  %s4587_s29 = sshll.u32 %s4688_s25, 4  ;;  %s4588_s29 = int_to_ptr.vmem [resolvable:$false] %s4587_s29 }
  0xba   : > { %s4589_s2 = scalar_lea.vmem %s4588_s29, 512  ;;  %p4590_p3 = scmp.lt.s32.totalorder %s5785_s16, %s4588_s29 }
  0xbb   : > { %838 = vmatpush1.bf16.msra.mxu1 %v4988_v19  ;;  %803 = vmatpush1.bf16.msra.mxu0 %v4992_v20  ;;  %p4586_p2 = pneg %p4585_p0  ;;  %p4591_p5 = scmp.lt.s32.totalorder %s4589_s2, %s4583_s27 }
  0xbc   : > { %839 = vmatprep.subr.bf16.mxu1 %v4996_v21  ;;  %804 = vmatprep.subr.bf16.mxu0 %v4998_v22 }
  0xbd   : > { %p4592_p6 = por %p4591_p5, %p4590_p3 }
  0xbf   : > { %840 = vmatpush1.bf16.msra.mxu1 %v5003_v23  ;;  %805 = vmatpush1.bf16.msra.mxu0 %v5005_v24  ;;  %p4593_p7 = pnand %p4592_p6, %p4586_p2 }
  0xc0   : > { %841 = vmatprep.subr.bf16.mxu1 %v5007_v25  ;;  %806 = vmatprep.subr.bf16.mxu0 %v5011_v26 }
  0xc3   : > { %842 = vmatpush1.bf16.msra.mxu1 %v5013_v27  ;;  %807 = vmatpush1.bf16.msra.mxu0 %v5017_v28 }
  0xc4   : > { %843 = vmatprep.subr.bf16.mxu1 %v5021_v29  ;;  %808 = vmatprep.subr.bf16.mxu0 %v5023_v30 }
  0xc7   : > { %844 = vmatpush1.bf16.msra.mxu1 %v5025_v31  ;;  %809 = vmatpush1.bf16.msra.mxu0 %v5027_v32 }
  0xc8   : > { %845 = vmatprep.subr.bf16.mxu1 %v5029_v34  ;;  %910 = vmatprep.subr.bf16.mxu0 %v4951_v2 }
  0xca   : > { %827 = vmatmul.mubr.bf16.vlgmr.msra.gmra.mrb[0].mxu0 %v633_v36 }
  0xcb   : > { %846 = vmatpush1.bf16.msra.mxu1 %v5035_v35  ;;  %911 = vmatpush1.bf16.msra.mxu0 %v4955_v5 }
  0xcc   : > { %847 = vmatprep.subr.bf16.mxu1 %v5037_v37  ;;  %912 = vmatprep.subr.bf16.mxu0 %v4959_v7 }
  0xcd   : > { %942 = vmatprep.mubr.bf16.mxu0 %v4685_v3 }
  0xcf   : > { %848 = vmatpush1.bf16.msra.mxu1 %v5043_v38  ;;  %913 = vmatpush1.bf16.msra.mxu0 %v4961_v8 }
  0xd0   : > { %849 = vmatprep.subr.bf16.mxu1 %v5045_v39  ;;  %914 = vmatprep.subr.bf16.mxu0 %v4965_v11 }
  0xd3   : > { %850 = vmatpush1.bf16.msra.mxu1 %v5051_v40  ;;  %915 = vmatpush1.bf16.msra.mxu0 %v4967_v12 }
  0xd4   : > { %951 = vmatprep.subr.bf16.mxu1 %v4970_v13  ;;  %916 = vmatprep.subr.bf16.mxu0 %v4973_v14 }
  0xd6   : > { %868 = vmatmul.mubr.bf16.vlgmr.msra.gmra.mrb[8].mxu1 %v633_v36 }
  0xd7   : > { %952 = vmatpush1.bf16.msra.mxu1 %v4978_v15  ;;  %917 = vmatpush1.bf16.msra.mxu0 %v4980_v16 }
  0xd8   : > { %953 = vmatprep.subr.bf16.mxu1 %v4982_v17  ;;  %918 = vmatprep.subr.bf16.mxu0 %v4985_v18 }
  0xd9   : > { %983 = vmatprep.mubr.bf16.mxu1 %v4685_v3 }
  0xdb   : > { %954 = vmatpush1.bf16.msra.mxu1 %v4988_v19  ;;  %919 = vmatpush1.bf16.msra.mxu0 %v4992_v20 }
  0xdc   : > { %955 = vmatprep.subr.bf16.mxu1 %v4996_v21  ;;  %920 = vmatprep.subr.bf16.mxu0 %v4998_v22 }
  0xdf   : > { %956 = vmatpush1.bf16.msra.mxu1 %v5003_v23  ;;  %921 = vmatpush1.bf16.msra.mxu0 %v5005_v24 }
  0xe0   : > { %957 = vmatprep.subr.bf16.mxu1 %v5007_v25  ;;  %922 = vmatprep.subr.bf16.mxu0 %v5011_v26 }
  0xe3   : > { %958 = vmatpush1.bf16.msra.mxu1 %v5013_v27  ;;  %923 = vmatpush1.bf16.msra.mxu0 %v5017_v28 }
  0xe4   : > { %959 = vmatprep.subr.bf16.mxu1 %v5021_v29  ;;  %924 = vmatprep.subr.bf16.mxu0 %v5023_v30 }
  0xe7   : > { %960 = vmatpush1.bf16.msra.mxu1 %v5025_v31  ;;  %925 = vmatpush1.bf16.msra.mxu0 %v5027_v32 }
  0xe8   : > { %961 = vmatprep.subr.bf16.mxu1 %v5029_v34  ;;  %1044 = vmatprep.subr.bf16.mxu0 %v4951_v2 }
  0xeb   : > { %962 = vmatpush1.bf16.msra.mxu1 %v5035_v35 }
  0xec   : > { %963 = vmatprep.subr.bf16.mxu1 %v5037_v37 }
  0xef   : > { %964 = vmatpush1.bf16.msra.mxu1 %v5043_v38 }
  0xf0   : > { %965 = vmatprep.subr.bf16.mxu1 %v5045_v39 }
  0xf3   : > { %966 = vmatpush1.bf16.msra.mxu1 %v5051_v40 }
  0xf4   : > { %1085 = vmatprep.subr.bf16.mxu1 %v4970_v13 }
 0x181   : > { %v567_v48 = vpop.f32.mrb[0].mxu1 }
 0x182   : > { %v568_v49 = vadd.f32 %v567_v48, %v487_v46  ;;  %v569_v50 = vpop.f32.mrb[1].mxu1 }
 0x183   : > { %v570_v52 = vadd.f32 %v569_v50, %v491_v47  ;;  %v571_v53 = vpop.f32.mrb[2].mxu1 }
 0x184   : > { %619 = vst [vmem:[#allocation5] sm:$0xff] %v568_v49  ;;  %v572_v55 = vadd.f32 %v571_v53, %v487_v46  ;;  %v573_v56 = vpop.f32.mrb[3].mxu1 }
 0x185   : > { %620 = vst [vmem:[#allocation5 + $0x8] sm:$0xff] %v570_v52  ;;  %v574_v57 = vadd.f32 %v573_v56, %v491_v47 }
 0x186   : > { %623 = vst [vmem:[#allocation5 + $0x20] sm:$0xff] %v572_v55 }
 0x187   : > { %624 = vst [vmem:[#allocation5 + $0x28] sm:$0xff] %v574_v57 }
 0x189   : > { %v610_v60 = vpop.f32.mrb[4].mxu1 }
 0x18a   : > { %v611_v61 = vadd.f32 %v610_v60, %v495_v58  ;;  %v612_v62 = vpop.f32.mrb[5].mxu1 }
 0x18b   : > { %v613_v63 = vadd.f32 %v612_v62, %v499_v59  ;;  %v614_v0 = vpop.f32.mrb[6].mxu1  ;;  %v629_v9 = vld [vmem:[#allocation5] sm:$0x3] }
 0x18c   : > { %621 = vst [vmem:[#allocation5 + $0x10] sm:$0xff] %v611_v61  ;;  %v615_v1 = vadd.f32 %v614_v0, %v495_v58  ;;  %v616_v4 = vpop.f32.mrb[7].mxu1  ;;  %v630_v36 = vld [vmem:[#allocation5 + $0x8] sm:$0x3] }
 0x18d   : > { %622 = vst [vmem:[#allocation5 + $0x18] sm:$0xff] %v613_v63  ;;  %v617_v6 = vadd.f32 %v616_v4, %v499_v59 }
 0x18e   : > { %625 = vst [vmem:[#allocation5 + $0x30] sm:$0xff] %v615_v1 }
 0x18f   : > { %626 = vst [vmem:[#allocation5 + $0x38] sm:$0xff] %v617_v6  ;;  %v628_v6 = vld [vmem:[#allocation3] sm:$0x3] }
 0x193   : > { %v631_v50 = vld [vmem:[#allocation5 + $0x10] sm:$0x3] }
 0x194   : > { %v632_v55 = vld [vmem:[#allocation5 + $0x18] sm:$0x3] }
 0x19d   : > { %v828_v10 = vpop.f32.mrb[0].mxu0 }
 0x19e   : > { %v876_v33 = vadd.f32 %v828_v10, %v629_v9  ;;  %v830_v41 = vpop.f32.mrb[1].mxu0 }
 0x19f   : > { %v877_v46 = vadd.f32 %v830_v41, %v630_v36  ;;  %v832_v47 = vpop.f32.mrb[2].mxu0 }
 0x1a0   : > { %v3692_v44 = vmul.f32 -1.442695, %v876_v33  ;;  %v833_v48 = vpop.f32.mrb[3].mxu0 }
 0x1a1   : > { %v3693_v49 = vmul.f32 -1.442695, %v877_v46 }
 0x1a2   : > { %4123 = vpow2.f32 %v3692_v44 }
 0x1a3   : > { %4125 = vpow2.f32 %v3693_v49 }
 0x1a9   : > { %v869_v52 = vpop.f32.mrb[8].mxu1 }
 0x1aa   : > { %v878_v53 = vadd.f32 %v869_v52, %v631_v50  ;;  %v871_v56 = vpop.f32.mrb[9].mxu1 }
 0x1ab   : > { %v879_v57 = vadd.f32 %v871_v56, %v632_v55  ;;  %v873_v58 = vpop.f32.mrb[10].mxu1 }
 0x1ac   : > { %v4124_v59 = vpop.eup %4123  ;;  %v3694_v60 = vmul.f32 -1.442695, %v878_v53  ;;  %v874_v61 = vpop.f32.mrb[11].mxu1 }
 0x1ad   : > { %v4126_v62 = vpop.eup %4125  ;;  %v889_v63 = vadd.f32 1.0, %v4124_v59  ;;  %4127 = vtanh.f32 %v879_v57  ;;  %v905_v57 = vld [vmem:[#allocation5] sm:$0xc] }
 0x1ae   : > { %v890_v0 = vadd.f32 1.0, %v4126_v62  ;;  %4129 = vpow2.f32 %v3694_v60  ;;  %v906_v62 = vld [vmem:[#allocation5 + $0x8] sm:$0xc] }
 0x1af   : > { %4131 = vrcp.f32 %v889_v63 }
 0x1b0   : > { %4133 = vrcp.f32 %v890_v0 }
 0x1b7   : > { %v4128_v1 = vpop.eup %4127 }
 0x1b8   : > { %v4130_v4 = vpop.eup %4129 }
 0x1b9   : > { %v4132_v9 = vpop.eup %4131  ;;  %v891_v33 = vadd.f32 1.0, %v4130_v4 }
 0x1ba   : > { %v4134_v10 = vpop.eup %4133  ;;  %v900_v36 = vmul.f32 %v4132_v9, %v4128_v1 }
 0x1bb   : > { %v899_v41 = vmul.f32 %v4134_v10, %v628_v6  ;;  %4135 = vrcp.f32 %v891_v33  ;;  %v907_v10 = vld [vmem:[#allocation5 + $0x10] sm:$0xc] }
 0x1bd   : > { %v5106_v46 = vadd.f32 %v900_v36, %v899_v41  ;;  %v908_v41 = vld [vmem:[#allocation5 + $0x18] sm:$0xc] }
 0x1bf   : > { %4137 = vtanh.f32 %v5106_v46 }
 0x1c5   : > { %v4136_v47 = vpop.eup %4135 }
 0x1c9   : > { %v4138_v44 = vpop.eup %4137 }
 0x1ca   : > { %v903_v48 = vmul.f32 %v4138_v44, %v4136_v47 }
 0x1cc   : > { %904 = vst [vmem:[#allocation4] sm:$0x3] %v903_v48  ;;  %v909_v49 = vpack.c.bf16 %v903_v48, %v903_v48 }
 0x1ce   : > { %943 = vmatmul.mubr.bf16.vlgmr.msra.gmra.mrb[4].mxu0 %v909_v49  ;;  %984 = vmatmul.mubr.bf16.vlgmr.msra.gmra.mrb[12].mxu1 %v909_v49 }
 0x1cf   : > { %1045 = vmatpush1.bf16.msra.mxu0 %v4955_v5  ;;  %1086 = vmatpush1.bf16.msra.mxu1 %v4978_v15 }
 0x1d0   : > { %1046 = vmatprep.subr.bf16.mxu0 %v4959_v7  ;;  %1087 = vmatprep.subr.bf16.mxu1 %v4982_v17 }
 0x1d1   : > { %1076 = vmatprep.mubr.bf16.mxu0 %v4685_v3  ;;  %1117 = vmatprep.mubr.bf16.mxu1 %v4685_v3 }
 0x1d3   : > { %1047 = vmatpush1.bf16.msra.mxu0 %v4961_v8  ;;  %1088 = vmatpush1.bf16.msra.mxu1 %v4988_v19 }
 0x1d4   : > { %1048 = vmatprep.subr.bf16.mxu0 %v4965_v11  ;;  %1089 = vmatprep.subr.bf16.mxu1 %v4996_v21 }
 0x1d7   : > { %1049 = vmatpush1.bf16.msra.mxu0 %v4967_v12  ;;  %1090 = vmatpush1.bf16.msra.mxu1 %v5003_v23 }
 0x1d8   : > { %1050 = vmatprep.subr.bf16.mxu0 %v4973_v14  ;;  %1091 = vmatprep.subr.bf16.mxu1 %v5007_v25 }
 0x1db   : > { %1051 = vmatpush1.bf16.msra.mxu0 %v4980_v16  ;;  %1092 = vmatpush1.bf16.msra.mxu1 %v5013_v27 }
 0x1dc   : > { %1052 = vmatprep.subr.bf16.mxu0 %v4985_v18  ;;  %1093 = vmatprep.subr.bf16.mxu1 %v5021_v29 }
 0x1df   : > { %1053 = vmatpush1.bf16.msra.mxu0 %v4992_v20  ;;  %1094 = vmatpush1.bf16.msra.mxu1 %v5025_v31 }
 0x1e0   : > { %1054 = vmatprep.subr.bf16.mxu0 %v4998_v22  ;;  %1095 = vmatprep.subr.bf16.mxu1 %v5029_v34 }
 0x1e3   : > { %1055 = vmatpush1.bf16.msra.mxu0 %v5005_v24  ;;  %1096 = vmatpush1.bf16.msra.mxu1 %v5035_v35 }
 0x1e4   : > { %1056 = vmatprep.subr.bf16.mxu0 %v5011_v26  ;;  %1097 = vmatprep.subr.bf16.mxu1 %v5037_v37 }
 0x1e7   : > { %1057 = vmatpush1.bf16.msra.mxu0 %v5017_v28  ;;  %1098 = vmatpush1.bf16.msra.mxu1 %v5043_v38 }
 0x1e8   : > { %1058 = vmatprep.subr.bf16.mxu0 %v5023_v30  ;;  %1099 = vmatprep.subr.bf16.mxu1 %v5045_v39 }
 0x1eb   : > { %1059 = vmatpush1.bf16.msra.mxu0 %v5027_v32  ;;  %1100 = vmatpush1.bf16.msra.mxu1 %v5051_v40 }
 0x1ec   : > { %1178 = vmatprep.subr.bf16.mxu0 %v4951_v2  ;;  %1219 = vmatprep.subr.bf16.mxu1 %v4970_v13 }
 0x2a1   : > { %v944_v50 = vpop.f32.mrb[4].mxu0  ;;  %v985_v52 = vpop.f32.mrb[12].mxu1 }
 0x2a2   : > { %v996_v53 = vrot.slane %v944_v50, 6  ;;  %v946_v55 = vpop.f32.mrb[5].mxu0  ;;  %v987_v56 = vpop.f32.mrb[13].mxu1  ;;  %v998_v9 = vrot.slane %v985_v52, 6  ;;  %v1028_v52 = vrot.slane %v5106_v46, 6 }
 0x2a3   : > { %v997_v58 = vrot.slane %v946_v55, 6  ;;  %v948_v59 = vpop.f32.mrb[6].mxu0  ;;  %v989_v60 = vpop.f32.mrb[14].mxu1  ;;  %v999_v33 = vrot.slane %v987_v56, 6 }
 0x2a4   : > { %v1004_v61 = vadd.f32 %v996_v53, %v905_v57  ;;  %v949_v63 = vpop.f32.mrb[7].mxu0  ;;  %v990_v0 = vpop.f32.mrb[15].mxu1  ;;  %v1006_v36 = vadd.f32 %v998_v9, %v907_v10 }
 0x2a5   : > { %v1005_v1 = vadd.f32 %v997_v58, %v906_v62  ;;  %v1007_v47 = vadd.f32 %v999_v33, %v908_v41  ;;  %v1036_v41 = vld [vmem:[#allocation5] sm:$0x30] }
 0x2a6   : > { %v3695_v4 = vmul.f32 -1.442695, %v1004_v61  ;;  %v3697_v44 = vmul.f32 -1.442695, %v1006_v36 }
 0x2a7   : > { %v3696_v6 = vmul.f32 -1.442695, %v1005_v1 }
 0x2a8   : > { %4139 = vpow2.f32 %v3695_v4 }
 0x2a9   : > { %4141 = vpow2.f32 %v3696_v6 }
 0x2aa   : > { %4143 = vtanh.f32 %v1007_v47 }
 0x2ab   : > { %4145 = vpow2.f32 %v3697_v44 }
 0x2b2   : > { %v4140_v48 = vpop.eup %4139 }
 0x2b3   : > { %v1017_v49 = vadd.f32 1.0, %v4140_v48  ;;  %v4142_v50 = vpop.eup %4141 }
 0x2b4   : > { %v1018_v53 = vadd.f32 1.0, %v4142_v50  ;;  %v4144_v55 = vpop.eup %4143  ;;  %v1037_v50 = vld [vmem:[#allocation5 + $0x8] sm:$0x30] }
 0x2b5   : > { %4147 = vrcp.f32 %v1017_v49  ;;  %v4146_v57 = vpop.eup %4145 }
 0x2b6   : > { %4149 = vrcp.f32 %v1018_v53  ;;  %v1019_v56 = vadd.f32 1.0, %v4146_v57 }
 0x2b8   : > { %4151 = vrcp.f32 %v1019_v56 }
 0x2bf   : > { %v4148_v58 = vpop.eup %4147 }
 0x2c0   : > { %v1031_v59 = vmul.f32 %v4148_v58, %v4144_v55  ;;  %v4150_v60 = vpop.eup %4149 }
 0x2c1   : > { %v1030_v61 = vmul.f32 %v4150_v60, %v1028_v52 }
 0x2c2   : > { %v4152_v63 = vpop.eup %4151 }
 0x2c3   : > { %v5144_v62 = vadd.f32 %v1031_v59, %v1030_v61  ;;  %v1038_v59 = vld [vmem:[#allocation5 + $0x10] sm:$0x30]  ;;  %v1039_v61 = vld [vmem:[#allocation5 + $0x18] sm:$0x30] }
 0x2c5   : > { %4153 = vtanh.f32 %v5144_v62 }
 0x2cf   : > { %v4154_v0 = vpop.eup %4153 }
 0x2d0   : > { %v1034_v1 = vmul.f32 %v4154_v0, %v4152_v63 }
 0x2d2   : > { %1035 = vst [vmem:[#allocation4] sm:$0xc] %v1034_v1  ;;  %v1040_v4 = vpack.c.bf16 %v1034_v1, %v1034_v1 }
 0x2d4   : > { %v1042_v6 = vrot.slane %v1040_v4, 1 }
 0x2d6   : > { %1077 = vmatmul.mubr.bf16.vlgmr.msra.gmra.mrb[8].mxu0 %v1042_v6  ;;  %1118 = vmatmul.mubr.bf16.vlgmr.msra.gmra.mrb[16].mxu1 %v1042_v6 }
 0x2d7   : > { %1179 = vmatpush1.bf16.msra.mxu0 %v4955_v5  ;;  %1220 = vmatpush1.bf16.msra.mxu1 %v4978_v15 }
 0x2d8   : > { %1180 = vmatprep.subr.bf16.mxu0 %v4959_v7  ;;  %1221 = vmatprep.subr.bf16.mxu1 %v4982_v17 }
 0x2d9   : > { %1210 = vmatprep.mubr.bf16.mxu0 %v4685_v3  ;;  %1251 = vmatprep.mubr.bf16.mxu1 %v4685_v3 }
 0x2db   : > { %1181 = vmatpush1.bf16.msra.mxu0 %v4961_v8  ;;  %1222 = vmatpush1.bf16.msra.mxu1 %v4988_v19 }
 0x2dc   : > { %1182 = vmatprep.subr.bf16.mxu0 %v4965_v11  ;;  %1223 = vmatprep.subr.bf16.mxu1 %v4996_v21 }
 0x2df   : > { %1183 = vmatpush1.bf16.msra.mxu0 %v4967_v12  ;;  %1224 = vmatpush1.bf16.msra.mxu1 %v5003_v23 }
 0x2e0   : > { %1184 = vmatprep.subr.bf16.mxu0 %v4973_v14  ;;  %1225 = vmatprep.subr.bf16.mxu1 %v5007_v25 }
 0x2e3   : > { %1185 = vmatpush1.bf16.msra.mxu0 %v4980_v16  ;;  %1226 = vmatpush1.bf16.msra.mxu1 %v5013_v27 }
 0x2e4   : > { %1186 = vmatprep.subr.bf16.mxu0 %v4985_v18  ;;  %1227 = vmatprep.subr.bf16.mxu1 %v5021_v29 }
 0x2e7   : > { %1187 = vmatpush1.bf16.msra.mxu0 %v4992_v20  ;;  %1228 = vmatpush1.bf16.msra.mxu1 %v5025_v31 }
 0x2e8   : > { %1188 = vmatprep.subr.bf16.mxu0 %v4998_v22  ;;  %1229 = vmatprep.subr.bf16.mxu1 %v5029_v34 }
 0x2eb   : > { %1189 = vmatpush1.bf16.msra.mxu0 %v5005_v24  ;;  %1230 = vmatpush1.bf16.msra.mxu1 %v5035_v35 }
 0x2ec   : > { %1190 = vmatprep.subr.bf16.mxu0 %v5011_v26  ;;  %1231 = vmatprep.subr.bf16.mxu1 %v5037_v37 }
 0x2ef   : > { %1191 = vmatpush1.bf16.msra.mxu0 %v5017_v28  ;;  %1232 = vmatpush1.bf16.msra.mxu1 %v5043_v38 }
 0x2f0   : > { %1192 = vmatprep.subr.bf16.mxu0 %v5023_v30  ;;  %1233 = vmatprep.subr.bf16.mxu1 %v5045_v39 }
 0x2f3   : > { %1193 = vmatpush1.bf16.msra.mxu0 %v5027_v32  ;;  %1234 = vmatpush1.bf16.msra.mxu1 %v5051_v40 }
 0x2f4   : > { %1312 = vmatprep.subr.bf16.mxu0 %v4951_v2  ;;  %1353 = vmatprep.subr.bf16.mxu1 %v4970_v13 }
 0x3a9   : > { %v1078_v46 = vpop.f32.mrb[8].mxu0  ;;  %v1119_v9 = vpop.f32.mrb[16].mxu1 }
 0x3aa   : > { %v1130_v10 = vrot.slane %v1078_v46, 4  ;;  %v1080_v33 = vpop.f32.mrb[9].mxu0  ;;  %v1121_v36 = vpop.f32.mrb[17].mxu1  ;;  %v1132_v2 = vrot.slane %v1119_v9, 4  ;;  %v1162_v9 = vrot.slane %v5144_v62, 6 }
 0x3ab   : > { %v1131_v47 = vrot.slane %v1080_v33, 4  ;;  %v1082_v44 = vpop.f32.mrb[10].mxu0  ;;  %v1123_v48 = vpop.f32.mrb[18].mxu1  ;;  %v1133_v60 = vrot.slane %v1121_v36, 4 }
 0x3ac   : > { %v1138_v49 = vadd.f32 %v1130_v10, %v1036_v41  ;;  %v1083_v53 = vpop.f32.mrb[11].mxu0  ;;  %v1124_v55 = vpop.f32.mrb[19].mxu1  ;;  %v1140_v56 = vadd.f32 %v1132_v2, %v1038_v59  ;;  %v1173_v59 = vld [vmem:[#allocation5 + $0x18] sm:$0xc0] }
 0x3ad   : > { %v1139_v57 = vadd.f32 %v1131_v47, %v1037_v50  ;;  %v1141_v63 = vadd.f32 %v1133_v60, %v1039_v61 }
 0x3ae   : > { %v3698_v58 = vmul.f32 -1.442695, %v1138_v49  ;;  %v3700_v0 = vmul.f32 -1.442695, %v1140_v56 }
 0x3af   : > { %v3699_v52 = vmul.f32 -1.442695, %v1139_v57 }
 0x3b0   : > { %4155 = vpow2.f32 %v3698_v58 }
 0x3b1   : > { %4157 = vpow2.f32 %v3699_v52 }
 0x3b2   : > { %4159 = vtanh.f32 %v1141_v63 }
 0x3b3   : > { %4161 = vpow2.f32 %v3700_v0 }
 0x3ba   : > { %v4156_v1 = vpop.eup %4155 }
 0x3bb   : > { %v1151_v4 = vadd.f32 1.0, %v4156_v1  ;;  %v4158_v6 = vpop.eup %4157 }
 0x3bc   : > { %v1152_v46 = vadd.f32 1.0, %v4158_v6  ;;  %v4160_v10 = vpop.eup %4159 }
 0x3bd   : > { %4163 = vrcp.f32 %v1151_v4  ;;  %v4162_v33 = vpop.eup %4161 }
 0x3be   : > { %4165 = vrcp.f32 %v1152_v46  ;;  %v1153_v36 = vadd.f32 1.0, %v4162_v33 }
 0x3c0   : > { %4167 = vrcp.f32 %v1153_v36 }
 0x3c7   : > { %v4164_v41 = vpop.eup %4163 }
 0x3c8   : > { %v1165_v47 = vmul.f32 %v4164_v41, %v4160_v10  ;;  %v4166_v44 = vpop.eup %4165 }
 0x3c9   : > { %v1164_v48 = vmul.f32 %v4166_v44, %v1162_v9 }
 0x3ca   : > { %v4168_v50 = vpop.eup %4167 }
 0x3cb   : > { %v5182_v49 = vadd.f32 %v1165_v47, %v1164_v48 }
 0x3cd   : > { %4169 = vtanh.f32 %v5182_v49  ;;  %v1296_v10 = vrot.slane %v5182_v49, 6  ;;  %v5228_v49 = vld [vmem:[#allocation9 + $0x8] ss:$16 sps:$4 sm:$0xff]  }
 0x3d7   : > { %v4170_v53 = vpop.eup %4169 }
 0x3d8   : > { %v1168_v55 = vmul.f32 %v4170_v53, %v4168_v50 }
 0x3da   : > { %1169 = vst [vmem:[#allocation4] sm:$0x30] %v1168_v55  ;;  %v1174_v57 = vpack.c.bf16 %v1168_v55, %v1168_v55 }
 0x3dc   : > { %v1176_v58 = vrot.slane %v1174_v57, 2  ;;  %v5225_v57 = vld [vmem:[#allocation9] ss:$16 sps:$4 sm:$0xff]  }
 0x3de   : > { %1211 = vmatmul.mubr.bf16.vlgmr.msra.gmra.mrb[12].mxu0 %v1176_v58  ;;  %1252 = vmatmul.mubr.bf16.vlgmr.msra.gmra.mrb[20].mxu1 %v1176_v58  ;;  %v5231_v58 = vld [vmem:[#allocation9 + $0x24] ss:$16 sps:$4 sm:$0xff]  }
 0x3df   : > { %1313 = vmatpush1.bf16.msra.mxu0 %v4955_v5  ;;  %1354 = vmatpush1.bf16.msra.mxu1 %v4978_v15  ;;  %v5217_v5 = vld [vmem:[#allocation9 + $0x4] ss:$16 sps:$4 sm:$0xff]  }
 0x3e0   : > { %1314 = vmatprep.subr.bf16.mxu0 %v4959_v7  ;;  %1355 = vmatprep.subr.bf16.mxu1 %v4982_v17  ;;  %v1170_v15 = vld [vmem:[#allocation5] sm:$0xc0] }
 0x3e1   : > { %1344 = vmatprep.mubr.bf16.mxu0 %v4685_v3  ;;  %1385 = vmatprep.mubr.bf16.mxu1 %v4685_v3 }
 0x3e3   : > { %1315 = vmatpush1.bf16.msra.mxu0 %v4961_v8  ;;  %1356 = vmatpush1.bf16.msra.mxu1 %v4988_v19 }
 0x3e4   : > { %1316 = vmatprep.subr.bf16.mxu0 %v4965_v11  ;;  %1357 = vmatprep.subr.bf16.mxu1 %v4996_v21 }
 0x3e7   : > { %1317 = vmatpush1.bf16.msra.mxu0 %v4967_v12  ;;  %1358 = vmatpush1.bf16.msra.mxu1 %v5003_v23 }
 0x3e8   : > { %1318 = vmatprep.subr.bf16.mxu0 %v4973_v14  ;;  %1359 = vmatprep.subr.bf16.mxu1 %v5007_v25 }
 0x3eb   : > { %1319 = vmatpush1.bf16.msra.mxu0 %v4980_v16  ;;  %1360 = vmatpush1.bf16.msra.mxu1 %v5013_v27 }
 0x3ec   : > { %1320 = vmatprep.subr.bf16.mxu0 %v4985_v18  ;;  %1361 = vmatprep.subr.bf16.mxu1 %v5021_v29 }
 0x3ef   : > { %1321 = vmatpush1.bf16.msra.mxu0 %v4992_v20  ;;  %1362 = vmatpush1.bf16.msra.mxu1 %v5025_v31  ;;  %v1171_v20 = vld [vmem:[#allocation5 + $0x8] sm:$0xc0] }
 0x3f0   : > { %1322 = vmatprep.subr.bf16.mxu0 %v4998_v22  ;;  %1363 = vmatprep.subr.bf16.mxu1 %v5029_v34 }
 0x3f3   : > { %1323 = vmatpush1.bf16.msra.mxu0 %v5005_v24  ;;  %1364 = vmatpush1.bf16.msra.mxu1 %v5035_v35 }
 0x3f4   : > { %1324 = vmatprep.subr.bf16.mxu0 %v5011_v26  ;;  %1365 = vmatprep.subr.bf16.mxu1 %v5037_v37 }
 0x3f7   : > { %1325 = vmatpush1.bf16.msra.mxu0 %v5017_v28  ;;  %1366 = vmatpush1.bf16.msra.mxu1 %v5043_v38 }
 0x3f8   : > { %1326 = vmatprep.subr.bf16.mxu0 %v5023_v30  ;;  %1367 = vmatprep.subr.bf16.mxu1 %v5045_v39 }
 0x3fb   : > { %1327 = vmatpush1.bf16.msra.mxu0 %v5027_v32  ;;  %1368 = vmatpush1.bf16.msra.mxu1 %v5051_v40 }
 0x3fc   : > { %1431 = vmatprep.subr.bf16.mxu0 %v5217_v5  ;;  %1472 = vmatprep.subr.bf16.mxu1 %v4970_v13  ;;  %v1172_v13 = vld [vmem:[#allocation5 + $0x10] sm:$0xc0] }
 0x4b1   : > { %v1212_v7 = vpop.f32.mrb[12].mxu0  ;;  %v1253_v8 = vpop.f32.mrb[20].mxu1 }
 0x4b2   : > { %v1264_v11 = vrot.slane %v1212_v7, 2  ;;  %v1214_v12 = vpop.f32.mrb[13].mxu0  ;;  %v1255_v14 = vpop.f32.mrb[21].mxu1  ;;  %v1266_v62 = vrot.slane %v1253_v8, 2  ;;  %v5234_v7 = vld [vmem:[#allocation9 + $0x2c] ss:$16 sps:$4 sm:$0xff]  }
 0x4b3   : > { %v1265_v16 = vrot.slane %v1214_v12, 2  ;;  %v1216_v17 = vpop.f32.mrb[14].mxu0  ;;  %v1257_v18 = vpop.f32.mrb[22].mxu1  ;;  %v1267_v52 = vrot.slane %v1255_v14, 2  ;;  %v5239_v8 = vld [vmem:[#allocation9 + $0x20] ss:$16 sps:$4 sm:$0xff]  }
 0x4b4   : > { %v1272_v19 = vadd.f32 %v1264_v11, %v1170_v15  ;;  %v1217_v21 = vpop.f32.mrb[15].mxu0  ;;  %v1258_v22 = vpop.f32.mrb[23].mxu1  ;;  %v1274_v2 = vadd.f32 %v1266_v62, %v1172_v13  ;;  %v5242_v11 = vld [vmem:[#allocation9 + $0x28] ss:$16 sps:$4 sm:$0xff]   ;;  %v5245_v12 = vld [vmem:[#allocation9 + $0x44] ss:$16 sps:$4 sm:$0xff]  }
 0x4b5   : > { %v1273_v24 = vadd.f32 %v1265_v16, %v1171_v20  ;;  %v1275_v60 = vadd.f32 %v1267_v52, %v1173_v59  ;;  %v5248_v14 = vld [vmem:[#allocation9 + $0x4c] ss:$16 sps:$4 sm:$0xff]   ;;  %v5251_v15 = vld [vmem:[#allocation9 + $0x40] ss:$16 sps:$4 sm:$0xff]   ;;  %v5255_v16 = vld [vmem:[#allocation9 + $0x64] ss:$16 sps:$4 sm:$0xff]  }
 0x4b6   : > { %v3701_v26 = vmul.f32 -1.442695, %v1272_v19  ;;  %v3703_v56 = vmul.f32 -1.442695, %v1274_v2  ;;  %v5259_v17 = vld [vmem:[#allocation9 + $0x60] ss:$16 sps:$4 sm:$0xff]  }
 0x4b7   : > { %v3702_v28 = vmul.f32 -1.442695, %v1273_v24  ;;  %v5263_v18 = vld [vmem:[#allocation9 + $0x84] ss:$16 sps:$4 sm:$0xff]   ;;  %v5267_v19 = vld [vmem:[#allocation9 + $0x80] ss:$16 sps:$4 sm:$0xff]  }
 0x4b8   : > { %4171 = vpow2.f32 %v3701_v26  ;;  %v1305_v21 = vld [vmem:[#allocation5 + $0x28] sm:$0x3]  ;;  %v1306_v62 = vld [vmem:[#allocation5 + $0x30] sm:$0x3]  ;;  %v1307_v52 = vld [vmem:[#allocation5 + $0x38] sm:$0x3] }
 0x4b9   : > { %4173 = vpow2.f32 %v3702_v28 }
 0x4ba   : > { %4175 = vtanh.f32 %v1275_v60 }
 0x4bb   : > { %4177 = vpow2.f32 %v3703_v56 }
 0x4c2   : > { %v4172_v61 = vpop.eup %4171 }
 0x4c3   : > { %v1285_v63 = vadd.f32 1.0, %v4172_v61  ;;  %v4174_v0 = vpop.eup %4173 }
 0x4c4   : > { %v1286_v1 = vadd.f32 1.0, %v4174_v0  ;;  %v4176_v4 = vpop.eup %4175 }
 0x4c5   : > { %4179 = vrcp.f32 %v1285_v63  ;;  %v4178_v6 = vpop.eup %4177 }
 0x4c6   : > { %4181 = vrcp.f32 %v1286_v1  ;;  %v1287_v9 = vadd.f32 1.0, %v4178_v6 }
 0x4c8   : > { %4183 = vrcp.f32 %v1287_v9 }
 0x4cf   : > { %v4180_v46 = vpop.eup %4179 }
 0x4d0   : > { %v1299_v33 = vmul.f32 %v4180_v46, %v4176_v4  ;;  %v4182_v41 = vpop.eup %4181 }
 0x4d1   : > { %v1298_v47 = vmul.f32 %v4182_v41, %v1296_v10 }
 0x4d2   : > { %v4184_v36 = vpop.eup %4183 }
 0x4d3   : > { %v5222_v44 = vadd.f32 %v1299_v33, %v1298_v47 }
 0x4d5   : > { %4185 = vtanh.f32 %v5222_v44  ;;  %v1418_v6 = vrot.slane %v5222_v44, 6  ;;  %v5310_v44 = vld [vmem:[#allocation9 + $0x48] ss:$16 sps:$4 sm:$0xff]  }
 0x4df   : > { %v4186_v48 = vpop.eup %4185 }
 0x4e0   : > { %v1302_v50 = vmul.f32 %v4186_v48, %v4184_v36 }
 0x4e2   : > { %1303 = vst [vmem:[#allocation4] sm:$0xc0] %v1302_v50  ;;  %v1308_v53 = vpack.c.bf16 %v1302_v50, %v1302_v50 }
 0x4e4   : > { %v1310_v55 = vrot.slane %v1308_v53, 3  ;;  %v5314_v53 = vld [vmem:[#allocation9 + $0x6c] ss:$16 sps:$4 sm:$0xff]  }
 0x4e6   : > { %1345 = vmatmul.mubr.bf16.vlgmr.msra.gmra.mrb[16].mxu0 %v1310_v55  ;;  %1386 = vmatmul.mubr.bf16.vlgmr.msra.gmra.mrb[24].mxu1 %v1310_v55  ;;  %v5318_v55 = vld [vmem:[#allocation9 + $0x68] ss:$16 sps:$4 sm:$0xff]  }
 0x4e7   : > { %1432 = vmatpush1.bf16.msra.mxu0 %v5225_v57  ;;  %1473 = vmatpush1.bf16.msra.mxu1 %v5228_v49 }
 0x4e8   : > { %1433 = vmatprep.subr.bf16.mxu0 %v5231_v58  ;;  %1474 = vmatprep.subr.bf16.mxu1 %v5234_v7 }
 0x4e9   : > { %1463 = vmatprep.mubr.bf16.mxu0 %v4685_v3  ;;  %1504 = vmatprep.mubr.bf16.mxu1 %v4685_v3 }
 0x4eb   : > { %1434 = vmatpush1.bf16.msra.mxu0 %v5239_v8  ;;  %1475 = vmatpush1.bf16.msra.mxu1 %v5242_v11 }
 0x4ec   : > { %1435 = vmatprep.subr.bf16.mxu0 %v5245_v12  ;;  %1476 = vmatprep.subr.bf16.mxu1 %v5248_v14 }
 0x4ef   : > { %1436 = vmatpush1.bf16.msra.mxu0 %v5251_v15  ;;  %1477 = vmatpush1.bf16.msra.mxu1 %v5003_v23  ;;  %v5271_v23 = vld [vmem:[#allocation9 + $0xa4] ss:$16 sps:$4 sm:$0xff]  }
 0x4f0   : > { %1437 = vmatprep.subr.bf16.mxu0 %v5255_v16  ;;  %1478 = vmatprep.subr.bf16.mxu1 %v5007_v25  ;;  %v5275_v25 = vld [vmem:[#allocation9 + $0xa0] ss:$16 sps:$4 sm:$0xff]  }
 0x4f3   : > { %1438 = vmatpush1.bf16.msra.mxu0 %v5259_v17  ;;  %1479 = vmatpush1.bf16.msra.mxu1 %v5013_v27  ;;  %v5279_v27 = vld [vmem:[#allocation9 + $0xc4] ss:$16 sps:$4 sm:$0xff]  }
 0x4f4   : > { %1439 = vmatprep.subr.bf16.mxu0 %v5263_v18  ;;  %1480 = vmatprep.subr.bf16.mxu1 %v5021_v29  ;;  %v5283_v29 = vld [vmem:[#allocation9 + $0xc0] ss:$16 sps:$4 sm:$0xff]  }
 0x4f7   : > { %1440 = vmatpush1.bf16.msra.mxu0 %v5267_v19  ;;  %1481 = vmatpush1.bf16.msra.mxu1 %v5025_v31  ;;  %v5292_v31 = vld [vmem:[#allocation9 + $0xc] ss:$16 sps:$4 sm:$0xff]  }
 0x4f8   : > { %1441 = vmatprep.subr.bf16.mxu0 %v5271_v23  ;;  %1482 = vmatprep.subr.bf16.mxu1 %v5029_v34  ;;  %v1304_v34 = vld [vmem:[#allocation5 + $0x20] sm:$0x3] }
 0x4fb   : > { %1442 = vmatpush1.bf16.msra.mxu0 %v5275_v25  ;;  %1483 = vmatpush1.bf16.msra.mxu1 %v5035_v35 }
 0x4fc   : > { %1443 = vmatprep.subr.bf16.mxu0 %v5279_v27  ;;  %1484 = vmatprep.subr.bf16.mxu1 %v5037_v37 }
 0x4ff   : > { %1444 = vmatpush1.bf16.msra.mxu0 %v5283_v29  ;;  %1485 = vmatpush1.bf16.msra.mxu1 %v5043_v38 }
 0x500   : > { %1445 = vmatprep.subr.bf16.mxu0 %v5023_v30  ;;  %1486 = vmatprep.subr.bf16.mxu1 %v5045_v39 }
 0x503   : > { %1446 = vmatpush1.bf16.msra.mxu0 %v5027_v32  ;;  %1487 = vmatpush1.bf16.msra.mxu1 %v5051_v40 }
 0x504   : > { %1565 = vmatprep.subr.bf16.mxu0 %v5217_v5  ;;  %1606 = vmatprep.subr.bf16.mxu1 %v5292_v31 }
 0x5b9   : > { %v1346_v35 = vpop.f32.mrb[16].mxu0  ;;  %v1387_v37 = vpop.f32.mrb[24].mxu1 }
 0x5ba   : > { %v1394_v20 = vadd.f32 %v1346_v35, %v1304_v34  ;;  %v1348_v38 = vpop.f32.mrb[17].mxu0  ;;  %v1389_v22 = vpop.f32.mrb[25].mxu1  ;;  %v1396_v13 = vadd.f32 %v1387_v37, %v1306_v62  ;;  %v5322_v34 = vld [vmem:[#allocation9 + $0x8c] ss:$16 sps:$4 sm:$0xff]   ;;  %v5326_v35 = vld [vmem:[#allocation9 + $0x88] ss:$16 sps:$4 sm:$0xff]  }
 0x5bb   : > { %v1395_v30 = vadd.f32 %v1348_v38, %v1305_v21  ;;  %v1350_v24 = vpop.f32.mrb[18].mxu0  ;;  %v1391_v39 = vpop.f32.mrb[26].mxu1  ;;  %v1397_v2 = vadd.f32 %v1389_v22, %v1307_v52  ;;  %v5330_v37 = vld [vmem:[#allocation9 + $0xac] ss:$16 sps:$4 sm:$0xff]   ;;  %v5342_v38 = vld [vmem:[#allocation9 + $0xc8] ss:$16 sps:$4 sm:$0xff]  }
 0x5bc   : > { %v3704_v26 = vmul.f32 -1.442695, %v1394_v20  ;;  %v1351_v32 = vpop.f32.mrb[19].mxu0  ;;  %v1392_v28 = vpop.f32.mrb[27].mxu1  ;;  %v3706_v59 = vmul.f32 -1.442695, %v1396_v13 }
 0x5bd   : > { %v3705_v40 = vmul.f32 -1.442695, %v1395_v30  ;;  %v5334_v20 = vld [vmem:[#allocation9 + $0xa8] ss:$16 sps:$4 sm:$0xff]   ;;  %v5338_v21 = vld [vmem:[#allocation9 + $0xcc] ss:$16 sps:$4 sm:$0xff]  }
 0x5be   : > { %4187 = vpow2.f32 %v3704_v26  ;;  %v5345_v22 = vld [vmem:[#allocation9 + $0xe4] ss:$16 sps:$4 sm:$0xff]   ;;  %v5348_v30 = vld [vmem:[#allocation9 + $0xec] ss:$16 sps:$4 sm:$0xff]   ;;  %v5351_v24 = vld [vmem:[#allocation9 + $0xe0] ss:$16 sps:$4 sm:$0xff]  }
 0x5bf   : > { %4189 = vpow2.f32 %v3705_v40  ;;  %v5354_v39 = vld [vmem:[#allocation9 + $0xe8] ss:$16 sps:$4 sm:$0xff]   ;;  %v1426_v13 = vld [vmem:[#allocation5 + $0x20] sm:$0xc] }
 0x5c0   : > { %4191 = vtanh.f32 %v1397_v2 }
 0x5c1   : > { %4193 = vpow2.f32 %v3706_v59 }
 0x5c8   : > { %v4188_v60 = vpop.eup %4187 }
 0x5c9   : > { %v1407_v56 = vadd.f32 1.0, %v4188_v60  ;;  %v4190_v61 = vpop.eup %4189 }
 0x5ca   : > { %v1408_v63 = vadd.f32 1.0, %v4190_v61  ;;  %v4192_v0 = vpop.eup %4191 }
 0x5cb   : > { %4195 = vrcp.f32 %v1407_v56  ;;  %v4194_v1 = vpop.eup %4193  ;;  %v1427_v56 = vld [vmem:[#allocation5 + $0x28] sm:$0xc] }
 0x5cc   : > { %4197 = vrcp.f32 %v1408_v63  ;;  %v1409_v33 = vadd.f32 1.0, %v4194_v1 }
 0x5ce   : > { %4199 = vrcp.f32 %v1409_v33 }
 0x5d5   : > { %v4196_v4 = vpop.eup %4195 }
 0x5d6   : > { %v1421_v46 = vmul.f32 %v4196_v4, %v4192_v0  ;;  %v4198_v10 = vpop.eup %4197 }
 0x5d7   : > { %v1420_v41 = vmul.f32 %v4198_v10, %v1418_v6  ;;  %v1429_v10 = vld [vmem:[#allocation5 + $0x38] sm:$0xc] }
 0x5d8   : > { %v4200_v47 = vpop.eup %4199 }
 0x5d9   : > { %v5296_v9 = vadd.f32 %v1421_v46, %v1420_v41 }
 0x5db   : > { %4201 = vtanh.f32 %v5296_v9 }
 0x5e5   : > { %v4202_v36 = vpop.eup %4201 }
 0x5e6   : > { %v1424_v48 = vmul.f32 %v4202_v36, %v4200_v47 }
 0x5e8   : > { %1425 = vst [vmem:[#allocation4 + $0x8] sm:$0x3] %v1424_v48  ;;  %v1430_v50 = vpack.c.bf16 %v1424_v48, %v1424_v48 }
 0x5ea   : > { %1464 = vmatmul.mubr.bf16.vlgmr.msra.gmra.mrb[20].mxu0 %v1430_v50  ;;  %1505 = vmatmul.mubr.bf16.vlgmr.msra.gmra.mrb[28].mxu1 %v1430_v50 }
 0x5eb   : > { %1566 = vmatpush1.bf16.msra.mxu0 %v5225_v57  ;;  %1607 = vmatpush1.bf16.msra.mxu1 %v5228_v49 }
 0x5ec   : > { %1567 = vmatprep.subr.bf16.mxu0 %v5231_v58  ;;  %1608 = vmatprep.subr.bf16.mxu1 %v5234_v7 }
 0x5ed   : > { %1597 = vmatprep.mubr.bf16.mxu0 %v4685_v3  ;;  %1638 = vmatprep.mubr.bf16.mxu1 %v4685_v3 }
 0x5ef   : > { %1568 = vmatpush1.bf16.msra.mxu0 %v5239_v8  ;;  %1609 = vmatpush1.bf16.msra.mxu1 %v5242_v11 }
 0x5f0   : > { %1569 = vmatprep.subr.bf16.mxu0 %v5245_v12  ;;  %1610 = vmatprep.subr.bf16.mxu1 %v5248_v14 }
 0x5f3   : > { %1570 = vmatpush1.bf16.msra.mxu0 %v5251_v15  ;;  %1611 = vmatpush1.bf16.msra.mxu1 %v5310_v44 }
 0x5f4   : > { %1571 = vmatprep.subr.bf16.mxu0 %v5255_v16  ;;  %1612 = vmatprep.subr.bf16.mxu1 %v5314_v53 }
 0x5f7   : > { %1572 = vmatpush1.bf16.msra.mxu0 %v5259_v17  ;;  %1613 = vmatpush1.bf16.msra.mxu1 %v5318_v55 }
 0x5f8   : > { %1573 = vmatprep.subr.bf16.mxu0 %v5263_v18  ;;  %1614 = vmatprep.subr.bf16.mxu1 %v5322_v34 }
 0x5fb   : > { %1574 = vmatpush1.bf16.msra.mxu0 %v5267_v19  ;;  %1615 = vmatpush1.bf16.msra.mxu1 %v5326_v35 }
 0x5fc   : > { %1575 = vmatprep.subr.bf16.mxu0 %v5271_v23  ;;  %1616 = vmatprep.subr.bf16.mxu1 %v5330_v37 }
 0x5ff   : > { %1576 = vmatpush1.bf16.msra.mxu0 %v5275_v25  ;;  %1617 = vmatpush1.bf16.msra.mxu1 %v5334_v20 }
 0x600   : > { %1577 = vmatprep.subr.bf16.mxu0 %v5279_v27  ;;  %1618 = vmatprep.subr.bf16.mxu1 %v5338_v21 }
 0x603   : > { %1578 = vmatpush1.bf16.msra.mxu0 %v5283_v29  ;;  %1619 = vmatpush1.bf16.msra.mxu1 %v5342_v38 }
 0x604   : > { %1579 = vmatprep.subr.bf16.mxu0 %v5345_v22  ;;  %1620 = vmatprep.subr.bf16.mxu1 %v5348_v30 }
 0x607   : > { %1580 = vmatpush1.bf16.msra.mxu0 %v5351_v24  ;;  %1621 = vmatpush1.bf16.msra.mxu1 %v5354_v39 }
 0x608   : > { %1699 = vmatprep.subr.bf16.mxu0 %v5217_v5  ;;  %1740 = vmatprep.subr.bf16.mxu1 %v5292_v31  ;;  %v1428_v31 = vld [vmem:[#allocation5 + $0x30] sm:$0xc] }
 0x6bd   : > { %v1465_v26 = vpop.f32.mrb[20].mxu0  ;;  %v1506_v32 = vpop.f32.mrb[28].mxu1 }
 0x6be   : > { %v1517_v28 = vrot.slane %v1465_v26, 6  ;;  %v1467_v40 = vpop.f32.mrb[21].mxu0  ;;  %v1508_v62 = vpop.f32.mrb[29].mxu1  ;;  %v1519_v5 = vrot.slane %v1506_v32, 6  ;;  %v1549_v32 = vrot.slane %v5296_v9, 6 }
 0x6bf   : > { %v1518_v52 = vrot.slane %v1467_v40, 6  ;;  %v1469_v2 = vpop.f32.mrb[22].mxu0  ;;  %v1510_v59 = vpop.f32.mrb[30].mxu1  ;;  %v1520_v6 = vrot.slane %v1508_v62, 6  ;;  %v1559_v9 = vld [vmem:[#allocation5 + $0x30] sm:$0x30] }
 0x6c0   : > { %v1525_v60 = vadd.f32 %v1517_v28, %v1426_v13  ;;  %v1470_v61 = vpop.f32.mrb[23].mxu0  ;;  %v1511_v63 = vpop.f32.mrb[31].mxu1  ;;  %v1527_v46 = vadd.f32 %v1519_v5, %v1428_v31 }
 0x6c1   : > { %v1526_v0 = vadd.f32 %v1518_v52, %v1427_v56  ;;  %v1528_v33 = vadd.f32 %v1520_v6, %v1429_v10 }
 0x6c2   : > { %v3707_v1 = vmul.f32 -1.442695, %v1525_v60  ;;  %v3709_v41 = vmul.f32 -1.442695, %v1527_v46 }
 0x6c3   : > { %v3708_v4 = vmul.f32 -1.442695, %v1526_v0 }
 0x6c4   : > { %4203 = vpow2.f32 %v3707_v1 }
 0x6c5   : > { %4205 = vpow2.f32 %v3708_v4 }
 0x6c6   : > { %4207 = vtanh.f32 %v1528_v33 }
 0x6c7   : > { %4209 = vpow2.f32 %v3709_v41 }
 0x6ce   : > { %v4204_v47 = vpop.eup %4203 }
 0x6cf   : > { %v1538_v36 = vadd.f32 1.0, %v4204_v47  ;;  %v4206_v48 = vpop.eup %4205 }
 0x6d0   : > { %v1539_v50 = vadd.f32 1.0, %v4206_v48  ;;  %v4208_v26 = vpop.eup %4207  ;;  %v4024_v48 = vld [vmem:[#allocation11 + $0xc] ss:$16 sps:$4 sm:$0xff]  }
 0x6d1   : > { %4211 = vrcp.f32 %v1538_v36  ;;  %v4210_v28 = vpop.eup %4209  ;;  %v4021_v36 = vld [vmem:[#allocation11 + $0x4] ss:$16 sps:$4 sm:$0xff]  }
 0x6d2   : > { %4213 = vrcp.f32 %v1539_v50  ;;  %v1540_v62 = vadd.f32 1.0, %v4210_v28  ;;  %v4019_v50 = vld [vmem:[#allocation11] ss:$16 sps:$4 sm:$0xff]   ;;  %v4027_v28 = vld [vmem:[#allocation11 + $0x24] ss:$16 sps:$4 sm:$0xff]  }
 0x6d4   : > { %4215 = vrcp.f32 %v1540_v62  ;;  %v4036_v62 = vld [vmem:[#allocation11 + $0x4c] ss:$16 sps:$4 sm:$0xff]  }
 0x6db   : > { %v4212_v40 = vpop.eup %4211 }
 0x6dc   : > { %v1552_v13 = vmul.f32 %v4212_v40, %v4208_v26  ;;  %v4214_v52 = vpop.eup %4213  ;;  %v4022_v26 = vld [vmem:[#allocation11 + $0x8] ss:$16 sps:$4 sm:$0xff]   ;;  %v4030_v40 = vld [vmem:[#allocation11 + $0x2c] ss:$16 sps:$4 sm:$0xff]  }
 0x6dd   : > { %v1551_v2 = vmul.f32 %v4214_v52, %v1549_v32  ;;  %v4025_v32 = vld [vmem:[#allocation11 + $0x20] ss:$16 sps:$4 sm:$0xff]   ;;  %v4033_v52 = vld [vmem:[#allocation11 + $0x44] ss:$16 sps:$4 sm:$0xff]  }
 0x6de   : > { %v4216_v60 = vpop.eup %4215 }
 0x6df   : > { %v5360_v59 = vadd.f32 %v1552_v13, %v1551_v2  ;;  %v4028_v13 = vld [vmem:[#allocation11 + $0x28] ss:$16 sps:$4 sm:$0xff]   ;;  %v4031_v2 = vld [vmem:[#allocation11 + $0x40] ss:$16 sps:$4 sm:$0xff]  }
 0x6e1   : > { %4217 = vtanh.f32 %v5360_v59 }
 0x6eb   : > { %v4218_v56 = vpop.eup %4217 }
 0x6ec   : > { %v1555_v61 = vmul.f32 %v4218_v56, %v4216_v60  ;;  %v4039_v60 = vld [vmem:[#allocation11 + $0x64] ss:$16 sps:$4 sm:$0xff]   ;;  %v4042_v56 = vld [vmem:[#allocation11 + $0x6c] ss:$16 sps:$4 sm:$0xff]  }
 0x6ee   : > { %1556 = vst [vmem:[#allocation4 + $0x8] sm:$0xc] %v1555_v61  ;;  %v1561_v63 = vpack.c.bf16 %v1555_v61, %v1555_v61  ;;  %v4037_v61 = vld [vmem:[#allocation11 + $0x60] ss:$16 sps:$4 sm:$0xff]  }
 0x6f0   : > { %v1563_v0 = vrot.slane %v1561_v63, 1  ;;  %v4040_v63 = vld [vmem:[#allocation11 + $0x68] ss:$16 sps:$4 sm:$0xff]  }
 0x6f2   : > { %1598 = vmatmul.mubr.bf16.vlgmr.msra.gmra.mrb[24].mxu0 %v1563_v0  ;;  %1639 = vmatmul.mubr.bf16.vlgmr.msra.gmra.mrb[32].mxu1 %v1563_v0  ;;  %v4045_v0 = vld [vmem:[#allocation11 + $0x84] ss:$16 sps:$4 sm:$0xff]  }
 0x6f3   : > { %1700 = vmatpush1.bf16.msra.mxu0 %v5225_v57  ;;  %1741 = vmatpush1.bf16.msra.mxu1 %v5228_v49 }
 0x6f4   : > { %1701 = vmatprep.subr.bf16.mxu0 %v5231_v58  ;;  %1742 = vmatprep.subr.bf16.mxu1 %v5234_v7 }
 0x6f5   : > { %1731 = vmatprep.mubr.bf16.mxu0 %v4685_v3  ;;  %1772 = vmatprep.mubr.bf16.mxu1 %v4685_v3 }
 0x6f7   : > { %1702 = vmatpush1.bf16.msra.mxu0 %v5239_v8  ;;  %1743 = vmatpush1.bf16.msra.mxu1 %v5242_v11  ;;  %v1557_v11 = vld [vmem:[#allocation5 + $0x20] sm:$0x30] }
 0x6f8   : > { %1703 = vmatprep.subr.bf16.mxu0 %v5245_v12  ;;  %1744 = vmatprep.subr.bf16.mxu1 %v5248_v14 }
 0x6fb   : > { %1704 = vmatpush1.bf16.msra.mxu0 %v5251_v15  ;;  %1745 = vmatpush1.bf16.msra.mxu1 %v5310_v44 }
 0x6fc   : > { %1705 = vmatprep.subr.bf16.mxu0 %v5255_v16  ;;  %1746 = vmatprep.subr.bf16.mxu1 %v5314_v53 }
 0x6ff   : > { %1706 = vmatpush1.bf16.msra.mxu0 %v5259_v17  ;;  %1747 = vmatpush1.bf16.msra.mxu1 %v5318_v55  ;;  %v1558_v17 = vld [vmem:[#allocation5 + $0x28] sm:$0x30]  ;;  %v1560_v55 = vld [vmem:[#allocation5 + $0x38] sm:$0x30] }
 0x700   : > { %1707 = vmatprep.subr.bf16.mxu0 %v5263_v18  ;;  %1748 = vmatprep.subr.bf16.mxu1 %v5322_v34 }
 0x703   : > { %1708 = vmatpush1.bf16.msra.mxu0 %v5267_v19  ;;  %1749 = vmatpush1.bf16.msra.mxu1 %v5326_v35 }
 0x704   : > { %1709 = vmatprep.subr.bf16.mxu0 %v5271_v23  ;;  %1750 = vmatprep.subr.bf16.mxu1 %v5330_v37 }
 0x707   : > { %1710 = vmatpush1.bf16.msra.mxu0 %v5275_v25  ;;  %1751 = vmatpush1.bf16.msra.mxu1 %v5334_v20 }
 0x708   : > { %1711 = vmatprep.subr.bf16.mxu0 %v5279_v27  ;;  %1752 = vmatprep.subr.bf16.mxu1 %v5338_v21 }
 0x70b   : > { %1712 = vmatpush1.bf16.msra.mxu0 %v5283_v29  ;;  %1753 = vmatpush1.bf16.msra.mxu1 %v5342_v38 }
 0x70c   : > { %1713 = vmatprep.subr.bf16.mxu0 %v5345_v22  ;;  %1754 = vmatprep.subr.bf16.mxu1 %v5348_v30 }
 0x70f   : > { %1714 = vmatpush1.bf16.msra.mxu0 %v5351_v24  ;;  %1755 = vmatpush1.bf16.msra.mxu1 %v5354_v39  ;;  %v1683_v39 = vrot.slane %v5360_v59, 6  ;;  %v4034_v59 = vld [vmem:[#allocation11 + $0x48] ss:$16 sps:$4 sm:$0xff]  }
 0x710   : > { %2076 = vmatprep.subr.bf16.mxu0 %v4021_v36  ;;  %2119 = vmatprep.subr.bf16.mxu1 %v4024_v48 }
 0x7c5   : > { %v1599_v57 = vpop.f32.mrb[24].mxu0  ;;  %v1640_v49 = vpop.f32.mrb[32].mxu1 }
 0x7c6   : > { %v1651_v58 = vrot.slane %v1599_v57, 4  ;;  %v1601_v7 = vpop.f32.mrb[25].mxu0  ;;  %v1642_v8 = vpop.f32.mrb[33].mxu1  ;;  %v1653_v29 = vrot.slane %v1640_v49, 4  ;;  %v4048_v57 = vld [vmem:[#allocation11 + $0x8c] ss:$16 sps:$4 sm:$0xff]  }
 0x7c7   : > { %v1652_v12 = vrot.slane %v1601_v7, 4  ;;  %v1603_v14 = vpop.f32.mrb[26].mxu0  ;;  %v1644_v15 = vpop.f32.mrb[34].mxu1  ;;  %v1654_v44 = vrot.slane %v1642_v8, 4  ;;  %v4043_v49 = vld [vmem:[#allocation11 + $0x80] ss:$16 sps:$4 sm:$0xff]  }
 0x7c8   : > { %v1659_v16 = vadd.f32 %v1651_v58, %v1557_v11  ;;  %v1604_v18 = vpop.f32.mrb[27].mxu0  ;;  %v1645_v19 = vpop.f32.mrb[35].mxu1  ;;  %v1661_v53 = vadd.f32 %v1653_v29, %v1559_v9  ;;  %v4046_v58 = vld [vmem:[#allocation11 + $0x88] ss:$16 sps:$4 sm:$0xff]   ;;  %v4051_v7 = vld [vmem:[#allocation11 + $0xa4] ss:$16 sps:$4 sm:$0xff]  }
 0x7c9   : > { %v1660_v23 = vadd.f32 %v1652_v12, %v1558_v17  ;;  %v1662_v34 = vadd.f32 %v1654_v44, %v1560_v55  ;;  %v4054_v8 = vld [vmem:[#allocation11 + $0xac] ss:$16 sps:$4 sm:$0xff]   ;;  %v4049_v11 = vld [vmem:[#allocation11 + $0xa0] ss:$16 sps:$4 sm:$0xff]   ;;  %v4052_v12 = vld [vmem:[#allocation11 + $0xa8] ss:$16 sps:$4 sm:$0xff]  }
 0x7ca   : > { %v3710_v25 = vmul.f32 -1.442695, %v1659_v16  ;;  %v3712_v35 = vmul.f32 -1.442695, %v1661_v53  ;;  %v4057_v14 = vld [vmem:[#allocation11 + $0xc4] ss:$16 sps:$4 sm:$0xff]  }
 0x7cb   : > { %v3711_v27 = vmul.f32 -1.442695, %v1660_v23  ;;  %v4060_v15 = vld [vmem:[#allocation11 + $0xcc] ss:$16 sps:$4 sm:$0xff]   ;;  %v4055_v16 = vld [vmem:[#allocation11 + $0xc0] ss:$16 sps:$4 sm:$0xff]  }
 0x7cc   : > { %4219 = vpow2.f32 %v3710_v25  ;;  %v4058_v17 = vld [vmem:[#allocation11 + $0xc8] ss:$16 sps:$4 sm:$0xff]   ;;  %v4063_v18 = vld [vmem:[#allocation11 + $0xe4] ss:$16 sps:$4 sm:$0xff]   ;;  %v4066_v19 = vld [vmem:[#allocation11 + $0xec] ss:$16 sps:$4 sm:$0xff]  }
 0x7cd   : > { %4221 = vpow2.f32 %v3711_v27  ;;  %v4061_v23 = vld [vmem:[#allocation11 + $0xe0] ss:$16 sps:$4 sm:$0xff]   ;;  %v4064_v25 = vld [vmem:[#allocation11 + $0xe8] ss:$16 sps:$4 sm:$0xff]   ;;  %v5401_v27 = vld [vmem:[#allocation12 + $0x4] ss:$16 sps:$4 sm:$0xff]  }
 0x7ce   : > { %4223 = vtanh.f32 %v1662_v34  ;;  %v5403_v29 = vld [vmem:[#allocation12 + $0xc] ss:$16 sps:$4 sm:$0xff]  }
 0x7cf   : > { %4225 = vpow2.f32 %v3712_v35  ;;  %v1691_v35 = vld [vmem:[#allocation5 + $0x20] sm:$0xc0] }
 0x7d6   : > { %v4220_v37 = vpop.eup %4219 }
 0x7d7   : > { %v1672_v20 = vadd.f32 1.0, %v4220_v37  ;;  %v4222_v21 = vpop.eup %4221 }
 0x7d8   : > { %v1673_v38 = vadd.f32 1.0, %v4222_v21  ;;  %v4224_v22 = vpop.eup %4223 }
 0x7d9   : > { %4227 = vrcp.f32 %v1672_v20  ;;  %v4226_v30 = vpop.eup %4225 }
 0x7da   : > { %4229 = vrcp.f32 %v1673_v38  ;;  %v1674_v5 = vadd.f32 1.0, %v4226_v30 }
 0x7dc   : > { %4231 = vrcp.f32 %v1674_v5 }
 0x7e3   : > { %v4228_v24 = vpop.eup %4227 }
 0x7e4   : > { %v1686_v1 = vmul.f32 %v4228_v24, %v4224_v22  ;;  %v4230_v4 = vpop.eup %4229  ;;  %v1692_v22 = vld [vmem:[#allocation5 + $0x28] sm:$0xc0] }
 0x7e5   : > { %v1685_v31 = vmul.f32 %v4230_v4, %v1683_v39 }
 0x7e6   : > { %v4232_v46 = vpop.eup %4231 }
 0x7e7   : > { %v5396_v6 = vadd.f32 %v1686_v1, %v1685_v31  ;;  %v1693_v31 = vld [vmem:[#allocation5 + $0x30] sm:$0xc0] }
 0x7e9   : > { %4233 = vtanh.f32 %v5396_v6 }
 0x7f3   : > { %v4234_v10 = vpop.eup %4233 }
 0x7f4   : > { %v1689_v33 = vmul.f32 %v4234_v10, %v4232_v46 }
 0x7f6   : > { %1690 = vst [vmem:[#allocation4 + $0x8] sm:$0x30] %v1689_v33  ;;  %v1695_v41 = vpack.c.bf16 %v1689_v33, %v1689_v33  ;;  %v1694_v33 = vld [vmem:[#allocation5 + $0x38] sm:$0xc0] }
 0x7f8   : > { %v1697_v47 = vrot.slane %v1695_v41, 2 }
 0x7fa   : > { %1732 = vmatmul.mubr.bf16.vlgmr.msra.gmra.mrb[28].mxu0 %v1697_v47  ;;  %1773 = vmatmul.mubr.bf16.vlgmr.msra.gmra.mrb[36].mxu1 %v1697_v47 }
 0x7fb   : > { %2108 = vmatprep.mubr.bf16.mxu0 %v4685_v3  ;;  %2151 = vmatprep.mubr.bf16.mxu1 %v4685_v3 }
 0x7fc   : > { %2077 = vmatpush1.bf16.msra.mxu0 %v4019_v50  ;;  %2120 = vmatpush1.bf16.msra.mxu1 %v4022_v26 }
 0x7fd   : > { %2078 = vmatprep.subr.bf16.mxu0 %v4027_v28  ;;  %2121 = vmatprep.subr.bf16.mxu1 %v4030_v40 }
 0x800   : > { %2079 = vmatpush1.bf16.msra.mxu0 %v4025_v32  ;;  %2122 = vmatpush1.bf16.msra.mxu1 %v4028_v13  ;;  %v1817_v13 = vrot.slane %v5396_v6, 6 }
 0x801   : > { %2080 = vmatprep.subr.bf16.mxu0 %v4033_v52  ;;  %2123 = vmatprep.subr.bf16.mxu1 %v4036_v62 }
 0x804   : > { %2081 = vmatpush1.bf16.msra.mxu0 %v4031_v2  ;;  %2124 = vmatpush1.bf16.msra.mxu1 %v4034_v59 }
 0x805   : > { %2082 = vmatprep.subr.bf16.mxu0 %v4039_v60  ;;  %2125 = vmatprep.subr.bf16.mxu1 %v4042_v56 }
 0x808   : > { %2083 = vmatpush1.bf16.msra.mxu0 %v4037_v61  ;;  %2126 = vmatpush1.bf16.msra.mxu1 %v4040_v63 }
 0x809   : > { %2084 = vmatprep.subr.bf16.mxu0 %v4045_v0  ;;  %2127 = vmatprep.subr.bf16.mxu1 %v4048_v57  ;;  %v1892_v0 = vld [vmem:[#allocation4] sm:$0xff] }
 0x80c   : > { %2085 = vmatpush1.bf16.msra.mxu0 %v4043_v49  ;;  %2128 = vmatpush1.bf16.msra.mxu1 %v4046_v58  ;;  %v5408_v49 = vld [vmem:[#allocation12] ss:$16 sps:$4 sm:$0xff]   ;;  %v5410_v58 = vld [vmem:[#allocation12 + $0x8] ss:$16 sps:$4 sm:$0xff]  }
 0x80d   : > { %2086 = vmatprep.subr.bf16.mxu0 %v4051_v7  ;;  %2129 = vmatprep.subr.bf16.mxu1 %v4054_v8  ;;  %v5412_v7 = vld [vmem:[#allocation12 + $0x24] ss:$16 sps:$4 sm:$0xff]   ;;  %v5414_v8 = vld [vmem:[#allocation12 + $0x2c] ss:$16 sps:$4 sm:$0xff]  }
 0x810   : > { %2087 = vmatpush1.bf16.msra.mxu0 %v4049_v11  ;;  %2130 = vmatpush1.bf16.msra.mxu1 %v4052_v12  ;;  %v5418_v11 = vld [vmem:[#allocation12 + $0x20] ss:$16 sps:$4 sm:$0xff]   ;;  %v5420_v12 = vld [vmem:[#allocation12 + $0x28] ss:$16 sps:$4 sm:$0xff]  }
 0x811   : > { %2088 = vmatprep.subr.bf16.mxu0 %v4057_v14  ;;  %2131 = vmatprep.subr.bf16.mxu1 %v4060_v15  ;;  %v5424_v14 = vld [vmem:[#allocation12 + $0x44] ss:$16 sps:$4 sm:$0xff]   ;;  %v5426_v15 = vld [vmem:[#allocation12 + $0x4c] ss:$16 sps:$4 sm:$0xff]  }
 0x814   : > { %2089 = vmatpush1.bf16.msra.mxu0 %v4055_v16  ;;  %2132 = vmatpush1.bf16.msra.mxu1 %v4058_v17  ;;  %v5432_v16 = vld [vmem:[#allocation12 + $0x40] ss:$16 sps:$4 sm:$0xff]   ;;  %v5434_v17 = vld [vmem:[#allocation12 + $0x48] ss:$16 sps:$4 sm:$0xff]  }
 0x815   : > { %2090 = vmatprep.subr.bf16.mxu0 %v4063_v18  ;;  %2133 = vmatprep.subr.bf16.mxu1 %v4066_v19  ;;  %v5438_v18 = vld [vmem:[#allocation12 + $0x64] ss:$16 sps:$4 sm:$0xff]   ;;  %v5440_v19 = vld [vmem:[#allocation12 + $0x6c] ss:$16 sps:$4 sm:$0xff]  }
 0x818   : > { %2091 = vmatpush1.bf16.msra.mxu0 %v4061_v23  ;;  %2134 = vmatpush1.bf16.msra.mxu1 %v4064_v25  ;;  %v5444_v23 = vld [vmem:[#allocation12 + $0x60] ss:$16 sps:$4 sm:$0xff]   ;;  %v5446_v25 = vld [vmem:[#allocation12 + $0x68] ss:$16 sps:$4 sm:$0xff]  }
 0x819   : > { %2339 = vmatprep.subr.bf16.mxu0 %v5401_v27  ;;  %2380 = vmatprep.subr.bf16.mxu1 %v5403_v29 }
 0x8cd   : > { %v1733_v9 = vpop.f32.mrb[28].mxu0  ;;  %v1774_v44 = vpop.f32.mrb[36].mxu1 }
 0x8ce   : > { %v1785_v53 = vrot.slane %v1733_v9, 2  ;;  %v1735_v55 = vpop.f32.mrb[29].mxu0  ;;  %v1776_v34 = vpop.f32.mrb[37].mxu1  ;;  %v1787_v5 = vrot.slane %v1774_v44, 2  ;;  %v5450_v9 = vld [vmem:[#allocation12 + $0x84] ss:$16 sps:$4 sm:$0xff]  }
 0x8cf   : > { %v1786_v37 = vrot.slane %v1735_v55, 2  ;;  %v1737_v20 = vpop.f32.mrb[30].mxu0  ;;  %v1778_v21 = vpop.f32.mrb[38].mxu1  ;;  %v1788_v46 = vrot.slane %v1776_v34, 2  ;;  %v5452_v44 = vld [vmem:[#allocation12 + $0x8c] ss:$16 sps:$4 sm:$0xff]  }
 0x8d0   : > { %v1793_v38 = vadd.f32 %v1785_v53, %v1691_v35  ;;  %v1738_v30 = vpop.f32.mrb[31].mxu0  ;;  %v1779_v24 = vpop.f32.mrb[39].mxu1  ;;  %v1795_v10 = vadd.f32 %v1787_v5, %v1693_v31  ;;  %v5456_v53 = vld [vmem:[#allocation12 + $0x80] ss:$16 sps:$4 sm:$0xff]   ;;  %v5458_v55 = vld [vmem:[#allocation12 + $0x88] ss:$16 sps:$4 sm:$0xff]  }
 0x8d1   : > { %v1794_v39 = vadd.f32 %v1786_v37, %v1692_v22  ;;  %v1796_v41 = vadd.f32 %v1788_v46, %v1694_v33  ;;  %v5462_v34 = vld [vmem:[#allocation12 + $0xa4] ss:$16 sps:$4 sm:$0xff]   ;;  %v5464_v35 = vld [vmem:[#allocation12 + $0xac] ss:$16 sps:$4 sm:$0xff]   ;;  %v5468_v37 = vld [vmem:[#allocation12 + $0xa0] ss:$16 sps:$4 sm:$0xff]  }
 0x8d2   : > { %v3713_v1 = vmul.f32 -1.442695, %v1793_v38  ;;  %v3715_v47 = vmul.f32 -1.442695, %v1795_v10  ;;  %v5470_v20 = vld [vmem:[#allocation12 + $0xa8] ss:$16 sps:$4 sm:$0xff]  }
 0x8d3   : > { %v3714_v4 = vmul.f32 -1.442695, %v1794_v39  ;;  %v5474_v21 = vld [vmem:[#allocation12 + $0xc4] ss:$16 sps:$4 sm:$0xff]   ;;  %v5476_v38 = vld [vmem:[#allocation12 + $0xcc] ss:$16 sps:$4 sm:$0xff]  }
 0x8d4   : > { %4235 = vpow2.f32 %v3713_v1  ;;  %v5480_v22 = vld [vmem:[#allocation12 + $0xc0] ss:$16 sps:$4 sm:$0xff]   ;;  %v5482_v30 = vld [vmem:[#allocation12 + $0xc8] ss:$16 sps:$4 sm:$0xff]   ;;  %v5486_v24 = vld [vmem:[#allocation12 + $0xe4] ss:$16 sps:$4 sm:$0xff]  }
 0x8d5   : > { %4237 = vpow2.f32 %v3714_v4  ;;  %v5488_v39 = vld [vmem:[#allocation12 + $0xec] ss:$16 sps:$4 sm:$0xff]   ;;  %v5492_v1 = vld [vmem:[#allocation12 + $0xe0] ss:$16 sps:$4 sm:$0xff]   ;;  %v5494_v4 = vld [vmem:[#allocation12 + $0xe8] ss:$16 sps:$4 sm:$0xff]  }
 0x8d6   : > { %4239 = vtanh.f32 %v1796_v41  ;;  %v2171_v5 = vld [vmem:[#allocation2 + $0x2] sm:$0x3]  ;;  %v1891_v46 = vld [vmem:[%s5843_s6] sm:$0xf] }
 0x8d7   : > { %4241 = vpow2.f32 %v3715_v47  ;;  %v2178_v31 = vpack.c.bf16 %v2171_v5, %v2171_v5  ;;  %v1899_v10 = vrot.slane %v1891_v46, %v486_v43  ;;  %v1907_v33 = vrot.slane %v1891_v46, %v494_v51 }
 0x8d8   : > { %v1903_v41 = vrot.slane %v1891_v46, %v490_v45  ;;  %v1911_v47 = vrot.slane %v1891_v46, %v498_v54 }
 0x8de   : > { %v4236_v36 = vpop.eup %4235 }
 0x8df   : > { %v1806_v48 = vadd.f32 1.0, %v4236_v36  ;;  %v4238_v50 = vpop.eup %4237 }
 0x8e0   : > { %v1807_v26 = vadd.f32 1.0, %v4238_v50  ;;  %v4240_v28 = vpop.eup %4239 }
 0x8e1   : > { %4243 = vrcp.f32 %v1806_v48  ;;  %v4242_v40 = vpop.eup %4241 }
 0x8e2   : > { %4245 = vrcp.f32 %v1807_v26  ;;  %v1808_v2 = vadd.f32 1.0, %v4242_v40 }
 0x8e4   : > { %4247 = vrcp.f32 %v1808_v2 }
 0x8eb   : > { %v4244_v32 = vpop.eup %4243 }
 0x8ec   : > { %v1820_v52 = vmul.f32 %v4244_v32, %v4240_v28  ;;  %v4246_v62 = vpop.eup %4245 }
 0x8ed   : > { %v1819_v59 = vmul.f32 %v4246_v62, %v1817_v13 }
 0x8ee   : > { %v4248_v56 = vpop.eup %4247 }
 0x8ef   : > { %v1821_v60 = vadd.f32 %v1820_v52, %v1819_v59 }
 0x8f1   : > { %4249 = vtanh.f32 %v1821_v60  ;;  %1826 = vst [vmem:[#allocation3 - $0x6] sm:$0xc0] %v1821_v60 }
 0x8fb   : > { %v4250_v61 = vpop.eup %4249 }
 0x8fc   : > { %v1823_v63 = vmul.f32 %v4250_v61, %v4248_v56 }
 0x8fe   : > { %1824 = vst [vmem:[#allocation4 + $0x8] sm:$0xc0] %v1823_v63  ;;  %1825 = vst [vmem:[#allocation2 - $0x6] sm:$0xc0] %v1823_v63 }
 0x905   : > { %v1893_v57 = vld [vmem:[#allocation4 + $0x8] sm:$0xff] }
 0x906   : > { %v1894_v6 = vpack.c.bf16 %v1893_v57, %v1892_v0 }
 0x908   : > { %2109 = vmatmul.mubr.bf16.vlgmr.msra.gmra.mrb[32].mxu0 %v1894_v6  ;;  %2152 = vmatmul.mubr.bf16.vlgmr.msra.gmra.mrb[40].mxu1 %v1894_v6 }
 0x909   : > { %2340 = vmatpush1.bf16.msra.mxu0 %v5408_v49  ;;  %2381 = vmatpush1.bf16.msra.mxu1 %v5410_v58 }
 0x90a   : > { %2341 = vmatprep.subr.bf16.mxu0 %v5412_v7  ;;  %2382 = vmatprep.subr.bf16.mxu1 %v5414_v8 }
 0x90b   : > { %2371 = vmatprep.mubr.bf16.mxu0 %v4685_v3  ;;  %2412 = vmatprep.mubr.bf16.mxu1 %v4685_v3 }
 0x90d   : > { %2342 = vmatpush1.bf16.msra.mxu0 %v5418_v11  ;;  %2383 = vmatpush1.bf16.msra.mxu1 %v5420_v12 }
 0x90e   : > { %2343 = vmatprep.subr.bf16.mxu0 %v5424_v14  ;;  %2384 = vmatprep.subr.bf16.mxu1 %v5426_v15 }
 0x911   : > { %2344 = vmatpush1.bf16.msra.mxu0 %v5432_v16  ;;  %2385 = vmatpush1.bf16.msra.mxu1 %v5434_v17 }
 0x912   : > { %2345 = vmatprep.subr.bf16.mxu0 %v5438_v18  ;;  %2386 = vmatprep.subr.bf16.mxu1 %v5440_v19 }
 0x915   : > { %2346 = vmatpush1.bf16.msra.mxu0 %v5444_v23  ;;  %2387 = vmatpush1.bf16.msra.mxu1 %v5446_v25 }
 0x916   : > { %2347 = vmatprep.subr.bf16.mxu0 %v5450_v9  ;;  %2388 = vmatprep.subr.bf16.mxu1 %v5452_v44 }
 0x919   : > { %2348 = vmatpush1.bf16.msra.mxu0 %v5456_v53  ;;  %2389 = vmatpush1.bf16.msra.mxu1 %v5458_v55 }
 0x91a   : > { %2349 = vmatprep.subr.bf16.mxu0 %v5462_v34  ;;  %2390 = vmatprep.subr.bf16.mxu1 %v5464_v35 }
 0x91d   : > { %2350 = vmatpush1.bf16.msra.mxu0 %v5468_v37  ;;  %2391 = vmatpush1.bf16.msra.mxu1 %v5470_v20 }
 0x91e   : > { %2351 = vmatprep.subr.bf16.mxu0 %v5474_v21  ;;  %2392 = vmatprep.subr.bf16.mxu1 %v5476_v38 }
 0x921   : > { %2352 = vmatpush1.bf16.msra.mxu0 %v5480_v22  ;;  %2393 = vmatpush1.bf16.msra.mxu1 %v5482_v30 }
 0x922   : > { %2353 = vmatprep.subr.bf16.mxu0 %v5486_v24  ;;  %2394 = vmatprep.subr.bf16.mxu1 %v5488_v39 }
 0x925   : > { %2354 = vmatpush1.bf16.msra.mxu0 %v5492_v1  ;;  %2395 = vmatpush1.bf16.msra.mxu1 %v5494_v4 }
 0x926   : > { %2455 = vmatprep.subr.bf16.mxu0 %v5401_v27  ;;  %2496 = vmatprep.subr.bf16.mxu1 %v5403_v29 }
 0x928   : > { %2372 = vmatmul.mubr.bf16.vlgmr.msra.gmra.mrb[36].mxu0 %v2178_v31  ;;  %2413 = vmatmul.mubr.bf16.vlgmr.msra.gmra.mrb[44].mxu1 %v2178_v31 }
 0x929   : > { %2456 = vmatpush1.bf16.msra.mxu0 %v5408_v49  ;;  %2497 = vmatpush1.bf16.msra.mxu1 %v5410_v58 }
 0x92a   : > { %2457 = vmatprep.subr.bf16.mxu0 %v5412_v7  ;;  %2498 = vmatprep.subr.bf16.mxu1 %v5414_v8 }
 0x92b   : > { %2487 = vmatprep.mubr.bf16.mxu0 %v4685_v3  ;;  %2528 = vmatprep.mubr.bf16.mxu1 %v4685_v3 }
 0x92d   : > { %2458 = vmatpush1.bf16.msra.mxu0 %v5418_v11  ;;  %2499 = vmatpush1.bf16.msra.mxu1 %v5420_v12 }
 0x92e   : > { %2459 = vmatprep.subr.bf16.mxu0 %v5424_v14  ;;  %2500 = vmatprep.subr.bf16.mxu1 %v5426_v15 }
 0x931   : > { %2460 = vmatpush1.bf16.msra.mxu0 %v5432_v16  ;;  %2501 = vmatpush1.bf16.msra.mxu1 %v5434_v17 }
 0x932   : > { %2461 = vmatprep.subr.bf16.mxu0 %v5438_v18  ;;  %2502 = vmatprep.subr.bf16.mxu1 %v5440_v19 }
 0x935   : > { %2462 = vmatpush1.bf16.msra.mxu0 %v5444_v23  ;;  %2503 = vmatpush1.bf16.msra.mxu1 %v5446_v25 }
 0x936   : > { %2463 = vmatprep.subr.bf16.mxu0 %v5450_v9  ;;  %2504 = vmatprep.subr.bf16.mxu1 %v5452_v44 }
 0x939   : > { %2464 = vmatpush1.bf16.msra.mxu0 %v5456_v53  ;;  %2505 = vmatpush1.bf16.msra.mxu1 %v5458_v55 }
 0x93a   : > { %2465 = vmatprep.subr.bf16.mxu0 %v5462_v34  ;;  %2506 = vmatprep.subr.bf16.mxu1 %v5464_v35 }
 0x93d   : > { %2466 = vmatpush1.bf16.msra.mxu0 %v5468_v37  ;;  %2507 = vmatpush1.bf16.msra.mxu1 %v5470_v20 }
 0x93e   : > { %2467 = vmatprep.subr.bf16.mxu0 %v5474_v21  ;;  %2508 = vmatprep.subr.bf16.mxu1 %v5476_v38 }
 0x941   : > { %2468 = vmatpush1.bf16.msra.mxu0 %v5480_v22  ;;  %2509 = vmatpush1.bf16.msra.mxu1 %v5482_v30 }
 0x942   : > { %2469 = vmatprep.subr.bf16.mxu0 %v5486_v24  ;;  %2510 = vmatprep.subr.bf16.mxu1 %v5488_v39 }
 0x945   : > { %2470 = vmatpush1.bf16.msra.mxu0 %v5492_v1  ;;  %2511 = vmatpush1.bf16.msra.mxu1 %v5494_v4 }
 0x946   : > { %2589 = vmatprep.subr.bf16.mxu0 %v5401_v27  ;;  %2630 = vmatprep.subr.bf16.mxu1 %v5403_v29 }
 0x9db   : > { %v2110_v36 = vpop.f32.mrb[32].mxu0  ;;  %v2153_v48 = vpop.f32.mrb[40].mxu1 }
 0x9dc   : > { %v2111_v50 = vadd.f32 %v2110_v36, %v1899_v10  ;;  %v2154_v26 = vadd.f32 %v2153_v48, %v1907_v33  ;;  %v2112_v28 = vpop.f32.mrb[33].mxu0  ;;  %v2155_v40 = vpop.f32.mrb[41].mxu1 }
 0x9dd   : > { %v2113_v32 = vadd.f32 %v2112_v28, %v1903_v41  ;;  %v2156_v13 = vadd.f32 %v2155_v40, %v1911_v47  ;;  %v2114_v52 = vpop.f32.mrb[34].mxu0  ;;  %v2157_v62 = vpop.f32.mrb[42].mxu1 }
 0x9de   : > { %2162 = vst [vmem:[#allocation5] sm:$0xff] %v2111_v50  ;;  %2164 = vst [vmem:[#allocation5 + $0x10] sm:$0xff] %v2154_v26  ;;  %v2115_v43 = vadd.f32 %v2114_v52, %v1899_v10  ;;  %v2158_v51 = vadd.f32 %v2157_v62, %v1907_v33  ;;  %v2116_v2 = vpop.f32.mrb[35].mxu0  ;;  %v2159_v59 = vpop.f32.mrb[43].mxu1 }
 0x9df   : > { %2163 = vst [vmem:[#allocation5 + $0x8] sm:$0xff] %v2113_v32  ;;  %2165 = vst [vmem:[#allocation5 + $0x18] sm:$0xff] %v2156_v13  ;;  %v2117_v42 = vadd.f32 %v2116_v2, %v1903_v41  ;;  %v2160_v45 = vadd.f32 %v2159_v59, %v1911_v47 }
 0x9e0   : > { %2166 = vst [vmem:[#allocation5 + $0x20] sm:$0xff] %v2115_v43  ;;  %2168 = vst [vmem:[#allocation5 + $0x30] sm:$0xff] %v2158_v51  ;;  %v2173_v51 = vld [vmem:[#allocation3 + $0x2] sm:$0x3] }
 0x9e1   : > { %2167 = vst [vmem:[#allocation5 + $0x28] sm:$0xff] %v2117_v42  ;;  %2169 = vst [vmem:[#allocation5 + $0x38] sm:$0xff] %v2160_v45 }
 0x9e5   : > { %v2174_v54 = vld [vmem:[#allocation5] sm:$0x3]  ;;  %v2176_v41 = vld [vmem:[#allocation5 + $0x10] sm:$0x3] }
 0x9e6   : > { %v2175_v63 = vld [vmem:[#allocation5 + $0x8] sm:$0x3]  ;;  %v2177_v48 = vld [vmem:[#allocation5 + $0x18] sm:$0x3] }
 0x9fb   : > { %v2373_v60 = vpop.f32.mrb[36].mxu0  ;;  %v2414_v56 = vpop.f32.mrb[44].mxu1 }
 0x9fc   : > { %v2421_v61 = vadd.f32 %v2373_v60, %v2174_v54  ;;  %v2375_v0 = vpop.f32.mrb[37].mxu0  ;;  %v2416_v57 = vpop.f32.mrb[45].mxu1  ;;  %v2423_v47 = vadd.f32 %v2414_v56, %v2176_v41 }
 0x9fd   : > { %v2422_v6 = vadd.f32 %v2375_v0, %v2175_v63  ;;  %v2377_v5 = vpop.f32.mrb[38].mxu0  ;;  %v2418_v31 = vpop.f32.mrb[46].mxu1  ;;  %v2424_v50 = vadd.f32 %v2416_v57, %v2177_v48 }
 0x9fe   : > { %v3780_v46 = vmul.f32 -1.442695, %v2421_v61  ;;  %v2378_v10 = vpop.f32.mrb[39].mxu0  ;;  %v2419_v33 = vpop.f32.mrb[47].mxu1  ;;  %v3782_v26 = vmul.f32 -1.442695, %v2423_v47 }
 0x9ff   : > { %v3781_v36 = vmul.f32 -1.442695, %v2422_v6  ;;  %v2451_v47 = vld [vmem:[#allocation5 + $0x8] sm:$0xc] }
 0xa00   : > { %4251 = vpow2.f32 %v3780_v46  ;;  %v2450_v46 = vld [vmem:[#allocation5] sm:$0xc] }
 0xa01   : > { %4253 = vpow2.f32 %v3781_v36 }
 0xa02   : > { %4255 = vtanh.f32 %v2424_v50 }
 0xa03   : > { %4257 = vpow2.f32 %v3782_v26 }
 0xa0a   : > { %v4252_v28 = vpop.eup %4251 }
 0xa0b   : > { %v2434_v40 = vadd.f32 1.0, %v4252_v28  ;;  %v4254_v32 = vpop.eup %4253 }
 0xa0c   : > { %v2435_v13 = vadd.f32 1.0, %v4254_v32  ;;  %v4256_v52 = vpop.eup %4255 }
 0xa0d   : > { %4259 = vrcp.f32 %v2434_v40  ;;  %v4258_v62 = vpop.eup %4257 }
 0xa0e   : > { %4261 = vrcp.f32 %v2435_v13  ;;  %v2436_v42 = vadd.f32 1.0, %v4258_v62  ;;  %v2452_v13 = vld [vmem:[#allocation5 + $0x10] sm:$0xc] }
 0xa10   : > { %4263 = vrcp.f32 %v2436_v42 }
 0xa17   : > { %v4260_v43 = vpop.eup %4259 }
 0xa18   : > { %v2445_v2 = vmul.f32 %v4260_v43, %v4256_v52  ;;  %v4262_v59 = vpop.eup %4261  ;;  %v2453_v43 = vld [vmem:[#allocation5 + $0x18] sm:$0xc] }
 0xa19   : > { %v2444_v45 = vmul.f32 %v4262_v59, %v2173_v51 }
 0xa1a   : > { %v4264_v60 = vpop.eup %4263 }
 0xa1b   : > { %v5547_v54 = vadd.f32 %v2445_v2, %v2444_v45 }
 0xa1d   : > { %4265 = vtanh.f32 %v5547_v54 }
 0xa27   : > { %v4266_v56 = vpop.eup %4265 }
 0xa28   : > { %v2448_v61 = vmul.f32 %v4266_v56, %v4264_v60 }
 0xa2a   : > { %2449 = vst [vmem:[#allocation4] sm:$0x3] %v2448_v61  ;;  %v2454_v63 = vpack.c.bf16 %v2448_v61, %v2448_v61 }
 0xa2c   : > { %2488 = vmatmul.mubr.bf16.vlgmr.msra.gmra.mrb[40].mxu0 %v2454_v63  ;;  %2529 = vmatmul.mubr.bf16.vlgmr.msra.gmra.mrb[48].mxu1 %v2454_v63 }
 0xa2d   : > { %2590 = vmatpush1.bf16.msra.mxu0 %v5408_v49  ;;  %2631 = vmatpush1.bf16.msra.mxu1 %v5410_v58 }
 0xa2e   : > { %2591 = vmatprep.subr.bf16.mxu0 %v5412_v7  ;;  %2632 = vmatprep.subr.bf16.mxu1 %v5414_v8 }
 0xa2f   : > { %2621 = vmatprep.mubr.bf16.mxu0 %v4685_v3  ;;  %2662 = vmatprep.mubr.bf16.mxu1 %v4685_v3 }
 0xa31   : > { %2592 = vmatpush1.bf16.msra.mxu0 %v5418_v11  ;;  %2633 = vmatpush1.bf16.msra.mxu1 %v5420_v12 }
 0xa32   : > { %2593 = vmatprep.subr.bf16.mxu0 %v5424_v14  ;;  %2634 = vmatprep.subr.bf16.mxu1 %v5426_v15 }
 0xa35   : > { %2594 = vmatpush1.bf16.msra.mxu0 %v5432_v16  ;;  %2635 = vmatpush1.bf16.msra.mxu1 %v5434_v17 }
 0xa36   : > { %2595 = vmatprep.subr.bf16.mxu0 %v5438_v18  ;;  %2636 = vmatprep.subr.bf16.mxu1 %v5440_v19 }
 0xa39   : > { %2596 = vmatpush1.bf16.msra.mxu0 %v5444_v23  ;;  %2637 = vmatpush1.bf16.msra.mxu1 %v5446_v25 }
 0xa3a   : > { %2597 = vmatprep.subr.bf16.mxu0 %v5450_v9  ;;  %2638 = vmatprep.subr.bf16.mxu1 %v5452_v44 }
 0xa3d   : > { %2598 = vmatpush1.bf16.msra.mxu0 %v5456_v53  ;;  %2639 = vmatpush1.bf16.msra.mxu1 %v5458_v55 }
 0xa3e   : > { %2599 = vmatprep.subr.bf16.mxu0 %v5462_v34  ;;  %2640 = vmatprep.subr.bf16.mxu1 %v5464_v35 }
 0xa41   : > { %2600 = vmatpush1.bf16.msra.mxu0 %v5468_v37  ;;  %2641 = vmatpush1.bf16.msra.mxu1 %v5470_v20 }
 0xa42   : > { %2601 = vmatprep.subr.bf16.mxu0 %v5474_v21  ;;  %2642 = vmatprep.subr.bf16.mxu1 %v5476_v38 }
 0xa45   : > { %2602 = vmatpush1.bf16.msra.mxu0 %v5480_v22  ;;  %2643 = vmatpush1.bf16.msra.mxu1 %v5482_v30 }
 0xa46   : > { %2603 = vmatprep.subr.bf16.mxu0 %v5486_v24  ;;  %2644 = vmatprep.subr.bf16.mxu1 %v5488_v39 }
 0xa49   : > { %2604 = vmatpush1.bf16.msra.mxu0 %v5492_v1  ;;  %2645 = vmatpush1.bf16.msra.mxu1 %v5494_v4 }
 0xa4a   : > { %2723 = vmatprep.subr.bf16.mxu0 %v5401_v27  ;;  %2764 = vmatprep.subr.bf16.mxu1 %v5403_v29 }
 0xaff   : > { %v2489_v0 = vpop.f32.mrb[40].mxu0  ;;  %v2530_v57 = vpop.f32.mrb[48].mxu1 }
 0xb00   : > { %v2541_v6 = vrot.slane %v2489_v0, 6  ;;  %v2491_v5 = vpop.f32.mrb[41].mxu0  ;;  %v2532_v31 = vpop.f32.mrb[49].mxu1  ;;  %v2543_v32 = vrot.slane %v2530_v57, 6  ;;  %v2573_v0 = vrot.slane %v5547_v54, 6 }
 0xb01   : > { %v2542_v10 = vrot.slane %v2491_v5, 6  ;;  %v2493_v33 = vpop.f32.mrb[42].mxu0  ;;  %v2534_v36 = vpop.f32.mrb[50].mxu1  ;;  %v2544_v52 = vrot.slane %v2532_v31, 6 }
 0xb02   : > { %v2549_v41 = vadd.f32 %v2541_v6, %v2450_v46  ;;  %v2494_v48 = vpop.f32.mrb[43].mxu0  ;;  %v2535_v50 = vpop.f32.mrb[51].mxu1  ;;  %v2551_v62 = vadd.f32 %v2543_v32, %v2452_v13 }
 0xb03   : > { %v2550_v26 = vadd.f32 %v2542_v10, %v2451_v47  ;;  %v2552_v51 = vadd.f32 %v2544_v52, %v2453_v43  ;;  %v2582_v43 = vld [vmem:[#allocation5 + $0x8] sm:$0x30] }
 0xb04   : > { %v3783_v28 = vmul.f32 -1.442695, %v2549_v41  ;;  %v3785_v2 = vmul.f32 -1.442695, %v2551_v62 }
 0xb05   : > { %v3784_v40 = vmul.f32 -1.442695, %v2550_v26 }
 0xb06   : > { %4267 = vpow2.f32 %v3783_v28 }
 0xb07   : > { %4269 = vpow2.f32 %v3784_v40  ;;  %v2581_v40 = vld [vmem:[#allocation5] sm:$0x30] }
 0xb08   : > { %4271 = vtanh.f32 %v2552_v51 }
 0xb09   : > { %4273 = vpow2.f32 %v3785_v2 }
 0xb10   : > { %v4268_v59 = vpop.eup %4267 }
 0xb11   : > { %v2562_v42 = vadd.f32 1.0, %v4268_v59  ;;  %v4270_v45 = vpop.eup %4269 }
 0xb12   : > { %v2563_v60 = vadd.f32 1.0, %v4270_v45  ;;  %v4272_v56 = vpop.eup %4271 }
 0xb13   : > { %4275 = vrcp.f32 %v2562_v42  ;;  %v4274_v61 = vpop.eup %4273 }
 0xb14   : > { %4277 = vrcp.f32 %v2563_v60  ;;  %v2564_v5 = vadd.f32 1.0, %v4274_v61 }
 0xb16   : > { %4279 = vrcp.f32 %v2564_v5 }
 0xb1d   : > { %v4276_v63 = vpop.eup %4275 }
 0xb1e   : > { %v2576_v57 = vmul.f32 %v4276_v63, %v4272_v56  ;;  %v4278_v6 = vpop.eup %4277  ;;  %v2583_v56 = vld [vmem:[#allocation5 + $0x10] sm:$0x30] }
 0xb1f   : > { %v2575_v31 = vmul.f32 %v4278_v6, %v2573_v0  ;;  %v2584_v0 = vld [vmem:[#allocation5 + $0x18] sm:$0x30] }
 0xb20   : > { %v4280_v10 = vpop.eup %4279 }
 0xb21   : > { %v5585_v46 = vadd.f32 %v2576_v57, %v2575_v31 }
 0xb23   : > { %4281 = vtanh.f32 %v5585_v46 }
 0xb2d   : > { %v4282_v33 = vpop.eup %4281 }
 0xb2e   : > { %v2579_v36 = vmul.f32 %v4282_v33, %v4280_v10 }
 0xb30   : > { %2580 = vst [vmem:[#allocation4] sm:$0xc] %v2579_v36  ;;  %v2585_v41 = vpack.c.bf16 %v2579_v36, %v2579_v36 }
 0xb32   : > { %v2587_v47 = vrot.slane %v2585_v41, 1 }
 0xb34   : > { %2622 = vmatmul.mubr.bf16.vlgmr.msra.gmra.mrb[44].mxu0 %v2587_v47  ;;  %2663 = vmatmul.mubr.bf16.vlgmr.msra.gmra.mrb[52].mxu1 %v2587_v47 }
 0xb35   : > { %2724 = vmatpush1.bf16.msra.mxu0 %v5408_v49  ;;  %2765 = vmatpush1.bf16.msra.mxu1 %v5410_v58 }
 0xb36   : > { %2725 = vmatprep.subr.bf16.mxu0 %v5412_v7  ;;  %2766 = vmatprep.subr.bf16.mxu1 %v5414_v8 }
 0xb37   : > { %2755 = vmatprep.mubr.bf16.mxu0 %v4685_v3  ;;  %2796 = vmatprep.mubr.bf16.mxu1 %v4685_v3 }
 0xb39   : > { %2726 = vmatpush1.bf16.msra.mxu0 %v5418_v11  ;;  %2767 = vmatpush1.bf16.msra.mxu1 %v5420_v12 }
 0xb3a   : > { %2727 = vmatprep.subr.bf16.mxu0 %v5424_v14  ;;  %2768 = vmatprep.subr.bf16.mxu1 %v5426_v15 }
 0xb3d   : > { %2728 = vmatpush1.bf16.msra.mxu0 %v5432_v16  ;;  %2769 = vmatpush1.bf16.msra.mxu1 %v5434_v17 }
 0xb3e   : > { %2729 = vmatprep.subr.bf16.mxu0 %v5438_v18  ;;  %2770 = vmatprep.subr.bf16.mxu1 %v5440_v19 }
 0xb41   : > { %2730 = vmatpush1.bf16.msra.mxu0 %v5444_v23  ;;  %2771 = vmatpush1.bf16.msra.mxu1 %v5446_v25 }
 0xb42   : > { %2731 = vmatprep.subr.bf16.mxu0 %v5450_v9  ;;  %2772 = vmatprep.subr.bf16.mxu1 %v5452_v44 }
 0xb45   : > { %2732 = vmatpush1.bf16.msra.mxu0 %v5456_v53  ;;  %2773 = vmatpush1.bf16.msra.mxu1 %v5458_v55 }
 0xb46   : > { %2733 = vmatprep.subr.bf16.mxu0 %v5462_v34  ;;  %2774 = vmatprep.subr.bf16.mxu1 %v5464_v35 }
 0xb49   : > { %2734 = vmatpush1.bf16.msra.mxu0 %v5468_v37  ;;  %2775 = vmatpush1.bf16.msra.mxu1 %v5470_v20 }
 0xb4a   : > { %2735 = vmatprep.subr.bf16.mxu0 %v5474_v21  ;;  %2776 = vmatprep.subr.bf16.mxu1 %v5476_v38 }
 0xb4d   : > { %2736 = vmatpush1.bf16.msra.mxu0 %v5480_v22  ;;  %2777 = vmatpush1.bf16.msra.mxu1 %v5482_v30 }
 0xb4e   : > { %2737 = vmatprep.subr.bf16.mxu0 %v5486_v24  ;;  %2778 = vmatprep.subr.bf16.mxu1 %v5488_v39 }
 0xb51   : > { %2738 = vmatpush1.bf16.msra.mxu0 %v5492_v1  ;;  %2779 = vmatpush1.bf16.msra.mxu1 %v5494_v4 }
 0xb52   : > { %2857 = vmatprep.subr.bf16.mxu0 %v5401_v27  ;;  %2898 = vmatprep.subr.bf16.mxu1 %v5403_v29 }
 0xc07   : > { %v2623_v54 = vpop.f32.mrb[44].mxu0  ;;  %v2664_v48 = vpop.f32.mrb[52].mxu1 }
 0xc08   : > { %v2675_v50 = vrot.slane %v2623_v54, 4  ;;  %v2625_v26 = vpop.f32.mrb[45].mxu0  ;;  %v2666_v28 = vpop.f32.mrb[53].mxu1  ;;  %v2677_v60 = vrot.slane %v2664_v48, 4  ;;  %v2707_v54 = vrot.slane %v5585_v46, 6 }
 0xc09   : > { %v2676_v32 = vrot.slane %v2625_v26, 4  ;;  %v2627_v13 = vpop.f32.mrb[46].mxu0  ;;  %v2668_v52 = vpop.f32.mrb[54].mxu1  ;;  %v2678_v61 = vrot.slane %v2666_v28, 4 }
 0xc0a   : > { %v2683_v62 = vadd.f32 %v2675_v50, %v2581_v40  ;;  %v2628_v51 = vpop.f32.mrb[47].mxu0  ;;  %v2669_v2 = vpop.f32.mrb[55].mxu1  ;;  %v2685_v63 = vadd.f32 %v2677_v60, %v2583_v56 }
 0xc0b   : > { %v2684_v59 = vadd.f32 %v2676_v32, %v2582_v43  ;;  %v2686_v57 = vadd.f32 %v2678_v61, %v2584_v0  ;;  %v2716_v0 = vld [vmem:[#allocation5 + $0x8] sm:$0xc0] }
 0xc0c   : > { %v3786_v42 = vmul.f32 -1.442695, %v2683_v62  ;;  %v3788_v6 = vmul.f32 -1.442695, %v2685_v63 }
 0xc0d   : > { %v3787_v45 = vmul.f32 -1.442695, %v2684_v59 }
 0xc0e   : > { %4283 = vpow2.f32 %v3786_v42 }
 0xc0f   : > { %4285 = vpow2.f32 %v3787_v45  ;;  %v2715_v45 = vld [vmem:[#allocation5] sm:$0xc0] }
 0xc10   : > { %4287 = vtanh.f32 %v2686_v57 }
 0xc11   : > { %4289 = vpow2.f32 %v3788_v6 }
 0xc18   : > { %v4284_v5 = vpop.eup %4283 }
 0xc19   : > { %v2696_v31 = vadd.f32 1.0, %v4284_v5  ;;  %v4286_v10 = vpop.eup %4285 }
 0xc1a   : > { %v2697_v33 = vadd.f32 1.0, %v4286_v10  ;;  %v4288_v36 = vpop.eup %4287 }
 0xc1b   : > { %4291 = vrcp.f32 %v2696_v31  ;;  %v4290_v41 = vpop.eup %4289 }
 0xc1c   : > { %4293 = vrcp.f32 %v2697_v33  ;;  %v2698_v26 = vadd.f32 1.0, %v4290_v41  ;;  %v2718_v41 = vld [vmem:[#allocation5 + $0x18] sm:$0xc0] }
 0xc1e   : > { %4295 = vrcp.f32 %v2698_v26 }
 0xc25   : > { %v4292_v47 = vpop.eup %4291 }
 0xc26   : > { %v2710_v48 = vmul.f32 %v4292_v47, %v4288_v36  ;;  %v4294_v50 = vpop.eup %4293 }
 0xc27   : > { %v2709_v28 = vmul.f32 %v4294_v50, %v2707_v54 }
 0xc28   : > { %v4296_v32 = vpop.eup %4295 }
 0xc29   : > { %v5623_v40 = vadd.f32 %v2710_v48, %v2709_v28 }
 0xc2b   : > { %4297 = vtanh.f32 %v5623_v40 }
 0xc35   : > { %v4298_v13 = vpop.eup %4297 }
 0xc36   : > { %v2713_v52 = vmul.f32 %v4298_v13, %v4296_v32 }
 0xc38   : > { %2714 = vst [vmem:[#allocation4] sm:$0x30] %v2713_v52  ;;  %v2719_v62 = vpack.c.bf16 %v2713_v52, %v2713_v52 }
 0xc3a   : > { %v2721_v43 = vrot.slane %v2719_v62, 2  ;;  %v2841_v62 = vrot.slane %v5623_v40, 6 }
 0xc3c   : > { %2756 = vmatmul.mubr.bf16.vlgmr.msra.gmra.mrb[48].mxu0 %v2721_v43  ;;  %2797 = vmatmul.mubr.bf16.vlgmr.msra.gmra.mrb[56].mxu1 %v2721_v43 }
 0xc3d   : > { %2858 = vmatpush1.bf16.msra.mxu0 %v5408_v49  ;;  %2899 = vmatpush1.bf16.msra.mxu1 %v5410_v58 }
 0xc3e   : > { %2859 = vmatprep.subr.bf16.mxu0 %v5412_v7  ;;  %2900 = vmatprep.subr.bf16.mxu1 %v5414_v8 }
 0xc3f   : > { %2889 = vmatprep.mubr.bf16.mxu0 %v4685_v3  ;;  %2930 = vmatprep.mubr.bf16.mxu1 %v4685_v3 }
 0xc41   : > { %2860 = vmatpush1.bf16.msra.mxu0 %v5418_v11  ;;  %2901 = vmatpush1.bf16.msra.mxu1 %v5420_v12 }
 0xc42   : > { %2861 = vmatprep.subr.bf16.mxu0 %v5424_v14  ;;  %2902 = vmatprep.subr.bf16.mxu1 %v5426_v15 }
 0xc45   : > { %2862 = vmatpush1.bf16.msra.mxu0 %v5432_v16  ;;  %2903 = vmatpush1.bf16.msra.mxu1 %v5434_v17 }
 0xc46   : > { %2863 = vmatprep.subr.bf16.mxu0 %v5438_v18  ;;  %2904 = vmatprep.subr.bf16.mxu1 %v5440_v19 }
 0xc49   : > { %2864 = vmatpush1.bf16.msra.mxu0 %v5444_v23  ;;  %2905 = vmatpush1.bf16.msra.mxu1 %v5446_v25 }
 0xc4a   : > { %2865 = vmatprep.subr.bf16.mxu0 %v5450_v9  ;;  %2906 = vmatprep.subr.bf16.mxu1 %v5452_v44 }
 0xc4d   : > { %2866 = vmatpush1.bf16.msra.mxu0 %v5456_v53  ;;  %2907 = vmatpush1.bf16.msra.mxu1 %v5458_v55 }
 0xc4e   : > { %2867 = vmatprep.subr.bf16.mxu0 %v5462_v34  ;;  %2908 = vmatprep.subr.bf16.mxu1 %v5464_v35 }
 0xc51   : > { %2868 = vmatpush1.bf16.msra.mxu0 %v5468_v37  ;;  %2909 = vmatpush1.bf16.msra.mxu1 %v5470_v20 }
 0xc52   : > { %2869 = vmatprep.subr.bf16.mxu0 %v5474_v21  ;;  %2910 = vmatprep.subr.bf16.mxu1 %v5476_v38 }
 0xc55   : > { %2870 = vmatpush1.bf16.msra.mxu0 %v5480_v22  ;;  %2911 = vmatpush1.bf16.msra.mxu1 %v5482_v30 }
 0xc56   : > { %2871 = vmatprep.subr.bf16.mxu0 %v5486_v24  ;;  %2912 = vmatprep.subr.bf16.mxu1 %v5488_v39 }
 0xc59   : > { %2872 = vmatpush1.bf16.msra.mxu0 %v5492_v1  ;;  %2913 = vmatpush1.bf16.msra.mxu1 %v5494_v4 }
 0xc5a   : > { %2976 = vmatprep.subr.bf16.mxu0 %v5401_v27  ;;  %3017 = vmatprep.subr.bf16.mxu1 %v5403_v29  ;;  %v2717_v29 = vld [vmem:[#allocation5 + $0x10] sm:$0xc0] }
 0xd0f   : > { %v2757_v46 = vpop.f32.mrb[48].mxu0  ;;  %v2798_v51 = vpop.f32.mrb[56].mxu1 }
 0xd10   : > { %v2809_v2 = vrot.slane %v2757_v46, 2  ;;  %v2759_v59 = vpop.f32.mrb[49].mxu0  ;;  %v2800_v42 = vpop.f32.mrb[57].mxu1  ;;  %v2811_v27 = vrot.slane %v2798_v51, 2 }
 0xd11   : > { %v2810_v60 = vrot.slane %v2759_v59, 2  ;;  %v2761_v56 = vpop.f32.mrb[50].mxu0  ;;  %v2802_v61 = vpop.f32.mrb[58].mxu1  ;;  %v2812_v33 = vrot.slane %v2800_v42, 2 }
 0xd12   : > { %v2817_v63 = vadd.f32 %v2809_v2, %v2715_v45  ;;  %v2762_v57 = vpop.f32.mrb[51].mxu0  ;;  %v2803_v6 = vpop.f32.mrb[59].mxu1  ;;  %v2819_v36 = vadd.f32 %v2811_v27, %v2717_v29  ;;  %v2851_v27 = vld [vmem:[#allocation5 + $0x30] sm:$0x3] }
 0xd13   : > { %v2818_v5 = vadd.f32 %v2810_v60, %v2716_v0  ;;  %v2820_v47 = vadd.f32 %v2812_v33, %v2718_v41  ;;  %v2852_v33 = vld [vmem:[#allocation5 + $0x38] sm:$0x3] }
 0xd14   : > { %v3789_v31 = vmul.f32 -1.442695, %v2817_v63  ;;  %v3791_v54 = vmul.f32 -1.442695, %v2819_v36 }
 0xd15   : > { %v3790_v10 = vmul.f32 -1.442695, %v2818_v5 }
 0xd16   : > { %4299 = vpow2.f32 %v3789_v31 }
 0xd17   : > { %4301 = vpow2.f32 %v3790_v10 }
 0xd18   : > { %4303 = vtanh.f32 %v2820_v47 }
 0xd19   : > { %4305 = vpow2.f32 %v3791_v54 }
 0xd20   : > { %v4300_v48 = vpop.eup %4299 }
 0xd21   : > { %v2830_v50 = vadd.f32 1.0, %v4300_v48  ;;  %v4302_v26 = vpop.eup %4301 }
 0xd22   : > { %v2831_v28 = vadd.f32 1.0, %v4302_v26  ;;  %v4304_v32 = vpop.eup %4303 }
 0xd23   : > { %4307 = vrcp.f32 %v2830_v50  ;;  %v4306_v13 = vpop.eup %4305 }
 0xd24   : > { %4309 = vrcp.f32 %v2831_v28  ;;  %v2832_v51 = vadd.f32 1.0, %v4306_v13 }
 0xd26   : > { %4311 = vrcp.f32 %v2832_v51 }
 0xd2d   : > { %v4308_v52 = vpop.eup %4307 }
 0xd2e   : > { %v2844_v43 = vmul.f32 %v4308_v52, %v4304_v32  ;;  %v4310_v46 = vpop.eup %4309 }
 0xd2f   : > { %v2843_v2 = vmul.f32 %v4310_v46, %v2841_v62 }
 0xd30   : > { %v4312_v42 = vpop.eup %4311 }
 0xd31   : > { %v5661_v59 = vadd.f32 %v2844_v43, %v2843_v2 }
 0xd33   : > { %4313 = vtanh.f32 %v5661_v59  ;;  %v2963_v13 = vrot.slane %v5661_v59, 6  ;;  %v5709_v59 = vld [vmem:[#allocation12 + $0x8] ss:$16 sps:$4 sm:$0xff]  }
 0xd3d   : > { %v4314_v45 = vpop.eup %4313 }
 0xd3e   : > { %v2847_v60 = vmul.f32 %v4314_v45, %v4312_v42 }
 0xd40   : > { %2848 = vst [vmem:[#allocation4] sm:$0xc0] %v2847_v60  ;;  %v2853_v56 = vpack.c.bf16 %v2847_v60, %v2847_v60 }
 0xd42   : > { %v2855_v61 = vrot.slane %v2853_v56, 3  ;;  %v5706_v56 = vld [vmem:[#allocation12] ss:$16 sps:$4 sm:$0xff]  }
 0xd44   : > { %2890 = vmatmul.mubr.bf16.vlgmr.msra.gmra.mrb[52].mxu0 %v2855_v61  ;;  %2931 = vmatmul.mubr.bf16.vlgmr.msra.gmra.mrb[60].mxu1 %v2855_v61  ;;  %v5712_v61 = vld [vmem:[#allocation12 + $0x24] ss:$16 sps:$4 sm:$0xff]  }
 0xd45   : > { %2977 = vmatpush1.bf16.msra.mxu0 %v5408_v49  ;;  %3018 = vmatpush1.bf16.msra.mxu1 %v5410_v58  ;;  %v5696_v49 = vld [vmem:[#allocation12 + $0x4] ss:$16 sps:$4 sm:$0xff]   ;;  %v5699_v58 = vld [vmem:[#allocation12 + $0xc] ss:$16 sps:$4 sm:$0xff]  }
 0xd46   : > { %2978 = vmatprep.subr.bf16.mxu0 %v5412_v7  ;;  %3019 = vmatprep.subr.bf16.mxu1 %v5414_v8  ;;  %v2849_v7 = vld [vmem:[#allocation5 + $0x20] sm:$0x3] }
 0xd47   : > { %3008 = vmatprep.mubr.bf16.mxu0 %v4685_v3  ;;  %3049 = vmatprep.mubr.bf16.mxu1 %v4685_v3 }
 0xd49   : > { %2979 = vmatpush1.bf16.msra.mxu0 %v5418_v11  ;;  %3020 = vmatpush1.bf16.msra.mxu1 %v5420_v12 }
 0xd4a   : > { %2980 = vmatprep.subr.bf16.mxu0 %v5424_v14  ;;  %3021 = vmatprep.subr.bf16.mxu1 %v5426_v15  ;;  %v2850_v14 = vld [vmem:[#allocation5 + $0x28] sm:$0x3] }
 0xd4d   : > { %2981 = vmatpush1.bf16.msra.mxu0 %v5432_v16  ;;  %3022 = vmatpush1.bf16.msra.mxu1 %v5434_v17 }
 0xd4e   : > { %2982 = vmatprep.subr.bf16.mxu0 %v5438_v18  ;;  %3023 = vmatprep.subr.bf16.mxu1 %v5440_v19 }
 0xd51   : > { %2983 = vmatpush1.bf16.msra.mxu0 %v5444_v23  ;;  %3024 = vmatpush1.bf16.msra.mxu1 %v5446_v25 }
 0xd52   : > { %2984 = vmatprep.subr.bf16.mxu0 %v5450_v9  ;;  %3025 = vmatprep.subr.bf16.mxu1 %v5452_v44 }
 0xd55   : > { %2985 = vmatpush1.bf16.msra.mxu0 %v5456_v53  ;;  %3026 = vmatpush1.bf16.msra.mxu1 %v5458_v55 }
 0xd56   : > { %2986 = vmatprep.subr.bf16.mxu0 %v5462_v34  ;;  %3027 = vmatprep.subr.bf16.mxu1 %v5464_v35 }
 0xd59   : > { %2987 = vmatpush1.bf16.msra.mxu0 %v5468_v37  ;;  %3028 = vmatpush1.bf16.msra.mxu1 %v5470_v20 }
 0xd5a   : > { %2988 = vmatprep.subr.bf16.mxu0 %v5474_v21  ;;  %3029 = vmatprep.subr.bf16.mxu1 %v5476_v38 }
 0xd5d   : > { %2989 = vmatpush1.bf16.msra.mxu0 %v5480_v22  ;;  %3030 = vmatpush1.bf16.msra.mxu1 %v5482_v30 }
 0xd5e   : > { %2990 = vmatprep.subr.bf16.mxu0 %v5486_v24  ;;  %3031 = vmatprep.subr.bf16.mxu1 %v5488_v39 }
 0xd61   : > { %2991 = vmatpush1.bf16.msra.mxu0 %v5492_v1  ;;  %3032 = vmatpush1.bf16.msra.mxu1 %v5494_v4 }
 0xd62   : > { %3110 = vmatprep.subr.bf16.mxu0 %v5696_v49  ;;  %3151 = vmatprep.subr.bf16.mxu1 %v5699_v58 }
 0xe17   : > { %v2891_v8 = vpop.f32.mrb[52].mxu0  ;;  %v2932_v11 = vpop.f32.mrb[60].mxu1 }
 0xe18   : > { %v2939_v12 = vadd.f32 %v2891_v8, %v2849_v7  ;;  %v2893_v15 = vpop.f32.mrb[53].mxu0  ;;  %v2934_v40 = vpop.f32.mrb[61].mxu1  ;;  %v2941_v29 = vadd.f32 %v2932_v11, %v2851_v27  ;;  %v5715_v7 = vld [vmem:[#allocation12 + $0x2c] ss:$16 sps:$4 sm:$0xff]   ;;  %v5720_v8 = vld [vmem:[#allocation12 + $0x20] ss:$16 sps:$4 sm:$0xff]  }
 0xe19   : > { %v2940_v63 = vadd.f32 %v2893_v15, %v2850_v14  ;;  %v2895_v0 = vpop.f32.mrb[54].mxu0  ;;  %v2936_v57 = vpop.f32.mrb[62].mxu1  ;;  %v2942_v36 = vadd.f32 %v2934_v40, %v2852_v33  ;;  %v5723_v11 = vld [vmem:[#allocation12 + $0x28] ss:$16 sps:$4 sm:$0xff]   ;;  %v5729_v14 = vld [vmem:[#allocation12 + $0x4c] ss:$16 sps:$4 sm:$0xff]  }
 0xe1a   : > { %v3792_v6 = vmul.f32 -1.442695, %v2939_v12  ;;  %v2896_v5 = vpop.f32.mrb[55].mxu0  ;;  %v2937_v31 = vpop.f32.mrb[63].mxu1  ;;  %v3794_v41 = vmul.f32 -1.442695, %v2941_v29 }
 0xe1b   : > { %v3793_v10 = vmul.f32 -1.442695, %v2940_v63  ;;  %v5726_v12 = vld [vmem:[#allocation12 + $0x44] ss:$16 sps:$4 sm:$0xff]  }
 0xe1c   : > { %4315 = vpow2.f32 %v3792_v6 }
 0xe1d   : > { %4317 = vpow2.f32 %v3793_v10 }
 0xe1e   : > { %4319 = vtanh.f32 %v2942_v36 }
 0xe1f   : > { %4321 = vpow2.f32 %v3794_v41 }
 0xe26   : > { %v4316_v47 = vpop.eup %4315 }
 0xe27   : > { %v2952_v54 = vadd.f32 1.0, %v4316_v47  ;;  %v4318_v48 = vpop.eup %4317 }
 0xe28   : > { %v2953_v50 = vadd.f32 1.0, %v4318_v48  ;;  %v4320_v26 = vpop.eup %4319 }
 0xe29   : > { %4323 = vrcp.f32 %v2952_v54  ;;  %v4322_v28 = vpop.eup %4321 }
 0xe2a   : > { %4325 = vrcp.f32 %v2953_v50  ;;  %v2954_v43 = vadd.f32 1.0, %v4322_v28  ;;  %v4421_v50 = vld [vmem:[#allocation12 + $0x40] ss:$16 sps:$4 sm:$0xff]   ;;  %v4423_v28 = vld [vmem:[#allocation12 + $0x64] ss:$16 sps:$4 sm:$0xff]  }
 0xe2c   : > { %4327 = vrcp.f32 %v2954_v43  ;;  %v4429_v43 = vld [vmem:[#allocation12 + $0x80] ss:$16 sps:$4 sm:$0xff]  }
 0xe33   : > { %v4324_v32 = vpop.eup %4323 }
 0xe34   : > { %v2966_v52 = vmul.f32 %v4324_v32, %v4320_v26  ;;  %v4326_v62 = vpop.eup %4325  ;;  %v4422_v26 = vld [vmem:[#allocation12 + $0x48] ss:$16 sps:$4 sm:$0xff]   ;;  %v4424_v32 = vld [vmem:[#allocation12 + $0x6c] ss:$16 sps:$4 sm:$0xff]  }
 0xe35   : > { %v2965_v46 = vmul.f32 %v4326_v62, %v2963_v13  ;;  %v4425_v13 = vld [vmem:[#allocation12 + $0x60] ss:$16 sps:$4 sm:$0xff]   ;;  %v4428_v62 = vld [vmem:[#allocation12 + $0x8c] ss:$16 sps:$4 sm:$0xff]  }
 0xe36   : > { %v4328_v2 = vpop.eup %4327 }
 0xe37   : > { %v5703_v51 = vadd.f32 %v2966_v52, %v2965_v46  ;;  %v4426_v52 = vld [vmem:[#allocation12 + $0x68] ss:$16 sps:$4 sm:$0xff]  }
 0xe38   : > { %v4430_v46 = vld [vmem:[#allocation12 + $0x88] ss:$16 sps:$4 sm:$0xff]  }
 0xe39   : > { %4329 = vtanh.f32 %v5703_v51  ;;  %v3094_v5 = vrot.slane %v5703_v51, 6  ;;  %v4431_v51 = vld [vmem:[#allocation12 + $0xa4] ss:$16 sps:$4 sm:$0xff]  }
 0xe43   : > { %v4330_v42 = vpop.eup %4329 }
 0xe44   : > { %v2969_v45 = vmul.f32 %v4330_v42, %v4328_v2  ;;  %v4432_v2 = vld [vmem:[#allocation12 + $0xac] ss:$16 sps:$4 sm:$0xff]   ;;  %v4433_v42 = vld [vmem:[#allocation12 + $0xa0] ss:$16 sps:$4 sm:$0xff]  }
 0xe46   : > { %2970 = vst [vmem:[#allocation4 + $0x8] sm:$0x3] %v2969_v45  ;;  %v2975_v60 = vpack.c.bf16 %v2969_v45, %v2969_v45  ;;  %v4434_v45 = vld [vmem:[#allocation12 + $0xa8] ss:$16 sps:$4 sm:$0xff]  }
 0xe48   : > { %3009 = vmatmul.mubr.bf16.vlgmr.msra.gmra.mrb[56].mxu0 %v2975_v60  ;;  %3050 = vmatmul.mubr.bf16.vlgmr.msra.gmra.mrb[64].mxu1 %v2975_v60  ;;  %v4435_v60 = vld [vmem:[#allocation12 + $0xc4] ss:$16 sps:$4 sm:$0xff]  }
 0xe49   : > { %3111 = vmatpush1.bf16.msra.mxu0 %v5706_v56  ;;  %3152 = vmatpush1.bf16.msra.mxu1 %v5709_v59 }
 0xe4a   : > { %3112 = vmatprep.subr.bf16.mxu0 %v5712_v61  ;;  %3153 = vmatprep.subr.bf16.mxu1 %v5715_v7 }
 0xe4b   : > { %3142 = vmatprep.mubr.bf16.mxu0 %v4685_v3  ;;  %3183 = vmatprep.mubr.bf16.mxu1 %v4685_v3 }
 0xe4d   : > { %3113 = vmatpush1.bf16.msra.mxu0 %v5720_v8  ;;  %3154 = vmatpush1.bf16.msra.mxu1 %v5723_v11 }
 0xe4e   : > { %3114 = vmatprep.subr.bf16.mxu0 %v5726_v12  ;;  %3155 = vmatprep.subr.bf16.mxu1 %v5729_v14 }
 0xe51   : > { %3115 = vmatpush1.bf16.msra.mxu0 %v5432_v16  ;;  %3156 = vmatpush1.bf16.msra.mxu1 %v5434_v17 }
 0xe52   : > { %3116 = vmatprep.subr.bf16.mxu0 %v5438_v18  ;;  %3157 = vmatprep.subr.bf16.mxu1 %v5440_v19 }
 0xe55   : > { %3117 = vmatpush1.bf16.msra.mxu0 %v5444_v23  ;;  %3158 = vmatpush1.bf16.msra.mxu1 %v5446_v25  ;;  %v2971_v25 = vld [vmem:[#allocation5 + $0x20] sm:$0xc] }
 0xe56   : > { %3118 = vmatprep.subr.bf16.mxu0 %v5450_v9  ;;  %3159 = vmatprep.subr.bf16.mxu1 %v5452_v44 }
 0xe59   : > { %3119 = vmatpush1.bf16.msra.mxu0 %v5456_v53  ;;  %3160 = vmatpush1.bf16.msra.mxu1 %v5458_v55 }
 0xe5a   : > { %3120 = vmatprep.subr.bf16.mxu0 %v5462_v34  ;;  %3161 = vmatprep.subr.bf16.mxu1 %v5464_v35  ;;  %v2972_v34 = vld [vmem:[#allocation5 + $0x28] sm:$0xc] }
 0xe5d   : > { %3121 = vmatpush1.bf16.msra.mxu0 %v5468_v37  ;;  %3162 = vmatpush1.bf16.msra.mxu1 %v5470_v20 }
 0xe5e   : > { %3122 = vmatprep.subr.bf16.mxu0 %v5474_v21  ;;  %3163 = vmatprep.subr.bf16.mxu1 %v5476_v38 }
 0xe61   : > { %3123 = vmatpush1.bf16.msra.mxu0 %v5480_v22  ;;  %3164 = vmatpush1.bf16.msra.mxu1 %v5482_v30  ;;  %v2973_v30 = vld [vmem:[#allocation5 + $0x30] sm:$0xc] }
 0xe62   : > { %3124 = vmatprep.subr.bf16.mxu0 %v5486_v24  ;;  %3165 = vmatprep.subr.bf16.mxu1 %v5488_v39 }
 0xe65   : > { %3125 = vmatpush1.bf16.msra.mxu0 %v5492_v1  ;;  %3166 = vmatpush1.bf16.msra.mxu1 %v5494_v4  ;;  %v2974_v1 = vld [vmem:[#allocation5 + $0x38] sm:$0xc] }
 0xe66   : > { %3244 = vmatprep.subr.bf16.mxu0 %v5696_v49  ;;  %3285 = vmatprep.subr.bf16.mxu1 %v5699_v58 }
 0xf1b   : > { %v3010_v16 = vpop.f32.mrb[56].mxu0  ;;  %v3051_v17 = vpop.f32.mrb[64].mxu1 }
 0xf1c   : > { %v3062_v18 = vrot.slane %v3010_v16, 6  ;;  %v3012_v19 = vpop.f32.mrb[57].mxu0  ;;  %v3053_v23 = vpop.f32.mrb[65].mxu1  ;;  %v3064_v22 = vrot.slane %v3051_v17, 6 }
 0xf1d   : > { %v3063_v9 = vrot.slane %v3012_v19, 6  ;;  %v3014_v44 = vpop.f32.mrb[58].mxu0  ;;  %v3055_v53 = vpop.f32.mrb[66].mxu1  ;;  %v3065_v24 = vrot.slane %v3053_v23, 6  ;;  %v3102_v23 = vld [vmem:[#allocation5 + $0x20] sm:$0x30] }
 0xf1e   : > { %v3070_v55 = vadd.f32 %v3062_v18, %v2971_v25  ;;  %v3015_v35 = vpop.f32.mrb[59].mxu0  ;;  %v3056_v37 = vpop.f32.mrb[67].mxu1  ;;  %v3072_v39 = vadd.f32 %v3064_v22, %v2973_v30  ;;  %v3104_v22 = vld [vmem:[#allocation5 + $0x30] sm:$0x30] }
 0xf1f   : > { %v3071_v20 = vadd.f32 %v3063_v9, %v2972_v34  ;;  %v3073_v4 = vadd.f32 %v3065_v24, %v2974_v1 }
 0xf20   : > { %v3795_v21 = vmul.f32 -1.442695, %v3070_v55  ;;  %v3797_v49 = vmul.f32 -1.442695, %v3072_v39  ;;  %v3103_v55 = vld [vmem:[#allocation5 + $0x28] sm:$0x30] }
 0xf21   : > { %v3796_v38 = vmul.f32 -1.442695, %v3071_v20  ;;  %v3105_v39 = vld [vmem:[#allocation5 + $0x38] sm:$0x30] }
 0xf22   : > { %4331 = vpow2.f32 %v3795_v21 }
 0xf23   : > { %4333 = vpow2.f32 %v3796_v38 }
 0xf24   : > { %4335 = vtanh.f32 %v3073_v4 }
 0xf25   : > { %4337 = vpow2.f32 %v3797_v49 }
 0xf2c   : > { %v4332_v58 = vpop.eup %4331 }
 0xf2d   : > { %v3083_v15 = vadd.f32 1.0, %v4332_v58  ;;  %v4334_v40 = vpop.eup %4333 }
 0xf2e   : > { %v3084_v63 = vadd.f32 1.0, %v4334_v40  ;;  %v4336_v0 = vpop.eup %4335 }
 0xf2f   : > { %4339 = vrcp.f32 %v3083_v15  ;;  %v4338_v57 = vpop.eup %4337 }
 0xf30   : > { %4341 = vrcp.f32 %v3084_v63  ;;  %v3085_v27 = vadd.f32 1.0, %v4338_v57 }
 0xf32   : > { %4343 = vrcp.f32 %v3085_v27 }
 0xf39   : > { %v4340_v6 = vpop.eup %4339 }
 0xf3a   : > { %v3097_v31 = vmul.f32 %v4340_v6, %v4336_v0  ;;  %v4342_v10 = vpop.eup %4341 }
 0xf3b   : > { %v3096_v29 = vmul.f32 %v4342_v10, %v3094_v5 }
 0xf3c   : > { %v4344_v36 = vpop.eup %4343 }
 0xf3d   : > { %v5757_v33 = vadd.f32 %v3097_v31, %v3096_v29 }
 0xf3f   : > { %4345 = vtanh.f32 %v5757_v33  ;;  %v3228_v6 = vrot.slane %v5757_v33, 6  ;;  %v4116_v33 = vld [vmem:[#allocation14 + $0x8] sm:$0xff]  }
 0xf49   : > { %v4346_v41 = vpop.eup %4345 }
 0xf4a   : > { %v3100_v47 = vmul.f32 %v4346_v41, %v4344_v36 }
 0xf4c   : > { %3101 = vst [vmem:[#allocation4 + $0x8] sm:$0xc] %v3100_v47  ;;  %v3106_v54 = vpack.c.bf16 %v3100_v47, %v3100_v47 }
 0xf4e   : > { %v3108_v48 = vrot.slane %v3106_v54, 1 }
 0xf50   : > { %3143 = vmatmul.mubr.bf16.vlgmr.msra.gmra.mrb[60].mxu0 %v3108_v48  ;;  %3184 = vmatmul.mubr.bf16.vlgmr.msra.gmra.mrb[68].mxu1 %v3108_v48 }
 0xf51   : > { %3245 = vmatpush1.bf16.msra.mxu0 %v5706_v56  ;;  %3286 = vmatpush1.bf16.msra.mxu1 %v5709_v59  ;;  %v4436_v56 = vld [vmem:[#allocation12 + $0xcc] ss:$16 sps:$4 sm:$0xff]   ;;  %v4437_v59 = vld [vmem:[#allocation12 + $0xc0] ss:$16 sps:$4 sm:$0xff]  }
 0xf52   : > { %3246 = vmatprep.subr.bf16.mxu0 %v5712_v61  ;;  %3287 = vmatprep.subr.bf16.mxu1 %v5715_v7  ;;  %v4438_v61 = vld [vmem:[#allocation12 + $0xc8] ss:$16 sps:$4 sm:$0xff]   ;;  %v4439_v7 = vld [vmem:[#allocation12 + $0xe4] ss:$16 sps:$4 sm:$0xff]  }
 0xf53   : > { %3276 = vmatprep.mubr.bf16.mxu0 %v4685_v3  ;;  %3317 = vmatprep.mubr.bf16.mxu1 %v4685_v3  ;;  %v4427_v3 = vld [vmem:[#allocation12 + $0x84] ss:$16 sps:$4 sm:$0xff]  }
 0xf55   : > { %3247 = vmatpush1.bf16.msra.mxu0 %v5720_v8  ;;  %3288 = vmatpush1.bf16.msra.mxu1 %v5723_v11  ;;  %v4440_v8 = vld [vmem:[#allocation12 + $0xec] ss:$16 sps:$4 sm:$0xff]   ;;  %v4441_v11 = vld [vmem:[#allocation12 + $0xe0] ss:$16 sps:$4 sm:$0xff]  }
 0xf56   : > { %3248 = vmatprep.subr.bf16.mxu0 %v5726_v12  ;;  %3289 = vmatprep.subr.bf16.mxu1 %v5729_v14  ;;  %v4442_v12 = vld [vmem:[#allocation12 + $0xe8] ss:$16 sps:$4 sm:$0xff]  }
 0xf59   : > { %3249 = vmatpush1.bf16.msra.mxu0 %v4421_v50  ;;  %3290 = vmatpush1.bf16.msra.mxu1 %v4422_v26  ;;  %v4115_v50 = vld [vmem:[#allocation14] sm:$0xff]   ;;  %v4686_v26 = vmov 0.0  }
 0xf5a   : > { %3250 = vmatprep.subr.bf16.mxu0 %v4423_v28  ;;  %3291 = vmatprep.subr.bf16.mxu1 %v4424_v32  ;;  %v4117_v28 = vld [vmem:[#allocation14 + $0x10] sm:$0xff]   ;;  %v4118_v32 = vld [vmem:[#allocation14 + $0x18] sm:$0xff]  }
 0xf5d   : > { %3251 = vmatpush1.bf16.msra.mxu0 %v4425_v13  ;;  %3292 = vmatpush1.bf16.msra.mxu1 %v4426_v52  ;;  %v4119_v13 = vld [vmem:[#allocation14 + $0x20] sm:$0xff]   ;;  %v4120_v52 = vld [vmem:[#allocation14 + $0x28] sm:$0xff]  }
 0xf5e   : > { %3252 = vmatprep.subr.bf16.mxu0 %v4427_v3  ;;  %3293 = vmatprep.subr.bf16.mxu1 %v4428_v62  ;;  %v4121_v3 = vld [vmem:[#allocation14 + $0x30] sm:$0xff]   ;;  %v4122_v62 = vld [vmem:[#allocation14 + $0x38] sm:$0xff]  }
 0xf61   : > { %3253 = vmatpush1.bf16.msra.mxu0 %v4429_v43  ;;  %3294 = vmatpush1.bf16.msra.mxu1 %v4430_v46 }
 0xf62   : > { %3254 = vmatprep.subr.bf16.mxu0 %v4431_v51  ;;  %3295 = vmatprep.subr.bf16.mxu1 %v4432_v2 }
 0xf65   : > { %3255 = vmatpush1.bf16.msra.mxu0 %v4433_v42  ;;  %3296 = vmatpush1.bf16.msra.mxu1 %v4434_v45  ;;  %v3236_v45 = vld [vmem:[#allocation5 + $0x20] sm:$0xc0] }
 0xf66   : > { %3256 = vmatprep.subr.bf16.mxu0 %v4435_v60  ;;  %3297 = vmatprep.subr.bf16.mxu1 %v4436_v56 }
 0xf69   : > { %3257 = vmatpush1.bf16.msra.mxu0 %v4437_v59  ;;  %3298 = vmatpush1.bf16.msra.mxu1 %v4438_v61 }
 0xf6a   : > { %3258 = vmatprep.subr.bf16.mxu0 %v4439_v7  ;;  %3299 = vmatprep.subr.bf16.mxu1 %v4440_v8  ;;  %v3237_v7 = vld [vmem:[#allocation5 + $0x28] sm:$0xc0] }
 0xf6d   : > { %3259 = vmatpush1.bf16.msra.mxu0 %v4441_v11  ;;  %3300 = vmatpush1.bf16.msra.mxu1 %v4442_v12 }
 0xf6e   : > { %3828 = vmatprep.subr.bf16.mxu0 %v4686_v26 }
0x1023   : > { %v3144_v14 = vpop.f32.mrb[60].mxu0  ;;  %v3185_v16 = vpop.f32.mrb[68].mxu1 }
0x1024   : > { %v3196_v17 = vrot.slane %v3144_v14, 4  ;;  %v3146_v18 = vpop.f32.mrb[61].mxu0  ;;  %v3187_v19 = vpop.f32.mrb[69].mxu1  ;;  %v3198_v38 = vrot.slane %v3185_v16, 4 }
0x1025   : > { %v3197_v25 = vrot.slane %v3146_v18, 4  ;;  %v3148_v9 = vpop.f32.mrb[62].mxu0  ;;  %v3189_v44 = vpop.f32.mrb[70].mxu1  ;;  %v3199_v30 = vrot.slane %v3187_v19, 4  ;;  %v3238_v18 = vld [vmem:[#allocation5 + $0x30] sm:$0xc0] }
0x1026   : > { %v3204_v53 = vadd.f32 %v3196_v17, %v3102_v23  ;;  %v3149_v34 = vpop.f32.mrb[63].mxu0  ;;  %v3190_v35 = vpop.f32.mrb[71].mxu1  ;;  %v3206_v24 = vadd.f32 %v3198_v38, %v3104_v22 }
0x1027   : > { %v3205_v37 = vadd.f32 %v3197_v25, %v3103_v55  ;;  %v3207_v1 = vadd.f32 %v3199_v30, %v3105_v39  ;;  %v3239_v25 = vld [vmem:[#allocation5 + $0x38] sm:$0xc0] }
0x1028   : > { %v3798_v20 = vmul.f32 -1.442695, %v3204_v53  ;;  %v3800_v4 = vmul.f32 -1.442695, %v3206_v24 }
0x1029   : > { %v3799_v21 = vmul.f32 -1.442695, %v3205_v37 }
0x102a   : > { %4347 = vpow2.f32 %v3798_v20 }
0x102b   : > { %4349 = vpow2.f32 %v3799_v21 }
0x102c   : > { %4351 = vtanh.f32 %v3207_v1 }
0x102d   : > { %4353 = vpow2.f32 %v3800_v4 }
0x1034   : > { %v4348_v49 = vpop.eup %4347 }
0x1035   : > { %v3217_v58 = vadd.f32 1.0, %v4348_v49  ;;  %v4350_v15 = vpop.eup %4349 }
0x1036   : > { %v3218_v40 = vadd.f32 1.0, %v4350_v15  ;;  %v4352_v63 = vpop.eup %4351  ;;  %v3372_v15 = vld [vmem:[#allocation4] sm:$0xff] }
0x1037   : > { %4355 = vrcp.f32 %v3217_v58  ;;  %v4354_v0 = vpop.eup %4353 }
0x1038   : > { %4357 = vrcp.f32 %v3218_v40  ;;  %v3219_v10 = vadd.f32 1.0, %v4354_v0  ;;  %v3804_v0 = vld [vmem:[%s5845_s8] ss:$0 sm:$0xff] }
0x103a   : > { %4359 = vrcp.f32 %v3219_v10 }
0x1041   : > { %v4356_v57 = vpop.eup %4355 }
0x1042   : > { %v3231_v5 = vmul.f32 %v4356_v57, %v4352_v63  ;;  %v4358_v31 = vpop.eup %4357 }
0x1043   : > { %v3230_v27 = vmul.f32 %v4358_v31, %v3228_v6 }
0x1044   : > { %v4360_v36 = vpop.eup %4359 }
0x1045   : > { %v5771_v29 = vadd.f32 %v3231_v5, %v3230_v27 }
0x1047   : > { %4361 = vtanh.f32 %v5771_v29  ;;  %v3362_v38 = vrot.slane %v5771_v29, 6 }
0x1051   : > { %v4362_v41 = vpop.eup %4361 }
0x1052   : > { %v3234_v47 = vmul.f32 %v4362_v41, %v4360_v36 }
0x1054   : > { %3235 = vst [vmem:[#allocation4 + $0x8] sm:$0x30] %v3234_v47  ;;  %v3240_v54 = vpack.c.bf16 %v3234_v47, %v3234_v47 }
0x1056   : > { %v3242_v48 = vrot.slane %v3240_v54, 2 }
0x1058   : > { %3277 = vmatmul.mubr.bf16.vlgmr.msra.gmra.mrb[64].mxu0 %v3242_v48  ;;  %3318 = vmatmul.mubr.bf16.vlgmr.msra.gmra.mrb[72].mxu1 %v3242_v48 }
0x1059   : > { %3829 = vmatpush3.bf16.msra.mxu0 %v4115_v50  ;;  %3844 = vmatprep.mubr.msk.bf16.mxu0 %vm4687_vm1, %v4686_v26 }
0x105a   : > { %3830 = vmatprep.subr.bf16.mxu0 %v4686_v26 }
0x105d   : > { %3831 = vmatpush3.bf16.msra.mxu0 %v4116_v33 }
0x105e   : > { %3832 = vmatprep.subr.bf16.mxu0 %v4686_v26 }
0x1061   : > { %3833 = vmatpush3.bf16.msra.mxu0 %v4117_v28 }
0x1062   : > { %3834 = vmatprep.subr.bf16.mxu0 %v4686_v26 }
0x1065   : > { %3835 = vmatpush3.bf16.msra.mxu0 %v4118_v32 }
0x1066   : > { %3836 = vmatprep.subr.bf16.mxu0 %v4686_v26 }
0x1069   : > { %3837 = vmatpush3.bf16.msra.mxu0 %v4119_v13 }
0x106a   : > { %3838 = vmatprep.subr.bf16.mxu0 %v4686_v26 }
0x106d   : > { %3839 = vmatpush3.bf16.msra.mxu0 %v4120_v52 }
0x106e   : > { %3840 = vmatprep.subr.bf16.mxu0 %v4686_v26 }
0x1071   : > { %3841 = vmatpush3.bf16.msra.mxu0 %v4121_v3 }
0x1072   : > { %3842 = vmatprep.subr.bf16.mxu0 %v4686_v26 }
0x1075   : > { %3843 = vmatpush3.bf16.msra.mxu0 %v4122_v62 }
0x112b   : > { %v3278_v43 = vpop.f32.mrb[64].mxu0  ;;  %v3319_v46 = vpop.f32.mrb[72].mxu1 }
0x112c   : > { %v3330_v51 = vrot.slane %v3278_v43, 2  ;;  %v3280_v2 = vpop.f32.mrb[65].mxu0  ;;  %v3321_v42 = vpop.f32.mrb[73].mxu1  ;;  %v3332_v17 = vrot.slane %v3319_v46, 2 }
0x112d   : > { %v3331_v60 = vrot.slane %v3280_v2, 2  ;;  %v3282_v56 = vpop.f32.mrb[66].mxu0  ;;  %v3323_v59 = vpop.f32.mrb[74].mxu1  ;;  %v3333_v19 = vrot.slane %v3321_v42, 2 }
0x112e   : > { %v3338_v61 = vadd.f32 %v3330_v51, %v3236_v45  ;;  %v3283_v8 = vpop.f32.mrb[67].mxu0  ;;  %v3324_v11 = vpop.f32.mrb[75].mxu1  ;;  %v3340_v23 = vadd.f32 %v3332_v17, %v3238_v18 }
0x112f   : > { %v3339_v12 = vadd.f32 %v3331_v60, %v3237_v7  ;;  %v3341_v9 = vadd.f32 %v3333_v19, %v3239_v25 }
0x1130   : > { %v3801_v14 = vmul.f32 -1.442695, %v3338_v61  ;;  %v3803_v44 = vmul.f32 -1.442695, %v3340_v23 }
0x1131   : > { %v3802_v16 = vmul.f32 -1.442695, %v3339_v12 }
0x1132   : > { %4363 = vpow2.f32 %v3801_v14 }
0x1133   : > { %4365 = vpow2.f32 %v3802_v16 }
0x1134   : > { %4367 = vtanh.f32 %v3341_v9 }
0x1135   : > { %4369 = vpow2.f32 %v3803_v44 }
0x113c   : > { %v4364_v53 = vpop.eup %4363 }
0x113d   : > { %v3351_v55 = vadd.f32 1.0, %v4364_v53  ;;  %v4366_v34 = vpop.eup %4365 }
0x113e   : > { %v3352_v35 = vadd.f32 1.0, %v4366_v34  ;;  %v4368_v37 = vpop.eup %4367 }
0x113f   : > { %4371 = vrcp.f32 %v3351_v55  ;;  %v4370_v20 = vpop.eup %4369 }
0x1140   : > { %4373 = vrcp.f32 %v3352_v35  ;;  %v3353_v24 = vadd.f32 1.0, %v4370_v20 }
0x1142   : > { %4375 = vrcp.f32 %v3353_v24 }
0x1149   : > { %v4372_v21 = vpop.eup %4371 }
0x114a   : > { %v3365_v22 = vmul.f32 %v4372_v21, %v4368_v37  ;;  %v4374_v30 = vpop.eup %4373 }
0x114b   : > { %v3364_v39 = vmul.f32 %v4374_v30, %v3362_v38 }
0x114c   : > { %v4376_v4 = vpop.eup %4375 }
0x114d   : > { %v3366_v1 = vadd.f32 %v3365_v22, %v3364_v39 }
0x114f   : > { %4377 = vtanh.f32 %v3366_v1  ;;  %3371 = vst [vmem:[#allocation3 - $0x4] sm:$0xc0] %v3366_v1 }
0x1159   : > { %v4378_v49 = vpop.eup %4377 }
0x115a   : > { %v3368_v58 = vmul.f32 %v4378_v49, %v4376_v4 }
0x115c   : > { %3369 = vst [vmem:[#allocation4 + $0x8] sm:$0xc0] %v3368_v58  ;;  %3370 = vst [vmem:[#allocation2 - $0x4] sm:$0xc0] %v3368_v58 }
0x1163   : > { %v3373_v40 = vld [vmem:[#allocation4 + $0x8] sm:$0xff] }
0x1164   : > { %v3374_v63 = vpack.c.bf16 %v3373_v40, %v3372_v15 }
0x1166   : > { %3845 = vmatmul.mubr.bf16.vlgmr.msra.gmra.mrb[68].mxu0 %v3374_v63 }
0x1239   : > { %v3480_v57 = vpop.f32.mrb[68].mxu0 }
0x123a   : > { %v3481_v6 = vadd.f32 %v3804_v0, %v3480_v57  ;;  %v3846_v5 = vpop.f32.mrb[69].mxu0 }
0x123b   : > { %v3483_v31 = vpop.f32.mrb[70].mxu0 }
0x123c   : > { %3487 = vst [vmem:[%s4948_s21] sm:$0xff] %v3481_v6  ;;  %v3484_v10 = vadd.f32 %v3804_v0, %v3483_v31  ;;  %v3847_v27 = vpop.f32.mrb[71].mxu0 }
0x123e   : > { %3488 = vst [vmem:[%s4948_s21 + $0x8] sm:$0xff] %v3484_v10 }
0x123f   : > { %4596 = shalt.err (!%p4593_p7)
}
0x1240   : > { %s4597_s23 = scalar_lea.hbm %s5783_s22, 256  ;;  %s4601_s21 = scalar_lea.hbm %s5846_s9, 512 }
0x1241   : > { %p4598_p9 = scmp.ne.s32.totalorder %s5783_s22, %s4597_s23  ;;  %p4602_p8 = scmp.lt.u32.totalorder %s5783_s22, %s5846_s9 }
0x1242   : > { %p4603_p13 = scmp.lt.u32.totalorder %s4601_s21, %s4597_s23  ;;  %p4605_p10 = scmp.lt.u32.totalorder %s4597_s23, %s5783_s22 }
0x1243   : > { %p4599_p12 = pnand %p4598_p9, %p5875_p11 }
0x1244   : > { %p4604_p1 = por %p4603_p13, %p4602_p8 }
0x1245   : > { %p4600_p4 = pneg %p4599_p12 }
0x1246   : > { %p4606_p0 = por %p4605_p10, %p4604_p1 }
0x1248   : > { %p4607_p2 = pnand %p4606_p0, %p4600_p4 }
0x124a   : > { %4610 = shalt.err (!%p4607_p2)
}
0x124b   : > { %s4689_s20 = smov 128   ;;  %s4690_s28 = smov 8  }
0x124c   : > { %3868 = dma.vmem_to_hbm [thread:$0]  (%p5875_p11), %s5785_s16, 256, %s5783_s22, %s5791_s12, %s4689_s20, %s4689_s20, %s4690_s28  }
0x124d PF: > { %s5876_s15 = sld [smem:[#allocation23_spill]]  ;;  %s5877_s26 = sld [smem:[#allocation20_spill]] }
0x124e   : > { %s5878_s17 = sld [smem:[#allocation25_spill]] }
0x1253   : > { %p3900_p3 = scmp.ge.s32.totalorder %s5876_s15, 2  ;;  %s3520_s18 = sand.u32 1, %s5877_s26  }
0x1254   : > { %p5879_p5 = scmp.ne.s32.totalorder %s5878_s17, 0  ;;  %s3521_s30 = scalar_lea.sflag [#allocation8], %s3520_s18 }
0x1256   : > { %p3887_p6 = pnand %p3900_p3, %p5879_p5 }
0x1258   : > { %4648 = dma.done.wait (!%p3887_p6), %s3521_s30, 256  }
0x1259   : > { %4650 = vsyncadd (!%p3887_p6), %s3521_s30, 4294967040  ;;  %s25_s14 = sadd.s32 1, %s5876_s15   ;;  %s5880_s27 = sld [smem:[#allocation21_spill]] }
0x125a   : > { %p22_p7 = scmp.ge.s32.totalorder %s25_s14, 4   ;;  %s5881_s11 = sld [smem:[#allocation26_spill]] }
0x125b   : > { %s5882_s12 = sld [smem:[#allocation22_spill]]  ;;  %s5883_s13 = sld [smem:[#allocation24_spill]] }
0x125c   : > { %s5884_s30 = smov %s4657_s10  ;;  %24 = sbr.rel (!%p22_p7) target bundleno = 9 (0x9), region = 118 }
0x125f   : > { %s5885_s10 = smov %s5880_s27 }
0x1263   :  { %3526 = vsyncpa [#allocation7], 1 }
0x1264   :  { %3528 = vsyncpa [#allocation7 + $0x1], 1 }
0x1265   :  { %3529 = vsyncpa [#allocation10], 1 }
0x1266   :  { %3530 = vsyncpa [#allocation13], 1 }
0x1267   :  { %3531 = vsyncpa [#allocation8], 1 }
0x1268   :  { %3533 = vsyncpa [#allocation8 + $0x1], 1 }

// kernel: tpu_custom_call.1
= control target key start
LH: loop header
LB: loop body
LE: loop exit
PB: predicated region body
PF: predicated region fallthrough
CT: control target
= control target key end

     0   :  { %s5837_s0 = inlined_call_operand.vmem [shape: bf16[1,32,16], index: 0, kind: input, shape index: {}]   ;;  %s5838_s1 = inlined_call_operand.hbm [shape: bf16[16,512], index: 1, kind: input, shape index: {}]   ;;  %s5839_s2 = inlined_call_operand.hbm [shape: bf16[128,512], index: 2, kind: input, shape index: {}]   ;;  %s5840_s3 = inlined_call_operand.vmem [shape: f32[1,512], index: 3, kind: input, shape index: {}]   ;;  %s5841_s4 = inlined_call_operand.hbm [shape: bf16[128,512], index: 4, kind: input, shape index: {}]   ;;  %s5842_s5 = inlined_call_operand.hbm [shape: bf16[128,512], index: 5, kind: input, shape index: {}]   ;;  %s5843_s6 = inlined_call_operand.vmem [shape: f32[1,512], index: 6, kind: input, shape index: {}]   ;;  %s5844_s7 = inlined_call_operand.hbm [shape: bf16[128,128], index: 7, kind: input, shape index: {}]   ;;  %s5845_s8 = inlined_call_operand.vmem [shape: f32[1,128], index: 8, kind: input, shape index: {}]   ;;  %s5846_s9 = inlined_call_operand.hbm [shape: f32[1,32,128], index: 9, kind: output, shape index: {}]  }
   0x1   :  { %5858 = sst [smem:[#allocation27_spill]] %s5839_s2 }
   0x2   :  { %14 = vsyncpa [#allocation7], 0 }
   0x3   :  { %15 = vsyncpa [#allocation10], 0 }
   0x4   :  { %16 = vsyncpa [#allocation13], 0 }
   0x5   :  { %17 = vsyncpa [#allocation8], 0 }
   0x6   :  { %19 = vsyncpa [#allocation8 + $0x1], 0  ;;  %s4741_s30 = smov 0   ;;  %s4743_s10 = smov 0  }
   0x7   :  { %s4745_s11 = smov 0   ;;  %s4747_s12 = smov 0  }
   0x8   :  { %s4749_s13 = smov 0   ;;  %s4751_s14 = smov 0  }
   0x9 LB: > { %5859 = sst [smem:[#allocation20_spill]] %s4653_s30  ;;  %s3634_s15 = sadd.s32 4294967295, %s4673_s14   ;;  %s4673_s14 = sphi %s4751_s14, %s25_s14   ;;  %s4669_s13 = sphi %s4749_s13, %s5883_s13   ;;  %s4665_s12 = sphi %s4747_s12, %s5882_s12   ;;  %s4661_s11 = sphi %s4745_s11, %s5881_s11   ;;  %s4657_s10 = sphi %s4743_s10, %s5885_s10   ;;  %s4653_s30 = sphi %s4741_s30, %s5884_s30  }
   0xa   : > { %5860 = sst [smem:[#allocation21_spill]] %s4661_s11  ;;  %s3635_s16 = sadd.s32 4294967294, %s4673_s14  }
   0xb   : > { %5861 = sst [smem:[#allocation22_spill]] %s4669_s13  ;;  %s34_s17 = sadd.s32 1, %s4669_s13 }
   0xc   : > { %5862 = sst [smem:[#allocation23_spill]] %s4673_s14  ;;  %s242_s18 = sadd.s32 1, %s4661_s11 }
   0xd   : > { %p35_p0 = scmp.ge.s32.totalorder %s34_s17, 2  ;;  %p252_p1 = scmp.ne.s32.totalorder %s4661_s11, %s4657_s10 }
   0xe   : > { %p253_p2 = scmp.eq.s32.totalorder %s3634_s15, 1  ;;  %p258_p3 = scmp.ne.s32.totalorder %s4657_s10, %s4653_s30 }
   0xf   : > { %s5887_s17 = smov (%p35_p0, %s34_s17), 0  ;;  %p259_p5 = scmp.eq.s32.totalorder %s3635_s16, 1 }
  0x10   : > { %5863 = sst [smem:[#allocation24_spill]] %s5887_s17  ;;  %p4781_p4 = por %p253_p2, %p252_p1 }
  0x11   : > { %s238_s20 = ssub.s32 %s4669_s13, %s5887_s17  ;;  %p3636_p6 = scmp.ge.s32.totalorder %s4673_s14, 1 }
  0x12   : > { %s5864_s19 = scalar_select %p4781_p4, 1, 0 }
  0x13   : > { %p240_p7 = scmp.eq.s32.totalorder %s238_s20, 0  ;;  %p4788_p8 = por %p259_p5, %p258_p3 }
  0x14   : > { %p266_p9 = scmp.lt.s32.totalorder %s4673_s14, 3  ;;  %p4800_p11 = scmp.eq.s32.totalorder %s3634_s15, 0 }
  0x15   : > { %s5865_s21 = scalar_select %p4788_p8, 1, 0 }
  0x16   : > { %s4794_s22 = scalar_select %p240_p7, %s4661_s11, %s242_s18  }
  0x17   : > { %5866 = sst [smem:[#allocation25_spill]] %s5865_s21  ;;  %p4796_p10 = pnand %p3636_p6, %p266_p9 }
  0x18   : > { %5867 = sst [smem:[#allocation26_spill]] %s4794_s22  ;;  %s4675_s25 = smov [#allocation9]  }
  0x19   : > { %s5868_s23 = scalar_select %p4796_p10, 1, 0 }
  0x1a   : > { %s5869_s24 = scalar_select %p4800_p11, 1, 0 }
  0x1b   : > { %p3870_p12 = pneg %p4796_p10  ;;  %s291_s26 = sshll.u32 %s4675_s25, 4  ;;  %s292_s26 = int_to_ptr.vmem [resolvable:$true] %s291_s26 }
  0x1c   : > { %s4676_s28 = smov [#allocation12]   ;;  %s5871_s2 = sld [smem:[#allocation27_spill]] }
  0x1d   : > { %p4808_p13 = pnand %p4800_p11, %p3870_p12  ;;  %s320_s29 = sshll.u32 %s4676_s28, 4  ;;  %s4812_s29 = int_to_ptr.vmem [resolvable:$true] %s320_s29 }
  0x1f   : > { %p4822_p1 = pneg %p4808_p13 }
  0x22   : > { %s4443_s18 = scalar_lea.hbm %s5871_s2, 4096 }
  0x23   : > { %p4444_p0 = scmp.ne.s32.totalorder %s5871_s2, %s4443_s18  ;;  %p4450_p5 = scmp.lt.u32.totalorder %s4443_s18, %s5871_s2 }
  0x25   : > { %p4446_p2 = pnand %p4822_p1, %p4444_p0 }
  0x27   : > { %p4447_p3 = pneg %p4446_p2 }
  0x29   : > { %p4452_p6 = pnand %p4450_p5, %p4447_p3 }
  0x2b   : > { %4455 = shalt.err (!%p4452_p6)
}
  0x2c   : > { %s4456_s15 = scalar_lea.vmem %s292_s26, 4096  ;;  %p4464_p8 = scmp.lt.s32.totalorder %s292_s26, %s292_s26 }
  0x2d   : > { %p4457_p7 = scmp.ne.s32.totalorder %s292_s26, %s4456_s15  ;;  %p4465_p4 = scmp.lt.s32.totalorder %s4456_s15, %s4456_s15 }
  0x2f   : > { %p4459_p9 = pnand %p4457_p7, %p4822_p1  ;;  %p4466_p11 = por %p4465_p4, %p4464_p8 }
  0x31   : > { %p4460_p12 = pneg %p4459_p9 }
  0x33   : > { %p4467_p10 = pnand %p4466_p11, %p4460_p12 }
  0x35   : > { %4470 = shalt.err (!%p4467_p10)
}
  0x36   : > { %s4677_s17 = smov 256   ;;  %s4678_s16 = smov 16  }
  0x37   : > { %3876 = dma.hbm_to_vmem [thread:$0]  (!%p4808_p13), %s5871_s2, 4096, %s292_s26, [#allocation10], %s4677_s17, %s4677_s17, %s4678_s16  }
  0x38   : > { %s4471_s22 = scalar_lea.hbm %s5842_s5, 4096 }
  0x39   : > { %p4472_p4 = scmp.ne.s32.totalorder %s5842_s5, %s4471_s22  ;;  %p4478_p11 = scmp.lt.u32.totalorder %s4471_s22, %s5842_s5 }
  0x3b   : > { %p4474_p8 = pnand %p4472_p4, %p4822_p1 }
  0x3d   : > { %p4475_p10 = pneg %p4474_p8 }
  0x3f   : > { %p4480_p0 = pnand %p4478_p11, %p4475_p10 }
  0x41   : > { %4483 = shalt.err (!%p4480_p0)
}
  0x42   : > { %s4484_s26 = scalar_lea.vmem %s4812_s29, 4096  ;;  %p4492_p6 = scmp.lt.s32.totalorder %s4812_s29, %s4812_s29 }
  0x43   : > { %p4485_p2 = scmp.ne.s32.totalorder %s4812_s29, %s4484_s26  ;;  %p4493_p7 = scmp.lt.s32.totalorder %s4484_s26, %s4484_s26 }
  0x45   : > { %p4487_p3 = pnand %p4485_p2, %p4822_p1  ;;  %p4494_p9 = por %p4493_p7, %p4492_p6 }
  0x47   : > { %p4488_p5 = pneg %p4487_p3 }
  0x49   : > { %p4495_p12 = pnand %p4494_p9, %p4488_p5 }
  0x4b   : > { %4498 = shalt.err (!%p4495_p12)
}
  0x4c   : > { %3882 = dma.hbm_to_vmem [thread:$0]  (!%p4808_p13), %s5842_s5, 4096, %s4812_s29, [#allocation13], %s4677_s17, %s4677_s17, %s4678_s16  }
  0x4d   : > { %s4679_s21 = smov [#allocation6]   ;;  %s4680_s13 = smov [#allocation11]  }
  0x4e   : > { %s278_s22 = sshll.u32 %s4679_s21, 4  ;;  %s307_s18 = sshll.u32 %s4680_s13, 4  ;;  %s279_s22 = int_to_ptr.vmem [resolvable:$true] %s278_s22  ;;  %s308_s18 = int_to_ptr.vmem [resolvable:$true] %s307_s18 }
  0x4f   : > { %s4499_s15 = scalar_lea.hbm %s5838_s1, 512 }
  0x50   : > { %p4500_p4 = scmp.ne.s32.totalorder %s5838_s1, %s4499_s15  ;;  %p4506_p11 = scmp.lt.u32.totalorder %s4499_s15, %s5838_s1 }
  0x52   : > { %p4502_p8 = pnand %p4500_p4, %p4822_p1 }
  0x54   : > { %p4503_p10 = pneg %p4502_p8 }
  0x56   : > { %p4508_p0 = pnand %p4506_p11, %p4503_p10 }
  0x58   : > { %4511 = shalt.err (!%p4508_p0)
}
  0x59   : > { %s4512_s29 = scalar_lea.vmem %s279_s22, 512  ;;  %p4520_p6 = scmp.lt.s32.totalorder %s279_s22, %s279_s22 }
  0x5a   : > { %p4513_p2 = scmp.ne.s32.totalorder %s279_s22, %s4512_s29  ;;  %p4521_p7 = scmp.lt.s32.totalorder %s4512_s29, %s4512_s29 }
  0x5c   : > { %p4515_p3 = pnand %p4513_p2, %p4822_p1  ;;  %p4522_p9 = por %p4521_p7, %p4520_p6 }
  0x5e   : > { %p4516_p5 = pneg %p4515_p3 }
  0x60   : > { %p4523_p12 = pnand %p4522_p9, %p4516_p5 }
  0x62   : > { %4526 = shalt.err (!%p4523_p12)
}
  0x63   : > { %3873 = dma.hbm_to_vmem [thread:$0]  (!%p4808_p13), %s5838_s1, 512, %s279_s22, [#allocation7], %s4677_s17, %s4677_s17, %s4678_s16  }
  0x64   : > { %s4527_s13 = scalar_lea.hbm %s5841_s4, 4096 }
  0x65   : > { %p4528_p4 = scmp.ne.s32.totalorder %s5841_s4, %s4527_s13  ;;  %p4534_p11 = scmp.lt.u32.totalorder %s4527_s13, %s5841_s4 }
  0x67   : > { %p4530_p8 = pnand %p4528_p4, %p4822_p1 }
  0x69   : > { %p4531_p10 = pneg %p4530_p8 }
  0x6b   : > { %p4536_p0 = pnand %p4534_p11, %p4531_p10 }
  0x6d   : > { %4539 = shalt.err (!%p4536_p0)
}
  0x6e   : > { %s4540_s30 = scalar_lea.vmem %s308_s18, 4096  ;;  %p4548_p6 = scmp.lt.s32.totalorder %s308_s18, %s308_s18 }
  0x6f   : > { %p4541_p2 = scmp.ne.s32.totalorder %s308_s18, %s4540_s30  ;;  %p4549_p7 = scmp.lt.s32.totalorder %s4540_s30, %s4540_s30 }
  0x71   : > { %p4543_p3 = pnand %p4541_p2, %p4822_p1  ;;  %p4550_p9 = por %p4549_p7, %p4548_p6 }
  0x73   : > { %p4544_p5 = pneg %p4543_p3 }
  0x75   : > { %p4551_p12 = pnand %p4550_p9, %p4544_p5 }
  0x77   : > { %4554 = shalt.err (!%p4551_p12)
}
  0x78   : > { %3879 = dma.hbm_to_vmem [thread:$0]  (!%p4808_p13), %s5841_s4, 4096, %s308_s18, [#allocation10], %s4677_s17, %s4677_s17, %s4678_s16  }
  0x79   : > { %s4681_s2 = smov [#allocation14]   ;;  %s4555_s13 = scalar_lea.hbm %s5844_s7, 1024 }
  0x7a   : > { %s336_s14 = sshll.u32 %s4681_s2, 4  ;;  %p4556_p4 = scmp.ne.s32.totalorder %s5844_s7, %s4555_s13  ;;  %s337_s14 = int_to_ptr.vmem [resolvable:$true] %s336_s14 }
  0x7b   : > { %p4562_p11 = scmp.lt.u32.totalorder %s4555_s13, %s5844_s7 }
  0x7c   : > { %p4558_p8 = pnand %p4556_p4, %p4822_p1 }
  0x7e   : > { %p4559_p10 = pneg %p4558_p8 }
  0x80   : > { %p4564_p0 = pnand %p4562_p11, %p4559_p10 }
  0x82   : > { %4567 = shalt.err (!%p4564_p0)
}
  0x83   : > { %s4568_s17 = scalar_lea.vmem %s337_s14, 1024  ;;  %p4576_p6 = scmp.lt.s32.totalorder %s337_s14, %s337_s14 }
  0x84   : > { %p4569_p2 = scmp.ne.s32.totalorder %s337_s14, %s4568_s17  ;;  %p4577_p7 = scmp.lt.s32.totalorder %s4568_s17, %s4568_s17 }
  0x86   : > { %p4571_p3 = pnand %p4569_p2, %p4822_p1  ;;  %p4578_p9 = por %p4577_p7, %p4576_p6 }
  0x88   : > { %p4572_p5 = pneg %p4571_p3 }
  0x8a   : > { %p4579_p12 = pnand %p4578_p9, %p4572_p5 }
  0x8c   : > { %4582 = shalt.err (!%p4579_p12)
}
  0x8d   : > { %s4682_s16 = smov 64   ;;  %s4683_s18 = smov 4  }
  0x8e   : > { %3885 = dma.hbm_to_vmem [thread:$0]  (!%p4808_p13), %s5844_s7, 1024, %s337_s14, [#allocation13], %s4682_s16, %s4682_s16, %s4683_s18  }
  0x8f   : > { %p5873_p4 = scmp.ne.s32.totalorder %s5868_s23, 0 }
  0x90   : > { %p5874_p8 = scmp.ne.s32.totalorder (!%p5873_p4), %s5869_s24, 0 }
  0x91   : > { %368 = sbr.rel (%p5873_p4) target bundleno = 4685 (0x124d), region = 56 }
  0x98   : > { %4636 = dma.done.wait (%p5874_p8), [#allocation7], 512  }
  0x99   : > { %4638 = vsyncadd (%p5874_p8), [#allocation7], 4294966784 }
  0x9a   : > { %4640 = dma.done.wait (%p5874_p8), [#allocation10], 8192  }
  0x9b   : > { %4642 = vsyncadd (%p5874_p8), [#allocation10], 4294959104 }
  0x9c   : > { %4644 = dma.done.wait (%p5874_p8), [#allocation13], 5120  }
  0x9d   : > { %4646 = vsyncadd (%p5874_p8), [#allocation13], 4294962176  ;;  %s421_s23 = sand.u32 1, %s4657_s10   ;;  %s3650_s27 = sshll.u32 %s4665_s12, 1 }
  0x9e   : > { %s3649_s25 = sshll.u32 %s421_s23, 4  ;;  %p427_p13 = scmp.lt.s32.totalorder %s3650_s27, 3 }
  0x9f   : > { %s4948_s21 = scalar_lea.vmem [#allocation15], %s3649_s25  ;;  %p3652_p1 = scmp.ne.s32.totalorder %s4665_s12, 0 }
  0xa0   : > { %s5889_s27 = smov (!%p427_p13, %s3650_s27), 3  ;;  %v4684_v0 = vmov (!%p3652_p1), 0.0  }
  0xa1   : > { %s3651_s29 = sshll.u32 %s5889_s27, 2  ;;  %439 = sbr.rel (%p3652_p1) target bundleno = 168 (0xa8), region = 80  ;;  %440 = vst [vmem:[#allocation2] sm:$0x3] (!%p3652_p1), %v4684_v0  ;;  %441 = vst [vmem:[#allocation2 + $0x2] sm:$0x3] (!%p3652_p1), %v4684_v0 }
  0xa2   : > { %s432_s11 = scalar_lea.vmem %s5837_s0, %s3651_s29  ;;  %442 = vst [vmem:[#allocation3] sm:$0x3] (!%p3652_p1), %v4684_v0  ;;  %443 = vst [vmem:[#allocation3 + $0x2] sm:$0x3] (!%p3652_p1), %v4684_v0 }
  0xa8 PF: > { %v3964_v1 = vld [vmem:[#allocation6 + $0x4] ss:$16 sps:$4 sm:$0xff]   ;;  %v4685_v3 = vmov 0   ;;  %v3968_v4 = vld [vmem:[#allocation6] ss:$16 sps:$4 sm:$0xff]   ;;  %v3970_v6 = vld [vmem:[%s432_s11] sm:$0xff]   ;;  %v484_v41 = vlaneseq }
  0xa9   : > { %v4951_v2 = vld [vmem:[#allocation9 + $0x4] ss:$16 sps:$4 sm:$0xff]   ;;  %565 = vmatprep.mubr.bf16.mxu1 %v4685_v3  ;;  %826 = vmatprep.mubr.bf16.mxu0 %v4685_v3  ;;  %v4955_v5 = vld [vmem:[#allocation9] ss:$16 sps:$4 sm:$0xff]   ;;  %vm529_vm0 = vcmask 130048   ;;  %vm4687_vm1 = vmmov 0  }
  0xaa   : > { %533 = vmatprep.subr.bf16.mxu1 %v3964_v1  ;;  %794 = vmatprep.subr.bf16.mxu0 %v4951_v2  ;;  %v4959_v7 = vld [vmem:[#allocation9 + $0x24] ss:$16 sps:$4 sm:$0xff]   ;;  %v4961_v8 = vld [vmem:[#allocation9 + $0x20] ss:$16 sps:$4 sm:$0xff]   ;;  %v3974_v9 = vld [vmem:[#allocation6 + $0x8] ss:$16 sps:$4 sm:$0xff]  }
  0xab   : > { %534 = vmatpush1.bf16.msra.mxu1 %v3968_v4  ;;  %795 = vmatpush1.bf16.msra.mxu0 %v4955_v5  ;;  %v3976_v10 = vld [vmem:[#allocation6 + $0xc] ss:$16 sps:$4 sm:$0xff]   ;;  %v4965_v11 = vld [vmem:[#allocation9 + $0x44] ss:$16 sps:$4 sm:$0xff]   ;;  %v4967_v12 = vld [vmem:[#allocation9 + $0x40] ss:$16 sps:$4 sm:$0xff]  }
  0xac   : > { %796 = vmatprep.subr.bf16.mxu0 %v4959_v7  ;;  %576 = vmatprep.subr.bf16.mxu1 %v3976_v10  ;;  %v4970_v13 = vld [vmem:[#allocation9 + $0xc] ss:$16 sps:$4 sm:$0xff]   ;;  %v4973_v14 = vld [vmem:[#allocation9 + $0x64] ss:$16 sps:$4 sm:$0xff]   ;;  %v4978_v15 = vld [vmem:[#allocation9 + $0x8] ss:$16 sps:$4 sm:$0xff]  }
  0xad   : > { %v4980_v16 = vld [vmem:[#allocation9 + $0x60] ss:$16 sps:$4 sm:$0xff]   ;;  %v4982_v17 = vld [vmem:[#allocation9 + $0x2c] ss:$16 sps:$4 sm:$0xff]   ;;  %v4985_v18 = vld [vmem:[#allocation9 + $0x84] ss:$16 sps:$4 sm:$0xff]  }
  0xae   : > { %3658 = vmatmul.mubr.msk.bf16.vlgmr.msra.gmra.mrb[0].mxu1 %vm529_vm0, %v3970_v6  ;;  %v4988_v19 = vld [vmem:[#allocation9 + $0x28] ss:$16 sps:$4 sm:$0xff]   ;;  %v4992_v20 = vld [vmem:[#allocation9 + $0x80] ss:$16 sps:$4 sm:$0xff]   ;;  %v4996_v21 = vld [vmem:[#allocation9 + $0x4c] ss:$16 sps:$4 sm:$0xff]  }
  0xaf   : > { %797 = vmatpush1.bf16.msra.mxu0 %v4961_v8  ;;  %577 = vmatpush1.bf16.msra.mxu1 %v3974_v9  ;;  %v4998_v22 = vld [vmem:[#allocation9 + $0xa4] ss:$16 sps:$4 sm:$0xff]   ;;  %v5003_v23 = vld [vmem:[#allocation9 + $0x48] ss:$16 sps:$4 sm:$0xff]   ;;  %v5005_v24 = vld [vmem:[#allocation9 + $0xa0] ss:$16 sps:$4 sm:$0xff]  }
  0xb0   : > { %798 = vmatprep.subr.bf16.mxu0 %v4965_v11  ;;  %608 = vmatprep.mubr.bf16.mxu1 %v4685_v3  ;;  %v5007_v25 = vld [vmem:[#allocation9 + $0x6c] ss:$16 sps:$4 sm:$0xff]   ;;  %v5011_v26 = vld [vmem:[#allocation9 + $0xc4] ss:$16 sps:$4 sm:$0xff]   ;;  %v5013_v27 = vld [vmem:[#allocation9 + $0x68] ss:$16 sps:$4 sm:$0xff]  }
  0xb1   : > { %835 = vmatprep.subr.bf16.mxu1 %v4970_v13  ;;  %v5017_v28 = vld [vmem:[#allocation9 + $0xc0] ss:$16 sps:$4 sm:$0xff]   ;;  %v5021_v29 = vld [vmem:[#allocation9 + $0x8c] ss:$16 sps:$4 sm:$0xff]   ;;  %v5023_v30 = vld [vmem:[#allocation9 + $0xe4] ss:$16 sps:$4 sm:$0xff]  }
  0xb2   : > { %v5025_v31 = vld [vmem:[#allocation9 + $0x88] ss:$16 sps:$4 sm:$0xff]   ;;  %v5027_v32 = vld [vmem:[#allocation9 + $0xe0] ss:$16 sps:$4 sm:$0xff]   ;;  %v5029_v34 = vld [vmem:[#allocation9 + $0xac] ss:$16 sps:$4 sm:$0xff]  }
  0xb3   : > { %799 = vmatpush1.bf16.msra.mxu0 %v4967_v12  ;;  %v627_v33 = vld [vmem:[#allocation2] sm:$0x3]  ;;  %v5037_v37 = vld [vmem:[#allocation9 + $0xcc] ss:$16 sps:$4 sm:$0xff]   ;;  %v5089_v42 = vshrl.u32 %v484_v41, 7  ;;  %s3818_s17 = sshll.u32 %s4665_s12, 8 }
  0xb4   : > { %800 = vmatprep.subr.bf16.mxu0 %v4973_v14  ;;  %v5035_v35 = vld [vmem:[#allocation9 + $0xa8] ss:$16 sps:$4 sm:$0xff]   ;;  %v633_v36 = vpack.c.bf16 %v627_v33, %v627_v33  ;;  %v5045_v39 = vld [vmem:[#allocation9 + $0xec] ss:$16 sps:$4 sm:$0xff]   ;;  %s3505_s16 = sshll.u32 %s4948_s21, 4  ;;  %s5783_s22 = scalar_lea.hbm %s5846_s9, %s3818_s17  ;;  %s5785_s16 = int_to_ptr.vmem [resolvable:$true] %s3505_s16 }
  0xb5   : > { %v5043_v38 = vld [vmem:[#allocation9 + $0xc8] ss:$16 sps:$4 sm:$0xff]   ;;  %v486_v43 = vsub.s32 0, %v5089_v42  ;;  %v490_v45 = vsub.s32 1, %v5089_v42  ;;  %v494_v51 = vsub.s32 2, %v5089_v42  ;;  %v498_v54 = vsub.s32 3, %v5089_v42 }
  0xb6   : > { %3659 = vmatmul.mubr.msk.bf16.vlgmr.msra.gmra.mrb[4].mxu1 %vm529_vm0, %v3970_v6  ;;  %v5051_v40 = vld [vmem:[#allocation9 + $0xe8] ss:$16 sps:$4 sm:$0xff]   ;;  %s5791_s12 = scalar_lea.sflag [#allocation8], %s421_s23  ;;  %s4583_s27 = scalar_lea.vmem %s5785_s16, 256 }
  0xb7   : > { %836 = vmatpush1.bf16.msra.mxu1 %v4978_v15  ;;  %801 = vmatpush1.bf16.msra.mxu0 %v4980_v16  ;;  %v480_v44 = vld [vmem:[%s5840_s3] sm:$0xf]  ;;  %p4584_p10 = scmp.ne.s32.totalorder %s5785_s16, %s4583_s27  ;;  %p5875_p11 = scmp.ne.s32.totalorder %s5864_s19, 0 }
  0xb8   : > { %837 = vmatprep.subr.bf16.mxu1 %v4982_v17  ;;  %802 = vmatprep.subr.bf16.mxu0 %v4985_v18  ;;  %v487_v46 = vrot.slane %v480_v44, %v486_v43  ;;  %v491_v47 = vrot.slane %v480_v44, %v490_v45  ;;  %v495_v58 = vrot.slane %v480_v44, %v494_v51  ;;  %s4688_s25 = smov [#allocation15]  }
  0xb9   : > { %867 = vmatprep.mubr.bf16.mxu1 %v4685_v3  ;;  %v499_v59 = vrot.slane %v480_v44, %v498_v54  ;;  %p4585_p0 = pnand %p4584_p10, %p5875_p11  ;;  %s4587_s29 = sshll.u32 %s4688_s25, 4  ;;  %s4588_s29 = int_to_ptr.vmem [resolvable:$false] %s4587_s29 }
  0xba   : > { %s4589_s2 = scalar_lea.vmem %s4588_s29, 512  ;;  %p4590_p3 = scmp.lt.s32.totalorder %s5785_s16, %s4588_s29 }
  0xbb   : > { %838 = vmatpush1.bf16.msra.mxu1 %v4988_v19  ;;  %803 = vmatpush1.bf16.msra.mxu0 %v4992_v20  ;;  %p4586_p2 = pneg %p4585_p0  ;;  %p4591_p5 = scmp.lt.s32.totalorder %s4589_s2, %s4583_s27 }
  0xbc   : > { %839 = vmatprep.subr.bf16.mxu1 %v4996_v21  ;;  %804 = vmatprep.subr.bf16.mxu0 %v4998_v22 }
  0xbd   : > { %p4592_p6 = por %p4591_p5, %p4590_p3 }
  0xbf   : > { %840 = vmatpush1.bf16.msra.mxu1 %v5003_v23  ;;  %805 = vmatpush1.bf16.msra.mxu0 %v5005_v24  ;;  %p4593_p7 = pnand %p4592_p6, %p4586_p2 }
  0xc0   : > { %841 = vmatprep.subr.bf16.mxu1 %v5007_v25  ;;  %806 = vmatprep.subr.bf16.mxu0 %v5011_v26 }
  0xc3   : > { %842 = vmatpush1.bf16.msra.mxu1 %v5013_v27  ;;  %807 = vmatpush1.bf16.msra.mxu0 %v5017_v28 }
  0xc4   : > { %843 = vmatprep.subr.bf16.mxu1 %v5021_v29  ;;  %808 = vmatprep.subr.bf16.mxu0 %v5023_v30 }
  0xc7   : > { %844 = vmatpush1.bf16.msra.mxu1 %v5025_v31  ;;  %809 = vmatpush1.bf16.msra.mxu0 %v5027_v32 }
  0xc8   : > { %845 = vmatprep.subr.bf16.mxu1 %v5029_v34  ;;  %910 = vmatprep.subr.bf16.mxu0 %v4951_v2 }
  0xca   : > { %827 = vmatmul.mubr.bf16.vlgmr.msra.gmra.mrb[0].mxu0 %v633_v36 }
  0xcb   : > { %846 = vmatpush1.bf16.msra.mxu1 %v5035_v35  ;;  %911 = vmatpush1.bf16.msra.mxu0 %v4955_v5 }
  0xcc   : > { %847 = vmatprep.subr.bf16.mxu1 %v5037_v37  ;;  %912 = vmatprep.subr.bf16.mxu0 %v4959_v7 }
  0xcd   : > { %942 = vmatprep.mubr.bf16.mxu0 %v4685_v3 }
  0xcf   : > { %848 = vmatpush1.bf16.msra.mxu1 %v5043_v38  ;;  %913 = vmatpush1.bf16.msra.mxu0 %v4961_v8 }
  0xd0   : > { %849 = vmatprep.subr.bf16.mxu1 %v5045_v39  ;;  %914 = vmatprep.subr.bf16.mxu0 %v4965_v11 }
  0xd3   : > { %850 = vmatpush1.bf16.msra.mxu1 %v5051_v40  ;;  %915 = vmatpush1.bf16.msra.mxu0 %v4967_v12 }
  0xd4   : > { %951 = vmatprep.subr.bf16.mxu1 %v4970_v13  ;;  %916 = vmatprep.subr.bf16.mxu0 %v4973_v14 }
  0xd6   : > { %868 = vmatmul.mubr.bf16.vlgmr.msra.gmra.mrb[8].mxu1 %v633_v36 }
  0xd7   : > { %952 = vmatpush1.bf16.msra.mxu1 %v4978_v15  ;;  %917 = vmatpush1.bf16.msra.mxu0 %v4980_v16 }
  0xd8   : > { %953 = vmatprep.subr.bf16.mxu1 %v4982_v17  ;;  %918 = vmatprep.subr.bf16.mxu0 %v4985_v18 }
  0xd9   : > { %983 = vmatprep.mubr.bf16.mxu1 %v4685_v3 }
  0xdb   : > { %954 = vmatpush1.bf16.msra.mxu1 %v4988_v19  ;;  %919 = vmatpush1.bf16.msra.mxu0 %v4992_v20 }
  0xdc   : > { %955 = vmatprep.subr.bf16.mxu1 %v4996_v21  ;;  %920 = vmatprep.subr.bf16.mxu0 %v4998_v22 }
  0xdf   : > { %956 = vmatpush1.bf16.msra.mxu1 %v5003_v23  ;;  %921 = vmatpush1.bf16.msra.mxu0 %v5005_v24 }
  0xe0   : > { %957 = vmatprep.subr.bf16.mxu1 %v5007_v25  ;;  %922 = vmatprep.subr.bf16.mxu0 %v5011_v26 }
  0xe3   : > { %958 = vmatpush1.bf16.msra.mxu1 %v5013_v27  ;;  %923 = vmatpush1.bf16.msra.mxu0 %v5017_v28 }
  0xe4   : > { %959 = vmatprep.subr.bf16.mxu1 %v5021_v29  ;;  %924 = vmatprep.subr.bf16.mxu0 %v5023_v30 }
  0xe7   : > { %960 = vmatpush1.bf16.msra.mxu1 %v5025_v31  ;;  %925 = vmatpush1.bf16.msra.mxu0 %v5027_v32 }
  0xe8   : > { %961 = vmatprep.subr.bf16.mxu1 %v5029_v34  ;;  %1044 = vmatprep.subr.bf16.mxu0 %v4951_v2 }
  0xeb   : > { %962 = vmatpush1.bf16.msra.mxu1 %v5035_v35 }
  0xec   : > { %963 = vmatprep.subr.bf16.mxu1 %v5037_v37 }
  0xef   : > { %964 = vmatpush1.bf16.msra.mxu1 %v5043_v38 }
  0xf0   : > { %965 = vmatprep.subr.bf16.mxu1 %v5045_v39 }
  0xf3   : > { %966 = vmatpush1.bf16.msra.mxu1 %v5051_v40 }
  0xf4   : > { %1085 = vmatprep.subr.bf16.mxu1 %v4970_v13 }
 0x181   : > { %v567_v48 = vpop.f32.mrb[0].mxu1 }
 0x182   : > { %v568_v49 = vadd.f32 %v567_v48, %v487_v46  ;;  %v569_v50 = vpop.f32.mrb[1].mxu1 }
 0x183   : > { %v570_v52 = vadd.f32 %v569_v50, %v491_v47  ;;  %v571_v53 = vpop.f32.mrb[2].mxu1 }
 0x184   : > { %619 = vst [vmem:[#allocation5] sm:$0xff] %v568_v49  ;;  %v572_v55 = vadd.f32 %v571_v53, %v487_v46  ;;  %v573_v56 = vpop.f32.mrb[3].mxu1 }
 0x185   : > { %620 = vst [vmem:[#allocation5 + $0x8] sm:$0xff] %v570_v52  ;;  %v574_v57 = vadd.f32 %v573_v56, %v491_v47 }
 0x186   : > { %623 = vst [vmem:[#allocation5 + $0x20] sm:$0xff] %v572_v55 }
 0x187   : > { %624 = vst [vmem:[#allocation5 + $0x28] sm:$0xff] %v574_v57 }
 0x189   : > { %v610_v60 = vpop.f32.mrb[4].mxu1 }
 0x18a   : > { %v611_v61 = vadd.f32 %v610_v60, %v495_v58  ;;  %v612_v62 = vpop.f32.mrb[5].mxu1 }
 0x18b   : > { %v613_v63 = vadd.f32 %v612_v62, %v499_v59  ;;  %v614_v0 = vpop.f32.mrb[6].mxu1  ;;  %v629_v9 = vld [vmem:[#allocation5] sm:$0x3] }
 0x18c   : > { %621 = vst [vmem:[#allocation5 + $0x10] sm:$0xff] %v611_v61  ;;  %v615_v1 = vadd.f32 %v614_v0, %v495_v58  ;;  %v616_v4 = vpop.f32.mrb[7].mxu1  ;;  %v630_v36 = vld [vmem:[#allocation5 + $0x8] sm:$0x3] }
 0x18d   : > { %622 = vst [vmem:[#allocation5 + $0x18] sm:$0xff] %v613_v63  ;;  %v617_v6 = vadd.f32 %v616_v4, %v499_v59 }
 0x18e   : > { %625 = vst [vmem:[#allocation5 + $0x30] sm:$0xff] %v615_v1 }
 0x18f   : > { %626 = vst [vmem:[#allocation5 + $0x38] sm:$0xff] %v617_v6  ;;  %v628_v6 = vld [vmem:[#allocation3] sm:$0x3] }
 0x193   : > { %v631_v50 = vld [vmem:[#allocation5 + $0x10] sm:$0x3] }
 0x194   : > { %v632_v55 = vld [vmem:[#allocation5 + $0x18] sm:$0x3] }
 0x19d   : > { %v828_v10 = vpop.f32.mrb[0].mxu0 }
 0x19e   : > { %v876_v33 = vadd.f32 %v828_v10, %v629_v9  ;;  %v830_v41 = vpop.f32.mrb[1].mxu0 }
 0x19f   : > { %v877_v46 = vadd.f32 %v830_v41, %v630_v36  ;;  %v832_v47 = vpop.f32.mrb[2].mxu0 }
 0x1a0   : > { %v3692_v44 = vmul.f32 -1.442695, %v876_v33  ;;  %v833_v48 = vpop.f32.mrb[3].mxu0 }
 0x1a1   : > { %v3693_v49 = vmul.f32 -1.442695, %v877_v46 }
 0x1a2   : > { %4123 = vpow2.f32 %v3692_v44 }
 0x1a3   : > { %4125 = vpow2.f32 %v3693_v49 }
 0x1a9   : > { %v869_v52 = vpop.f32.mrb[8].mxu1 }
 0x1aa   : > { %v878_v53 = vadd.f32 %v869_v52, %v631_v50  ;;  %v871_v56 = vpop.f32.mrb[9].mxu1 }
 0x1ab   : > { %v879_v57 = vadd.f32 %v871_v56, %v632_v55  ;;  %v873_v58 = vpop.f32.mrb[10].mxu1 }
 0x1ac   : > { %v4124_v59 = vpop.eup %4123  ;;  %v3694_v60 = vmul.f32 -1.442695, %v878_v53  ;;  %v874_v61 = vpop.f32.mrb[11].mxu1 }
 0x1ad   : > { %v4126_v62 = vpop.eup %4125  ;;  %v889_v63 = vadd.f32 1.0, %v4124_v59  ;;  %4127 = vtanh.f32 %v879_v57  ;;  %v905_v57 = vld [vmem:[#allocation5] sm:$0xc] }
 0x1ae   : > { %v890_v0 = vadd.f32 1.0, %v4126_v62  ;;  %4129 = vpow2.f32 %v3694_v60  ;;  %v906_v62 = vld [vmem:[#allocation5 + $0x8] sm:$0xc] }
 0x1af   : > { %4131 = vrcp.f32 %v889_v63 }
 0x1b0   : > { %4133 = vrcp.f32 %v890_v0 }
 0x1b7   : > { %v4128_v1 = vpop.eup %4127 }
 0x1b8   : > { %v4130_v4 = vpop.eup %4129 }
 0x1b9   : > { %v4132_v9 = vpop.eup %4131  ;;  %v891_v33 = vadd.f32 1.0, %v4130_v4 }
 0x1ba   : > { %v4134_v10 = vpop.eup %4133  ;;  %v900_v36 = vmul.f32 %v4132_v9, %v4128_v1 }
 0x1bb   : > { %v899_v41 = vmul.f32 %v4134_v10, %v628_v6  ;;  %4135 = vrcp.f32 %v891_v33  ;;  %v907_v10 = vld [vmem:[#allocation5 + $0x10] sm:$0xc] }
 0x1bd   : > { %v5106_v46 = vadd.f32 %v900_v36, %v899_v41  ;;  %v908_v41 = vld [vmem:[#allocation5 + $0x18] sm:$0xc] }
 0x1bf   : > { %4137 = vtanh.f32 %v5106_v46 }
 0x1c5   : > { %v4136_v47 = vpop.eup %4135 }
 0x1c9   : > { %v4138_v44 = vpop.eup %4137 }
 0x1ca   : > { %v903_v48 = vmul.f32 %v4138_v44, %v4136_v47 }
 0x1cc   : > { %904 = vst [vmem:[#allocation4] sm:$0x3] %v903_v48  ;;  %v909_v49 = vpack.c.bf16 %v903_v48, %v903_v48 }
 0x1ce   : > { %943 = vmatmul.mubr.bf16.vlgmr.msra.gmra.mrb[4].mxu0 %v909_v49  ;;  %984 = vmatmul.mubr.bf16.vlgmr.msra.gmra.mrb[12].mxu1 %v909_v49 }
 0x1cf   : > { %1045 = vmatpush1.bf16.msra.mxu0 %v4955_v5  ;;  %1086 = vmatpush1.bf16.msra.mxu1 %v4978_v15 }
 0x1d0   : > { %1046 = vmatprep.subr.bf16.mxu0 %v4959_v7  ;;  %1087 = vmatprep.subr.bf16.mxu1 %v4982_v17 }
 0x1d1   : > { %1076 = vmatprep.mubr.bf16.mxu0 %v4685_v3  ;;  %1117 = vmatprep.mubr.bf16.mxu1 %v4685_v3 }
 0x1d3   : > { %1047 = vmatpush1.bf16.msra.mxu0 %v4961_v8  ;;  %1088 = vmatpush1.bf16.msra.mxu1 %v4988_v19 }
 0x1d4   : > { %1048 = vmatprep.subr.bf16.mxu0 %v4965_v11  ;;  %1089 = vmatprep.subr.bf16.mxu1 %v4996_v21 }
 0x1d7   : > { %1049 = vmatpush1.bf16.msra.mxu0 %v4967_v12  ;;  %1090 = vmatpush1.bf16.msra.mxu1 %v5003_v23 }
 0x1d8   : > { %1050 = vmatprep.subr.bf16.mxu0 %v4973_v14  ;;  %1091 = vmatprep.subr.bf16.mxu1 %v5007_v25 }
 0x1db   : > { %1051 = vmatpush1.bf16.msra.mxu0 %v4980_v16  ;;  %1092 = vmatpush1.bf16.msra.mxu1 %v5013_v27 }
 0x1dc   : > { %1052 = vmatprep.subr.bf16.mxu0 %v4985_v18  ;;  %1093 = vmatprep.subr.bf16.mxu1 %v5021_v29 }
 0x1df   : > { %1053 = vmatpush1.bf16.msra.mxu0 %v4992_v20  ;;  %1094 = vmatpush1.bf16.msra.mxu1 %v5025_v31 }
 0x1e0   : > { %1054 = vmatprep.subr.bf16.mxu0 %v4998_v22  ;;  %1095 = vmatprep.subr.bf16.mxu1 %v5029_v34 }
 0x1e3   : > { %1055 = vmatpush1.bf16.msra.mxu0 %v5005_v24  ;;  %1096 = vmatpush1.bf16.msra.mxu1 %v5035_v35 }
 0x1e4   : > { %1056 = vmatprep.subr.bf16.mxu0 %v5011_v26  ;;  %1097 = vmatprep.subr.bf16.mxu1 %v5037_v37 }
 0x1e7   : > { %1057 = vmatpush1.bf16.msra.mxu0 %v5017_v28  ;;  %1098 = vmatpush1.bf16.msra.mxu1 %v5043_v38 }
 0x1e8   : > { %1058 = vmatprep.subr.bf16.mxu0 %v5023_v30  ;;  %1099 = vmatprep.subr.bf16.mxu1 %v5045_v39 }
 0x1eb   : > { %1059 = vmatpush1.bf16.msra.mxu0 %v5027_v32  ;;  %1100 = vmatpush1.bf16.msra.mxu1 %v5051_v40 }
 0x1ec   : > { %1178 = vmatprep.subr.bf16.mxu0 %v4951_v2  ;;  %1219 = vmatprep.subr.bf16.mxu1 %v4970_v13 }
 0x2a1   : > { %v944_v50 = vpop.f32.mrb[4].mxu0  ;;  %v985_v52 = vpop.f32.mrb[12].mxu1 }
 0x2a2   : > { %v996_v53 = vrot.slane %v944_v50, 6  ;;  %v946_v55 = vpop.f32.mrb[5].mxu0  ;;  %v987_v56 = vpop.f32.mrb[13].mxu1  ;;  %v998_v9 = vrot.slane %v985_v52, 6  ;;  %v1028_v52 = vrot.slane %v5106_v46, 6 }
 0x2a3   : > { %v997_v58 = vrot.slane %v946_v55, 6  ;;  %v948_v59 = vpop.f32.mrb[6].mxu0  ;;  %v989_v60 = vpop.f32.mrb[14].mxu1  ;;  %v999_v33 = vrot.slane %v987_v56, 6 }
 0x2a4   : > { %v1004_v61 = vadd.f32 %v996_v53, %v905_v57  ;;  %v949_v63 = vpop.f32.mrb[7].mxu0  ;;  %v990_v0 = vpop.f32.mrb[15].mxu1  ;;  %v1006_v36 = vadd.f32 %v998_v9, %v907_v10 }
 0x2a5   : > { %v1005_v1 = vadd.f32 %v997_v58, %v906_v62  ;;  %v1007_v47 = vadd.f32 %v999_v33, %v908_v41  ;;  %v1036_v41 = vld [vmem:[#allocation5] sm:$0x30] }
 0x2a6   : > { %v3695_v4 = vmul.f32 -1.442695, %v1004_v61  ;;  %v3697_v44 = vmul.f32 -1.442695, %v1006_v36 }
 0x2a7   : > { %v3696_v6 = vmul.f32 -1.442695, %v1005_v1 }
 0x2a8   : > { %4139 = vpow2.f32 %v3695_v4 }
 0x2a9   : > { %4141 = vpow2.f32 %v3696_v6 }
 0x2aa   : > { %4143 = vtanh.f32 %v1007_v47 }
 0x2ab   : > { %4145 = vpow2.f32 %v3697_v44 }
 0x2b2   : > { %v4140_v48 = vpop.eup %4139 }
 0x2b3   : > { %v1017_v49 = vadd.f32 1.0, %v4140_v48  ;;  %v4142_v50 = vpop.eup %4141 }
 0x2b4   : > { %v1018_v53 = vadd.f32 1.0, %v4142_v50  ;;  %v4144_v55 = vpop.eup %4143  ;;  %v1037_v50 = vld [vmem:[#allocation5 + $0x8] sm:$0x30] }
 0x2b5   : > { %4147 = vrcp.f32 %v1017_v49  ;;  %v4146_v57 = vpop.eup %4145 }
 0x2b6   : > { %4149 = vrcp.f32 %v1018_v53  ;;  %v1019_v56 = vadd.f32 1.0, %v4146_v57 }
 0x2b8   : > { %4151 = vrcp.f32 %v1019_v56 }
 0x2bf   : > { %v4148_v58 = vpop.eup %4147 }
 0x2c0   : > { %v1031_v59 = vmul.f32 %v4148_v58, %v4144_v55  ;;  %v4150_v60 = vpop.eup %4149 }
 0x2c1   : > { %v1030_v61 = vmul.f32 %v4150_v60, %v1028_v52 }
 0x2c2   : > { %v4152_v63 = vpop.eup %4151 }
 0x2c3   : > { %v5144_v62 = vadd.f32 %v1031_v59, %v1030_v61  ;;  %v1038_v59 = vld [vmem:[#allocation5 + $0x10] sm:$0x30]  ;;  %v1039_v61 = vld [vmem:[#allocation5 + $0x18] sm:$0x30] }
 0x2c5   : > { %4153 = vtanh.f32 %v5144_v62 }
 0x2cf   : > { %v4154_v0 = vpop.eup %4153 }
 0x2d0   : > { %v1034_v1 = vmul.f32 %v4154_v0, %v4152_v63 }
 0x2d2   : > { %1035 = vst [vmem:[#allocation4] sm:$0xc] %v1034_v1  ;;  %v1040_v4 = vpack.c.bf16 %v1034_v1, %v1034_v1 }
 0x2d4   : > { %v1042_v6 = vrot.slane %v1040_v4, 1 }
 0x2d6   : > { %1077 = vmatmul.mubr.bf16.vlgmr.msra.gmra.mrb[8].mxu0 %v1042_v6  ;;  %1118 = vmatmul.mubr.bf16.vlgmr.msra.gmra.mrb[16].mxu1 %v1042_v6 }
 0x2d7   : > { %1179 = vmatpush1.bf16.msra.mxu0 %v4955_v5  ;;  %1220 = vmatpush1.bf16.msra.mxu1 %v4978_v15 }
 0x2d8   : > { %1180 = vmatprep.subr.bf16.mxu0 %v4959_v7  ;;  %1221 = vmatprep.subr.bf16.mxu1 %v4982_v17 }
 0x2d9   : > { %1210 = vmatprep.mubr.bf16.mxu0 %v4685_v3  ;;  %1251 = vmatprep.mubr.bf16.mxu1 %v4685_v3 }
 0x2db   : > { %1181 = vmatpush1.bf16.msra.mxu0 %v4961_v8  ;;  %1222 = vmatpush1.bf16.msra.mxu1 %v4988_v19 }
 0x2dc   : > { %1182 = vmatprep.subr.bf16.mxu0 %v4965_v11  ;;  %1223 = vmatprep.subr.bf16.mxu1 %v4996_v21 }
 0x2df   : > { %1183 = vmatpush1.bf16.msra.mxu0 %v4967_v12  ;;  %1224 = vmatpush1.bf16.msra.mxu1 %v5003_v23 }
 0x2e0   : > { %1184 = vmatprep.subr.bf16.mxu0 %v4973_v14  ;;  %1225 = vmatprep.subr.bf16.mxu1 %v5007_v25 }
 0x2e3   : > { %1185 = vmatpush1.bf16.msra.mxu0 %v4980_v16  ;;  %1226 = vmatpush1.bf16.msra.mxu1 %v5013_v27 }
 0x2e4   : > { %1186 = vmatprep.subr.bf16.mxu0 %v4985_v18  ;;  %1227 = vmatprep.subr.bf16.mxu1 %v5021_v29 }
 0x2e7   : > { %1187 = vmatpush1.bf16.msra.mxu0 %v4992_v20  ;;  %1228 = vmatpush1.bf16.msra.mxu1 %v5025_v31 }
 0x2e8   : > { %1188 = vmatprep.subr.bf16.mxu0 %v4998_v22  ;;  %1229 = vmatprep.subr.bf16.mxu1 %v5029_v34 }
 0x2eb   : > { %1189 = vmatpush1.bf16.msra.mxu0 %v5005_v24  ;;  %1230 = vmatpush1.bf16.msra.mxu1 %v5035_v35 }
 0x2ec   : > { %1190 = vmatprep.subr.bf16.mxu0 %v5011_v26  ;;  %1231 = vmatprep.subr.bf16.mxu1 %v5037_v37 }
 0x2ef   : > { %1191 = vmatpush1.bf16.msra.mxu0 %v5017_v28  ;;  %1232 = vmatpush1.bf16.msra.mxu1 %v5043_v38 }
 0x2f0   : > { %1192 = vmatprep.subr.bf16.mxu0 %v5023_v30  ;;  %1233 = vmatprep.subr.bf16.mxu1 %v5045_v39 }
 0x2f3   : > { %1193 = vmatpush1.bf16.msra.mxu0 %v5027_v32  ;;  %1234 = vmatpush1.bf16.msra.mxu1 %v5051_v40 }
 0x2f4   : > { %1312 = vmatprep.subr.bf16.mxu0 %v4951_v2  ;;  %1353 = vmatprep.subr.bf16.mxu1 %v4970_v13 }
 0x3a9   : > { %v1078_v46 = vpop.f32.mrb[8].mxu0  ;;  %v1119_v9 = vpop.f32.mrb[16].mxu1 }
 0x3aa   : > { %v1130_v10 = vrot.slane %v1078_v46, 4  ;;  %v1080_v33 = vpop.f32.mrb[9].mxu0  ;;  %v1121_v36 = vpop.f32.mrb[17].mxu1  ;;  %v1132_v2 = vrot.slane %v1119_v9, 4  ;;  %v1162_v9 = vrot.slane %v5144_v62, 6 }
 0x3ab   : > { %v1131_v47 = vrot.slane %v1080_v33, 4  ;;  %v1082_v44 = vpop.f32.mrb[10].mxu0  ;;  %v1123_v48 = vpop.f32.mrb[18].mxu1  ;;  %v1133_v60 = vrot.slane %v1121_v36, 4 }
 0x3ac   : > { %v1138_v49 = vadd.f32 %v1130_v10, %v1036_v41  ;;  %v1083_v53 = vpop.f32.mrb[11].mxu0  ;;  %v1124_v55 = vpop.f32.mrb[19].mxu1  ;;  %v1140_v56 = vadd.f32 %v1132_v2, %v1038_v59  ;;  %v1173_v59 = vld [vmem:[#allocation5 + $0x18] sm:$0xc0] }
 0x3ad   : > { %v1139_v57 = vadd.f32 %v1131_v47, %v1037_v50  ;;  %v1141_v63 = vadd.f32 %v1133_v60, %v1039_v61 }
 0x3ae   : > { %v3698_v58 = vmul.f32 -1.442695, %v1138_v49  ;;  %v3700_v0 = vmul.f32 -1.442695, %v1140_v56 }
 0x3af   : > { %v3699_v52 = vmul.f32 -1.442695, %v1139_v57 }
 0x3b0   : > { %4155 = vpow2.f32 %v3698_v58 }
 0x3b1   : > { %4157 = vpow2.f32 %v3699_v52 }
 0x3b2   : > { %4159 = vtanh.f32 %v1141_v63 }
 0x3b3   : > { %4161 = vpow2.f32 %v3700_v0 }
 0x3ba   : > { %v4156_v1 = vpop.eup %4155 }
 0x3bb   : > { %v1151_v4 = vadd.f32 1.0, %v4156_v1  ;;  %v4158_v6 = vpop.eup %4157 }
 0x3bc   : > { %v1152_v46 = vadd.f32 1.0, %v4158_v6  ;;  %v4160_v10 = vpop.eup %4159 }
 0x3bd   : > { %4163 = vrcp.f32 %v1151_v4  ;;  %v4162_v33 = vpop.eup %4161 }
 0x3be   : > { %4165 = vrcp.f32 %v1152_v46  ;;  %v1153_v36 = vadd.f32 1.0, %v4162_v33 }
 0x3c0   : > { %4167 = vrcp.f32 %v1153_v36 }
 0x3c7   : > { %v4164_v41 = vpop.eup %4163 }
 0x3c8   : > { %v1165_v47 = vmul.f32 %v4164_v41, %v4160_v10  ;;  %v4166_v44 = vpop.eup %4165 }
 0x3c9   : > { %v1164_v48 = vmul.f32 %v4166_v44, %v1162_v9 }
 0x3ca   : > { %v4168_v50 = vpop.eup %4167 }
 0x3cb   : > { %v5182_v49 = vadd.f32 %v1165_v47, %v1164_v48 }
 0x3cd   : > { %4169 = vtanh.f32 %v5182_v49  ;;  %v1296_v10 = vrot.slane %v5182_v49, 6  ;;  %v5228_v49 = vld [vmem:[#allocation9 + $0x8] ss:$16 sps:$4 sm:$0xff]  }
 0x3d7   : > { %v4170_v53 = vpop.eup %4169 }
 0x3d8   : > { %v1168_v55 = vmul.f32 %v4170_v53, %v4168_v50 }
 0x3da   : > { %1169 = vst [vmem:[#allocation4] sm:$0x30] %v1168_v55  ;;  %v1174_v57 = vpack.c.bf16 %v1168_v55, %v1168_v55 }
 0x3dc   : > { %v1176_v58 = vrot.slane %v1174_v57, 2  ;;  %v5225_v57 = vld [vmem:[#allocation9] ss:$16 sps:$4 sm:$0xff]  }
 0x3de   : > { %1211 = vmatmul.mubr.bf16.vlgmr.msra.gmra.mrb[12].mxu0 %v1176_v58  ;;  %1252 = vmatmul.mubr.bf16.vlgmr.msra.gmra.mrb[20].mxu1 %v1176_v58  ;;  %v5231_v58 = vld [vmem:[#allocation9 + $0x24] ss:$16 sps:$4 sm:$0xff]  }
 0x3df   : > { %1313 = vmatpush1.bf16.msra.mxu0 %v4955_v5  ;;  %1354 = vmatpush1.bf16.msra.mxu1 %v4978_v15  ;;  %v5217_v5 = vld [vmem:[#allocation9 + $0x4] ss:$16 sps:$4 sm:$0xff]  }
 0x3e0   : > { %1314 = vmatprep.subr.bf16.mxu0 %v4959_v7  ;;  %1355 = vmatprep.subr.bf16.mxu1 %v4982_v17  ;;  %v1170_v15 = vld [vmem:[#allocation5] sm:$0xc0] }
 0x3e1   : > { %1344 = vmatprep.mubr.bf16.mxu0 %v4685_v3  ;;  %1385 = vmatprep.mubr.bf16.mxu1 %v4685_v3 }
 0x3e3   : > { %1315 = vmatpush1.bf16.msra.mxu0 %v4961_v8  ;;  %1356 = vmatpush1.bf16.msra.mxu1 %v4988_v19 }
 0x3e4   : > { %1316 = vmatprep.subr.bf16.mxu0 %v4965_v11  ;;  %1357 = vmatprep.subr.bf16.mxu1 %v4996_v21 }
 0x3e7   : > { %1317 = vmatpush1.bf16.msra.mxu0 %v4967_v12  ;;  %1358 = vmatpush1.bf16.msra.mxu1 %v5003_v23 }
 0x3e8   : > { %1318 = vmatprep.subr.bf16.mxu0 %v4973_v14  ;;  %1359 = vmatprep.subr.bf16.mxu1 %v5007_v25 }
 0x3eb   : > { %1319 = vmatpush1.bf16.msra.mxu0 %v4980_v16  ;;  %1360 = vmatpush1.bf16.msra.mxu1 %v5013_v27 }
 0x3ec   : > { %1320 = vmatprep.subr.bf16.mxu0 %v4985_v18  ;;  %1361 = vmatprep.subr.bf16.mxu1 %v5021_v29 }
 0x3ef   : > { %1321 = vmatpush1.bf16.msra.mxu0 %v4992_v20  ;;  %1362 = vmatpush1.bf16.msra.mxu1 %v5025_v31  ;;  %v1171_v20 = vld [vmem:[#allocation5 + $0x8] sm:$0xc0] }
 0x3f0   : > { %1322 = vmatprep.subr.bf16.mxu0 %v4998_v22  ;;  %1363 = vmatprep.subr.bf16.mxu1 %v5029_v34 }
 0x3f3   : > { %1323 = vmatpush1.bf16.msra.mxu0 %v5005_v24  ;;  %1364 = vmatpush1.bf16.msra.mxu1 %v5035_v35 }
 0x3f4   : > { %1324 = vmatprep.subr.bf16.mxu0 %v5011_v26  ;;  %1365 = vmatprep.subr.bf16.mxu1 %v5037_v37 }
 0x3f7   : > { %1325 = vmatpush1.bf16.msra.mxu0 %v5017_v28  ;;  %1366 = vmatpush1.bf16.msra.mxu1 %v5043_v38 }
 0x3f8   : > { %1326 = vmatprep.subr.bf16.mxu0 %v5023_v30  ;;  %1367 = vmatprep.subr.bf16.mxu1 %v5045_v39 }
 0x3fb   : > { %1327 = vmatpush1.bf16.msra.mxu0 %v5027_v32  ;;  %1368 = vmatpush1.bf16.msra.mxu1 %v5051_v40 }
 0x3fc   : > { %1431 = vmatprep.subr.bf16.mxu0 %v5217_v5  ;;  %1472 = vmatprep.subr.bf16.mxu1 %v4970_v13  ;;  %v1172_v13 = vld [vmem:[#allocation5 + $0x10] sm:$0xc0] }
 0x4b1   : > { %v1212_v7 = vpop.f32.mrb[12].mxu0  ;;  %v1253_v8 = vpop.f32.mrb[20].mxu1 }
 0x4b2   : > { %v1264_v11 = vrot.slane %v1212_v7, 2  ;;  %v1214_v12 = vpop.f32.mrb[13].mxu0  ;;  %v1255_v14 = vpop.f32.mrb[21].mxu1  ;;  %v1266_v62 = vrot.slane %v1253_v8, 2  ;;  %v5234_v7 = vld [vmem:[#allocation9 + $0x2c] ss:$16 sps:$4 sm:$0xff]  }
 0x4b3   : > { %v1265_v16 = vrot.slane %v1214_v12, 2  ;;  %v1216_v17 = vpop.f32.mrb[14].mxu0  ;;  %v1257_v18 = vpop.f32.mrb[22].mxu1  ;;  %v1267_v52 = vrot.slane %v1255_v14, 2  ;;  %v5239_v8 = vld [vmem:[#allocation9 + $0x20] ss:$16 sps:$4 sm:$0xff]  }
 0x4b4   : > { %v1272_v19 = vadd.f32 %v1264_v11, %v1170_v15  ;;  %v1217_v21 = vpop.f32.mrb[15].mxu0  ;;  %v1258_v22 = vpop.f32.mrb[23].mxu1  ;;  %v1274_v2 = vadd.f32 %v1266_v62, %v1172_v13  ;;  %v5242_v11 = vld [vmem:[#allocation9 + $0x28] ss:$16 sps:$4 sm:$0xff]   ;;  %v5245_v12 = vld [vmem:[#allocation9 + $0x44] ss:$16 sps:$4 sm:$0xff]  }
 0x4b5   : > { %v1273_v24 = vadd.f32 %v1265_v16, %v1171_v20  ;;  %v1275_v60 = vadd.f32 %v1267_v52, %v1173_v59  ;;  %v5248_v14 = vld [vmem:[#allocation9 + $0x4c] ss:$16 sps:$4 sm:$0xff]   ;;  %v5251_v15 = vld [vmem:[#allocation9 + $0x40] ss:$16 sps:$4 sm:$0xff]   ;;  %v5255_v16 = vld [vmem:[#allocation9 + $0x64] ss:$16 sps:$4 sm:$0xff]  }
 0x4b6   : > { %v3701_v26 = vmul.f32 -1.442695, %v1272_v19  ;;  %v3703_v56 = vmul.f32 -1.442695, %v1274_v2  ;;  %v5259_v17 = vld [vmem:[#allocation9 + $0x60] ss:$16 sps:$4 sm:$0xff]  }
 0x4b7   : > { %v3702_v28 = vmul.f32 -1.442695, %v1273_v24  ;;  %v5263_v18 = vld [vmem:[#allocation9 + $0x84] ss:$16 sps:$4 sm:$0xff]   ;;  %v5267_v19 = vld [vmem:[#allocation9 + $0x80] ss:$16 sps:$4 sm:$0xff]  }
 0x4b8   : > { %4171 = vpow2.f32 %v3701_v26  ;;  %v1305_v21 = vld [vmem:[#allocation5 + $0x28] sm:$0x3]  ;;  %v1306_v62 = vld [vmem:[#allocation5 + $0x30] sm:$0x3]  ;;  %v1307_v52 = vld [vmem:[#allocation5 + $0x38] sm:$0x3] }
 0x4b9   : > { %4173 = vpow2.f32 %v3702_v28 }
 0x4ba   : > { %4175 = vtanh.f32 %v1275_v60 }
 0x4bb   : > { %4177 = vpow2.f32 %v3703_v56 }
 0x4c2   : > { %v4172_v61 = vpop.eup %4171 }
 0x4c3   : > { %v1285_v63 = vadd.f32 1.0, %v4172_v61  ;;  %v4174_v0 = vpop.eup %4173 }
 0x4c4   : > { %v1286_v1 = vadd.f32 1.0, %v4174_v0  ;;  %v4176_v4 = vpop.eup %4175 }
 0x4c5   : > { %4179 = vrcp.f32 %v1285_v63  ;;  %v4178_v6 = vpop.eup %4177 }
 0x4c6   : > { %4181 = vrcp.f32 %v1286_v1  ;;  %v1287_v9 = vadd.f32 1.0, %v4178_v6 }
 0x4c8   : > { %4183 = vrcp.f32 %v1287_v9 }
 0x4cf   : > { %v4180_v46 = vpop.eup %4179 }
 0x4d0   : > { %v1299_v33 = vmul.f32 %v4180_v46, %v4176_v4  ;;  %v4182_v41 = vpop.eup %4181 }
 0x4d1   : > { %v1298_v47 = vmul.f32 %v4182_v41, %v1296_v10 }
 0x4d2   : > { %v4184_v36 = vpop.eup %4183 }
 0x4d3   : > { %v5222_v44 = vadd.f32 %v1299_v33, %v1298_v47 }
 0x4d5   : > { %4185 = vtanh.f32 %v5222_v44  ;;  %v1418_v6 = vrot.slane %v5222_v44, 6  ;;  %v5310_v44 = vld [vmem:[#allocation9 + $0x48] ss:$16 sps:$4 sm:$0xff]  }
 0x4df   : > { %v4186_v48 = vpop.eup %4185 }
 0x4e0   : > { %v1302_v50 = vmul.f32 %v4186_v48, %v4184_v36 }
 0x4e2   : > { %1303 = vst [vmem:[#allocation4] sm:$0xc0] %v1302_v50  ;;  %v1308_v53 = vpack.c.bf16 %v1302_v50, %v1302_v50 }
 0x4e4   : > { %v1310_v55 = vrot.slane %v1308_v53, 3  ;;  %v5314_v53 = vld [vmem:[#allocation9 + $0x6c] ss:$16 sps:$4 sm:$0xff]  }
 0x4e6   : > { %1345 = vmatmul.mubr.bf16.vlgmr.msra.gmra.mrb[16].mxu0 %v1310_v55  ;;  %1386 = vmatmul.mubr.bf16.vlgmr.msra.gmra.mrb[24].mxu1 %v1310_v55  ;;  %v5318_v55 = vld [vmem:[#allocation9 + $0x68] ss:$16 sps:$4 sm:$0xff]  }
 0x4e7   : > { %1432 = vmatpush1.bf16.msra.mxu0 %v5225_v57  ;;  %1473 = vmatpush1.bf16.msra.mxu1 %v5228_v49 }
 0x4e8   : > { %1433 = vmatprep.subr.bf16.mxu0 %v5231_v58  ;;  %1474 = vmatprep.subr.bf16.mxu1 %v5234_v7 }
 0x4e9   : > { %1463 = vmatprep.mubr.bf16.mxu0 %v4685_v3  ;;  %1504 = vmatprep.mubr.bf16.mxu1 %v4685_v3 }
 0x4eb   : > { %1434 = vmatpush1.bf16.msra.mxu0 %v5239_v8  ;;  %1475 = vmatpush1.bf16.msra.mxu1 %v5242_v11 }
 0x4ec   : > { %1435 = vmatprep.subr.bf16.mxu0 %v5245_v12  ;;  %1476 = vmatprep.subr.bf16.mxu1 %v5248_v14 }
 0x4ef   : > { %1436 = vmatpush1.bf16.msra.mxu0 %v5251_v15  ;;  %1477 = vmatpush1.bf16.msra.mxu1 %v5003_v23  ;;  %v5271_v23 = vld [vmem:[#allocation9 + $0xa4] ss:$16 sps:$4 sm:$0xff]  }
 0x4f0   : > { %1437 = vmatprep.subr.bf16.mxu0 %v5255_v16  ;;  %1478 = vmatprep.subr.bf16.mxu1 %v5007_v25  ;;  %v5275_v25 = vld [vmem:[#allocation9 + $0xa0] ss:$16 sps:$4 sm:$0xff]  }
 0x4f3   : > { %1438 = vmatpush1.bf16.msra.mxu0 %v5259_v17  ;;  %1479 = vmatpush1.bf16.msra.mxu1 %v5013_v27  ;;  %v5279_v27 = vld [vmem:[#allocation9 + $0xc4] ss:$16 sps:$4 sm:$0xff]  }
 0x4f4   : > { %1439 = vmatprep.subr.bf16.mxu0 %v5263_v18  ;;  %1480 = vmatprep.subr.bf16.mxu1 %v5021_v29  ;;  %v5283_v29 = vld [vmem:[#allocation9 + $0xc0] ss:$16 sps:$4 sm:$0xff]  }
 0x4f7   : > { %1440 = vmatpush1.bf16.msra.mxu0 %v5267_v19  ;;  %1481 = vmatpush1.bf16.msra.mxu1 %v5025_v31  ;;  %v5292_v31 = vld [vmem:[#allocation9 + $0xc] ss:$16 sps:$4 sm:$0xff]  }
 0x4f8   : > { %1441 = vmatprep.subr.bf16.mxu0 %v5271_v23  ;;  %1482 = vmatprep.subr.bf16.mxu1 %v5029_v34  ;;  %v1304_v34 = vld [vmem:[#allocation5 + $0x20] sm:$0x3] }
 0x4fb   : > { %1442 = vmatpush1.bf16.msra.mxu0 %v5275_v25  ;;  %1483 = vmatpush1.bf16.msra.mxu1 %v5035_v35 }
 0x4fc   : > { %1443 = vmatprep.subr.bf16.mxu0 %v5279_v27  ;;  %1484 = vmatprep.subr.bf16.mxu1 %v5037_v37 }
 0x4ff   : > { %1444 = vmatpush1.bf16.msra.mxu0 %v5283_v29  ;;  %1485 = vmatpush1.bf16.msra.mxu1 %v5043_v38 }
 0x500   : > { %1445 = vmatprep.subr.bf16.mxu0 %v5023_v30  ;;  %1486 = vmatprep.subr.bf16.mxu1 %v5045_v39 }
 0x503   : > { %1446 = vmatpush1.bf16.msra.mxu0 %v5027_v32  ;;  %1487 = vmatpush1.bf16.msra.mxu1 %v5051_v40 }
 0x504   : > { %1565 = vmatprep.subr.bf16.mxu0 %v5217_v5  ;;  %1606 = vmatprep.subr.bf16.mxu1 %v5292_v31 }
 0x5b9   : > { %v1346_v35 = vpop.f32.mrb[16].mxu0  ;;  %v1387_v37 = vpop.f32.mrb[24].mxu1 }
 0x5ba   : > { %v1394_v20 = vadd.f32 %v1346_v35, %v1304_v34  ;;  %v1348_v38 = vpop.f32.mrb[17].mxu0  ;;  %v1389_v22 = vpop.f32.mrb[25].mxu1  ;;  %v1396_v13 = vadd.f32 %v1387_v37, %v1306_v62  ;;  %v5322_v34 = vld [vmem:[#allocation9 + $0x8c] ss:$16 sps:$4 sm:$0xff]   ;;  %v5326_v35 = vld [vmem:[#allocation9 + $0x88] ss:$16 sps:$4 sm:$0xff]  }
 0x5bb   : > { %v1395_v30 = vadd.f32 %v1348_v38, %v1305_v21  ;;  %v1350_v24 = vpop.f32.mrb[18].mxu0  ;;  %v1391_v39 = vpop.f32.mrb[26].mxu1  ;;  %v1397_v2 = vadd.f32 %v1389_v22, %v1307_v52  ;;  %v5330_v37 = vld [vmem:[#allocation9 + $0xac] ss:$16 sps:$4 sm:$0xff]   ;;  %v5342_v38 = vld [vmem:[#allocation9 + $0xc8] ss:$16 sps:$4 sm:$0xff]  }
 0x5bc   : > { %v3704_v26 = vmul.f32 -1.442695, %v1394_v20  ;;  %v1351_v32 = vpop.f32.mrb[19].mxu0  ;;  %v1392_v28 = vpop.f32.mrb[27].mxu1  ;;  %v3706_v59 = vmul.f32 -1.442695, %v1396_v13 }
 0x5bd   : > { %v3705_v40 = vmul.f32 -1.442695, %v1395_v30  ;;  %v5334_v20 = vld [vmem:[#allocation9 + $0xa8] ss:$16 sps:$4 sm:$0xff]   ;;  %v5338_v21 = vld [vmem:[#allocation9 + $0xcc] ss:$16 sps:$4 sm:$0xff]  }
 0x5be   : > { %4187 = vpow2.f32 %v3704_v26  ;;  %v5345_v22 = vld [vmem:[#allocation9 + $0xe4] ss:$16 sps:$4 sm:$0xff]   ;;  %v5348_v30 = vld [vmem:[#allocation9 + $0xec] ss:$16 sps:$4 sm:$0xff]   ;;  %v5351_v24 = vld [vmem:[#allocation9 + $0xe0] ss:$16 sps:$4 sm:$0xff]  }
 0x5bf   : > { %4189 = vpow2.f32 %v3705_v40  ;;  %v5354_v39 = vld [vmem:[#allocation9 + $0xe8] ss:$16 sps:$4 sm:$0xff]   ;;  %v1426_v13 = vld [vmem:[#allocation5 + $0x20] sm:$0xc] }
 0x5c0   : > { %4191 = vtanh.f32 %v1397_v2 }
 0x5c1   : > { %4193 = vpow2.f32 %v3706_v59 }
 0x5c8   : > { %v4188_v60 = vpop.eup %4187 }
 0x5c9   : > { %v1407_v56 = vadd.f32 1.0, %v4188_v60  ;;  %v4190_v61 = vpop.eup %4189 }
 0x5ca   : > { %v1408_v63 = vadd.f32 1.0, %v4190_v61  ;;  %v4192_v0 = vpop.eup %4191 }
 0x5cb   : > { %4195 = vrcp.f32 %v1407_v56  ;;  %v4194_v1 = vpop.eup %4193  ;;  %v1427_v56 = vld [vmem:[#allocation5 + $0x28] sm:$0xc] }
 0x5cc   : > { %4197 = vrcp.f32 %v1408_v63  ;;  %v1409_v33 = vadd.f32 1.0, %v4194_v1 }
 0x5ce   : > { %4199 = vrcp.f32 %v1409_v33 }
 0x5d5   : > { %v4196_v4 = vpop.eup %4195 }
 0x5d6   : > { %v1421_v46 = vmul.f32 %v4196_v4, %v4192_v0  ;;  %v4198_v10 = vpop.eup %4197 }
 0x5d7   : > { %v1420_v41 = vmul.f32 %v4198_v10, %v1418_v6  ;;  %v1429_v10 = vld [vmem:[#allocation5 + $0x38] sm:$0xc] }
 0x5d8   : > { %v4200_v47 = vpop.eup %4199 }
 0x5d9   : > { %v5296_v9 = vadd.f32 %v1421_v46, %v1420_v41 }
 0x5db   : > { %4201 = vtanh.f32 %v5296_v9 }
 0x5e5   : > { %v4202_v36 = vpop.eup %4201 }
 0x5e6   : > { %v1424_v48 = vmul.f32 %v4202_v36, %v4200_v47 }
 0x5e8   : > { %1425 = vst [vmem:[#allocation4 + $0x8] sm:$0x3] %v1424_v48  ;;  %v1430_v50 = vpack.c.bf16 %v1424_v48, %v1424_v48 }
 0x5ea   : > { %1464 = vmatmul.mubr.bf16.vlgmr.msra.gmra.mrb[20].mxu0 %v1430_v50  ;;  %1505 = vmatmul.mubr.bf16.vlgmr.msra.gmra.mrb[28].mxu1 %v1430_v50 }
 0x5eb   : > { %1566 = vmatpush1.bf16.msra.mxu0 %v5225_v57  ;;  %1607 = vmatpush1.bf16.msra.mxu1 %v5228_v49 }
 0x5ec   : > { %1567 = vmatprep.subr.bf16.mxu0 %v5231_v58  ;;  %1608 = vmatprep.subr.bf16.mxu1 %v5234_v7 }
 0x5ed   : > { %1597 = vmatprep.mubr.bf16.mxu0 %v4685_v3  ;;  %1638 = vmatprep.mubr.bf16.mxu1 %v4685_v3 }
 0x5ef   : > { %1568 = vmatpush1.bf16.msra.mxu0 %v5239_v8  ;;  %1609 = vmatpush1.bf16.msra.mxu1 %v5242_v11 }
 0x5f0   : > { %1569 = vmatprep.subr.bf16.mxu0 %v5245_v12  ;;  %1610 = vmatprep.subr.bf16.mxu1 %v5248_v14 }
 0x5f3   : > { %1570 = vmatpush1.bf16.msra.mxu0 %v5251_v15  ;;  %1611 = vmatpush1.bf16.msra.mxu1 %v5310_v44 }
 0x5f4   : > { %1571 = vmatprep.subr.bf16.mxu0 %v5255_v16  ;;  %1612 = vmatprep.subr.bf16.mxu1 %v5314_v53 }
 0x5f7   : > { %1572 = vmatpush1.bf16.msra.mxu0 %v5259_v17  ;;  %1613 = vmatpush1.bf16.msra.mxu1 %v5318_v55 }
 0x5f8   : > { %1573 = vmatprep.subr.bf16.mxu0 %v5263_v18  ;;  %1614 = vmatprep.subr.bf16.mxu1 %v5322_v34 }
 0x5fb   : > { %1574 = vmatpush1.bf16.msra.mxu0 %v5267_v19  ;;  %1615 = vmatpush1.bf16.msra.mxu1 %v5326_v35 }
 0x5fc   : > { %1575 = vmatprep.subr.bf16.mxu0 %v5271_v23  ;;  %1616 = vmatprep.subr.bf16.mxu1 %v5330_v37 }
 0x5ff   : > { %1576 = vmatpush1.bf16.msra.mxu0 %v5275_v25  ;;  %1617 = vmatpush1.bf16.msra.mxu1 %v5334_v20 }
 0x600   : > { %1577 = vmatprep.subr.bf16.mxu0 %v5279_v27  ;;  %1618 = vmatprep.subr.bf16.mxu1 %v5338_v21 }
 0x603   : > { %1578 = vmatpush1.bf16.msra.mxu0 %v5283_v29  ;;  %1619 = vmatpush1.bf16.msra.mxu1 %v5342_v38 }
 0x604   : > { %1579 = vmatprep.subr.bf16.mxu0 %v5345_v22  ;;  %1620 = vmatprep.subr.bf16.mxu1 %v5348_v30 }
 0x607   : > { %1580 = vmatpush1.bf16.msra.mxu0 %v5351_v24  ;;  %1621 = vmatpush1.bf16.msra.mxu1 %v5354_v39 }
 0x608   : > { %1699 = vmatprep.subr.bf16.mxu0 %v5217_v5  ;;  %1740 = vmatprep.subr.bf16.mxu1 %v5292_v31  ;;  %v1428_v31 = vld [vmem:[#allocation5 + $0x30] sm:$0xc] }
 0x6bd   : > { %v1465_v26 = vpop.f32.mrb[20].mxu0  ;;  %v1506_v32 = vpop.f32.mrb[28].mxu1 }
 0x6be   : > { %v1517_v28 = vrot.slane %v1465_v26, 6  ;;  %v1467_v40 = vpop.f32.mrb[21].mxu0  ;;  %v1508_v62 = vpop.f32.mrb[29].mxu1  ;;  %v1519_v5 = vrot.slane %v1506_v32, 6  ;;  %v1549_v32 = vrot.slane %v5296_v9, 6 }
 0x6bf   : > { %v1518_v52 = vrot.slane %v1467_v40, 6  ;;  %v1469_v2 = vpop.f32.mrb[22].mxu0  ;;  %v1510_v59 = vpop.f32.mrb[30].mxu1  ;;  %v1520_v6 = vrot.slane %v1508_v62, 6  ;;  %v1559_v9 = vld [vmem:[#allocation5 + $0x30] sm:$0x30] }
 0x6c0   : > { %v1525_v60 = vadd.f32 %v1517_v28, %v1426_v13  ;;  %v1470_v61 = vpop.f32.mrb[23].mxu0  ;;  %v1511_v63 = vpop.f32.mrb[31].mxu1  ;;  %v1527_v46 = vadd.f32 %v1519_v5, %v1428_v31 }
 0x6c1   : > { %v1526_v0 = vadd.f32 %v1518_v52, %v1427_v56  ;;  %v1528_v33 = vadd.f32 %v1520_v6, %v1429_v10 }
 0x6c2   : > { %v3707_v1 = vmul.f32 -1.442695, %v1525_v60  ;;  %v3709_v41 = vmul.f32 -1.442695, %v1527_v46 }
 0x6c3   : > { %v3708_v4 = vmul.f32 -1.442695, %v1526_v0 }
 0x6c4   : > { %4203 = vpow2.f32 %v3707_v1 }
 0x6c5   : > { %4205 = vpow2.f32 %v3708_v4 }
 0x6c6   : > { %4207 = vtanh.f32 %v1528_v33 }
 0x6c7   : > { %4209 = vpow2.f32 %v3709_v41 }
 0x6ce   : > { %v4204_v47 = vpop.eup %4203 }
 0x6cf   : > { %v1538_v36 = vadd.f32 1.0, %v4204_v47  ;;  %v4206_v48 = vpop.eup %4205 }
 0x6d0   : > { %v1539_v50 = vadd.f32 1.0, %v4206_v48  ;;  %v4208_v26 = vpop.eup %4207  ;;  %v4024_v48 = vld [vmem:[#allocation11 + $0xc] ss:$16 sps:$4 sm:$0xff]  }
 0x6d1   : > { %4211 = vrcp.f32 %v1538_v36  ;;  %v4210_v28 = vpop.eup %4209  ;;  %v4021_v36 = vld [vmem:[#allocation11 + $0x4] ss:$16 sps:$4 sm:$0xff]  }
 0x6d2   : > { %4213 = vrcp.f32 %v1539_v50  ;;  %v1540_v62 = vadd.f32 1.0, %v4210_v28  ;;  %v4019_v50 = vld [vmem:[#allocation11] ss:$16 sps:$4 sm:$0xff]   ;;  %v4027_v28 = vld [vmem:[#allocation11 + $0x24] ss:$16 sps:$4 sm:$0xff]  }
 0x6d4   : > { %4215 = vrcp.f32 %v1540_v62  ;;  %v4036_v62 = vld [vmem:[#allocation11 + $0x4c] ss:$16 sps:$4 sm:$0xff]  }
 0x6db   : > { %v4212_v40 = vpop.eup %4211 }
 0x6dc   : > { %v1552_v13 = vmul.f32 %v4212_v40, %v4208_v26  ;;  %v4214_v52 = vpop.eup %4213  ;;  %v4022_v26 = vld [vmem:[#allocation11 + $0x8] ss:$16 sps:$4 sm:$0xff]   ;;  %v4030_v40 = vld [vmem:[#allocation11 + $0x2c] ss:$16 sps:$4 sm:$0xff]  }
 0x6dd   : > { %v1551_v2 = vmul.f32 %v4214_v52, %v1549_v32  ;;  %v4025_v32 = vld [vmem:[#allocation11 + $0x20] ss:$16 sps:$4 sm:$0xff]   ;;  %v4033_v52 = vld [vmem:[#allocation11 + $0x44] ss:$16 sps:$4 sm:$0xff]  }
 0x6de   : > { %v4216_v60 = vpop.eup %4215 }
 0x6df   : > { %v5360_v59 = vadd.f32 %v1552_v13, %v1551_v2  ;;  %v4028_v13 = vld [vmem:[#allocation11 + $0x28] ss:$16 sps:$4 sm:$0xff]   ;;  %v4031_v2 = vld [vmem:[#allocation11 + $0x40] ss:$16 sps:$4 sm:$0xff]  }
 0x6e1   : > { %4217 = vtanh.f32 %v5360_v59 }
 0x6eb   : > { %v4218_v56 = vpop.eup %4217 }
 0x6ec   : > { %v1555_v61 = vmul.f32 %v4218_v56, %v4216_v60  ;;  %v4039_v60 = vld [vmem:[#allocation11 + $0x64] ss:$16 sps:$4 sm:$0xff]   ;;  %v4042_v56 = vld [vmem:[#allocation11 + $0x6c] ss:$16 sps:$4 sm:$0xff]  }
 0x6ee   : > { %1556 = vst [vmem:[#allocation4 + $0x8] sm:$0xc] %v1555_v61  ;;  %v1561_v63 = vpack.c.bf16 %v1555_v61, %v1555_v61  ;;  %v4037_v61 = vld [vmem:[#allocation11 + $0x60] ss:$16 sps:$4 sm:$0xff]  }
 0x6f0   : > { %v1563_v0 = vrot.slane %v1561_v63, 1  ;;  %v4040_v63 = vld [vmem:[#allocation11 + $0x68] ss:$16 sps:$4 sm:$0xff]  }
 0x6f2   : > { %1598 = vmatmul.mubr.bf16.vlgmr.msra.gmra.mrb[24].mxu0 %v1563_v0  ;;  %1639 = vmatmul.mubr.bf16.vlgmr.msra.gmra.mrb[32].mxu1 %v1563_v0  ;;  %v4045_v0 = vld [vmem:[#allocation11 + $0x84] ss:$16 sps:$4 sm:$0xff]  }
 0x6f3   : > { %1700 = vmatpush1.bf16.msra.mxu0 %v5225_v57  ;;  %1741 = vmatpush1.bf16.msra.mxu1 %v5228_v49 }
 0x6f4   : > { %1701 = vmatprep.subr.bf16.mxu0 %v5231_v58  ;;  %1742 = vmatprep.subr.bf16.mxu1 %v5234_v7 }
 0x6f5   : > { %1731 = vmatprep.mubr.bf16.mxu0 %v4685_v3  ;;  %1772 = vmatprep.mubr.bf16.mxu1 %v4685_v3 }
 0x6f7   : > { %1702 = vmatpush1.bf16.msra.mxu0 %v5239_v8  ;;  %1743 = vmatpush1.bf16.msra.mxu1 %v5242_v11  ;;  %v1557_v11 = vld [vmem:[#allocation5 + $0x20] sm:$0x30] }
 0x6f8   : > { %1703 = vmatprep.subr.bf16.mxu0 %v5245_v12  ;;  %1744 = vmatprep.subr.bf16.mxu1 %v5248_v14 }
 0x6fb   : > { %1704 = vmatpush1.bf16.msra.mxu0 %v5251_v15  ;;  %1745 = vmatpush1.bf16.msra.mxu1 %v5310_v44 }
 0x6fc   : > { %1705 = vmatprep.subr.bf16.mxu0 %v5255_v16  ;;  %1746 = vmatprep.subr.bf16.mxu1 %v5314_v53 }
 0x6ff   : > { %1706 = vmatpush1.bf16.msra.mxu0 %v5259_v17  ;;  %1747 = vmatpush1.bf16.msra.mxu1 %v5318_v55  ;;  %v1558_v17 = vld [vmem:[#allocation5 + $0x28] sm:$0x30]  ;;  %v1560_v55 = vld [vmem:[#allocation5 + $0x38] sm:$0x30] }
 0x700   : > { %1707 = vmatprep.subr.bf16.mxu0 %v5263_v18  ;;  %1748 = vmatprep.subr.bf16.mxu1 %v5322_v34 }
 0x703   : > { %1708 = vmatpush1.bf16.msra.mxu0 %v5267_v19  ;;  %1749 = vmatpush1.bf16.msra.mxu1 %v5326_v35 }
 0x704   : > { %1709 = vmatprep.subr.bf16.mxu0 %v5271_v23  ;;  %1750 = vmatprep.subr.bf16.mxu1 %v5330_v37 }
 0x707   : > { %1710 = vmatpush1.bf16.msra.mxu0 %v5275_v25  ;;  %1751 = vmatpush1.bf16.msra.mxu1 %v5334_v20 }
 0x708   : > { %1711 = vmatprep.subr.bf16.mxu0 %v5279_v27  ;;  %1752 = vmatprep.subr.bf16.mxu1 %v5338_v21 }
 0x70b   : > { %1712 = vmatpush1.bf16.msra.mxu0 %v5283_v29  ;;  %1753 = vmatpush1.bf16.msra.mxu1 %v5342_v38 }
 0x70c   : > { %1713 = vmatprep.subr.bf16.mxu0 %v5345_v22  ;;  %1754 = vmatprep.subr.bf16.mxu1 %v5348_v30 }
 0x70f   : > { %1714 = vmatpush1.bf16.msra.mxu0 %v5351_v24  ;;  %1755 = vmatpush1.bf16.msra.mxu1 %v5354_v39  ;;  %v1683_v39 = vrot.slane %v5360_v59, 6  ;;  %v4034_v59 = vld [vmem:[#allocation11 + $0x48] ss:$16 sps:$4 sm:$0xff]  }
 0x710   : > { %2076 = vmatprep.subr.bf16.mxu0 %v4021_v36  ;;  %2119 = vmatprep.subr.bf16.mxu1 %v4024_v48 }
 0x7c5   : > { %v1599_v57 = vpop.f32.mrb[24].mxu0  ;;  %v1640_v49 = vpop.f32.mrb[32].mxu1 }
 0x7c6   : > { %v1651_v58 = vrot.slane %v1599_v57, 4  ;;  %v1601_v7 = vpop.f32.mrb[25].mxu0  ;;  %v1642_v8 = vpop.f32.mrb[33].mxu1  ;;  %v1653_v29 = vrot.slane %v1640_v49, 4  ;;  %v4048_v57 = vld [vmem:[#allocation11 + $0x8c] ss:$16 sps:$4 sm:$0xff]  }
 0x7c7   : > { %v1652_v12 = vrot.slane %v1601_v7, 4  ;;  %v1603_v14 = vpop.f32.mrb[26].mxu0  ;;  %v1644_v15 = vpop.f32.mrb[34].mxu1  ;;  %v1654_v44 = vrot.slane %v1642_v8, 4  ;;  %v4043_v49 = vld [vmem:[#allocation11 + $0x80] ss:$16 sps:$4 sm:$0xff]  }
 0x7c8   : > { %v1659_v16 = vadd.f32 %v1651_v58, %v1557_v11  ;;  %v1604_v18 = vpop.f32.mrb[27].mxu0  ;;  %v1645_v19 = vpop.f32.mrb[35].mxu1  ;;  %v1661_v53 = vadd.f32 %v1653_v29, %v1559_v9  ;;  %v4046_v58 = vld [vmem:[#allocation11 + $0x88] ss:$16 sps:$4 sm:$0xff]   ;;  %v4051_v7 = vld [vmem:[#allocation11 + $0xa4] ss:$16 sps:$4 sm:$0xff]  }
 0x7c9   : > { %v1660_v23 = vadd.f32 %v1652_v12, %v1558_v17  ;;  %v1662_v34 = vadd.f32 %v1654_v44, %v1560_v55  ;;  %v4054_v8 = vld [vmem:[#allocation11 + $0xac] ss:$16 sps:$4 sm:$0xff]   ;;  %v4049_v11 = vld [vmem:[#allocation11 + $0xa0] ss:$16 sps:$4 sm:$0xff]   ;;  %v4052_v12 = vld [vmem:[#allocation11 + $0xa8] ss:$16 sps:$4 sm:$0xff]  }
 0x7ca   : > { %v3710_v25 = vmul.f32 -1.442695, %v1659_v16  ;;  %v3712_v35 = vmul.f32 -1.442695, %v1661_v53  ;;  %v4057_v14 = vld [vmem:[#allocation11 + $0xc4] ss:$16 sps:$4 sm:$0xff]  }
 0x7cb   : > { %v3711_v27 = vmul.f32 -1.442695, %v1660_v23  ;;  %v4060_v15 = vld [vmem:[#allocation11 + $0xcc] ss:$16 sps:$4 sm:$0xff]   ;;  %v4055_v16 = vld [vmem:[#allocation11 + $0xc0] ss:$16 sps:$4 sm:$0xff]  }
 0x7cc   : > { %4219 = vpow2.f32 %v3710_v25  ;;  %v4058_v17 = vld [vmem:[#allocation11 + $0xc8] ss:$16 sps:$4 sm:$0xff]   ;;  %v4063_v18 = vld [vmem:[#allocation11 + $0xe4] ss:$16 sps:$4 sm:$0xff]   ;;  %v4066_v19 = vld [vmem:[#allocation11 + $0xec] ss:$16 sps:$4 sm:$0xff]  }
 0x7cd   : > { %4221 = vpow2.f32 %v3711_v27  ;;  %v4061_v23 = vld [vmem:[#allocation11 + $0xe0] ss:$16 sps:$4 sm:$0xff]   ;;  %v4064_v25 = vld [vmem:[#allocation11 + $0xe8] ss:$16 sps:$4 sm:$0xff]   ;;  %v5401_v27 = vld [vmem:[#allocation12 + $0x4] ss:$16 sps:$4 sm:$0xff]  }
 0x7ce   : > { %4223 = vtanh.f32 %v1662_v34  ;;  %v5403_v29 = vld [vmem:[#allocation12 + $0xc] ss:$16 sps:$4 sm:$0xff]  }
 0x7cf   : > { %4225 = vpow2.f32 %v3712_v35  ;;  %v1691_v35 = vld [vmem:[#allocation5 + $0x20] sm:$0xc0] }
 0x7d6   : > { %v4220_v37 = vpop.eup %4219 }
 0x7d7   : > { %v1672_v20 = vadd.f32 1.0, %v4220_v37  ;;  %v4222_v21 = vpop.eup %4221 }
 0x7d8   : > { %v1673_v38 = vadd.f32 1.0, %v4222_v21  ;;  %v4224_v22 = vpop.eup %4223 }
 0x7d9   : > { %4227 = vrcp.f32 %v1672_v20  ;;  %v4226_v30 = vpop.eup %4225 }
 0x7da   : > { %4229 = vrcp.f32 %v1673_v38  ;;  %v1674_v5 = vadd.f32 1.0, %v4226_v30 }
 0x7dc   : > { %4231 = vrcp.f32 %v1674_v5 }
 0x7e3   : > { %v4228_v24 = vpop.eup %4227 }
 0x7e4   : > { %v1686_v1 = vmul.f32 %v4228_v24, %v4224_v22  ;;  %v4230_v4 = vpop.eup %4229  ;;  %v1692_v22 = vld [vmem:[#allocation5 + $0x28] sm:$0xc0] }
 0x7e5   : > { %v1685_v31 = vmul.f32 %v4230_v4, %v1683_v39 }
 0x7e6   : > { %v4232_v46 = vpop.eup %4231 }
 0x7e7   : > { %v5396_v6 = vadd.f32 %v1686_v1, %v1685_v31  ;;  %v1693_v31 = vld [vmem:[#allocation5 + $0x30] sm:$0xc0] }
 0x7e9   : > { %4233 = vtanh.f32 %v5396_v6 }
 0x7f3   : > { %v4234_v10 = vpop.eup %4233 }
 0x7f4   : > { %v1689_v33 = vmul.f32 %v4234_v10, %v4232_v46 }
 0x7f6   : > { %1690 = vst [vmem:[#allocation4 + $0x8] sm:$0x30] %v1689_v33  ;;  %v1695_v41 = vpack.c.bf16 %v1689_v33, %v1689_v33  ;;  %v1694_v33 = vld [vmem:[#allocation5 + $0x38] sm:$0xc0] }
 0x7f8   : > { %v1697_v47 = vrot.slane %v1695_v41, 2 }
 0x7fa   : > { %1732 = vmatmul.mubr.bf16.vlgmr.msra.gmra.mrb[28].mxu0 %v1697_v47  ;;  %1773 = vmatmul.mubr.bf16.vlgmr.msra.gmra.mrb[36].mxu1 %v1697_v47 }
 0x7fb   : > { %2108 = vmatprep.mubr.bf16.mxu0 %v4685_v3  ;;  %2151 = vmatprep.mubr.bf16.mxu1 %v4685_v3 }
 0x7fc   : > { %2077 = vmatpush1.bf16.msra.mxu0 %v4019_v50  ;;  %2120 = vmatpush1.bf16.msra.mxu1 %v4022_v26 }
 0x7fd   : > { %2078 = vmatprep.subr.bf16.mxu0 %v4027_v28  ;;  %2121 = vmatprep.subr.bf16.mxu1 %v4030_v40 }
 0x800   : > { %2079 = vmatpush1.bf16.msra.mxu0 %v4025_v32  ;;  %2122 = vmatpush1.bf16.msra.mxu1 %v4028_v13  ;;  %v1817_v13 = vrot.slane %v5396_v6, 6 }
 0x801   : > { %2080 = vmatprep.subr.bf16.mxu0 %v4033_v52  ;;  %2123 = vmatprep.subr.bf16.mxu1 %v4036_v62 }
 0x804   : > { %2081 = vmatpush1.bf16.msra.mxu0 %v4031_v2  ;;  %2124 = vmatpush1.bf16.msra.mxu1 %v4034_v59 }
 0x805   : > { %2082 = vmatprep.subr.bf16.mxu0 %v4039_v60  ;;  %2125 = vmatprep.subr.bf16.mxu1 %v4042_v56 }
 0x808   : > { %2083 = vmatpush1.bf16.msra.mxu0 %v4037_v61  ;;  %2126 = vmatpush1.bf16.msra.mxu1 %v4040_v63 }
 0x809   : > { %2084 = vmatprep.subr.bf16.mxu0 %v4045_v0  ;;  %2127 = vmatprep.subr.bf16.mxu1 %v4048_v57  ;;  %v1892_v0 = vld [vmem:[#allocation4] sm:$0xff] }
 0x80c   : > { %2085 = vmatpush1.bf16.msra.mxu0 %v4043_v49  ;;  %2128 = vmatpush1.bf16.msra.mxu1 %v4046_v58  ;;  %v5408_v49 = vld [vmem:[#allocation12] ss:$16 sps:$4 sm:$0xff]   ;;  %v5410_v58 = vld [vmem:[#allocation12 + $0x8] ss:$16 sps:$4 sm:$0xff]  }
 0x80d   : > { %2086 = vmatprep.subr.bf16.mxu0 %v4051_v7  ;;  %2129 = vmatprep.subr.bf16.mxu1 %v4054_v8  ;;  %v5412_v7 = vld [vmem:[#allocation12 + $0x24] ss:$16 sps:$4 sm:$0xff]   ;;  %v5414_v8 = vld [vmem:[#allocation12 + $0x2c] ss:$16 sps:$4 sm:$0xff]  }
 0x810   : > { %2087 = vmatpush1.bf16.msra.mxu0 %v4049_v11  ;;  %2130 = vmatpush1.bf16.msra.mxu1 %v4052_v12  ;;  %v5418_v11 = vld [vmem:[#allocation12 + $0x20] ss:$16 sps:$4 sm:$0xff]   ;;  %v5420_v12 = vld [vmem:[#allocation12 + $0x28] ss:$16 sps:$4 sm:$0xff]  }
 0x811   : > { %2088 = vmatprep.subr.bf16.mxu0 %v4057_v14  ;;  %2131 = vmatprep.subr.bf16.mxu1 %v4060_v15  ;;  %v5424_v14 = vld [vmem:[#allocation12 + $0x44] ss:$16 sps:$4 sm:$0xff]   ;;  %v5426_v15 = vld [vmem:[#allocation12 + $0x4c] ss:$16 sps:$4 sm:$0xff]  }
 0x814   : > { %2089 = vmatpush1.bf16.msra.mxu0 %v4055_v16  ;;  %2132 = vmatpush1.bf16.msra.mxu1 %v4058_v17  ;;  %v5432_v16 = vld [vmem:[#allocation12 + $0x40] ss:$16 sps:$4 sm:$0xff]   ;;  %v5434_v17 = vld [vmem:[#allocation12 + $0x48] ss:$16 sps:$4 sm:$0xff]  }
 0x815   : > { %2090 = vmatprep.subr.bf16.mxu0 %v4063_v18  ;;  %2133 = vmatprep.subr.bf16.mxu1 %v4066_v19  ;;  %v5438_v18 = vld [vmem:[#allocation12 + $0x64] ss:$16 sps:$4 sm:$0xff]   ;;  %v5440_v19 = vld [vmem:[#allocation12 + $0x6c] ss:$16 sps:$4 sm:$0xff]  }
 0x818   : > { %2091 = vmatpush1.bf16.msra.mxu0 %v4061_v23  ;;  %2134 = vmatpush1.bf16.msra.mxu1 %v4064_v25  ;;  %v5444_v23 = vld [vmem:[#allocation12 + $0x60] ss:$16 sps:$4 sm:$0xff]   ;;  %v5446_v25 = vld [vmem:[#allocation12 + $0x68] ss:$16 sps:$4 sm:$0xff]  }
 0x819   : > { %2339 = vmatprep.subr.bf16.mxu0 %v5401_v27  ;;  %2380 = vmatprep.subr.bf16.mxu1 %v5403_v29 }
 0x8cd   : > { %v1733_v9 = vpop.f32.mrb[28].mxu0  ;;  %v1774_v44 = vpop.f32.mrb[36].mxu1 }
 0x8ce   : > { %v1785_v53 = vrot.slane %v1733_v9, 2  ;;  %v1735_v55 = vpop.f32.mrb[29].mxu0  ;;  %v1776_v34 = vpop.f32.mrb[37].mxu1  ;;  %v1787_v5 = vrot.slane %v1774_v44, 2  ;;  %v5450_v9 = vld [vmem:[#allocation12 + $0x84] ss:$16 sps:$4 sm:$0xff]  }
 0x8cf   : > { %v1786_v37 = vrot.slane %v1735_v55, 2  ;;  %v1737_v20 = vpop.f32.mrb[30].mxu0  ;;  %v1778_v21 = vpop.f32.mrb[38].mxu1  ;;  %v1788_v46 = vrot.slane %v1776_v34, 2  ;;  %v5452_v44 = vld [vmem:[#allocation12 + $0x8c] ss:$16 sps:$4 sm:$0xff]  }
 0x8d0   : > { %v1793_v38 = vadd.f32 %v1785_v53, %v1691_v35  ;;  %v1738_v30 = vpop.f32.mrb[31].mxu0  ;;  %v1779_v24 = vpop.f32.mrb[39].mxu1  ;;  %v1795_v10 = vadd.f32 %v1787_v5, %v1693_v31  ;;  %v5456_v53 = vld [vmem:[#allocation12 + $0x80] ss:$16 sps:$4 sm:$0xff]   ;;  %v5458_v55 = vld [vmem:[#allocation12 + $0x88] ss:$16 sps:$4 sm:$0xff]  }
 0x8d1   : > { %v1794_v39 = vadd.f32 %v1786_v37, %v1692_v22  ;;  %v1796_v41 = vadd.f32 %v1788_v46, %v1694_v33  ;;  %v5462_v34 = vld [vmem:[#allocation12 + $0xa4] ss:$16 sps:$4 sm:$0xff]   ;;  %v5464_v35 = vld [vmem:[#allocation12 + $0xac] ss:$16 sps:$4 sm:$0xff]   ;;  %v5468_v37 = vld [vmem:[#allocation12 + $0xa0] ss:$16 sps:$4 sm:$0xff]  }
 0x8d2   : > { %v3713_v1 = vmul.f32 -1.442695, %v1793_v38  ;;  %v3715_v47 = vmul.f32 -1.442695, %v1795_v10  ;;  %v5470_v20 = vld [vmem:[#allocation12 + $0xa8] ss:$16 sps:$4 sm:$0xff]  }
 0x8d3   : > { %v3714_v4 = vmul.f32 -1.442695, %v1794_v39  ;;  %v5474_v21 = vld [vmem:[#allocation12 + $0xc4] ss:$16 sps:$4 sm:$0xff]   ;;  %v5476_v38 = vld [vmem:[#allocation12 + $0xcc] ss:$16 sps:$4 sm:$0xff]  }
 0x8d4   : > { %4235 = vpow2.f32 %v3713_v1  ;;  %v5480_v22 = vld [vmem:[#allocation12 + $0xc0] ss:$16 sps:$4 sm:$0xff]   ;;  %v5482_v30 = vld [vmem:[#allocation12 + $0xc8] ss:$16 sps:$4 sm:$0xff]   ;;  %v5486_v24 = vld [vmem:[#allocation12 + $0xe4] ss:$16 sps:$4 sm:$0xff]  }
 0x8d5   : > { %4237 = vpow2.f32 %v3714_v4  ;;  %v5488_v39 = vld [vmem:[#allocation12 + $0xec] ss:$16 sps:$4 sm:$0xff]   ;;  %v5492_v1 = vld [vmem:[#allocation12 + $0xe0] ss:$16 sps:$4 sm:$0xff]   ;;  %v5494_v4 = vld [vmem:[#allocation12 + $0xe8] ss:$16 sps:$4 sm:$0xff]  }
 0x8d6   : > { %4239 = vtanh.f32 %v1796_v41  ;;  %v2171_v5 = vld [vmem:[#allocation2 + $0x2] sm:$0x3]  ;;  %v1891_v46 = vld [vmem:[%s5843_s6] sm:$0xf] }
 0x8d7   : > { %4241 = vpow2.f32 %v3715_v47  ;;  %v2178_v31 = vpack.c.bf16 %v2171_v5, %v2171_v5  ;;  %v1899_v10 = vrot.slane %v1891_v46, %v486_v43  ;;  %v1907_v33 = vrot.slane %v1891_v46, %v494_v51 }
 0x8d8   : > { %v1903_v41 = vrot.slane %v1891_v46, %v490_v45  ;;  %v1911_v47 = vrot.slane %v1891_v46, %v498_v54 }
 0x8de   : > { %v4236_v36 = vpop.eup %4235 }
 0x8df   : > { %v1806_v48 = vadd.f32 1.0, %v4236_v36  ;;  %v4238_v50 = vpop.eup %4237 }
 0x8e0   : > { %v1807_v26 = vadd.f32 1.0, %v4238_v50  ;;  %v4240_v28 = vpop.eup %4239 }
 0x8e1   : > { %4243 = vrcp.f32 %v1806_v48  ;;  %v4242_v40 = vpop.eup %4241 }
 0x8e2   : > { %4245 = vrcp.f32 %v1807_v26  ;;  %v1808_v2 = vadd.f32 1.0, %v4242_v40 }
 0x8e4   : > { %4247 = vrcp.f32 %v1808_v2 }
 0x8eb   : > { %v4244_v32 = vpop.eup %4243 }
 0x8ec   : > { %v1820_v52 = vmul.f32 %v4244_v32, %v4240_v28  ;;  %v4246_v62 = vpop.eup %4245 }
 0x8ed   : > { %v1819_v59 = vmul.f32 %v4246_v62, %v1817_v13 }
 0x8ee   : > { %v4248_v56 = vpop.eup %4247 }
 0x8ef   : > { %v1821_v60 = vadd.f32 %v1820_v52, %v1819_v59 }
 0x8f1   : > { %4249 = vtanh.f32 %v1821_v60  ;;  %1826 = vst [vmem:[#allocation3 - $0x6] sm:$0xc0] %v1821_v60 }
 0x8fb   : > { %v4250_v61 = vpop.eup %4249 }
 0x8fc   : > { %v1823_v63 = vmul.f32 %v4250_v61, %v4248_v56 }
 0x8fe   : > { %1824 = vst [vmem:[#allocation4 + $0x8] sm:$0xc0] %v1823_v63  ;;  %1825 = vst [vmem:[#allocation2 - $0x6] sm:$0xc0] %v1823_v63 }
 0x905   : > { %v1893_v57 = vld [vmem:[#allocation4 + $0x8] sm:$0xff] }
 0x906   : > { %v1894_v6 = vpack.c.bf16 %v1893_v57, %v1892_v0 }
 0x908   : > { %2109 = vmatmul.mubr.bf16.vlgmr.msra.gmra.mrb[32].mxu0 %v1894_v6  ;;  %2152 = vmatmul.mubr.bf16.vlgmr.msra.gmra.mrb[40].mxu1 %v1894_v6 }
 0x909   : > { %2340 = vmatpush1.bf16.msra.mxu0 %v5408_v49  ;;  %2381 = vmatpush1.bf16.msra.mxu1 %v5410_v58 }
 0x90a   : > { %2341 = vmatprep.subr.bf16.mxu0 %v5412_v7  ;;  %2382 = vmatprep.subr.bf16.mxu1 %v5414_v8 }
 0x90b   : > { %2371 = vmatprep.mubr.bf16.mxu0 %v4685_v3  ;;  %2412 = vmatprep.mubr.bf16.mxu1 %v4685_v3 }
 0x90d   : > { %2342 = vmatpush1.bf16.msra.mxu0 %v5418_v11  ;;  %2383 = vmatpush1.bf16.msra.mxu1 %v5420_v12 }
 0x90e   : > { %2343 = vmatprep.subr.bf16.mxu0 %v5424_v14  ;;  %2384 = vmatprep.subr.bf16.mxu1 %v5426_v15 }
 0x911   : > { %2344 = vmatpush1.bf16.msra.mxu0 %v5432_v16  ;;  %2385 = vmatpush1.bf16.msra.mxu1 %v5434_v17 }
 0x912   : > { %2345 = vmatprep.subr.bf16.mxu0 %v5438_v18  ;;  %2386 = vmatprep.subr.bf16.mxu1 %v5440_v19 }
 0x915   : > { %2346 = vmatpush1.bf16.msra.mxu0 %v5444_v23  ;;  %2387 = vmatpush1.bf16.msra.mxu1 %v5446_v25 }
 0x916   : > { %2347 = vmatprep.subr.bf16.mxu0 %v5450_v9  ;;  %2388 = vmatprep.subr.bf16.mxu1 %v5452_v44 }
 0x919   : > { %2348 = vmatpush1.bf16.msra.mxu0 %v5456_v53  ;;  %2389 = vmatpush1.bf16.msra.mxu1 %v5458_v55 }
 0x91a   : > { %2349 = vmatprep.subr.bf16.mxu0 %v5462_v34  ;;  %2390 = vmatprep.subr.bf16.mxu1 %v5464_v35 }
 0x91d   : > { %2350 = vmatpush1.bf16.msra.mxu0 %v5468_v37  ;;  %2391 = vmatpush1.bf16.msra.mxu1 %v5470_v20 }
 0x91e   : > { %2351 = vmatprep.subr.bf16.mxu0 %v5474_v21  ;;  %2392 = vmatprep.subr.bf16.mxu1 %v5476_v38 }
 0x921   : > { %2352 = vmatpush1.bf16.msra.mxu0 %v5480_v22  ;;  %2393 = vmatpush1.bf16.msra.mxu1 %v5482_v30 }
 0x922   : > { %2353 = vmatprep.subr.bf16.mxu0 %v5486_v24  ;;  %2394 = vmatprep.subr.bf16.mxu1 %v5488_v39 }
 0x925   : > { %2354 = vmatpush1.bf16.msra.mxu0 %v5492_v1  ;;  %2395 = vmatpush1.bf16.msra.mxu1 %v5494_v4 }
 0x926   : > { %2455 = vmatprep.subr.bf16.mxu0 %v5401_v27  ;;  %2496 = vmatprep.subr.bf16.mxu1 %v5403_v29 }
 0x928   : > { %2372 = vmatmul.mubr.bf16.vlgmr.msra.gmra.mrb[36].mxu0 %v2178_v31  ;;  %2413 = vmatmul.mubr.bf16.vlgmr.msra.gmra.mrb[44].mxu1 %v2178_v31 }
 0x929   : > { %2456 = vmatpush1.bf16.msra.mxu0 %v5408_v49  ;;  %2497 = vmatpush1.bf16.msra.mxu1 %v5410_v58 }
 0x92a   : > { %2457 = vmatprep.subr.bf16.mxu0 %v5412_v7  ;;  %2498 = vmatprep.subr.bf16.mxu1 %v5414_v8 }
 0x92b   : > { %2487 = vmatprep.mubr.bf16.mxu0 %v4685_v3  ;;  %2528 = vmatprep.mubr.bf16.mxu1 %v4685_v3 }
 0x92d   : > { %2458 = vmatpush1.bf16.msra.mxu0 %v5418_v11  ;;  %2499 = vmatpush1.bf16.msra.mxu1 %v5420_v12 }
 0x92e   : > { %2459 = vmatprep.subr.bf16.mxu0 %v5424_v14  ;;  %2500 = vmatprep.subr.bf16.mxu1 %v5426_v15 }
 0x931   : > { %2460 = vmatpush1.bf16.msra.mxu0 %v5432_v16  ;;  %2501 = vmatpush1.bf16.msra.mxu1 %v5434_v17 }
 0x932   : > { %2461 = vmatprep.subr.bf16.mxu0 %v5438_v18  ;;  %2502 = vmatprep.subr.bf16.mxu1 %v5440_v19 }
 0x935   : > { %2462 = vmatpush1.bf16.msra.mxu0 %v5444_v23  ;;  %2503 = vmatpush1.bf16.msra.mxu1 %v5446_v25 }
 0x936   : > { %2463 = vmatprep.subr.bf16.mxu0 %v5450_v9  ;;  %2504 = vmatprep.subr.bf16.mxu1 %v5452_v44 }
 0x939   : > { %2464 = vmatpush1.bf16.msra.mxu0 %v5456_v53  ;;  %2505 = vmatpush1.bf16.msra.mxu1 %v5458_v55 }
 0x93a   : > { %2465 = vmatprep.subr.bf16.mxu0 %v5462_v34  ;;  %2506 = vmatprep.subr.bf16.mxu1 %v5464_v35 }
 0x93d   : > { %2466 = vmatpush1.bf16.msra.mxu0 %v5468_v37  ;;  %2507 = vmatpush1.bf16.msra.mxu1 %v5470_v20 }
 0x93e   : > { %2467 = vmatprep.subr.bf16.mxu0 %v5474_v21  ;;  %2508 = vmatprep.subr.bf16.mxu1 %v5476_v38 }
 0x941   : > { %2468 = vmatpush1.bf16.msra.mxu0 %v5480_v22  ;;  %2509 = vmatpush1.bf16.msra.mxu1 %v5482_v30 }
 0x942   : > { %2469 = vmatprep.subr.bf16.mxu0 %v5486_v24  ;;  %2510 = vmatprep.subr.bf16.mxu1 %v5488_v39 }
 0x945   : > { %2470 = vmatpush1.bf16.msra.mxu0 %v5492_v1  ;;  %2511 = vmatpush1.bf16.msra.mxu1 %v5494_v4 }
 0x946   : > { %2589 = vmatprep.subr.bf16.mxu0 %v5401_v27  ;;  %2630 = vmatprep.subr.bf16.mxu1 %v5403_v29 }
 0x9db   : > { %v2110_v36 = vpop.f32.mrb[32].mxu0  ;;  %v2153_v48 = vpop.f32.mrb[40].mxu1 }
 0x9dc   : > { %v2111_v50 = vadd.f32 %v2110_v36, %v1899_v10  ;;  %v2154_v26 = vadd.f32 %v2153_v48, %v1907_v33  ;;  %v2112_v28 = vpop.f32.mrb[33].mxu0  ;;  %v2155_v40 = vpop.f32.mrb[41].mxu1 }
 0x9dd   : > { %v2113_v32 = vadd.f32 %v2112_v28, %v1903_v41  ;;  %v2156_v13 = vadd.f32 %v2155_v40, %v1911_v47  ;;  %v2114_v52 = vpop.f32.mrb[34].mxu0  ;;  %v2157_v62 = vpop.f32.mrb[42].mxu1 }
 0x9de   : > { %2162 = vst [vmem:[#allocation5] sm:$0xff] %v2111_v50  ;;  %2164 = vst [vmem:[#allocation5 + $0x10] sm:$0xff] %v2154_v26  ;;  %v2115_v43 = vadd.f32 %v2114_v52, %v1899_v10  ;;  %v2158_v51 = vadd.f32 %v2157_v62, %v1907_v33  ;;  %v2116_v2 = vpop.f32.mrb[35].mxu0  ;;  %v2159_v59 = vpop.f32.mrb[43].mxu1 }
 0x9df   : > { %2163 = vst [vmem:[#allocation5 + $0x8] sm:$0xff] %v2113_v32  ;;  %2165 = vst [vmem:[#allocation5 + $0x18] sm:$0xff] %v2156_v13  ;;  %v2117_v42 = vadd.f32 %v2116_v2, %v1903_v41  ;;  %v2160_v45 = vadd.f32 %v2159_v59, %v1911_v47 }
 0x9e0   : > { %2166 = vst [vmem:[#allocation5 + $0x20] sm:$0xff] %v2115_v43  ;;  %2168 = vst [vmem:[#allocation5 + $0x30] sm:$0xff] %v2158_v51  ;;  %v2173_v51 = vld [vmem:[#allocation3 + $0x2] sm:$0x3] }
 0x9e1   : > { %2167 = vst [vmem:[#allocation5 + $0x28] sm:$0xff] %v2117_v42  ;;  %2169 = vst [vmem:[#allocation5 + $0x38] sm:$0xff] %v2160_v45 }
 0x9e5   : > { %v2174_v54 = vld [vmem:[#allocation5] sm:$0x3]  ;;  %v2176_v41 = vld [vmem:[#allocation5 + $0x10] sm:$0x3] }
 0x9e6   : > { %v2175_v63 = vld [vmem:[#allocation5 + $0x8] sm:$0x3]  ;;  %v2177_v48 = vld [vmem:[#allocation5 + $0x18] sm:$0x3] }
 0x9fb   : > { %v2373_v60 = vpop.f32.mrb[36].mxu0  ;;  %v2414_v56 = vpop.f32.mrb[44].mxu1 }
 0x9fc   : > { %v2421_v61 = vadd.f32 %v2373_v60, %v2174_v54  ;;  %v2375_v0 = vpop.f32.mrb[37].mxu0  ;;  %v2416_v57 = vpop.f32.mrb[45].mxu1  ;;  %v2423_v47 = vadd.f32 %v2414_v56, %v2176_v41 }
 0x9fd   : > { %v2422_v6 = vadd.f32 %v2375_v0, %v2175_v63  ;;  %v2377_v5 = vpop.f32.mrb[38].mxu0  ;;  %v2418_v31 = vpop.f32.mrb[46].mxu1  ;;  %v2424_v50 = vadd.f32 %v2416_v57, %v2177_v48 }
 0x9fe   : > { %v3780_v46 = vmul.f32 -1.442695, %v2421_v61  ;;  %v2378_v10 = vpop.f32.mrb[39].mxu0  ;;  %v2419_v33 = vpop.f32.mrb[47].mxu1  ;;  %v3782_v26 = vmul.f32 -1.442695, %v2423_v47 }
 0x9ff   : > { %v3781_v36 = vmul.f32 -1.442695, %v2422_v6  ;;  %v2451_v47 = vld [vmem:[#allocation5 + $0x8] sm:$0xc] }
 0xa00   : > { %4251 = vpow2.f32 %v3780_v46  ;;  %v2450_v46 = vld [vmem:[#allocation5] sm:$0xc] }
 0xa01   : > { %4253 = vpow2.f32 %v3781_v36 }
 0xa02   : > { %4255 = vtanh.f32 %v2424_v50 }
 0xa03   : > { %4257 = vpow2.f32 %v3782_v26 }
 0xa0a   : > { %v4252_v28 = vpop.eup %4251 }
 0xa0b   : > { %v2434_v40 = vadd.f32 1.0, %v4252_v28  ;;  %v4254_v32 = vpop.eup %4253 }
 0xa0c   : > { %v2435_v13 = vadd.f32 1.0, %v4254_v32  ;;  %v4256_v52 = vpop.eup %4255 }
 0xa0d   : > { %4259 = vrcp.f32 %v2434_v40  ;;  %v4258_v62 = vpop.eup %4257 }
 0xa0e   : > { %4261 = vrcp.f32 %v2435_v13  ;;  %v2436_v42 = vadd.f32 1.0, %v4258_v62  ;;  %v2452_v13 = vld [vmem:[#allocation5 + $0x10] sm:$0xc] }
 0xa10   : > { %4263 = vrcp.f32 %v2436_v42 }
 0xa17   : > { %v4260_v43 = vpop.eup %4259 }
 0xa18   : > { %v2445_v2 = vmul.f32 %v4260_v43, %v4256_v52  ;;  %v4262_v59 = vpop.eup %4261  ;;  %v2453_v43 = vld [vmem:[#allocation5 + $0x18] sm:$0xc] }
 0xa19   : > { %v2444_v45 = vmul.f32 %v4262_v59, %v2173_v51 }
 0xa1a   : > { %v4264_v60 = vpop.eup %4263 }
 0xa1b   : > { %v5547_v54 = vadd.f32 %v2445_v2, %v2444_v45 }
 0xa1d   : > { %4265 = vtanh.f32 %v5547_v54 }
 0xa27   : > { %v4266_v56 = vpop.eup %4265 }
 0xa28   : > { %v2448_v61 = vmul.f32 %v4266_v56, %v4264_v60 }
 0xa2a   : > { %2449 = vst [vmem:[#allocation4] sm:$0x3] %v2448_v61  ;;  %v2454_v63 = vpack.c.bf16 %v2448_v61, %v2448_v61 }
 0xa2c   : > { %2488 = vmatmul.mubr.bf16.vlgmr.msra.gmra.mrb[40].mxu0 %v2454_v63  ;;  %2529 = vmatmul.mubr.bf16.vlgmr.msra.gmra.mrb[48].mxu1 %v2454_v63 }
 0xa2d   : > { %2590 = vmatpush1.bf16.msra.mxu0 %v5408_v49  ;;  %2631 = vmatpush1.bf16.msra.mxu1 %v5410_v58 }
 0xa2e   : > { %2591 = vmatprep.subr.bf16.mxu0 %v5412_v7  ;;  %2632 = vmatprep.subr.bf16.mxu1 %v5414_v8 }
 0xa2f   : > { %2621 = vmatprep.mubr.bf16.mxu0 %v4685_v3  ;;  %2662 = vmatprep.mubr.bf16.mxu1 %v4685_v3 }
 0xa31   : > { %2592 = vmatpush1.bf16.msra.mxu0 %v5418_v11  ;;  %2633 = vmatpush1.bf16.msra.mxu1 %v5420_v12 }
 0xa32   : > { %2593 = vmatprep.subr.bf16.mxu0 %v5424_v14  ;;  %2634 = vmatprep.subr.bf16.mxu1 %v5426_v15 }
 0xa35   : > { %2594 = vmatpush1.bf16.msra.mxu0 %v5432_v16  ;;  %2635 = vmatpush1.bf16.msra.mxu1 %v5434_v17 }
 0xa36   : > { %2595 = vmatprep.subr.bf16.mxu0 %v5438_v18  ;;  %2636 = vmatprep.subr.bf16.mxu1 %v5440_v19 }
 0xa39   : > { %2596 = vmatpush1.bf16.msra.mxu0 %v5444_v23  ;;  %2637 = vmatpush1.bf16.msra.mxu1 %v5446_v25 }
 0xa3a   : > { %2597 = vmatprep.subr.bf16.mxu0 %v5450_v9  ;;  %2638 = vmatprep.subr.bf16.mxu1 %v5452_v44 }
 0xa3d   : > { %2598 = vmatpush1.bf16.msra.mxu0 %v5456_v53  ;;  %2639 = vmatpush1.bf16.msra.mxu1 %v5458_v55 }
 0xa3e   : > { %2599 = vmatprep.subr.bf16.mxu0 %v5462_v34  ;;  %2640 = vmatprep.subr.bf16.mxu1 %v5464_v35 }
 0xa41   : > { %2600 = vmatpush1.bf16.msra.mxu0 %v5468_v37  ;;  %2641 = vmatpush1.bf16.msra.mxu1 %v5470_v20 }
 0xa42   : > { %2601 = vmatprep.subr.bf16.mxu0 %v5474_v21  ;;  %2642 = vmatprep.subr.bf16.mxu1 %v5476_v38 }
 0xa45   : > { %2602 = vmatpush1.bf16.msra.mxu0 %v5480_v22  ;;  %2643 = vmatpush1.bf16.msra.mxu1 %v5482_v30 }
 0xa46   : > { %2603 = vmatprep.subr.bf16.mxu0 %v5486_v24  ;;  %2644 = vmatprep.subr.bf16.mxu1 %v5488_v39 }
 0xa49   : > { %2604 = vmatpush1.bf16.msra.mxu0 %v5492_v1  ;;  %2645 = vmatpush1.bf16.msra.mxu1 %v5494_v4 }
 0xa4a   : > { %2723 = vmatprep.subr.bf16.mxu0 %v5401_v27  ;;  %2764 = vmatprep.subr.bf16.mxu1 %v5403_v29 }
 0xaff   : > { %v2489_v0 = vpop.f32.mrb[40].mxu0  ;;  %v2530_v57 = vpop.f32.mrb[48].mxu1 }
 0xb00   : > { %v2541_v6 = vrot.slane %v2489_v0, 6  ;;  %v2491_v5 = vpop.f32.mrb[41].mxu0  ;;  %v2532_v31 = vpop.f32.mrb[49].mxu1  ;;  %v2543_v32 = vrot.slane %v2530_v57, 6  ;;  %v2573_v0 = vrot.slane %v5547_v54, 6 }
 0xb01   : > { %v2542_v10 = vrot.slane %v2491_v5, 6  ;;  %v2493_v33 = vpop.f32.mrb[42].mxu0  ;;  %v2534_v36 = vpop.f32.mrb[50].mxu1  ;;  %v2544_v52 = vrot.slane %v2532_v31, 6 }
 0xb02   : > { %v2549_v41 = vadd.f32 %v2541_v6, %v2450_v46  ;;  %v2494_v48 = vpop.f32.mrb[43].mxu0  ;;  %v2535_v50 = vpop.f32.mrb[51].mxu1  ;;  %v2551_v62 = vadd.f32 %v2543_v32, %v2452_v13 }
 0xb03   : > { %v2550_v26 = vadd.f32 %v2542_v10, %v2451_v47  ;;  %v2552_v51 = vadd.f32 %v2544_v52, %v2453_v43  ;;  %v2582_v43 = vld [vmem:[#allocation5 + $0x8] sm:$0x30] }
 0xb04   : > { %v3783_v28 = vmul.f32 -1.442695, %v2549_v41  ;;  %v3785_v2 = vmul.f32 -1.442695, %v2551_v62 }
 0xb05   : > { %v3784_v40 = vmul.f32 -1.442695, %v2550_v26 }
 0xb06   : > { %4267 = vpow2.f32 %v3783_v28 }
 0xb07   : > { %4269 = vpow2.f32 %v3784_v40  ;;  %v2581_v40 = vld [vmem:[#allocation5] sm:$0x30] }
 0xb08   : > { %4271 = vtanh.f32 %v2552_v51 }
 0xb09   : > { %4273 = vpow2.f32 %v3785_v2 }
 0xb10   : > { %v4268_v59 = vpop.eup %4267 }
 0xb11   : > { %v2562_v42 = vadd.f32 1.0, %v4268_v59  ;;  %v4270_v45 = vpop.eup %4269 }
 0xb12   : > { %v2563_v60 = vadd.f32 1.0, %v4270_v45  ;;  %v4272_v56 = vpop.eup %4271 }
 0xb13   : > { %4275 = vrcp.f32 %v2562_v42  ;;  %v4274_v61 = vpop.eup %4273 }
 0xb14   : > { %4277 = vrcp.f32 %v2563_v60  ;;  %v2564_v5 = vadd.f32 1.0, %v4274_v61 }
 0xb16   : > { %4279 = vrcp.f32 %v2564_v5 }
 0xb1d   : > { %v4276_v63 = vpop.eup %4275 }
 0xb1e   : > { %v2576_v57 = vmul.f32 %v4276_v63, %v4272_v56  ;;  %v4278_v6 = vpop.eup %4277  ;;  %v2583_v56 = vld [vmem:[#allocation5 + $0x10] sm:$0x30] }
 0xb1f   : > { %v2575_v31 = vmul.f32 %v4278_v6, %v2573_v0  ;;  %v2584_v0 = vld [vmem:[#allocation5 + $0x18] sm:$0x30] }
 0xb20   : > { %v4280_v10 = vpop.eup %4279 }
 0xb21   : > { %v5585_v46 = vadd.f32 %v2576_v57, %v2575_v31 }
 0xb23   : > { %4281 = vtanh.f32 %v5585_v46 }
 0xb2d   : > { %v4282_v33 = vpop.eup %4281 }
 0xb2e   : > { %v2579_v36 = vmul.f32 %v4282_v33, %v4280_v10 }
 0xb30   : > { %2580 = vst [vmem:[#allocation4] sm:$0xc] %v2579_v36  ;;  %v2585_v41 = vpack.c.bf16 %v2579_v36, %v2579_v36 }
 0xb32   : > { %v2587_v47 = vrot.slane %v2585_v41, 1 }
 0xb34   : > { %2622 = vmatmul.mubr.bf16.vlgmr.msra.gmra.mrb[44].mxu0 %v2587_v47  ;;  %2663 = vmatmul.mubr.bf16.vlgmr.msra.gmra.mrb[52].mxu1 %v2587_v47 }
 0xb35   : > { %2724 = vmatpush1.bf16.msra.mxu0 %v5408_v49  ;;  %2765 = vmatpush1.bf16.msra.mxu1 %v5410_v58 }
 0xb36   : > { %2725 = vmatprep.subr.bf16.mxu0 %v5412_v7  ;;  %2766 = vmatprep.subr.bf16.mxu1 %v5414_v8 }
 0xb37   : > { %2755 = vmatprep.mubr.bf16.mxu0 %v4685_v3  ;;  %2796 = vmatprep.mubr.bf16.mxu1 %v4685_v3 }
 0xb39   : > { %2726 = vmatpush1.bf16.msra.mxu0 %v5418_v11  ;;  %2767 = vmatpush1.bf16.msra.mxu1 %v5420_v12 }
 0xb3a   : > { %2727 = vmatprep.subr.bf16.mxu0 %v5424_v14  ;;  %2768 = vmatprep.subr.bf16.mxu1 %v5426_v15 }
 0xb3d   : > { %2728 = vmatpush1.bf16.msra.mxu0 %v5432_v16  ;;  %2769 = vmatpush1.bf16.msra.mxu1 %v5434_v17 }
 0xb3e   : > { %2729 = vmatprep.subr.bf16.mxu0 %v5438_v18  ;;  %2770 = vmatprep.subr.bf16.mxu1 %v5440_v19 }
 0xb41   : > { %2730 = vmatpush1.bf16.msra.mxu0 %v5444_v23  ;;  %2771 = vmatpush1.bf16.msra.mxu1 %v5446_v25 }
 0xb42   : > { %2731 = vmatprep.subr.bf16.mxu0 %v5450_v9  ;;  %2772 = vmatprep.subr.bf16.mxu1 %v5452_v44 }
 0xb45   : > { %2732 = vmatpush1.bf16.msra.mxu0 %v5456_v53  ;;  %2773 = vmatpush1.bf16.msra.mxu1 %v5458_v55 }
 0xb46   : > { %2733 = vmatprep.subr.bf16.mxu0 %v5462_v34  ;;  %2774 = vmatprep.subr.bf16.mxu1 %v5464_v35 }
 0xb49   : > { %2734 = vmatpush1.bf16.msra.mxu0 %v5468_v37  ;;  %2775 = vmatpush1.bf16.msra.mxu1 %v5470_v20 }
 0xb4a   : > { %2735 = vmatprep.subr.bf16.mxu0 %v5474_v21  ;;  %2776 = vmatprep.subr.bf16.mxu1 %v5476_v38 }
 0xb4d   : > { %2736 = vmatpush1.bf16.msra.mxu0 %v5480_v22  ;;  %2777 = vmatpush1.bf16.msra.mxu1 %v5482_v30 }
 0xb4e   : > { %2737 = vmatprep.subr.bf16.mxu0 %v5486_v24  ;;  %2778 = vmatprep.subr.bf16.mxu1 %v5488_v39 }
 0xb51   : > { %2738 = vmatpush1.bf16.msra.mxu0 %v5492_v1  ;;  %2779 = vmatpush1.bf16.msra.mxu1 %v5494_v4 }
 0xb52   : > { %2857 = vmatprep.subr.bf16.mxu0 %v5401_v27  ;;  %2898 = vmatprep.subr.bf16.mxu1 %v5403_v29 }
 0xc07   : > { %v2623_v54 = vpop.f32.mrb[44].mxu0  ;;  %v2664_v48 = vpop.f32.mrb[52].mxu1 }
 0xc08   : > { %v2675_v50 = vrot.slane %v2623_v54, 4  ;;  %v2625_v26 = vpop.f32.mrb[45].mxu0  ;;  %v2666_v28 = vpop.f32.mrb[53].mxu1  ;;  %v2677_v60 = vrot.slane %v2664_v48, 4  ;;  %v2707_v54 = vrot.slane %v5585_v46, 6 }
 0xc09   : > { %v2676_v32 = vrot.slane %v2625_v26, 4  ;;  %v2627_v13 = vpop.f32.mrb[46].mxu0  ;;  %v2668_v52 = vpop.f32.mrb[54].mxu1  ;;  %v2678_v61 = vrot.slane %v2666_v28, 4 }
 0xc0a   : > { %v2683_v62 = vadd.f32 %v2675_v50, %v2581_v40  ;;  %v2628_v51 = vpop.f32.mrb[47].mxu0  ;;  %v2669_v2 = vpop.f32.mrb[55].mxu1  ;;  %v2685_v63 = vadd.f32 %v2677_v60, %v2583_v56 }
 0xc0b   : > { %v2684_v59 = vadd.f32 %v2676_v32, %v2582_v43  ;;  %v2686_v57 = vadd.f32 %v2678_v61, %v2584_v0  ;;  %v2716_v0 = vld [vmem:[#allocation5 + $0x8] sm:$0xc0] }
 0xc0c   : > { %v3786_v42 = vmul.f32 -1.442695, %v2683_v62  ;;  %v3788_v6 = vmul.f32 -1.442695, %v2685_v63 }
 0xc0d   : > { %v3787_v45 = vmul.f32 -1.442695, %v2684_v59 }
 0xc0e   : > { %4283 = vpow2.f32 %v3786_v42 }
 0xc0f   : > { %4285 = vpow2.f32 %v3787_v45  ;;  %v2715_v45 = vld [vmem:[#allocation5] sm:$0xc0] }
 0xc10   : > { %4287 = vtanh.f32 %v2686_v57 }
 0xc11   : > { %4289 = vpow2.f32 %v3788_v6 }
 0xc18   : > { %v4284_v5 = vpop.eup %4283 }
 0xc19   : > { %v2696_v31 = vadd.f32 1.0, %v4284_v5  ;;  %v4286_v10 = vpop.eup %4285 }
 0xc1a   : > { %v2697_v33 = vadd.f32 1.0, %v4286_v10  ;;  %v4288_v36 = vpop.eup %4287 }
 0xc1b   : > { %4291 = vrcp.f32 %v2696_v31  ;;  %v4290_v41 = vpop.eup %4289 }
 0xc1c   : > { %4293 = vrcp.f32 %v2697_v33  ;;  %v2698_v26 = vadd.f32 1.0, %v4290_v41  ;;  %v2718_v41 = vld [vmem:[#allocation5 + $0x18] sm:$0xc0] }
 0xc1e   : > { %4295 = vrcp.f32 %v2698_v26 }
 0xc25   : > { %v4292_v47 = vpop.eup %4291 }
 0xc26   : > { %v2710_v48 = vmul.f32 %v4292_v47, %v4288_v36  ;;  %v4294_v50 = vpop.eup %4293 }
 0xc27   : > { %v2709_v28 = vmul.f32 %v4294_v50, %v2707_v54 }
 0xc28   : > { %v4296_v32 = vpop.eup %4295 }
 0xc29   : > { %v5623_v40 = vadd.f32 %v2710_v48, %v2709_v28 }
 0xc2b   : > { %4297 = vtanh.f32 %v5623_v40 }
 0xc35   : > { %v4298_v13 = vpop.eup %4297 }
 0xc36   : > { %v2713_v52 = vmul.f32 %v4298_v13, %v4296_v32 }
 0xc38   : > { %2714 = vst [vmem:[#allocation4] sm:$0x30] %v2713_v52  ;;  %v2719_v62 = vpack.c.bf16 %v2713_v52, %v2713_v52 }
 0xc3a   : > { %v2721_v43 = vrot.slane %v2719_v62, 2  ;;  %v2841_v62 = vrot.slane %v5623_v40, 6 }
 0xc3c   : > { %2756 = vmatmul.mubr.bf16.vlgmr.msra.gmra.mrb[48].mxu0 %v2721_v43  ;;  %2797 = vmatmul.mubr.bf16.vlgmr.msra.gmra.mrb[56].mxu1 %v2721_v43 }
 0xc3d   : > { %2858 = vmatpush1.bf16.msra.mxu0 %v5408_v49  ;;  %2899 = vmatpush1.bf16.msra.mxu1 %v5410_v58 }
 0xc3e   : > { %2859 = vmatprep.subr.bf16.mxu0 %v5412_v7  ;;  %2900 = vmatprep.subr.bf16.mxu1 %v5414_v8 }
 0xc3f   : > { %2889 = vmatprep.mubr.bf16.mxu0 %v4685_v3  ;;  %2930 = vmatprep.mubr.bf16.mxu1 %v4685_v3 }
 0xc41   : > { %2860 = vmatpush1.bf16.msra.mxu0 %v5418_v11  ;;  %2901 = vmatpush1.bf16.msra.mxu1 %v5420_v12 }
 0xc42   : > { %2861 = vmatprep.subr.bf16.mxu0 %v5424_v14  ;;  %2902 = vmatprep.subr.bf16.mxu1 %v5426_v15 }
 0xc45   : > { %2862 = vmatpush1.bf16.msra.mxu0 %v5432_v16  ;;  %2903 = vmatpush1.bf16.msra.mxu1 %v5434_v17 }
 0xc46   : > { %2863 = vmatprep.subr.bf16.mxu0 %v5438_v18  ;;  %2904 = vmatprep.subr.bf16.mxu1 %v5440_v19 }
 0xc49   : > { %2864 = vmatpush1.bf16.msra.mxu0 %v5444_v23  ;;  %2905 = vmatpush1.bf16.msra.mxu1 %v5446_v25 }
 0xc4a   : > { %2865 = vmatprep.subr.bf16.mxu0 %v5450_v9  ;;  %2906 = vmatprep.subr.bf16.mxu1 %v5452_v44 }
 0xc4d   : > { %2866 = vmatpush1.bf16.msra.mxu0 %v5456_v53  ;;  %2907 = vmatpush1.bf16.msra.mxu1 %v5458_v55 }
 0xc4e   : > { %2867 = vmatprep.subr.bf16.mxu0 %v5462_v34  ;;  %2908 = vmatprep.subr.bf16.mxu1 %v5464_v35 }
 0xc51   : > { %2868 = vmatpush1.bf16.msra.mxu0 %v5468_v37  ;;  %2909 = vmatpush1.bf16.msra.mxu1 %v5470_v20 }
 0xc52   : > { %2869 = vmatprep.subr.bf16.mxu0 %v5474_v21  ;;  %2910 = vmatprep.subr.bf16.mxu1 %v5476_v38 }
 0xc55   : > { %2870 = vmatpush1.bf16.msra.mxu0 %v5480_v22  ;;  %2911 = vmatpush1.bf16.msra.mxu1 %v5482_v30 }
 0xc56   : > { %2871 = vmatprep.subr.bf16.mxu0 %v5486_v24  ;;  %2912 = vmatprep.subr.bf16.mxu1 %v5488_v39 }
 0xc59   : > { %2872 = vmatpush1.bf16.msra.mxu0 %v5492_v1  ;;  %2913 = vmatpush1.bf16.msra.mxu1 %v5494_v4 }
 0xc5a   : > { %2976 = vmatprep.subr.bf16.mxu0 %v5401_v27  ;;  %3017 = vmatprep.subr.bf16.mxu1 %v5403_v29  ;;  %v2717_v29 = vld [vmem:[#allocation5 + $0x10] sm:$0xc0] }
 0xd0f   : > { %v2757_v46 = vpop.f32.mrb[48].mxu0  ;;  %v2798_v51 = vpop.f32.mrb[56].mxu1 }
 0xd10   : > { %v2809_v2 = vrot.slane %v2757_v46, 2  ;;  %v2759_v59 = vpop.f32.mrb[49].mxu0  ;;  %v2800_v42 = vpop.f32.mrb[57].mxu1  ;;  %v2811_v27 = vrot.slane %v2798_v51, 2 }
 0xd11   : > { %v2810_v60 = vrot.slane %v2759_v59, 2  ;;  %v2761_v56 = vpop.f32.mrb[50].mxu0  ;;  %v2802_v61 = vpop.f32.mrb[58].mxu1  ;;  %v2812_v33 = vrot.slane %v2800_v42, 2 }
 0xd12   : > { %v2817_v63 = vadd.f32 %v2809_v2, %v2715_v45  ;;  %v2762_v57 = vpop.f32.mrb[51].mxu0  ;;  %v2803_v6 = vpop.f32.mrb[59].mxu1  ;;  %v2819_v36 = vadd.f32 %v2811_v27, %v2717_v29  ;;  %v2851_v27 = vld [vmem:[#allocation5 + $0x30] sm:$0x3] }
 0xd13   : > { %v2818_v5 = vadd.f32 %v2810_v60, %v2716_v0  ;;  %v2820_v47 = vadd.f32 %v2812_v33, %v2718_v41  ;;  %v2852_v33 = vld [vmem:[#allocation5 + $0x38] sm:$0x3] }
 0xd14   : > { %v3789_v31 = vmul.f32 -1.442695, %v2817_v63  ;;  %v3791_v54 = vmul.f32 -1.442695, %v2819_v36 }
 0xd15   : > { %v3790_v10 = vmul.f32 -1.442695, %v2818_v5 }
 0xd16   : > { %4299 = vpow2.f32 %v3789_v31 }
 0xd17   : > { %4301 = vpow2.f32 %v3790_v10 }
 0xd18   : > { %4303 = vtanh.f32 %v2820_v47 }
 0xd19   : > { %4305 = vpow2.f32 %v3791_v54 }
 0xd20   : > { %v4300_v48 = vpop.eup %4299 }
 0xd21   : > { %v2830_v50 = vadd.f32 1.0, %v4300_v48  ;;  %v4302_v26 = vpop.eup %4301 }
 0xd22   : > { %v2831_v28 = vadd.f32 1.0, %v4302_v26  ;;  %v4304_v32 = vpop.eup %4303 }
 0xd23   : > { %4307 = vrcp.f32 %v2830_v50  ;;  %v4306_v13 = vpop.eup %4305 }
 0xd24   : > { %4309 = vrcp.f32 %v2831_v28  ;;  %v2832_v51 = vadd.f32 1.0, %v4306_v13 }
 0xd26   : > { %4311 = vrcp.f32 %v2832_v51 }
 0xd2d   : > { %v4308_v52 = vpop.eup %4307 }
 0xd2e   : > { %v2844_v43 = vmul.f32 %v4308_v52, %v4304_v32  ;;  %v4310_v46 = vpop.eup %4309 }
 0xd2f   : > { %v2843_v2 = vmul.f32 %v4310_v46, %v2841_v62 }
 0xd30   : > { %v4312_v42 = vpop.eup %4311 }
 0xd31   : > { %v5661_v59 = vadd.f32 %v2844_v43, %v2843_v2 }
 0xd33   : > { %4313 = vtanh.f32 %v5661_v59  ;;  %v2963_v13 = vrot.slane %v5661_v59, 6  ;;  %v5709_v59 = vld [vmem:[#allocation12 + $0x8] ss:$16 sps:$4 sm:$0xff]  }
 0xd3d   : > { %v4314_v45 = vpop.eup %4313 }
 0xd3e   : > { %v2847_v60 = vmul.f32 %v4314_v45, %v4312_v42 }
 0xd40   : > { %2848 = vst [vmem:[#allocation4] sm:$0xc0] %v2847_v60  ;;  %v2853_v56 = vpack.c.bf16 %v2847_v60, %v2847_v60 }
 0xd42   : > { %v2855_v61 = vrot.slane %v2853_v56, 3  ;;  %v5706_v56 = vld [vmem:[#allocation12] ss:$16 sps:$4 sm:$0xff]  }
 0xd44   : > { %2890 = vmatmul.mubr.bf16.vlgmr.msra.gmra.mrb[52].mxu0 %v2855_v61  ;;  %2931 = vmatmul.mubr.bf16.vlgmr.msra.gmra.mrb[60].mxu1 %v2855_v61  ;;  %v5712_v61 = vld [vmem:[#allocation12 + $0x24] ss:$16 sps:$4 sm:$0xff]  }
 0xd45   : > { %2977 = vmatpush1.bf16.msra.mxu0 %v5408_v49  ;;  %3018 = vmatpush1.bf16.msra.mxu1 %v5410_v58  ;;  %v5696_v49 = vld [vmem:[#allocation12 + $0x4] ss:$16 sps:$4 sm:$0xff]   ;;  %v5699_v58 = vld [vmem:[#allocation12 + $0xc] ss:$16 sps:$4 sm:$0xff]  }
 0xd46   : > { %2978 = vmatprep.subr.bf16.mxu0 %v5412_v7  ;;  %3019 = vmatprep.subr.bf16.mxu1 %v5414_v8  ;;  %v2849_v7 = vld [vmem:[#allocation5 + $0x20] sm:$0x3] }
 0xd47   : > { %3008 = vmatprep.mubr.bf16.mxu0 %v4685_v3  ;;  %3049 = vmatprep.mubr.bf16.mxu1 %v4685_v3 }
 0xd49   : > { %2979 = vmatpush1.bf16.msra.mxu0 %v5418_v11  ;;  %3020 = vmatpush1.bf16.msra.mxu1 %v5420_v12 }
 0xd4a   : > { %2980 = vmatprep.subr.bf16.mxu0 %v5424_v14  ;;  %3021 = vmatprep.subr.bf16.mxu1 %v5426_v15  ;;  %v2850_v14 = vld [vmem:[#allocation5 + $0x28] sm:$0x3] }
 0xd4d   : > { %2981 = vmatpush1.bf16.msra.mxu0 %v5432_v16  ;;  %3022 = vmatpush1.bf16.msra.mxu1 %v5434_v17 }
 0xd4e   : > { %2982 = vmatprep.subr.bf16.mxu0 %v5438_v18  ;;  %3023 = vmatprep.subr.bf16.mxu1 %v5440_v19 }
 0xd51   : > { %2983 = vmatpush1.bf16.msra.mxu0 %v5444_v23  ;;  %3024 = vmatpush1.bf16.msra.mxu1 %v5446_v25 }
 0xd52   : > { %2984 = vmatprep.subr.bf16.mxu0 %v5450_v9  ;;  %3025 = vmatprep.subr.bf16.mxu1 %v5452_v44 }
 0xd55   : > { %2985 = vmatpush1.bf16.msra.mxu0 %v5456_v53  ;;  %3026 = vmatpush1.bf16.msra.mxu1 %v5458_v55 }
 0xd56   : > { %2986 = vmatprep.subr.bf16.mxu0 %v5462_v34  ;;  %3027 = vmatprep.subr.bf16.mxu1 %v5464_v35 }
 0xd59   : > { %2987 = vmatpush1.bf16.msra.mxu0 %v5468_v37  ;;  %3028 = vmatpush1.bf16.msra.mxu1 %v5470_v20 }
 0xd5a   : > { %2988 = vmatprep.subr.bf16.mxu0 %v5474_v21  ;;  %3029 = vmatprep.subr.bf16.mxu1 %v5476_v38 }
 0xd5d   : > { %2989 = vmatpush1.bf16.msra.mxu0 %v5480_v22  ;;  %3030 = vmatpush1.bf16.msra.mxu1 %v5482_v30 }
 0xd5e   : > { %2990 = vmatprep.subr.bf16.mxu0 %v5486_v24  ;;  %3031 = vmatprep.subr.bf16.mxu1 %v5488_v39 }
 0xd61   : > { %2991 = vmatpush1.bf16.msra.mxu0 %v5492_v1  ;;  %3032 = vmatpush1.bf16.msra.mxu1 %v5494_v4 }
 0xd62   : > { %3110 = vmatprep.subr.bf16.mxu0 %v5696_v49  ;;  %3151 = vmatprep.subr.bf16.mxu1 %v5699_v58 }
 0xe17   : > { %v2891_v8 = vpop.f32.mrb[52].mxu0  ;;  %v2932_v11 = vpop.f32.mrb[60].mxu1 }
 0xe18   : > { %v2939_v12 = vadd.f32 %v2891_v8, %v2849_v7  ;;  %v2893_v15 = vpop.f32.mrb[53].mxu0  ;;  %v2934_v40 = vpop.f32.mrb[61].mxu1  ;;  %v2941_v29 = vadd.f32 %v2932_v11, %v2851_v27  ;;  %v5715_v7 = vld [vmem:[#allocation12 + $0x2c] ss:$16 sps:$4 sm:$0xff]   ;;  %v5720_v8 = vld [vmem:[#allocation12 + $0x20] ss:$16 sps:$4 sm:$0xff]  }
 0xe19   : > { %v2940_v63 = vadd.f32 %v2893_v15, %v2850_v14  ;;  %v2895_v0 = vpop.f32.mrb[54].mxu0  ;;  %v2936_v57 = vpop.f32.mrb[62].mxu1  ;;  %v2942_v36 = vadd.f32 %v2934_v40, %v2852_v33  ;;  %v5723_v11 = vld [vmem:[#allocation12 + $0x28] ss:$16 sps:$4 sm:$0xff]   ;;  %v5729_v14 = vld [vmem:[#allocation12 + $0x4c] ss:$16 sps:$4 sm:$0xff]  }
 0xe1a   : > { %v3792_v6 = vmul.f32 -1.442695, %v2939_v12  ;;  %v2896_v5 = vpop.f32.mrb[55].mxu0  ;;  %v2937_v31 = vpop.f32.mrb[63].mxu1  ;;  %v3794_v41 = vmul.f32 -1.442695, %v2941_v29 }
 0xe1b   : > { %v3793_v10 = vmul.f32 -1.442695, %v2940_v63  ;;  %v5726_v12 = vld [vmem:[#allocation12 + $0x44] ss:$16 sps:$4 sm:$0xff]  }
 0xe1c   : > { %4315 = vpow2.f32 %v3792_v6 }
 0xe1d   : > { %4317 = vpow2.f32 %v3793_v10 }
 0xe1e   : > { %4319 = vtanh.f32 %v2942_v36 }
 0xe1f   : > { %4321 = vpow2.f32 %v3794_v41 }
 0xe26   : > { %v4316_v47 = vpop.eup %4315 }
 0xe27   : > { %v2952_v54 = vadd.f32 1.0, %v4316_v47  ;;  %v4318_v48 = vpop.eup %4317 }
 0xe28   : > { %v2953_v50 = vadd.f32 1.0, %v4318_v48  ;;  %v4320_v26 = vpop.eup %4319 }
 0xe29   : > { %4323 = vrcp.f32 %v2952_v54  ;;  %v4322_v28 = vpop.eup %4321 }
 0xe2a   : > { %4325 = vrcp.f32 %v2953_v50  ;;  %v2954_v43 = vadd.f32 1.0, %v4322_v28  ;;  %v4421_v50 = vld [vmem:[#allocation12 + $0x40] ss:$16 sps:$4 sm:$0xff]   ;;  %v4423_v28 = vld [vmem:[#allocation12 + $0x64] ss:$16 sps:$4 sm:$0xff]  }
 0xe2c   : > { %4327 = vrcp.f32 %v2954_v43  ;;  %v4429_v43 = vld [vmem:[#allocation12 + $0x80] ss:$16 sps:$4 sm:$0xff]  }
 0xe33   : > { %v4324_v32 = vpop.eup %4323 }
 0xe34   : > { %v2966_v52 = vmul.f32 %v4324_v32, %v4320_v26  ;;  %v4326_v62 = vpop.eup %4325  ;;  %v4422_v26 = vld [vmem:[#allocation12 + $0x48] ss:$16 sps:$4 sm:$0xff]   ;;  %v4424_v32 = vld [vmem:[#allocation12 + $0x6c] ss:$16 sps:$4 sm:$0xff]  }
 0xe35   : > { %v2965_v46 = vmul.f32 %v4326_v62, %v2963_v13  ;;  %v4425_v13 = vld [vmem:[#allocation12 + $0x60] ss:$16 sps:$4 sm:$0xff]   ;;  %v4428_v62 = vld [vmem:[#allocation12 + $0x8c] ss:$16 sps:$4 sm:$0xff]  }
 0xe36   : > { %v4328_v2 = vpop.eup %4327 }
 0xe37   : > { %v5703_v51 = vadd.f32 %v2966_v52, %v2965_v46  ;;  %v4426_v52 = vld [vmem:[#allocation12 + $0x68] ss:$16 sps:$4 sm:$0xff]  }
 0xe38   : > { %v4430_v46 = vld [vmem:[#allocation12 + $0x88] ss:$16 sps:$4 sm:$0xff]  }
 0xe39   : > { %4329 = vtanh.f32 %v5703_v51  ;;  %v3094_v5 = vrot.slane %v5703_v51, 6  ;;  %v4431_v51 = vld [vmem:[#allocation12 + $0xa4] ss:$16 sps:$4 sm:$0xff]  }
 0xe43   : > { %v4330_v42 = vpop.eup %4329 }
 0xe44   : > { %v2969_v45 = vmul.f32 %v4330_v42, %v4328_v2  ;;  %v4432_v2 = vld [vmem:[#allocation12 + $0xac] ss:$16 sps:$4 sm:$0xff]   ;;  %v4433_v42 = vld [vmem:[#allocation12 + $0xa0] ss:$16 sps:$4 sm:$0xff]  }
 0xe46   : > { %2970 = vst [vmem:[#allocation4 + $0x8] sm:$0x3] %v2969_v45  ;;  %v2975_v60 = vpack.c.bf16 %v2969_v45, %v2969_v45  ;;  %v4434_v45 = vld [vmem:[#allocation12 + $0xa8] ss:$16 sps:$4 sm:$0xff]  }
 0xe48   : > { %3009 = vmatmul.mubr.bf16.vlgmr.msra.gmra.mrb[56].mxu0 %v2975_v60  ;;  %3050 = vmatmul.mubr.bf16.vlgmr.msra.gmra.mrb[64].mxu1 %v2975_v60  ;;  %v4435_v60 = vld [vmem:[#allocation12 + $0xc4] ss:$16 sps:$4 sm:$0xff]  }
 0xe49   : > { %3111 = vmatpush1.bf16.msra.mxu0 %v5706_v56  ;;  %3152 = vmatpush1.bf16.msra.mxu1 %v5709_v59 }
 0xe4a   : > { %3112 = vmatprep.subr.bf16.mxu0 %v5712_v61  ;;  %3153 = vmatprep.subr.bf16.mxu1 %v5715_v7 }
 0xe4b   : > { %3142 = vmatprep.mubr.bf16.mxu0 %v4685_v3  ;;  %3183 = vmatprep.mubr.bf16.mxu1 %v4685_v3 }
 0xe4d   : > { %3113 = vmatpush1.bf16.msra.mxu0 %v5720_v8  ;;  %3154 = vmatpush1.bf16.msra.mxu1 %v5723_v11 }
 0xe4e   : > { %3114 = vmatprep.subr.bf16.mxu0 %v5726_v12  ;;  %3155 = vmatprep.subr.bf16.mxu1 %v5729_v14 }
 0xe51   : > { %3115 = vmatpush1.bf16.msra.mxu0 %v5432_v16  ;;  %3156 = vmatpush1.bf16.msra.mxu1 %v5434_v17 }
 0xe52   : > { %3116 = vmatprep.subr.bf16.mxu0 %v5438_v18  ;;  %3157 = vmatprep.subr.bf16.mxu1 %v5440_v19 }
 0xe55   : > { %3117 = vmatpush1.bf16.msra.mxu0 %v5444_v23  ;;  %3158 = vmatpush1.bf16.msra.mxu1 %v5446_v25  ;;  %v2971_v25 = vld [vmem:[#allocation5 + $0x20] sm:$0xc] }
 0xe56   : > { %3118 = vmatprep.subr.bf16.mxu0 %v5450_v9  ;;  %3159 = vmatprep.subr.bf16.mxu1 %v5452_v44 }
 0xe59   : > { %3119 = vmatpush1.bf16.msra.mxu0 %v5456_v53  ;;  %3160 = vmatpush1.bf16.msra.mxu1 %v5458_v55 }
 0xe5a   : > { %3120 = vmatprep.subr.bf16.mxu0 %v5462_v34  ;;  %3161 = vmatprep.subr.bf16.mxu1 %v5464_v35  ;;  %v2972_v34 = vld [vmem:[#allocation5 + $0x28] sm:$0xc] }
 0xe5d   : > { %3121 = vmatpush1.bf16.msra.mxu0 %v5468_v37  ;;  %3162 = vmatpush1.bf16.msra.mxu1 %v5470_v20 }
 0xe5e   : > { %3122 = vmatprep.subr.bf16.mxu0 %v5474_v21  ;;  %3163 = vmatprep.subr.bf16.mxu1 %v5476_v38 }
 0xe61   : > { %3123 = vmatpush1.bf16.msra.mxu0 %v5480_v22  ;;  %3164 = vmatpush1.bf16.msra.mxu1 %v5482_v30  ;;  %v2973_v30 = vld [vmem:[#allocation5 + $0x30] sm:$0xc] }
 0xe62   : > { %3124 = vmatprep.subr.bf16.mxu0 %v5486_v24  ;;  %3165 = vmatprep.subr.bf16.mxu1 %v5488_v39 }
 0xe65   : > { %3125 = vmatpush1.bf16.msra.mxu0 %v5492_v1  ;;  %3166 = vmatpush1.bf16.msra.mxu1 %v5494_v4  ;;  %v2974_v1 = vld [vmem:[#allocation5 + $0x38] sm:$0xc] }
 0xe66   : > { %3244 = vmatprep.subr.bf16.mxu0 %v5696_v49  ;;  %3285 = vmatprep.subr.bf16.mxu1 %v5699_v58 }
 0xf1b   : > { %v3010_v16 = vpop.f32.mrb[56].mxu0  ;;  %v3051_v17 = vpop.f32.mrb[64].mxu1 }
 0xf1c   : > { %v3062_v18 = vrot.slane %v3010_v16, 6  ;;  %v3012_v19 = vpop.f32.mrb[57].mxu0  ;;  %v3053_v23 = vpop.f32.mrb[65].mxu1  ;;  %v3064_v22 = vrot.slane %v3051_v17, 6 }
 0xf1d   : > { %v3063_v9 = vrot.slane %v3012_v19, 6  ;;  %v3014_v44 = vpop.f32.mrb[58].mxu0  ;;  %v3055_v53 = vpop.f32.mrb[66].mxu1  ;;  %v3065_v24 = vrot.slane %v3053_v23, 6  ;;  %v3102_v23 = vld [vmem:[#allocation5 + $0x20] sm:$0x30] }
 0xf1e   : > { %v3070_v55 = vadd.f32 %v3062_v18, %v2971_v25  ;;  %v3015_v35 = vpop.f32.mrb[59].mxu0  ;;  %v3056_v37 = vpop.f32.mrb[67].mxu1  ;;  %v3072_v39 = vadd.f32 %v3064_v22, %v2973_v30  ;;  %v3104_v22 = vld [vmem:[#allocation5 + $0x30] sm:$0x30] }
 0xf1f   : > { %v3071_v20 = vadd.f32 %v3063_v9, %v2972_v34  ;;  %v3073_v4 = vadd.f32 %v3065_v24, %v2974_v1 }
 0xf20   : > { %v3795_v21 = vmul.f32 -1.442695, %v3070_v55  ;;  %v3797_v49 = vmul.f32 -1.442695, %v3072_v39  ;;  %v3103_v55 = vld [vmem:[#allocation5 + $0x28] sm:$0x30] }
 0xf21   : > { %v3796_v38 = vmul.f32 -1.442695, %v3071_v20  ;;  %v3105_v39 = vld [vmem:[#allocation5 + $0x38] sm:$0x30] }
 0xf22   : > { %4331 = vpow2.f32 %v3795_v21 }
 0xf23   : > { %4333 = vpow2.f32 %v3796_v38 }
 0xf24   : > { %4335 = vtanh.f32 %v3073_v4 }
 0xf25   : > { %4337 = vpow2.f32 %v3797_v49 }
 0xf2c   : > { %v4332_v58 = vpop.eup %4331 }
 0xf2d   : > { %v3083_v15 = vadd.f32 1.0, %v4332_v58  ;;  %v4334_v40 = vpop.eup %4333 }
 0xf2e   : > { %v3084_v63 = vadd.f32 1.0, %v4334_v40  ;;  %v4336_v0 = vpop.eup %4335 }
 0xf2f   : > { %4339 = vrcp.f32 %v3083_v15  ;;  %v4338_v57 = vpop.eup %4337 }
 0xf30   : > { %4341 = vrcp.f32 %v3084_v63  ;;  %v3085_v27 = vadd.f32 1.0, %v4338_v57 }
 0xf32   : > { %4343 = vrcp.f32 %v3085_v27 }
 0xf39   : > { %v4340_v6 = vpop.eup %4339 }
 0xf3a   : > { %v3097_v31 = vmul.f32 %v4340_v6, %v4336_v0  ;;  %v4342_v10 = vpop.eup %4341 }
 0xf3b   : > { %v3096_v29 = vmul.f32 %v4342_v10, %v3094_v5 }
 0xf3c   : > { %v4344_v36 = vpop.eup %4343 }
 0xf3d   : > { %v5757_v33 = vadd.f32 %v3097_v31, %v3096_v29 }
 0xf3f   : > { %4345 = vtanh.f32 %v5757_v33  ;;  %v3228_v6 = vrot.slane %v5757_v33, 6  ;;  %v4116_v33 = vld [vmem:[#allocation14 + $0x8] sm:$0xff]  }
 0xf49   : > { %v4346_v41 = vpop.eup %4345 }
 0xf4a   : > { %v3100_v47 = vmul.f32 %v4346_v41, %v4344_v36 }
 0xf4c   : > { %3101 = vst [vmem:[#allocation4 + $0x8] sm:$0xc] %v3100_v47  ;;  %v3106_v54 = vpack.c.bf16 %v3100_v47, %v3100_v47 }
 0xf4e   : > { %v3108_v48 = vrot.slane %v3106_v54, 1 }
 0xf50   : > { %3143 = vmatmul.mubr.bf16.vlgmr.msra.gmra.mrb[60].mxu0 %v3108_v48  ;;  %3184 = vmatmul.mubr.bf16.vlgmr.msra.gmra.mrb[68].mxu1 %v3108_v48 }
 0xf51   : > { %3245 = vmatpush1.bf16.msra.mxu0 %v5706_v56  ;;  %3286 = vmatpush1.bf16.msra.mxu1 %v5709_v59  ;;  %v4436_v56 = vld [vmem:[#allocation12 + $0xcc] ss:$16 sps:$4 sm:$0xff]   ;;  %v4437_v59 = vld [vmem:[#allocation12 + $0xc0] ss:$16 sps:$4 sm:$0xff]  }
 0xf52   : > { %3246 = vmatprep.subr.bf16.mxu0 %v5712_v61  ;;  %3287 = vmatprep.subr.bf16.mxu1 %v5715_v7  ;;  %v4438_v61 = vld [vmem:[#allocation12 + $0xc8] ss:$16 sps:$4 sm:$0xff]   ;;  %v4439_v7 = vld [vmem:[#allocation12 + $0xe4] ss:$16 sps:$4 sm:$0xff]  }
 0xf53   : > { %3276 = vmatprep.mubr.bf16.mxu0 %v4685_v3  ;;  %3317 = vmatprep.mubr.bf16.mxu1 %v4685_v3  ;;  %v4427_v3 = vld [vmem:[#allocation12 + $0x84] ss:$16 sps:$4 sm:$0xff]  }
 0xf55   : > { %3247 = vmatpush1.bf16.msra.mxu0 %v5720_v8  ;;  %3288 = vmatpush1.bf16.msra.mxu1 %v5723_v11  ;;  %v4440_v8 = vld [vmem:[#allocation12 + $0xec] ss:$16 sps:$4 sm:$0xff]   ;;  %v4441_v11 = vld [vmem:[#allocation12 + $0xe0] ss:$16 sps:$4 sm:$0xff]  }
 0xf56   : > { %3248 = vmatprep.subr.bf16.mxu0 %v5726_v12  ;;  %3289 = vmatprep.subr.bf16.mxu1 %v5729_v14  ;;  %v4442_v12 = vld [vmem:[#allocation12 + $0xe8] ss:$16 sps:$4 sm:$0xff]  }
 0xf59   : > { %3249 = vmatpush1.bf16.msra.mxu0 %v4421_v50  ;;  %3290 = vmatpush1.bf16.msra.mxu1 %v4422_v26  ;;  %v4115_v50 = vld [vmem:[#allocation14] sm:$0xff]   ;;  %v4686_v26 = vmov 0.0  }
 0xf5a   : > { %3250 = vmatprep.subr.bf16.mxu0 %v4423_v28  ;;  %3291 = vmatprep.subr.bf16.mxu1 %v4424_v32  ;;  %v4117_v28 = vld [vmem:[#allocation14 + $0x10] sm:$0xff]   ;;  %v4118_v32 = vld [vmem:[#allocation14 + $0x18] sm:$0xff]  }
 0xf5d   : > { %3251 = vmatpush1.bf16.msra.mxu0 %v4425_v13  ;;  %3292 = vmatpush1.bf16.msra.mxu1 %v4426_v52  ;;  %v4119_v13 = vld [vmem:[#allocation14 + $0x20] sm:$0xff]   ;;  %v4120_v52 = vld [vmem:[#allocation14 + $0x28] sm:$0xff]  }
 0xf5e   : > { %3252 = vmatprep.subr.bf16.mxu0 %v4427_v3  ;;  %3293 = vmatprep.subr.bf16.mxu1 %v4428_v62  ;;  %v4121_v3 = vld [vmem:[#allocation14 + $0x30] sm:$0xff]   ;;  %v4122_v62 = vld [vmem:[#allocation14 + $0x38] sm:$0xff]  }
 0xf61   : > { %3253 = vmatpush1.bf16.msra.mxu0 %v4429_v43  ;;  %3294 = vmatpush1.bf16.msra.mxu1 %v4430_v46 }
 0xf62   : > { %3254 = vmatprep.subr.bf16.mxu0 %v4431_v51  ;;  %3295 = vmatprep.subr.bf16.mxu1 %v4432_v2 }
 0xf65   : > { %3255 = vmatpush1.bf16.msra.mxu0 %v4433_v42  ;;  %3296 = vmatpush1.bf16.msra.mxu1 %v4434_v45  ;;  %v3236_v45 = vld [vmem:[#allocation5 + $0x20] sm:$0xc0] }
 0xf66   : > { %3256 = vmatprep.subr.bf16.mxu0 %v4435_v60  ;;  %3297 = vmatprep.subr.bf16.mxu1 %v4436_v56 }
 0xf69   : > { %3257 = vmatpush1.bf16.msra.mxu0 %v4437_v59  ;;  %3298 = vmatpush1.bf16.msra.mxu1 %v4438_v61 }
 0xf6a   : > { %3258 = vmatprep.subr.bf16.mxu0 %v4439_v7  ;;  %3299 = vmatprep.subr.bf16.mxu1 %v4440_v8  ;;  %v3237_v7 = vld [vmem:[#allocation5 + $0x28] sm:$0xc0] }
 0xf6d   : > { %3259 = vmatpush1.bf16.msra.mxu0 %v4441_v11  ;;  %3300 = vmatpush1.bf16.msra.mxu1 %v4442_v12 }
 0xf6e   : > { %3828 = vmatprep.subr.bf16.mxu0 %v4686_v26 }
0x1023   : > { %v3144_v14 = vpop.f32.mrb[60].mxu0  ;;  %v3185_v16 = vpop.f32.mrb[68].mxu1 }
0x1024   : > { %v3196_v17 = vrot.slane %v3144_v14, 4  ;;  %v3146_v18 = vpop.f32.mrb[61].mxu0  ;;  %v3187_v19 = vpop.f32.mrb[69].mxu1  ;;  %v3198_v38 = vrot.slane %v3185_v16, 4 }
0x1025   : > { %v3197_v25 = vrot.slane %v3146_v18, 4  ;;  %v3148_v9 = vpop.f32.mrb[62].mxu0  ;;  %v3189_v44 = vpop.f32.mrb[70].mxu1  ;;  %v3199_v30 = vrot.slane %v3187_v19, 4  ;;  %v3238_v18 = vld [vmem:[#allocation5 + $0x30] sm:$0xc0] }
0x1026   : > { %v3204_v53 = vadd.f32 %v3196_v17, %v3102_v23  ;;  %v3149_v34 = vpop.f32.mrb[63].mxu0  ;;  %v3190_v35 = vpop.f32.mrb[71].mxu1  ;;  %v3206_v24 = vadd.f32 %v3198_v38, %v3104_v22 }
0x1027   : > { %v3205_v37 = vadd.f32 %v3197_v25, %v3103_v55  ;;  %v3207_v1 = vadd.f32 %v3199_v30, %v3105_v39  ;;  %v3239_v25 = vld [vmem:[#allocation5 + $0x38] sm:$0xc0] }
0x1028   : > { %v3798_v20 = vmul.f32 -1.442695, %v3204_v53  ;;  %v3800_v4 = vmul.f32 -1.442695, %v3206_v24 }
0x1029   : > { %v3799_v21 = vmul.f32 -1.442695, %v3205_v37 }
0x102a   : > { %4347 = vpow2.f32 %v3798_v20 }
0x102b   : > { %4349 = vpow2.f32 %v3799_v21 }
0x102c   : > { %4351 = vtanh.f32 %v3207_v1 }
0x102d   : > { %4353 = vpow2.f32 %v3800_v4 }
0x1034   : > { %v4348_v49 = vpop.eup %4347 }
0x1035   : > { %v3217_v58 = vadd.f32 1.0, %v4348_v49  ;;  %v4350_v15 = vpop.eup %4349 }
0x1036   : > { %v3218_v40 = vadd.f32 1.0, %v4350_v15  ;;  %v4352_v63 = vpop.eup %4351  ;;  %v3372_v15 = vld [vmem:[#allocation4] sm:$0xff] }
0x1037   : > { %4355 = vrcp.f32 %v3217_v58  ;;  %v4354_v0 = vpop.eup %4353 }
0x1038   : > { %4357 = vrcp.f32 %v3218_v40  ;;  %v3219_v10 = vadd.f32 1.0, %v4354_v0  ;;  %v3804_v0 = vld [vmem:[%s5845_s8] ss:$0 sm:$0xff] }
0x103a   : > { %4359 = vrcp.f32 %v3219_v10 }
0x1041   : > { %v4356_v57 = vpop.eup %4355 }
0x1042   : > { %v3231_v5 = vmul.f32 %v4356_v57, %v4352_v63  ;;  %v4358_v31 = vpop.eup %4357 }
0x1043   : > { %v3230_v27 = vmul.f32 %v4358_v31, %v3228_v6 }
0x1044   : > { %v4360_v36 = vpop.eup %4359 }
0x1045   : > { %v5771_v29 = vadd.f32 %v3231_v5, %v3230_v27 }
0x1047   : > { %4361 = vtanh.f32 %v5771_v29  ;;  %v3362_v38 = vrot.slane %v5771_v29, 6 }
0x1051   : > { %v4362_v41 = vpop.eup %4361 }
0x1052   : > { %v3234_v47 = vmul.f32 %v4362_v41, %v4360_v36 }
0x1054   : > { %3235 = vst [vmem:[#allocation4 + $0x8] sm:$0x30] %v3234_v47  ;;  %v3240_v54 = vpack.c.bf16 %v3234_v47, %v3234_v47 }
0x1056   : > { %v3242_v48 = vrot.slane %v3240_v54, 2 }
0x1058   : > { %3277 = vmatmul.mubr.bf16.vlgmr.msra.gmra.mrb[64].mxu0 %v3242_v48  ;;  %3318 = vmatmul.mubr.bf16.vlgmr.msra.gmra.mrb[72].mxu1 %v3242_v48 }
0x1059   : > { %3829 = vmatpush3.bf16.msra.mxu0 %v4115_v50  ;;  %3844 = vmatprep.mubr.msk.bf16.mxu0 %vm4687_vm1, %v4686_v26 }
0x105a   : > { %3830 = vmatprep.subr.bf16.mxu0 %v4686_v26 }
0x105d   : > { %3831 = vmatpush3.bf16.msra.mxu0 %v4116_v33 }
0x105e   : > { %3832 = vmatprep.subr.bf16.mxu0 %v4686_v26 }
0x1061   : > { %3833 = vmatpush3.bf16.msra.mxu0 %v4117_v28 }
0x1062   : > { %3834 = vmatprep.subr.bf16.mxu0 %v4686_v26 }
0x1065   : > { %3835 = vmatpush3.bf16.msra.mxu0 %v4118_v32 }
0x1066   : > { %3836 = vmatprep.subr.bf16.mxu0 %v4686_v26 }
0x1069   : > { %3837 = vmatpush3.bf16.msra.mxu0 %v4119_v13 }
0x106a   : > { %3838 = vmatprep.subr.bf16.mxu0 %v4686_v26 }
0x106d   : > { %3839 = vmatpush3.bf16.msra.mxu0 %v4120_v52 }
0x106e   : > { %3840 = vmatprep.subr.bf16.mxu0 %v4686_v26 }
0x1071   : > { %3841 = vmatpush3.bf16.msra.mxu0 %v4121_v3 }
0x1072   : > { %3842 = vmatprep.subr.bf16.mxu0 %v4686_v26 }
0x1075   : > { %3843 = vmatpush3.bf16.msra.mxu0 %v4122_v62 }
0x112b   : > { %v3278_v43 = vpop.f32.mrb[64].mxu0  ;;  %v3319_v46 = vpop.f32.mrb[72].mxu1 }
0x112c   : > { %v3330_v51 = vrot.slane %v3278_v43, 2  ;;  %v3280_v2 = vpop.f32.mrb[65].mxu0  ;;  %v3321_v42 = vpop.f32.mrb[73].mxu1  ;;  %v3332_v17 = vrot.slane %v3319_v46, 2 }
0x112d   : > { %v3331_v60 = vrot.slane %v3280_v2, 2  ;;  %v3282_v56 = vpop.f32.mrb[66].mxu0  ;;  %v3323_v59 = vpop.f32.mrb[74].mxu1  ;;  %v3333_v19 = vrot.slane %v3321_v42, 2 }
0x112e   : > { %v3338_v61 = vadd.f32 %v3330_v51, %v3236_v45  ;;  %v3283_v8 = vpop.f32.mrb[67].mxu0  ;;  %v3324_v11 = vpop.f32.mrb[75].mxu1  ;;  %v3340_v23 = vadd.f32 %v3332_v17, %v3238_v18 }
0x112f   : > { %v3339_v12 = vadd.f32 %v3331_v60, %v3237_v7  ;;  %v3341_v9 = vadd.f32 %v3333_v19, %v3239_v25 }
0x1130   : > { %v3801_v14 = vmul.f32 -1.442695, %v3338_v61  ;;  %v3803_v44 = vmul.f32 -1.442695, %v3340_v23 }
0x1131   : > { %v3802_v16 = vmul.f32 -1.442695, %v3339_v12 }
0x1132   : > { %4363 = vpow2.f32 %v3801_v14 }
0x1133   : > { %4365 = vpow2.f32 %v3802_v16 }
0x1134   : > { %4367 = vtanh.f32 %v3341_v9 }
0x1135   : > { %4369 = vpow2.f32 %v3803_v44 }
0x113c   : > { %v4364_v53 = vpop.eup %4363 }
0x113d   : > { %v3351_v55 = vadd.f32 1.0, %v4364_v53  ;;  %v4366_v34 = vpop.eup %4365 }
0x113e   : > { %v3352_v35 = vadd.f32 1.0, %v4366_v34  ;;  %v4368_v37 = vpop.eup %4367 }
0x113f   : > { %4371 = vrcp.f32 %v3351_v55  ;;  %v4370_v20 = vpop.eup %4369 }
0x1140   : > { %4373 = vrcp.f32 %v3352_v35  ;;  %v3353_v24 = vadd.f32 1.0, %v4370_v20 }
0x1142   : > { %4375 = vrcp.f32 %v3353_v24 }
0x1149   : > { %v4372_v21 = vpop.eup %4371 }
0x114a   : > { %v3365_v22 = vmul.f32 %v4372_v21, %v4368_v37  ;;  %v4374_v30 = vpop.eup %4373 }
0x114b   : > { %v3364_v39 = vmul.f32 %v4374_v30, %v3362_v38 }
0x114c   : > { %v4376_v4 = vpop.eup %4375 }
0x114d   : > { %v3366_v1 = vadd.f32 %v3365_v22, %v3364_v39 }
0x114f   : > { %4377 = vtanh.f32 %v3366_v1  ;;  %3371 = vst [vmem:[#allocation3 - $0x4] sm:$0xc0] %v3366_v1 }
0x1159   : > { %v4378_v49 = vpop.eup %4377 }
0x115a   : > { %v3368_v58 = vmul.f32 %v4378_v49, %v4376_v4 }
0x115c   : > { %3369 = vst [vmem:[#allocation4 + $0x8] sm:$0xc0] %v3368_v58  ;;  %3370 = vst [vmem:[#allocation2 - $0x4] sm:$0xc0] %v3368_v58 }
0x1163   : > { %v3373_v40 = vld [vmem:[#allocation4 + $0x8] sm:$0xff] }
0x1164   : > { %v3374_v63 = vpack.c.bf16 %v3373_v40, %v3372_v15 }
0x1166   : > { %3845 = vmatmul.mubr.bf16.vlgmr.msra.gmra.mrb[68].mxu0 %v3374_v63 }
0x1239   : > { %v3480_v57 = vpop.f32.mrb[68].mxu0 }
0x123a   : > { %v3481_v6 = vadd.f32 %v3804_v0, %v3480_v57  ;;  %v3846_v5 = vpop.f32.mrb[69].mxu0 }
0x123b   : > { %v3483_v31 = vpop.f32.mrb[70].mxu0 }
0x123c   : > { %3487 = vst [vmem:[%s4948_s21] sm:$0xff] %v3481_v6  ;;  %v3484_v10 = vadd.f32 %v3804_v0, %v3483_v31  ;;  %v3847_v27 = vpop.f32.mrb[71].mxu0 }
0x123e   : > { %3488 = vst [vmem:[%s4948_s21 + $0x8] sm:$0xff] %v3484_v10 }
0x123f   : > { %4596 = shalt.err (!%p4593_p7)
}
0x1240   : > { %s4597_s23 = scalar_lea.hbm %s5783_s22, 256  ;;  %s4601_s21 = scalar_lea.hbm %s5846_s9, 512 }
0x1241   : > { %p4598_p9 = scmp.ne.s32.totalorder %s5783_s22, %s4597_s23  ;;  %p4602_p8 = scmp.lt.u32.totalorder %s5783_s22, %s5846_s9 }
0x1242   : > { %p4603_p13 = scmp.lt.u32.totalorder %s4601_s21, %s4597_s23  ;;  %p4605_p10 = scmp.lt.u32.totalorder %s4597_s23, %s5783_s22 }
0x1243   : > { %p4599_p12 = pnand %p4598_p9, %p5875_p11 }
0x1244   : > { %p4604_p1 = por %p4603_p13, %p4602_p8 }
0x1245   : > { %p4600_p4 = pneg %p4599_p12 }
0x1246   : > { %p4606_p0 = por %p4605_p10, %p4604_p1 }
0x1248   : > { %p4607_p2 = pnand %p4606_p0, %p4600_p4 }
0x124a   : > { %4610 = shalt.err (!%p4607_p2)
}
0x124b   : > { %s4689_s20 = smov 128   ;;  %s4690_s28 = smov 8  }
0x124c   : > { %3868 = dma.vmem_to_hbm [thread:$0]  (%p5875_p11), %s5785_s16, 256, %s5783_s22, %s5791_s12, %s4689_s20, %s4689_s20, %s4690_s28  }
0x124d PF: > { %s5876_s15 = sld [smem:[#allocation23_spill]]  ;;  %s5877_s26 = sld [smem:[#allocation20_spill]] }
0x124e   : > { %s5878_s17 = sld [smem:[#allocation25_spill]] }
0x1253   : > { %p3900_p3 = scmp.ge.s32.totalorder %s5876_s15, 2  ;;  %s3520_s18 = sand.u32 1, %s5877_s26  }
0x1254   : > { %p5879_p5 = scmp.ne.s32.totalorder %s5878_s17, 0  ;;  %s3521_s30 = scalar_lea.sflag [#allocation8], %s3520_s18 }
0x1256   : > { %p3887_p6 = pnand %p3900_p3, %p5879_p5 }
0x1258   : > { %4648 = dma.done.wait (!%p3887_p6), %s3521_s30, 256  }
0x1259   : > { %4650 = vsyncadd (!%p3887_p6), %s3521_s30, 4294967040  ;;  %s25_s14 = sadd.s32 1, %s5876_s15   ;;  %s5880_s27 = sld [smem:[#allocation21_spill]] }
0x125a   : > { %p22_p7 = scmp.ge.s32.totalorder %s25_s14, 4   ;;  %s5881_s11 = sld [smem:[#allocation26_spill]] }
0x125b   : > { %s5882_s12 = sld [smem:[#allocation22_spill]]  ;;  %s5883_s13 = sld [smem:[#allocation24_spill]] }
0x125c   : > { %s5884_s30 = smov %s4657_s10  ;;  %24 = sbr.rel (!%p22_p7) target bundleno = 9 (0x9), region = 118 }
0x125f   : > { %s5885_s10 = smov %s5880_s27 }
0x1263   :  { %3526 = vsyncpa [#allocation7], 1 }
0x1264   :  { %3528 = vsyncpa [#allocation7 + $0x1], 1 }
0x1265   :  { %3529 = vsyncpa [#allocation10], 1 }
0x1266   :  { %3530 = vsyncpa [#allocation13], 1 }
0x1267   :  { %3531 = vsyncpa [#allocation8], 1 }
0x1268   :  { %3533 = vsyncpa [#allocation8 + $0x1], 1 }

</bundles_post_ra>
